<compile_context>
chip_gen: v5e
topology: v5e:2x2
jax: 0.10.0
libtpu: 0.0.40
codegen_flags: <defaults>
</compile_context>

<pallas_src>
import functools

import jax
import jax.numpy as jnp
from jax.experimental import pallas as pl
from jax.experimental.pallas import tpu as pltpu


def _round_up(a, m):
    return (a + m - 1) // m * m


# ---------------------------------------------------------------------------
# Fused kernel: one (batch block, time chunk) per grid step.
#   x_ref    : (1, Bb, Tc)   lane-dense input chunk (In == 1 squeezed away)
#   wih0     : (1, 4Hg)      layer-0 input->gate row (In == 1)
#   whh0/1   : (Hg, 4Hg)     recurrent weights, gate blocks lane-aligned
#   wih1     : (Hg, 4Hg)     layer-1 input->gate weights
#   b0/b1    : (1, 4Hg)      b_ih + b_hh, zero in gate padding
#   linw     : (1, Tc, Hg)   head weight rows for this time chunk (O == 1)
#   linb     : (1, 1)
#   out      : (Bb, 1)
#   scratch  : h0,c0,h1,c1,acc (Bb,Hg) carried across the time-chunk axis;
#              lwc (1,Hg) carries the pending head row across chunk boundaries.
# ---------------------------------------------------------------------------
def _fused_lstm_kernel(x_ref, wih0_ref, whh0_ref, b0_ref,
                       wih1_ref, whh1_ref, b1_ref, linw_ref, linb_ref,
                       out_ref,
                       h0_ref, c0_ref, h1_ref, c1_ref, acc_ref, lwc_ref):
    tc = pl.program_id(1)
    n_tc = pl.num_programs(1)
    Tc = x_ref.shape[2]
    Hg = whh0_ref.shape[1] // 4

    # Weights stay VMEM-resident across the whole grid (constant index_map).
    wih0 = wih0_ref[...]
    whh0 = whh0_ref[...]
    b0 = b0_ref[...]
    wih1 = wih1_ref[...]
    whh1 = whh1_ref[...]
    b1 = b1_ref[...]
    xb = x_ref[0]            # (Bb, Tc)
    lwb = linw_ref[0]        # (Tc, Hg)

    def cell(gates, c):
        # Gate blocks are lane-aligned 128-wide groups -> free vreg selects.
        i = jax.nn.sigmoid(gates[:, 0 * Hg:1 * Hg])
        f = jax.nn.sigmoid(gates[:, 1 * Hg:2 * Hg])
        g = jnp.tanh(gates[:, 2 * Hg:3 * Hg])
        o = jax.nn.sigmoid(gates[:, 3 * Hg:4 * Hg])
        c_new = f * c + i * g
        return o * jnp.tanh(c_new), c_new

    def l1_step(h0_in, h1_in, c1_in):
        g1 = (jnp.dot(h0_in, wih1, preferred_element_type=jnp.float32)
              + jnp.dot(h1_in, whh1, preferred_element_type=jnp.float32)
              + b1)
        return cell(g1, c1_in)

    # ---- chunk 0: reset carried state ------------------------------------
    @pl.when(tc == 0)
    def _():
        for r in (h0_ref, c0_ref, h1_ref, c1_ref, acc_ref):
            r[...] = jnp.zeros_like(r)
        lwc_ref[...] = jnp.zeros_like(lwc_ref)

    # ---- chunk > 0: layer-1 consumes the last layer-0 step of the previous
    #      chunk (one-step skew across the chunk boundary) -------------------
    @pl.when(tc > 0)
    def _():
        h1n, c1n = l1_step(h0_ref[...], h1_ref[...], c1_ref[...])
        h1_ref[...] = h1n
        c1_ref[...] = c1n
        acc_ref[...] = acc_ref[...] + h1n * lwc_ref[...]

    h0 = h0_ref[...]
    c0 = c0_ref[...]
    h1 = h1_ref[...]
    c1 = c1_ref[...]
    acc = acc_ref[...]

    # ---- skewed, statically-unrolled chunk loop ---------------------------
    # iteration t: layer-0 local step t, layer-1 local step t-1.  The three
    # matmuls per iteration are mutually independent (latency overlap).
    for t in range(Tc):
        if t > 0:
            h1, c1 = l1_step(h0, h1, c1)
            acc = acc + h1 * lwb[t - 1:t, :]          # O==1 head: VPU MAC
        xcol = xb[:, t:t + 1]                         # (Bb, 1)
        g0 = (xcol * wih0 + b0                        # In==1: VPU broadcast
              + jnp.dot(h0, whh0, preferred_element_type=jnp.float32))
        h0, c0 = cell(g0, c0)

    # ---- write back carried state -----------------------------------------
    h0_ref[...] = h0
    c0_ref[...] = c0
    h1_ref[...] = h1
    c1_ref[...] = c1
    acc_ref[...] = acc
    lwc_ref[...] = lwb[Tc - 1:Tc, :]

    # ---- last chunk: drain the pending layer-1 step and emit the head ------
    @pl.when(tc == n_tc - 1)
    def _():
        h1f, _ = l1_step(h0, h1, c1)
        accf = acc + h1f * lwb[Tc - 1:Tc, :]
        out_ref[...] = (jnp.sum(accf, axis=-1, keepdims=True)   # XLU reduce
                        + linb_ref[...])


# ---------------------------------------------------------------------------
# One-time parameter preparation (transpose / gate-align / zero-pad).
# ---------------------------------------------------------------------------
def prepare_params(params, *, hidden, seq_len, time_chunk):
    H = hidden
    Hg = _round_up(H, 128)                 # lane-aligned per-gate width
    Tc = time_chunk
    Tp = _round_up(seq_len, Tc)            # trailing time padding is inert:
    nT = Tp // Tc                          # padded lin_w rows are zero.

    assert params["w_ih_0"].shape[1] == 1, "kernel specialises input_size == 1"
    assert params["lin_b"].shape[0] == 1, "kernel specialises output_size == 1"

    def gate_pad_cols(w):                  # (rows, 4H) -> (rows, 4Hg)
        rows = w.shape[0]
        out = jnp.zeros((rows, 4 * Hg), jnp.float32)
        for g in range(4):
            out = out.at[:, g * Hg:g * Hg + H].set(w[:, g * H:(g + 1) * H])
        return out

    def pad_rows(w):                       # (H, N) -> (Hg, N), zero rows
        return jnp.pad(w, ((0, Hg - w.shape[0]), (0, 0)))

    wih0 = gate_pad_cols(params["w_ih_0"].T)                            # (1, 4Hg)
    whh0 = pad_rows(gate_pad_cols(params["w_hh_0"].T))                  # (Hg, 4Hg)
    b0 = gate_pad_cols((params["b_ih_0"] + params["b_hh_0"])[None, :])  # (1, 4Hg)
    wih1 = pad_rows(gate_pad_cols(params["w_ih_1"].T))                  # (Hg, 4Hg)
    whh1 = pad_rows(gate_pad_cols(params["w_hh_1"].T))                  # (Hg, 4Hg)
    b1 = gate_pad_cols((params["b_ih_1"] + params["b_hh_1"])[None, :])  # (1, 4Hg)

    lw = jnp.zeros((Tp, Hg), jnp.float32).at[:seq_len, :H].set(
        params["lin_w"].reshape(seq_len, H))
    lin_w = lw.reshape(nT, Tc, Hg)                                      # lane-dense
    lin_b = params["lin_b"].reshape(1, 1)

    return {"wih0": wih0, "whh0": whh0, "b0": b0,
            "wih1": wih1, "whh1": whh1, "b1": b1,
            "lin_w": lin_w, "lin_b": lin_b}


# ---------------------------------------------------------------------------
# Forward wrapper
# ---------------------------------------------------------------------------
def lstm_model_forward(prep, x, *, batch_block=8):
    B, T, In = x.shape
    assert In == 1, "kernel specialises input_size == 1"
    nT, Tc, Hg = prep["lin_w"].shape
    Tp = nT * Tc
    assert Tp >= T
    Bb = batch_block
    assert Bb % 8 == 0 and B % Bb == 0
    nB = B // Bb
    O = prep["lin_b"].shape[1]

    # Tiny per-call reshape: lane-dense (nT, B, Tc), zero-padded in time.
    x2 = jnp.pad(x[:, :, 0], ((0, 0), (0, Tp - T)))
    x3 = x2.reshape(B, nT, Tc).transpose(1, 0, 2)

    const = lambda bi, tc: (0, 0)

    return pl.pallas_call(
        _fused_lstm_kernel,
        out_shape=jax.ShapeDtypeStruct((B, O), jnp.float32),
        grid_spec=pltpu.PrefetchScalarGridSpec(
            num_scalar_prefetch=0,
            grid=(nB, nT),
            in_specs=[
                pl.BlockSpec((1, Bb, Tc), lambda bi, tc: (tc, bi, 0)),   # x chunk
                pl.BlockSpec((1, 4 * Hg), const),                        # w_ih0
                pl.BlockSpec((Hg, 4 * Hg), const),                       # w_hh0
                pl.BlockSpec((1, 4 * Hg), const),                        # b0
                pl.BlockSpec((Hg, 4 * Hg), const),                       # w_ih1
                pl.BlockSpec((Hg, 4 * Hg), const),                       # w_hh1
                pl.BlockSpec((1, 4 * Hg), const),                        # b1
                pl.BlockSpec((1, Tc, Hg), lambda bi, tc: (tc, 0, 0)),    # lin_w chunk
                pl.BlockSpec((1, 1), const),                             # lin_b
            ],
            out_specs=pl.BlockSpec((Bb, O), lambda bi, tc: (bi, 0)),
            scratch_shapes=[pltpu.VMEM((Bb, Hg), jnp.float32)] * 5       # h0,c0,h1,c1,acc
                         + [pltpu.VMEM((1, Hg), jnp.float32)],           # lin_w carry
        ),
        compiler_params=pltpu.CompilerParams(
            dimension_semantics=("parallel", "arbitrary"),
            vmem_limit_bytes=32 * 1024 * 1024,
        ),
    )(x3, prep["wih0"], prep["whh0"], prep["b0"],
      prep["wih1"], prep["whh1"], prep["b1"], prep["lin_w"], prep["lin_b"])


# ---------------------------------------------------------------------------
# Parameter init (deterministic, PyTorch-style U(-1/sqrt(H), 1/sqrt(H)))
# ---------------------------------------------------------------------------
def init_params(key, input_size, hidden, num_layers, seq_len, output_size):
    params = {}
    k = 1.0 / jnp.sqrt(jnp.float32(hidden))
    keys = iter(jax.random.split(key, num_layers * 4 + 2))
    for l in range(num_layers):
        in_l = input_size if l == 0 else hidden
        params[f"w_ih_{l}"] = jax.random.uniform(
            next(keys), (4 * hidden, in_l), jnp.float32, -k, k)
        params[f"w_hh_{l}"] = jax.random.uniform(
            next(keys), (4 * hidden, hidden), jnp.float32, -k, k)
        params[f"b_ih_{l}"] = jax.random.uniform(
            next(keys), (4 * hidden,), jnp.float32, -k, k)
        params[f"b_hh_{l}"] = jax.random.uniform(
            next(keys), (4 * hidden,), jnp.float32, -k, k)
    k_lin = 1.0 / jnp.sqrt(jnp.float32(hidden * seq_len))
    params["lin_w"] = jax.random.uniform(
        next(keys), (output_size, hidden * seq_len), jnp.float32, -k_lin, k_lin)
    params["lin_b"] = jax.random.uniform(
        next(keys), (output_size,), jnp.float32, -k_lin, k_lin)
    return params


# ---------------------------------------------------------------------------
# Pure-JAX reference
# ---------------------------------------------------------------------------
def lstm_model_reference(params, x, num_layers, hidden):
    B, T, _ = x.shape
    h_seq = jnp.transpose(x, (1, 0, 2))
    for l in range(num_layers):
        w_ih_t = params[f"w_ih_{l}"].T
        w_hh_t = params[f"w_hh_{l}"].T
        b = params[f"b_ih_{l}"] + params[f"b_hh_{l}"]
        h = jnp.zeros((B, hidden), jnp.float32)
        c = jnp.zeros((B, hidden), jnp.float32)
        outs = []
        for t in range(T):
            gates = h_seq[t] @ w_ih_t + h @ w_hh_t + b
            i = jax.nn.sigmoid(gates[:, 0 * hidden:1 * hidden])
            f = jax.nn.sigmoid(gates[:, 1 * hidden:2 * hidden])
            g = jnp.tanh(gates[:, 2 * hidden:3 * hidden])
            o = jax.nn.sigmoid(gates[:, 3 * hidden:4 * hidden])
            c = f * c + i * g
            h = o * jnp.tanh(c)
            outs.append(h)
        h_seq = jnp.stack(outs, axis=0)
    lstm_out = jnp.transpose(h_seq, (1, 0, 2)).reshape(B, T * hidden)
    return lstm_out @ params["lin_w"].T + params["lin_b"][None, :]


# ---------------------------------------------------------------------------

if __name__ == "__main__":
    # Small shapes consistent with the module's forward (input_size=1,
    # output_size=1), chosen to exercise both grid axes and time padding:
    # batch blocks = 2 ("parallel"), time chunks = 2 ("arbitrary", T=12 -> 16).
    batch, seq_len, input_size = 16, 12, 1
    hidden, num_layers, output_size = 32, 2, 1
    time_chunk, batch_block = 8, 8

    key = jax.random.PRNGKey(0)
    k_param, k_x = jax.random.split(key)
    params = init_params(k_param, input_size, hidden, num_layers,
                         seq_len, output_size)
    x = jax.random.normal(k_x, (batch, seq_len, input_size), jnp.float32)

    # One-time weight preparation (outside the per-call path).
    prep = prepare_params(params, hidden=hidden, seq_len=seq_len,
                          time_chunk=time_chunk)

    fwd = jax.jit(functools.partial(lstm_model_forward,
                                    batch_block=batch_block))
    y = jax.block_until_ready(fwd(prep, x))

    y_ref = lstm_model_reference(params, x, num_layers, hidden)
    assert y.shape == (batch, output_size)
    assert jnp.allclose(y, y_ref, rtol=1e-3, atol=1e-3), (y, y_ref)

    print("KERNEL_OK")
</pallas_src>

<mosaic_0001>
module attributes {stable_mosaic.version = 11 : i64} {
  func.func @_fused_lstm_kernel(%arg0: i32, %arg1: i32, %arg2: memref<1x8x8xf32, #tpu.memory_space<vmem>>, %arg3: memref<1x512xf32, #tpu.memory_space<vmem>>, %arg4: memref<128x512xf32, #tpu.memory_space<vmem>>, %arg5: memref<1x512xf32, #tpu.memory_space<vmem>>, %arg6: memref<128x512xf32, #tpu.memory_space<vmem>>, %arg7: memref<128x512xf32, #tpu.memory_space<vmem>>, %arg8: memref<1x512xf32, #tpu.memory_space<vmem>>, %arg9: memref<1x8x128xf32, #tpu.memory_space<vmem>>, %arg10: memref<1x1xf32, #tpu.memory_space<vmem>>, %arg11: memref<8x1xf32, #tpu.memory_space<vmem>>, %arg12: memref<8x128xf32, #tpu.memory_space<vmem>>, %arg13: memref<8x128xf32, #tpu.memory_space<vmem>>, %arg14: memref<8x128xf32, #tpu.memory_space<vmem>>, %arg15: memref<8x128xf32, #tpu.memory_space<vmem>>, %arg16: memref<8x128xf32, #tpu.memory_space<vmem>>, %arg17: memref<1x128xf32, #tpu.memory_space<vmem>>) attributes {dimension_semantics = [#tpu.dimension_semantics<parallel>, #tpu.dimension_semantics<arbitrary>], iteration_bounds = array<i64: 2, 2>, scalar_prefetch = 0 : i64, scratch_operands = 6 : i64, tpu.core_type = #tpu.core_type<tc>, window_params = [{transform_indices = @transform_0, window_bounds = array<i64: 1, 8, 8>}, {pipeline_mode = #tpu.pipeline_mode<synchronous>, transform_indices = @transform_1, window_bounds = array<i64: 1, 512>}, {pipeline_mode = #tpu.pipeline_mode<synchronous>, transform_indices = @transform_2, window_bounds = array<i64: 128, 512>}, {pipeline_mode = #tpu.pipeline_mode<synchronous>, transform_indices = @transform_3, window_bounds = array<i64: 1, 512>}, {pipeline_mode = #tpu.pipeline_mode<synchronous>, transform_indices = @transform_4, window_bounds = array<i64: 128, 512>}, {pipeline_mode = #tpu.pipeline_mode<synchronous>, transform_indices = @transform_5, window_bounds = array<i64: 128, 512>}, {pipeline_mode = #tpu.pipeline_mode<synchronous>, transform_indices = @transform_6, window_bounds = array<i64: 1, 512>}, {transform_indices = @transform_7, window_bounds = array<i64: 1, 8, 128>}, {pipeline_mode = #tpu.pipeline_mode<synchronous>, transform_indices = @transform_8, window_bounds = array<i64: 1, 1>}, {transform_indices = @transform_9, window_bounds = array<i64: 8, 1>}]} {
    %c0 = arith.constant 0 : index
    %c0_0 = arith.constant 0 : index
    %0 = vector.load %arg3[%c0, %c0_0] : memref<1x512xf32, #tpu.memory_space<vmem>>, vector<1x512xf32>
    %c0_1 = arith.constant 0 : index
    %c0_2 = arith.constant 0 : index
    %1 = vector.load %arg4[%c0_1, %c0_2] : memref<128x512xf32, #tpu.memory_space<vmem>>, vector<128x512xf32>
    %c0_3 = arith.constant 0 : index
    %c0_4 = arith.constant 0 : index
    %2 = vector.load %arg5[%c0_3, %c0_4] : memref<1x512xf32, #tpu.memory_space<vmem>>, vector<1x512xf32>
    %c0_5 = arith.constant 0 : index
    %c0_6 = arith.constant 0 : index
    %3 = vector.load %arg6[%c0_5, %c0_6] : memref<128x512xf32, #tpu.memory_space<vmem>>, vector<128x512xf32>
    %c0_7 = arith.constant 0 : index
    %c0_8 = arith.constant 0 : index
    %4 = vector.load %arg7[%c0_7, %c0_8] : memref<128x512xf32, #tpu.memory_space<vmem>>, vector<128x512xf32>
    %c0_9 = arith.constant 0 : index
    %c0_10 = arith.constant 0 : index
    %5 = vector.load %arg8[%c0_9, %c0_10] : memref<1x512xf32, #tpu.memory_space<vmem>>, vector<1x512xf32>
    %c0_11 = arith.constant 0 : index
    %c0_12 = arith.constant 0 : index
    %c0_13 = arith.constant 0 : index
    %6 = vector.load %arg2[%c0_11, %c0_12, %c0_13] : memref<1x8x8xf32, #tpu.memory_space<vmem>>, vector<1x8x8xf32>
    %7 = vector.shape_cast %6 : vector<1x8x8xf32> to vector<8x8xf32>
    %c0_14 = arith.constant 0 : index
    %c0_15 = arith.constant 0 : index
    %c0_16 = arith.constant 0 : index
    %8 = vector.load %arg9[%c0_14, %c0_15, %c0_16] : memref<1x8x128xf32, #tpu.memory_space<vmem>>, vector<1x8x128xf32>
    %9 = vector.shape_cast %8 : vector<1x8x128xf32> to vector<8x128xf32>
    %c0_i32 = arith.constant 0 : i32
    %10 = arith.cmpi eq, %arg1, %c0_i32 : i32
    %11 = arith.extui %10 : i1 to i32
    %c0_i32_17 = arith.constant 0 : i32
    %12 = arith.cmpi ne, %11, %c0_i32_17 : i32
    scf.if %12 {
      %cst_109 = arith.constant 0.000000e+00 : f32
      %533 = vector.broadcast %cst_109 : f32 to vector<8x128xf32>
      %c0_110 = arith.constant 0 : index
      %c0_111 = arith.constant 0 : index
      %534 = vector.load %arg12[%c0_110, %c0_111] : memref<8x128xf32, #tpu.memory_space<vmem>>, vector<8x128xf32>
      tpu.vector_store %arg12[%c0_110, %c0_111], %533 {strides = array<i32>} : memref<8x128xf32, #tpu.memory_space<vmem>>, vector<8x128xf32>,
      %cst_112 = arith.constant 0.000000e+00 : f32
      %535 = vector.broadcast %cst_112 : f32 to vector<8x128xf32>
      %c0_113 = arith.constant 0 : index
      %c0_114 = arith.constant 0 : index
      %536 = vector.load %arg13[%c0_113, %c0_114] : memref<8x128xf32, #tpu.memory_space<vmem>>, vector<8x128xf32>
      tpu.vector_store %arg13[%c0_113, %c0_114], %535 {strides = array<i32>} : memref<8x128xf32, #tpu.memory_space<vmem>>, vector<8x128xf32>,
      %cst_115 = arith.constant 0.000000e+00 : f32
      %537 = vector.broadcast %cst_115 : f32 to vector<8x128xf32>
      %c0_116 = arith.constant 0 : index
      %c0_117 = arith.constant 0 : index
      %538 = vector.load %arg14[%c0_116, %c0_117] : memref<8x128xf32, #tpu.memory_space<vmem>>, vector<8x128xf32>
      tpu.vector_store %arg14[%c0_116, %c0_117], %537 {strides = array<i32>} : memref<8x128xf32, #tpu.memory_space<vmem>>, vector<8x128xf32>,
      %cst_118 = arith.constant 0.000000e+00 : f32
      %539 = vector.broadcast %cst_118 : f32 to vector<8x128xf32>
      %c0_119 = arith.constant 0 : index
      %c0_120 = arith.constant 0 : index
      %540 = vector.load %arg15[%c0_119, %c0_120] : memref<8x128xf32, #tpu.memory_space<vmem>>, vector<8x128xf32>
      tpu.vector_store %arg15[%c0_119, %c0_120], %539 {strides = array<i32>} : memref<8x128xf32, #tpu.memory_space<vmem>>, vector<8x128xf32>,
      %cst_121 = arith.constant 0.000000e+00 : f32
      %541 = vector.broadcast %cst_121 : f32 to vector<8x128xf32>
      %c0_122 = arith.constant 0 : index
      %c0_123 = arith.constant 0 : index
      %542 = vector.load %arg16[%c0_122, %c0_123] : memref<8x128xf32, #tpu.memory_space<vmem>>, vector<8x128xf32>
      tpu.vector_store %arg16[%c0_122, %c0_123], %541 {strides = array<i32>} : memref<8x128xf32, #tpu.memory_space<vmem>>, vector<8x128xf32>,
      %cst_124 = arith.constant 0.000000e+00 : f32
      %543 = vector.broadcast %cst_124 : f32 to vector<1x128xf32>
      %c0_125 = arith.constant 0 : index
      %c0_126 = arith.constant 0 : index
      %544 = vector.load %arg17[%c0_125, %c0_126] : memref<1x128xf32, #tpu.memory_space<vmem>>, vector<1x128xf32>
      tpu.vector_store %arg17[%c0_125, %c0_126], %543 {strides = array<i32>} : memref<1x128xf32, #tpu.memory_space<vmem>>, vector<1x128xf32>,
    } else {
    }
    %c0_i32_18 = arith.constant 0 : i32
    %13 = arith.cmpi sgt, %arg1, %c0_i32_18 : i32
    %14 = arith.extui %13 : i1 to i32
    %c0_i32_19 = arith.constant 0 : i32
    %15 = arith.cmpi ne, %14, %c0_i32_19 : i32
    scf.if %15 {
      %c0_109 = arith.constant 0 : index
      %c0_110 = arith.constant 0 : index
      %533 = vector.load %arg12[%c0_109, %c0_110] : memref<8x128xf32, #tpu.memory_space<vmem>>, vector<8x128xf32>
      %c0_111 = arith.constant 0 : index
      %c0_112 = arith.constant 0 : index
      %534 = vector.load %arg14[%c0_111, %c0_112] : memref<8x128xf32, #tpu.memory_space<vmem>>, vector<8x128xf32>
      %c0_113 = arith.constant 0 : index
      %c0_114 = arith.constant 0 : index
      %535 = vector.load %arg15[%c0_113, %c0_114] : memref<8x128xf32, #tpu.memory_space<vmem>>, vector<8x128xf32>
      %cst_115 = arith.constant dense<0.000000e+00> : vector<8x512xf32>
      %536 = tpu.matmul %533, %3, %cst_115 {dimension_numbers = #tpu.dot_dimension_numbers<[1], [0], [0], [1], [0, 0, 1, 1], [], []>} : vector<8x128xf32>, vector<128x512xf32>, vector<8x512xf32> -> vector<8x512xf32>
      %cst_116 = arith.constant dense<0.000000e+00> : vector<8x512xf32>
      %537 = tpu.matmul %534, %4, %cst_116 {dimension_numbers = #tpu.dot_dimension_numbers<[1], [0], [0], [1], [0, 0, 1, 1], [], []>} : vector<8x128xf32>, vector<128x512xf32>, vector<8x512xf32> -> vector<8x512xf32>
      %538 = arith.addf %536, %537 : vector<8x512xf32>
      %539 = vector.broadcast %5 : vector<1x512xf32> to vector<8x512xf32>
      %540 = arith.addf %538, %539 : vector<8x512xf32>
      %541 = vector.extract_strided_slice %540 {offsets = [0, 0], sizes = [8, 128], strides = [1, 1]} : vector<8x512xf32> to vector<8x128xf32>
      %542 = arith.negf %541 : vector<8x128xf32>
      %543 = math.exp %542 : vector<8x128xf32>
      %cst_117 = arith.constant 1.000000e+00 : f32
      %544 = vector.broadcast %cst_117 : f32 to vector<8x128xf32>
      %545 = arith.addf %544, %543 : vector<8x128xf32>
      %546 = arith.divf %544, %545 : vector<8x128xf32>
      %547 = vector.extract_strided_slice %540 {offsets = [0, 128], sizes = [8, 128], strides = [1, 1]} : vector<8x512xf32> to vector<8x128xf32>
      %548 = arith.negf %547 : vector<8x128xf32>
      %549 = math.exp %548 : vector<8x128xf32>
      %cst_118 = arith.constant 1.000000e+00 : f32
      %550 = vector.broadcast %cst_118 : f32 to vector<8x128xf32>
      %551 = arith.addf %550, %549 : vector<8x128xf32>
      %552 = arith.divf %550, %551 : vector<8x128xf32>
      %553 = vector.extract_strided_slice %540 {offsets = [0, 256], sizes = [8, 128], strides = [1, 1]} : vector<8x512xf32> to vector<8x128xf32>
      %554 = math.tanh %553 : vector<8x128xf32>
      %555 = vector.extract_strided_slice %540 {offsets = [0, 384], sizes = [8, 128], strides = [1, 1]} : vector<8x512xf32> to vector<8x128xf32>
      %556 = arith.negf %555 : vector<8x128xf32>
      %557 = math.exp %556 : vector<8x128xf32>
      %cst_119 = arith.constant 1.000000e+00 : f32
      %558 = vector.broadcast %cst_119 : f32 to vector<8x128xf32>
      %559 = arith.addf %558, %557 : vector<8x128xf32>
      %560 = arith.divf %558, %559 : vector<8x128xf32>
      %561 = arith.mulf %552, %535 : vector<8x128xf32>
      %562 = arith.mulf %546, %554 : vector<8x128xf32>
      %563 = arith.addf %561, %562 : vector<8x128xf32>
      %564 = math.tanh %563 : vector<8x128xf32>
      %565 = arith.mulf %560, %564 : vector<8x128xf32>
      %c0_120 = arith.constant 0 : index
      %c0_121 = arith.constant 0 : index
      %566 = vector.load %arg14[%c0_120, %c0_121] : memref<8x128xf32, #tpu.memory_space<vmem>>, vector<8x128xf32>
      tpu.vector_store %arg14[%c0_120, %c0_121], %565 {strides = array<i32>} : memref<8x128xf32, #tpu.memory_space<vmem>>, vector<8x128xf32>,
      %c0_122 = arith.constant 0 : index
      %c0_123 = arith.constant 0 : index
      %567 = vector.load %arg15[%c0_122, %c0_123] : memref<8x128xf32, #tpu.memory_space<vmem>>, vector<8x128xf32>
      tpu.vector_store %arg15[%c0_122, %c0_123], %563 {strides = array<i32>} : memref<8x128xf32, #tpu.memory_space<vmem>>, vector<8x128xf32>,
      %c0_124 = arith.constant 0 : index
      %c0_125 = arith.constant 0 : index
      %568 = vector.load %arg16[%c0_124, %c0_125] : memref<8x128xf32, #tpu.memory_space<vmem>>, vector<8x128xf32>
      %c0_126 = arith.constant 0 : index
      %c0_127 = arith.constant 0 : index
      %569 = vector.load %arg17[%c0_126, %c0_127] : memref<1x128xf32, #tpu.memory_space<vmem>>, vector<1x128xf32>
      %570 = vector.broadcast %569 : vector<1x128xf32> to vector<8x128xf32>
      %571 = arith.mulf %565, %570 : vector<8x128xf32>
      %572 = arith.addf %568, %571 : vector<8x128xf32>
      %c0_128 = arith.constant 0 : index
      %c0_129 = arith.constant 0 : index
      %573 = vector.load %arg16[%c0_128, %c0_129] : memref<8x128xf32, #tpu.memory_space<vmem>>, vector<8x128xf32>
      tpu.vector_store %arg16[%c0_128, %c0_129], %572 {strides = array<i32>} : memref<8x128xf32, #tpu.memory_space<vmem>>, vector<8x128xf32>,
    } else {
    }
    %c0_20 = arith.constant 0 : index
    %c0_21 = arith.constant 0 : index
    %16 = vector.load %arg12[%c0_20, %c0_21] : memref<8x128xf32, #tpu.memory_space<vmem>>, vector<8x128xf32>
    %c0_22 = arith.constant 0 : index
    %c0_23 = arith.constant 0 : index
    %17 = vector.load %arg13[%c0_22, %c0_23] : memref<8x128xf32, #tpu.memory_space<vmem>>, vector<8x128xf32>
    %c0_24 = arith.constant 0 : index
    %c0_25 = arith.constant 0 : index
    %18 = vector.load %arg14[%c0_24, %c0_25] : memref<8x128xf32, #tpu.memory_space<vmem>>, vector<8x128xf32>
    %c0_26 = arith.constant 0 : index
    %c0_27 = arith.constant 0 : index
    %19 = vector.load %arg15[%c0_26, %c0_27] : memref<8x128xf32, #tpu.memory_space<vmem>>, vector<8x128xf32>
    %c0_28 = arith.constant 0 : index
    %c0_29 = arith.constant 0 : index
    %20 = vector.load %arg16[%c0_28, %c0_29] : memref<8x128xf32, #tpu.memory_space<vmem>>, vector<8x128xf32>
    %21 = vector.extract_strided_slice %7 {offsets = [0, 0], sizes = [8, 1], strides = [1, 1]} : vector<8x8xf32> to vector<8x1xf32>
    %22 = vector.broadcast %21 : vector<8x1xf32> to vector<8x512xf32>
    %23 = vector.broadcast %0 : vector<1x512xf32> to vector<8x512xf32>
    %24 = arith.mulf %22, %23 : vector<8x512xf32>
    %25 = vector.broadcast %2 : vector<1x512xf32> to vector<8x512xf32>
    %26 = arith.addf %24, %25 : vector<8x512xf32>
    %cst = arith.constant dense<0.000000e+00> : vector<8x512xf32>
    %27 = tpu.matmul %16, %1, %cst {dimension_numbers = #tpu.dot_dimension_numbers<[1], [0], [0], [1], [0, 0, 1, 1], [], []>} : vector<8x128xf32>, vector<128x512xf32>, vector<8x512xf32> -> vector<8x512xf32>
    %28 = arith.addf %26, %27 : vector<8x512xf32>
    %29 = vector.extract_strided_slice %28 {offsets = [0, 0], sizes = [8, 128], strides = [1, 1]} : vector<8x512xf32> to vector<8x128xf32>
    %30 = arith.negf %29 : vector<8x128xf32>
    %31 = math.exp %30 : vector<8x128xf32>
    %cst_30 = arith.constant 1.000000e+00 : f32
    %32 = vector.broadcast %cst_30 : f32 to vector<8x128xf32>
    %33 = arith.addf %32, %31 : vector<8x128xf32>
    %34 = arith.divf %32, %33 : vector<8x128xf32>
    %35 = vector.extract_strided_slice %28 {offsets = [0, 128], sizes = [8, 128], strides = [1, 1]} : vector<8x512xf32> to vector<8x128xf32>
    %36 = arith.negf %35 : vector<8x128xf32>
    %37 = math.exp %36 : vector<8x128xf32>
    %cst_31 = arith.constant 1.000000e+00 : f32
    %38 = vector.broadcast %cst_31 : f32 to vector<8x128xf32>
    %39 = arith.addf %38, %37 : vector<8x128xf32>
    %40 = arith.divf %38, %39 : vector<8x128xf32>
    %41 = vector.extract_strided_slice %28 {offsets = [0, 256], sizes = [8, 128], strides = [1, 1]} : vector<8x512xf32> to vector<8x128xf32>
    %42 = math.tanh %41 : vector<8x128xf32>
    %43 = vector.extract_strided_slice %28 {offsets = [0, 384], sizes = [8, 128], strides = [1, 1]} : vector<8x512xf32> to vector<8x128xf32>
    %44 = arith.negf %43 : vector<8x128xf32>
    %45 = math.exp %44 : vector<8x128xf32>
    %cst_32 = arith.constant 1.000000e+00 : f32
    %46 = vector.broadcast %cst_32 : f32 to vector<8x128xf32>
    %47 = arith.addf %46, %45 : vector<8x128xf32>
    %48 = arith.divf %46, %47 : vector<8x128xf32>
    %49 = arith.mulf %40, %17 : vector<8x128xf32>
    %50 = arith.mulf %34, %42 : vector<8x128xf32>
    %51 = arith.addf %49, %50 : vector<8x128xf32>
    %52 = math.tanh %51 : vector<8x128xf32>
    %53 = arith.mulf %48, %52 : vector<8x128xf32>
    %cst_33 = arith.constant dense<0.000000e+00> : vector<8x512xf32>
    %54 = tpu.matmul %53, %3, %cst_33 {dimension_numbers = #tpu.dot_dimension_numbers<[1], [0], [0], [1], [0, 0, 1, 1], [], []>} : vector<8x128xf32>, vector<128x512xf32>, vector<8x512xf32> -> vector<8x512xf32>
    %cst_34 = arith.constant dense<0.000000e+00> : vector<8x512xf32>
    %55 = tpu.matmul %18, %4, %cst_34 {dimension_numbers = #tpu.dot_dimension_numbers<[1], [0], [0], [1], [0, 0, 1, 1], [], []>} : vector<8x128xf32>, vector<128x512xf32>, vector<8x512xf32> -> vector<8x512xf32>
    %56 = arith.addf %54, %55 : vector<8x512xf32>
    %57 = vector.broadcast %5 : vector<1x512xf32> to vector<8x512xf32>
    %58 = arith.addf %56, %57 : vector<8x512xf32>
    %59 = vector.extract_strided_slice %58 {offsets = [0, 0], sizes = [8, 128], strides = [1, 1]} : vector<8x512xf32> to vector<8x128xf32>
    %60 = arith.negf %59 : vector<8x128xf32>
    %61 = math.exp %60 : vector<8x128xf32>
    %cst_35 = arith.constant 1.000000e+00 : f32
    %62 = vector.broadcast %cst_35 : f32 to vector<8x128xf32>
    %63 = arith.addf %62, %61 : vector<8x128xf32>
    %64 = arith.divf %62, %63 : vector<8x128xf32>
    %65 = vector.extract_strided_slice %58 {offsets = [0, 128], sizes = [8, 128], strides = [1, 1]} : vector<8x512xf32> to vector<8x128xf32>
    %66 = arith.negf %65 : vector<8x128xf32>
    %67 = math.exp %66 : vector<8x128xf32>
    %cst_36 = arith.constant 1.000000e+00 : f32
    %68 = vector.broadcast %cst_36 : f32 to vector<8x128xf32>
    %69 = arith.addf %68, %67 : vector<8x128xf32>
    %70 = arith.divf %68, %69 : vector<8x128xf32>
    %71 = vector.extract_strided_slice %58 {offsets = [0, 256], sizes = [8, 128], strides = [1, 1]} : vector<8x512xf32> to vector<8x128xf32>
    %72 = math.tanh %71 : vector<8x128xf32>
    %73 = vector.extract_strided_slice %58 {offsets = [0, 384], sizes = [8, 128], strides = [1, 1]} : vector<8x512xf32> to vector<8x128xf32>
    %74 = arith.negf %73 : vector<8x128xf32>
    %75 = math.exp %74 : vector<8x128xf32>
    %cst_37 = arith.constant 1.000000e+00 : f32
    %76 = vector.broadcast %cst_37 : f32 to vector<8x128xf32>
    %77 = arith.addf %76, %75 : vector<8x128xf32>
    %78 = arith.divf %76, %77 : vector<8x128xf32>
    %79 = arith.mulf %70, %19 : vector<8x128xf32>
    %80 = arith.mulf %64, %72 : vector<8x128xf32>
    %81 = arith.addf %79, %80 : vector<8x128xf32>
    %82 = math.tanh %81 : vector<8x128xf32>
    %83 = arith.mulf %78, %82 : vector<8x128xf32>
    %84 = vector.extract_strided_slice %9 {offsets = [0, 0], sizes = [1, 128], strides = [1, 1]} : vector<8x128xf32> to vector<1x128xf32>
    %85 = vector.broadcast %84 : vector<1x128xf32> to vector<8x128xf32>
    %86 = arith.mulf %83, %85 : vector<8x128xf32>
    %87 = arith.addf %20, %86 : vector<8x128xf32>
    %88 = vector.extract_strided_slice %7 {offsets = [0, 1], sizes = [8, 1], strides = [1, 1]} : vector<8x8xf32> to vector<8x1xf32>
    %89 = vector.broadcast %88 : vector<8x1xf32> to vector<8x512xf32>
    %90 = vector.broadcast %0 : vector<1x512xf32> to vector<8x512xf32>
    %91 = arith.mulf %89, %90 : vector<8x512xf32>
    %92 = vector.broadcast %2 : vector<1x512xf32> to vector<8x512xf32>
    %93 = arith.addf %91, %92 : vector<8x512xf32>
    %cst_38 = arith.constant dense<0.000000e+00> : vector<8x512xf32>
    %94 = tpu.matmul %53, %1, %cst_38 {dimension_numbers = #tpu.dot_dimension_numbers<[1], [0], [0], [1], [0, 0, 1, 1], [], []>} : vector<8x128xf32>, vector<128x512xf32>, vector<8x512xf32> -> vector<8x512xf32>
    %95 = arith.addf %93, %94 : vector<8x512xf32>
    %96 = vector.extract_strided_slice %95 {offsets = [0, 0], sizes = [8, 128], strides = [1, 1]} : vector<8x512xf32> to vector<8x128xf32>
    %97 = arith.negf %96 : vector<8x128xf32>
    %98 = math.exp %97 : vector<8x128xf32>
    %cst_39 = arith.constant 1.000000e+00 : f32
    %99 = vector.broadcast %cst_39 : f32 to vector<8x128xf32>
    %100 = arith.addf %99, %98 : vector<8x128xf32>
    %101 = arith.divf %99, %100 : vector<8x128xf32>
    %102 = vector.extract_strided_slice %95 {offsets = [0, 128], sizes = [8, 128], strides = [1, 1]} : vector<8x512xf32> to vector<8x128xf32>
    %103 = arith.negf %102 : vector<8x128xf32>
    %104 = math.exp %103 : vector<8x128xf32>
    %cst_40 = arith.constant 1.000000e+00 : f32
    %105 = vector.broadcast %cst_40 : f32 to vector<8x128xf32>
    %106 = arith.addf %105, %104 : vector<8x128xf32>
    %107 = arith.divf %105, %106 : vector<8x128xf32>
    %108 = vector.extract_strided_slice %95 {offsets = [0, 256], sizes = [8, 128], strides = [1, 1]} : vector<8x512xf32> to vector<8x128xf32>
    %109 = math.tanh %108 : vector<8x128xf32>
    %110 = vector.extract_strided_slice %95 {offsets = [0, 384], sizes = [8, 128], strides = [1, 1]} : vector<8x512xf32> to vector<8x128xf32>
    %111 = arith.negf %110 : vector<8x128xf32>
    %112 = math.exp %111 : vector<8x128xf32>
    %cst_41 = arith.constant 1.000000e+00 : f32
    %113 = vector.broadcast %cst_41 : f32 to vector<8x128xf32>
    %114 = arith.addf %113, %112 : vector<8x128xf32>
    %115 = arith.divf %113, %114 : vector<8x128xf32>
    %116 = arith.mulf %107, %51 : vector<8x128xf32>
    %117 = arith.mulf %101, %109 : vector<8x128xf32>
    %118 = arith.addf %116, %117 : vector<8x128xf32>
    %119 = math.tanh %118 : vector<8x128xf32>
    %120 = arith.mulf %115, %119 : vector<8x128xf32>
    %cst_42 = arith.constant dense<0.000000e+00> : vector<8x512xf32>
    %121 = tpu.matmul %120, %3, %cst_42 {dimension_numbers = #tpu.dot_dimension_numbers<[1], [0], [0], [1], [0, 0, 1, 1], [], []>} : vector<8x128xf32>, vector<128x512xf32>, vector<8x512xf32> -> vector<8x512xf32>
    %cst_43 = arith.constant dense<0.000000e+00> : vector<8x512xf32>
    %122 = tpu.matmul %83, %4, %cst_43 {dimension_numbers = #tpu.dot_dimension_numbers<[1], [0], [0], [1], [0, 0, 1, 1], [], []>} : vector<8x128xf32>, vector<128x512xf32>, vector<8x512xf32> -> vector<8x512xf32>
    %123 = arith.addf %121, %122 : vector<8x512xf32>
    %124 = vector.broadcast %5 : vector<1x512xf32> to vector<8x512xf32>
    %125 = arith.addf %123, %124 : vector<8x512xf32>
    %126 = vector.extract_strided_slice %125 {offsets = [0, 0], sizes = [8, 128], strides = [1, 1]} : vector<8x512xf32> to vector<8x128xf32>
    %127 = arith.negf %126 : vector<8x128xf32>
    %128 = math.exp %127 : vector<8x128xf32>
    %cst_44 = arith.constant 1.000000e+00 : f32
    %129 = vector.broadcast %cst_44 : f32 to vector<8x128xf32>
    %130 = arith.addf %129, %128 : vector<8x128xf32>
    %131 = arith.divf %129, %130 : vector<8x128xf32>
    %132 = vector.extract_strided_slice %125 {offsets = [0, 128], sizes = [8, 128], strides = [1, 1]} : vector<8x512xf32> to vector<8x128xf32>
    %133 = arith.negf %132 : vector<8x128xf32>
    %134 = math.exp %133 : vector<8x128xf32>
    %cst_45 = arith.constant 1.000000e+00 : f32
    %135 = vector.broadcast %cst_45 : f32 to vector<8x128xf32>
    %136 = arith.addf %135, %134 : vector<8x128xf32>
    %137 = arith.divf %135, %136 : vector<8x128xf32>
    %138 = vector.extract_strided_slice %125 {offsets = [0, 256], sizes = [8, 128], strides = [1, 1]} : vector<8x512xf32> to vector<8x128xf32>
    %139 = math.tanh %138 : vector<8x128xf32>
    %140 = vector.extract_strided_slice %125 {offsets = [0, 384], sizes = [8, 128], strides = [1, 1]} : vector<8x512xf32> to vector<8x128xf32>
    %141 = arith.negf %140 : vector<8x128xf32>
    %142 = math.exp %141 : vector<8x128xf32>
    %cst_46 = arith.constant 1.000000e+00 : f32
    %143 = vector.broadcast %cst_46 : f32 to vector<8x128xf32>
    %144 = arith.addf %143, %142 : vector<8x128xf32>
    %145 = arith.divf %143, %144 : vector<8x128xf32>
    %146 = arith.mulf %137, %81 : vector<8x128xf32>
    %147 = arith.mulf %131, %139 : vector<8x128xf32>
    %148 = arith.addf %146, %147 : vector<8x128xf32>
    %149 = math.tanh %148 : vector<8x128xf32>
    %150 = arith.mulf %145, %149 : vector<8x128xf32>
    %151 = vector.extract_strided_slice %9 {offsets = [1, 0], sizes = [1, 128], strides = [1, 1]} : vector<8x128xf32> to vector<1x128xf32>
    %152 = vector.broadcast %151 : vector<1x128xf32> to vector<8x128xf32>
    %153 = arith.mulf %150, %152 : vector<8x128xf32>
    %154 = arith.addf %87, %153 : vector<8x128xf32>
    %155 = vector.extract_strided_slice %7 {offsets = [0, 2], sizes = [8, 1], strides = [1, 1]} : vector<8x8xf32> to vector<8x1xf32>
    %156 = vector.broadcast %155 : vector<8x1xf32> to vector<8x512xf32>
    %157 = vector.broadcast %0 : vector<1x512xf32> to vector<8x512xf32>
    %158 = arith.mulf %156, %157 : vector<8x512xf32>
    %159 = vector.broadcast %2 : vector<1x512xf32> to vector<8x512xf32>
    %160 = arith.addf %158, %159 : vector<8x512xf32>
    %cst_47 = arith.constant dense<0.000000e+00> : vector<8x512xf32>
    %161 = tpu.matmul %120, %1, %cst_47 {dimension_numbers = #tpu.dot_dimension_numbers<[1], [0], [0], [1], [0, 0, 1, 1], [], []>} : vector<8x128xf32>, vector<128x512xf32>, vector<8x512xf32> -> vector<8x512xf32>
    %162 = arith.addf %160, %161 : vector<8x512xf32>
    %163 = vector.extract_strided_slice %162 {offsets = [0, 0], sizes = [8, 128], strides = [1, 1]} : vector<8x512xf32> to vector<8x128xf32>
    %164 = arith.negf %163 : vector<8x128xf32>
    %165 = math.exp %164 : vector<8x128xf32>
    %cst_48 = arith.constant 1.000000e+00 : f32
    %166 = vector.broadcast %cst_48 : f32 to vector<8x128xf32>
    %167 = arith.addf %166, %165 : vector<8x128xf32>
    %168 = arith.divf %166, %167 : vector<8x128xf32>
    %169 = vector.extract_strided_slice %162 {offsets = [0, 128], sizes = [8, 128], strides = [1, 1]} : vector<8x512xf32> to vector<8x128xf32>
    %170 = arith.negf %169 : vector<8x128xf32>
    %171 = math.exp %170 : vector<8x128xf32>
    %cst_49 = arith.constant 1.000000e+00 : f32
    %172 = vector.broadcast %cst_49 : f32 to vector<8x128xf32>
    %173 = arith.addf %172, %171 : vector<8x128xf32>
    %174 = arith.divf %172, %173 : vector<8x128xf32>
    %175 = vector.extract_strided_slice %162 {offsets = [0, 256], sizes = [8, 128], strides = [1, 1]} : vector<8x512xf32> to vector<8x128xf32>
    %176 = math.tanh %175 : vector<8x128xf32>
    %177 = vector.extract_strided_slice %162 {offsets = [0, 384], sizes = [8, 128], strides = [1, 1]} : vector<8x512xf32> to vector<8x128xf32>
    %178 = arith.negf %177 : vector<8x128xf32>
    %179 = math.exp %178 : vector<8x128xf32>
    %cst_50 = arith.constant 1.000000e+00 : f32
    %180 = vector.broadcast %cst_50 : f32 to vector<8x128xf32>
    %181 = arith.addf %180, %179 : vector<8x128xf32>
    %182 = arith.divf %180, %181 : vector<8x128xf32>
    %183 = arith.mulf %174, %118 : vector<8x128xf32>
    %184 = arith.mulf %168, %176 : vector<8x128xf32>
    %185 = arith.addf %183, %184 : vector<8x128xf32>
    %186 = math.tanh %185 : vector<8x128xf32>
    %187 = arith.mulf %182, %186 : vector<8x128xf32>
    %cst_51 = arith.constant dense<0.000000e+00> : vector<8x512xf32>
    %188 = tpu.matmul %187, %3, %cst_51 {dimension_numbers = #tpu.dot_dimension_numbers<[1], [0], [0], [1], [0, 0, 1, 1], [], []>} : vector<8x128xf32>, vector<128x512xf32>, vector<8x512xf32> -> vector<8x512xf32>
    %cst_52 = arith.constant dense<0.000000e+00> : vector<8x512xf32>
    %189 = tpu.matmul %150, %4, %cst_52 {dimension_numbers = #tpu.dot_dimension_numbers<[1], [0], [0], [1], [0, 0, 1, 1], [], []>} : vector<8x128xf32>, vector<128x512xf32>, vector<8x512xf32> -> vector<8x512xf32>
    %190 = arith.addf %188, %189 : vector<8x512xf32>
    %191 = vector.broadcast %5 : vector<1x512xf32> to vector<8x512xf32>
    %192 = arith.addf %190, %191 : vector<8x512xf32>
    %193 = vector.extract_strided_slice %192 {offsets = [0, 0], sizes = [8, 128], strides = [1, 1]} : vector<8x512xf32> to vector<8x128xf32>
    %194 = arith.negf %193 : vector<8x128xf32>
    %195 = math.exp %194 : vector<8x128xf32>
    %cst_53 = arith.constant 1.000000e+00 : f32
    %196 = vector.broadcast %cst_53 : f32 to vector<8x128xf32>
    %197 = arith.addf %196, %195 : vector<8x128xf32>
    %198 = arith.divf %196, %197 : vector<8x128xf32>
    %199 = vector.extract_strided_slice %192 {offsets = [0, 128], sizes = [8, 128], strides = [1, 1]} : vector<8x512xf32> to vector<8x128xf32>
    %200 = arith.negf %199 : vector<8x128xf32>
    %201 = math.exp %200 : vector<8x128xf32>
    %cst_54 = arith.constant 1.000000e+00 : f32
    %202 = vector.broadcast %cst_54 : f32 to vector<8x128xf32>
    %203 = arith.addf %202, %201 : vector<8x128xf32>
    %204 = arith.divf %202, %203 : vector<8x128xf32>
    %205 = vector.extract_strided_slice %192 {offsets = [0, 256], sizes = [8, 128], strides = [1, 1]} : vector<8x512xf32> to vector<8x128xf32>
    %206 = math.tanh %205 : vector<8x128xf32>
    %207 = vector.extract_strided_slice %192 {offsets = [0, 384], sizes = [8, 128], strides = [1, 1]} : vector<8x512xf32> to vector<8x128xf32>
    %208 = arith.negf %207 : vector<8x128xf32>
    %209 = math.exp %208 : vector<8x128xf32>
    %cst_55 = arith.constant 1.000000e+00 : f32
    %210 = vector.broadcast %cst_55 : f32 to vector<8x128xf32>
    %211 = arith.addf %210, %209 : vector<8x128xf32>
    %212 = arith.divf %210, %211 : vector<8x128xf32>
    %213 = arith.mulf %204, %148 : vector<8x128xf32>
    %214 = arith.mulf %198, %206 : vector<8x128xf32>
    %215 = arith.addf %213, %214 : vector<8x128xf32>
    %216 = math.tanh %215 : vector<8x128xf32>
    %217 = arith.mulf %212, %216 : vector<8x128xf32>
    %218 = vector.extract_strided_slice %9 {offsets = [2, 0], sizes = [1, 128], strides = [1, 1]} : vector<8x128xf32> to vector<1x128xf32>
    %219 = vector.broadcast %218 : vector<1x128xf32> to vector<8x128xf32>
    %220 = arith.mulf %217, %219 : vector<8x128xf32>
    %221 = arith.addf %154, %220 : vector<8x128xf32>
    %222 = vector.extract_strided_slice %7 {offsets = [0, 3], sizes = [8, 1], strides = [1, 1]} : vector<8x8xf32> to vector<8x1xf32>
    %223 = vector.broadcast %222 : vector<8x1xf32> to vector<8x512xf32>
    %224 = vector.broadcast %0 : vector<1x512xf32> to vector<8x512xf32>
    %225 = arith.mulf %223, %224 : vector<8x512xf32>
    %226 = vector.broadcast %2 : vector<1x512xf32> to vector<8x512xf32>
    %227 = arith.addf %225, %226 : vector<8x512xf32>
    %cst_56 = arith.constant dense<0.000000e+00> : vector<8x512xf32>
    %228 = tpu.matmul %187, %1, %cst_56 {dimension_numbers = #tpu.dot_dimension_numbers<[1], [0], [0], [1], [0, 0, 1, 1], [], []>} : vector<8x128xf32>, vector<128x512xf32>, vector<8x512xf32> -> vector<8x512xf32>
    %229 = arith.addf %227, %228 : vector<8x512xf32>
    %230 = vector.extract_strided_slice %229 {offsets = [0, 0], sizes = [8, 128], strides = [1, 1]} : vector<8x512xf32> to vector<8x128xf32>
    %231 = arith.negf %230 : vector<8x128xf32>
    %232 = math.exp %231 : vector<8x128xf32>
    %cst_57 = arith.constant 1.000000e+00 : f32
    %233 = vector.broadcast %cst_57 : f32 to vector<8x128xf32>
    %234 = arith.addf %233, %232 : vector<8x128xf32>
    %235 = arith.divf %233, %234 : vector<8x128xf32>
    %236 = vector.extract_strided_slice %229 {offsets = [0, 128], sizes = [8, 128], strides = [1, 1]} : vector<8x512xf32> to vector<8x128xf32>
    %237 = arith.negf %236 : vector<8x128xf32>
    %238 = math.exp %237 : vector<8x128xf32>
    %cst_58 = arith.constant 1.000000e+00 : f32
    %239 = vector.broadcast %cst_58 : f32 to vector<8x128xf32>
    %240 = arith.addf %239, %238 : vector<8x128xf32>
    %241 = arith.divf %239, %240 : vector<8x128xf32>
    %242 = vector.extract_strided_slice %229 {offsets = [0, 256], sizes = [8, 128], strides = [1, 1]} : vector<8x512xf32> to vector<8x128xf32>
    %243 = math.tanh %242 : vector<8x128xf32>
    %244 = vector.extract_strided_slice %229 {offsets = [0, 384], sizes = [8, 128], strides = [1, 1]} : vector<8x512xf32> to vector<8x128xf32>
    %245 = arith.negf %244 : vector<8x128xf32>
    %246 = math.exp %245 : vector<8x128xf32>
    %cst_59 = arith.constant 1.000000e+00 : f32
    %247 = vector.broadcast %cst_59 : f32 to vector<8x128xf32>
    %248 = arith.addf %247, %246 : vector<8x128xf32>
    %249 = arith.divf %247, %248 : vector<8x128xf32>
    %250 = arith.mulf %241, %185 : vector<8x128xf32>
    %251 = arith.mulf %235, %243 : vector<8x128xf32>
    %252 = arith.addf %250, %251 : vector<8x128xf32>
    %253 = math.tanh %252 : vector<8x128xf32>
    %254 = arith.mulf %249, %253 : vector<8x128xf32>
    %cst_60 = arith.constant dense<0.000000e+00> : vector<8x512xf32>
    %255 = tpu.matmul %254, %3, %cst_60 {dimension_numbers = #tpu.dot_dimension_numbers<[1], [0], [0], [1], [0, 0, 1, 1], [], []>} : vector<8x128xf32>, vector<128x512xf32>, vector<8x512xf32> -> vector<8x512xf32>
    %cst_61 = arith.constant dense<0.000000e+00> : vector<8x512xf32>
    %256 = tpu.matmul %217, %4, %cst_61 {dimension_numbers = #tpu.dot_dimension_numbers<[1], [0], [0], [1], [0, 0, 1, 1], [], []>} : vector<8x128xf32>, vector<128x512xf32>, vector<8x512xf32> -> vector<8x512xf32>
    %257 = arith.addf %255, %256 : vector<8x512xf32>
    %258 = vector.broadcast %5 : vector<1x512xf32> to vector<8x512xf32>
    %259 = arith.addf %257, %258 : vector<8x512xf32>
    %260 = vector.extract_strided_slice %259 {offsets = [0, 0], sizes = [8, 128], strides = [1, 1]} : vector<8x512xf32> to vector<8x128xf32>
    %261 = arith.negf %260 : vector<8x128xf32>
    %262 = math.exp %261 : vector<8x128xf32>
    %cst_62 = arith.constant 1.000000e+00 : f32
    %263 = vector.broadcast %cst_62 : f32 to vector<8x128xf32>
    %264 = arith.addf %263, %262 : vector<8x128xf32>
    %265 = arith.divf %263, %264 : vector<8x128xf32>
    %266 = vector.extract_strided_slice %259 {offsets = [0, 128], sizes = [8, 128], strides = [1, 1]} : vector<8x512xf32> to vector<8x128xf32>
    %267 = arith.negf %266 : vector<8x128xf32>
    %268 = math.exp %267 : vector<8x128xf32>
    %cst_63 = arith.constant 1.000000e+00 : f32
    %269 = vector.broadcast %cst_63 : f32 to vector<8x128xf32>
    %270 = arith.addf %269, %268 : vector<8x128xf32>
    %271 = arith.divf %269, %270 : vector<8x128xf32>
    %272 = vector.extract_strided_slice %259 {offsets = [0, 256], sizes = [8, 128], strides = [1, 1]} : vector<8x512xf32> to vector<8x128xf32>
    %273 = math.tanh %272 : vector<8x128xf32>
    %274 = vector.extract_strided_slice %259 {offsets = [0, 384], sizes = [8, 128], strides = [1, 1]} : vector<8x512xf32> to vector<8x128xf32>
    %275 = arith.negf %274 : vector<8x128xf32>
    %276 = math.exp %275 : vector<8x128xf32>
    %cst_64 = arith.constant 1.000000e+00 : f32
    %277 = vector.broadcast %cst_64 : f32 to vector<8x128xf32>
    %278 = arith.addf %277, %276 : vector<8x128xf32>
    %279 = arith.divf %277, %278 : vector<8x128xf32>
    %280 = arith.mulf %271, %215 : vector<8x128xf32>
    %281 = arith.mulf %265, %273 : vector<8x128xf32>
    %282 = arith.addf %280, %281 : vector<8x128xf32>
    %283 = math.tanh %282 : vector<8x128xf32>
    %284 = arith.mulf %279, %283 : vector<8x128xf32>
    %285 = vector.extract_strided_slice %9 {offsets = [3, 0], sizes = [1, 128], strides = [1, 1]} : vector<8x128xf32> to vector<1x128xf32>
    %286 = vector.broadcast %285 : vector<1x128xf32> to vector<8x128xf32>
    %287 = arith.mulf %284, %286 : vector<8x128xf32>
    %288 = arith.addf %221, %287 : vector<8x128xf32>
    %289 = vector.extract_strided_slice %7 {offsets = [0, 4], sizes = [8, 1], strides = [1, 1]} : vector<8x8xf32> to vector<8x1xf32>
    %290 = vector.broadcast %289 : vector<8x1xf32> to vector<8x512xf32>
    %291 = vector.broadcast %0 : vector<1x512xf32> to vector<8x512xf32>
    %292 = arith.mulf %290, %291 : vector<8x512xf32>
    %293 = vector.broadcast %2 : vector<1x512xf32> to vector<8x512xf32>
    %294 = arith.addf %292, %293 : vector<8x512xf32>
    %cst_65 = arith.constant dense<0.000000e+00> : vector<8x512xf32>
    %295 = tpu.matmul %254, %1, %cst_65 {dimension_numbers = #tpu.dot_dimension_numbers<[1], [0], [0], [1], [0, 0, 1, 1], [], []>} : vector<8x128xf32>, vector<128x512xf32>, vector<8x512xf32> -> vector<8x512xf32>
    %296 = arith.addf %294, %295 : vector<8x512xf32>
    %297 = vector.extract_strided_slice %296 {offsets = [0, 0], sizes = [8, 128], strides = [1, 1]} : vector<8x512xf32> to vector<8x128xf32>
    %298 = arith.negf %297 : vector<8x128xf32>
    %299 = math.exp %298 : vector<8x128xf32>
    %cst_66 = arith.constant 1.000000e+00 : f32
    %300 = vector.broadcast %cst_66 : f32 to vector<8x128xf32>
    %301 = arith.addf %300, %299 : vector<8x128xf32>
    %302 = arith.divf %300, %301 : vector<8x128xf32>
    %303 = vector.extract_strided_slice %296 {offsets = [0, 128], sizes = [8, 128], strides = [1, 1]} : vector<8x512xf32> to vector<8x128xf32>
    %304 = arith.negf %303 : vector<8x128xf32>
    %305 = math.exp %304 : vector<8x128xf32>
    %cst_67 = arith.constant 1.000000e+00 : f32
    %306 = vector.broadcast %cst_67 : f32 to vector<8x128xf32>
    %307 = arith.addf %306, %305 : vector<8x128xf32>
    %308 = arith.divf %306, %307 : vector<8x128xf32>
    %309 = vector.extract_strided_slice %296 {offsets = [0, 256], sizes = [8, 128], strides = [1, 1]} : vector<8x512xf32> to vector<8x128xf32>
    %310 = math.tanh %309 : vector<8x128xf32>
    %311 = vector.extract_strided_slice %296 {offsets = [0, 384], sizes = [8, 128], strides = [1, 1]} : vector<8x512xf32> to vector<8x128xf32>
    %312 = arith.negf %311 : vector<8x128xf32>
    %313 = math.exp %312 : vector<8x128xf32>
    %cst_68 = arith.constant 1.000000e+00 : f32
    %314 = vector.broadcast %cst_68 : f32 to vector<8x128xf32>
    %315 = arith.addf %314, %313 : vector<8x128xf32>
    %316 = arith.divf %314, %315 : vector<8x128xf32>
    %317 = arith.mulf %308, %252 : vector<8x128xf32>
    %318 = arith.mulf %302, %310 : vector<8x128xf32>
    %319 = arith.addf %317, %318 : vector<8x128xf32>
    %320 = math.tanh %319 : vector<8x128xf32>
    %321 = arith.mulf %316, %320 : vector<8x128xf32>
    %cst_69 = arith.constant dense<0.000000e+00> : vector<8x512xf32>
    %322 = tpu.matmul %321, %3, %cst_69 {dimension_numbers = #tpu.dot_dimension_numbers<[1], [0], [0], [1], [0, 0, 1, 1], [], []>} : vector<8x128xf32>, vector<128x512xf32>, vector<8x512xf32> -> vector<8x512xf32>
    %cst_70 = arith.constant dense<0.000000e+00> : vector<8x512xf32>
    %323 = tpu.matmul %284, %4, %cst_70 {dimension_numbers = #tpu.dot_dimension_numbers<[1], [0], [0], [1], [0, 0, 1, 1], [], []>} : vector<8x128xf32>, vector<128x512xf32>, vector<8x512xf32> -> vector<8x512xf32>
    %324 = arith.addf %322, %323 : vector<8x512xf32>
    %325 = vector.broadcast %5 : vector<1x512xf32> to vector<8x512xf32>
    %326 = arith.addf %324, %325 : vector<8x512xf32>
    %327 = vector.extract_strided_slice %326 {offsets = [0, 0], sizes = [8, 128], strides = [1, 1]} : vector<8x512xf32> to vector<8x128xf32>
    %328 = arith.negf %327 : vector<8x128xf32>
    %329 = math.exp %328 : vector<8x128xf32>
    %cst_71 = arith.constant 1.000000e+00 : f32
    %330 = vector.broadcast %cst_71 : f32 to vector<8x128xf32>
    %331 = arith.addf %330, %329 : vector<8x128xf32>
    %332 = arith.divf %330, %331 : vector<8x128xf32>
    %333 = vector.extract_strided_slice %326 {offsets = [0, 128], sizes = [8, 128], strides = [1, 1]} : vector<8x512xf32> to vector<8x128xf32>
    %334 = arith.negf %333 : vector<8x128xf32>
    %335 = math.exp %334 : vector<8x128xf32>
    %cst_72 = arith.constant 1.000000e+00 : f32
    %336 = vector.broadcast %cst_72 : f32 to vector<8x128xf32>
    %337 = arith.addf %336, %335 : vector<8x128xf32>
    %338 = arith.divf %336, %337 : vector<8x128xf32>
    %339 = vector.extract_strided_slice %326 {offsets = [0, 256], sizes = [8, 128], strides = [1, 1]} : vector<8x512xf32> to vector<8x128xf32>
    %340 = math.tanh %339 : vector<8x128xf32>
    %341 = vector.extract_strided_slice %326 {offsets = [0, 384], sizes = [8, 128], strides = [1, 1]} : vector<8x512xf32> to vector<8x128xf32>
    %342 = arith.negf %341 : vector<8x128xf32>
    %343 = math.exp %342 : vector<8x128xf32>
    %cst_73 = arith.constant 1.000000e+00 : f32
    %344 = vector.broadcast %cst_73 : f32 to vector<8x128xf32>
    %345 = arith.addf %344, %343 : vector<8x128xf32>
    %346 = arith.divf %344, %345 : vector<8x128xf32>
    %347 = arith.mulf %338, %282 : vector<8x128xf32>
    %348 = arith.mulf %332, %340 : vector<8x128xf32>
    %349 = arith.addf %347, %348 : vector<8x128xf32>
    %350 = math.tanh %349 : vector<8x128xf32>
    %351 = arith.mulf %346, %350 : vector<8x128xf32>
    %352 = vector.extract_strided_slice %9 {offsets = [4, 0], sizes = [1, 128], strides = [1, 1]} : vector<8x128xf32> to vector<1x128xf32>
    %353 = vector.broadcast %352 : vector<1x128xf32> to vector<8x128xf32>
    %354 = arith.mulf %351, %353 : vector<8x128xf32>
    %355 = arith.addf %288, %354 : vector<8x128xf32>
    %356 = vector.extract_strided_slice %7 {offsets = [0, 5], sizes = [8, 1], strides = [1, 1]} : vector<8x8xf32> to vector<8x1xf32>
    %357 = vector.broadcast %356 : vector<8x1xf32> to vector<8x512xf32>
    %358 = vector.broadcast %0 : vector<1x512xf32> to vector<8x512xf32>
    %359 = arith.mulf %357, %358 : vector<8x512xf32>
    %360 = vector.broadcast %2 : vector<1x512xf32> to vector<8x512xf32>
    %361 = arith.addf %359, %360 : vector<8x512xf32>
    %cst_74 = arith.constant dense<0.000000e+00> : vector<8x512xf32>
    %362 = tpu.matmul %321, %1, %cst_74 {dimension_numbers = #tpu.dot_dimension_numbers<[1], [0], [0], [1], [0, 0, 1, 1], [], []>} : vector<8x128xf32>, vector<128x512xf32>, vector<8x512xf32> -> vector<8x512xf32>
    %363 = arith.addf %361, %362 : vector<8x512xf32>
    %364 = vector.extract_strided_slice %363 {offsets = [0, 0], sizes = [8, 128], strides = [1, 1]} : vector<8x512xf32> to vector<8x128xf32>
    %365 = arith.negf %364 : vector<8x128xf32>
    %366 = math.exp %365 : vector<8x128xf32>
    %cst_75 = arith.constant 1.000000e+00 : f32
    %367 = vector.broadcast %cst_75 : f32 to vector<8x128xf32>
    %368 = arith.addf %367, %366 : vector<8x128xf32>
    %369 = arith.divf %367, %368 : vector<8x128xf32>
    %370 = vector.extract_strided_slice %363 {offsets = [0, 128], sizes = [8, 128], strides = [1, 1]} : vector<8x512xf32> to vector<8x128xf32>
    %371 = arith.negf %370 : vector<8x128xf32>
    %372 = math.exp %371 : vector<8x128xf32>
    %cst_76 = arith.constant 1.000000e+00 : f32
    %373 = vector.broadcast %cst_76 : f32 to vector<8x128xf32>
    %374 = arith.addf %373, %372 : vector<8x128xf32>
    %375 = arith.divf %373, %374 : vector<8x128xf32>
    %376 = vector.extract_strided_slice %363 {offsets = [0, 256], sizes = [8, 128], strides = [1, 1]} : vector<8x512xf32> to vector<8x128xf32>
    %377 = math.tanh %376 : vector<8x128xf32>
    %378 = vector.extract_strided_slice %363 {offsets = [0, 384], sizes = [8, 128], strides = [1, 1]} : vector<8x512xf32> to vector<8x128xf32>
    %379 = arith.negf %378 : vector<8x128xf32>
    %380 = math.exp %379 : vector<8x128xf32>
    %cst_77 = arith.constant 1.000000e+00 : f32
    %381 = vector.broadcast %cst_77 : f32 to vector<8x128xf32>
    %382 = arith.addf %381, %380 : vector<8x128xf32>
    %383 = arith.divf %381, %382 : vector<8x128xf32>
    %384 = arith.mulf %375, %319 : vector<8x128xf32>
    %385 = arith.mulf %369, %377 : vector<8x128xf32>
    %386 = arith.addf %384, %385 : vector<8x128xf32>
    %387 = math.tanh %386 : vector<8x128xf32>
    %388 = arith.mulf %383, %387 : vector<8x128xf32>
    %cst_78 = arith.constant dense<0.000000e+00> : vector<8x512xf32>
    %389 = tpu.matmul %388, %3, %cst_78 {dimension_numbers = #tpu.dot_dimension_numbers<[1], [0], [0], [1], [0, 0, 1, 1], [], []>} : vector<8x128xf32>, vector<128x512xf32>, vector<8x512xf32> -> vector<8x512xf32>
    %cst_79 = arith.constant dense<0.000000e+00> : vector<8x512xf32>
    %390 = tpu.matmul %351, %4, %cst_79 {dimension_numbers = #tpu.dot_dimension_numbers<[1], [0], [0], [1], [0, 0, 1, 1], [], []>} : vector<8x128xf32>, vector<128x512xf32>, vector<8x512xf32> -> vector<8x512xf32>
    %391 = arith.addf %389, %390 : vector<8x512xf32>
    %392 = vector.broadcast %5 : vector<1x512xf32> to vector<8x512xf32>
    %393 = arith.addf %391, %392 : vector<8x512xf32>
    %394 = vector.extract_strided_slice %393 {offsets = [0, 0], sizes = [8, 128], strides = [1, 1]} : vector<8x512xf32> to vector<8x128xf32>
    %395 = arith.negf %394 : vector<8x128xf32>
    %396 = math.exp %395 : vector<8x128xf32>
    %cst_80 = arith.constant 1.000000e+00 : f32
    %397 = vector.broadcast %cst_80 : f32 to vector<8x128xf32>
    %398 = arith.addf %397, %396 : vector<8x128xf32>
    %399 = arith.divf %397, %398 : vector<8x128xf32>
    %400 = vector.extract_strided_slice %393 {offsets = [0, 128], sizes = [8, 128], strides = [1, 1]} : vector<8x512xf32> to vector<8x128xf32>
    %401 = arith.negf %400 : vector<8x128xf32>
    %402 = math.exp %401 : vector<8x128xf32>
    %cst_81 = arith.constant 1.000000e+00 : f32
    %403 = vector.broadcast %cst_81 : f32 to vector<8x128xf32>
    %404 = arith.addf %403, %402 : vector<8x128xf32>
    %405 = arith.divf %403, %404 : vector<8x128xf32>
    %406 = vector.extract_strided_slice %393 {offsets = [0, 256], sizes = [8, 128], strides = [1, 1]} : vector<8x512xf32> to vector<8x128xf32>
    %407 = math.tanh %406 : vector<8x128xf32>
    %408 = vector.extract_strided_slice %393 {offsets = [0, 384], sizes = [8, 128], strides = [1, 1]} : vector<8x512xf32> to vector<8x128xf32>
    %409 = arith.negf %408 : vector<8x128xf32>
    %410 = math.exp %409 : vector<8x128xf32>
    %cst_82 = arith.constant 1.000000e+00 : f32
    %411 = vector.broadcast %cst_82 : f32 to vector<8x128xf32>
    %412 = arith.addf %411, %410 : vector<8x128xf32>
    %413 = arith.divf %411, %412 : vector<8x128xf32>
    %414 = arith.mulf %405, %349 : vector<8x128xf32>
    %415 = arith.mulf %399, %407 : vector<8x128xf32>
    %416 = arith.addf %414, %415 : vector<8x128xf32>
    %417 = math.tanh %416 : vector<8x128xf32>
    %418 = arith.mulf %413, %417 : vector<8x128xf32>
    %419 = vector.extract_strided_slice %9 {offsets = [5, 0], sizes = [1, 128], strides = [1, 1]} : vector<8x128xf32> to vector<1x128xf32>
    %420 = vector.broadcast %419 : vector<1x128xf32> to vector<8x128xf32>
    %421 = arith.mulf %418, %420 : vector<8x128xf32>
    %422 = arith.addf %355, %421 : vector<8x128xf32>
    %423 = vector.extract_strided_slice %7 {offsets = [0, 6], sizes = [8, 1], strides = [1, 1]} : vector<8x8xf32> to vector<8x1xf32>
    %424 = vector.broadcast %423 : vector<8x1xf32> to vector<8x512xf32>
    %425 = vector.broadcast %0 : vector<1x512xf32> to vector<8x512xf32>
    %426 = arith.mulf %424, %425 : vector<8x512xf32>
    %427 = vector.broadcast %2 : vector<1x512xf32> to vector<8x512xf32>
    %428 = arith.addf %426, %427 : vector<8x512xf32>
    %cst_83 = arith.constant dense<0.000000e+00> : vector<8x512xf32>
    %429 = tpu.matmul %388, %1, %cst_83 {dimension_numbers = #tpu.dot_dimension_numbers<[1], [0], [0], [1], [0, 0, 1, 1], [], []>} : vector<8x128xf32>, vector<128x512xf32>, vector<8x512xf32> -> vector<8x512xf32>
    %430 = arith.addf %428, %429 : vector<8x512xf32>
    %431 = vector.extract_strided_slice %430 {offsets = [0, 0], sizes = [8, 128], strides = [1, 1]} : vector<8x512xf32> to vector<8x128xf32>
    %432 = arith.negf %431 : vector<8x128xf32>
    %433 = math.exp %432 : vector<8x128xf32>
    %cst_84 = arith.constant 1.000000e+00 : f32
    %434 = vector.broadcast %cst_84 : f32 to vector<8x128xf32>
    %435 = arith.addf %434, %433 : vector<8x128xf32>
    %436 = arith.divf %434, %435 : vector<8x128xf32>
    %437 = vector.extract_strided_slice %430 {offsets = [0, 128], sizes = [8, 128], strides = [1, 1]} : vector<8x512xf32> to vector<8x128xf32>
    %438 = arith.negf %437 : vector<8x128xf32>
    %439 = math.exp %438 : vector<8x128xf32>
    %cst_85 = arith.constant 1.000000e+00 : f32
    %440 = vector.broadcast %cst_85 : f32 to vector<8x128xf32>
    %441 = arith.addf %440, %439 : vector<8x128xf32>
    %442 = arith.divf %440, %441 : vector<8x128xf32>
    %443 = vector.extract_strided_slice %430 {offsets = [0, 256], sizes = [8, 128], strides = [1, 1]} : vector<8x512xf32> to vector<8x128xf32>
    %444 = math.tanh %443 : vector<8x128xf32>
    %445 = vector.extract_strided_slice %430 {offsets = [0, 384], sizes = [8, 128], strides = [1, 1]} : vector<8x512xf32> to vector<8x128xf32>
    %446 = arith.negf %445 : vector<8x128xf32>
    %447 = math.exp %446 : vector<8x128xf32>
    %cst_86 = arith.constant 1.000000e+00 : f32
    %448 = vector.broadcast %cst_86 : f32 to vector<8x128xf32>
    %449 = arith.addf %448, %447 : vector<8x128xf32>
    %450 = arith.divf %448, %449 : vector<8x128xf32>
    %451 = arith.mulf %442, %386 : vector<8x128xf32>
    %452 = arith.mulf %436, %444 : vector<8x128xf32>
    %453 = arith.addf %451, %452 : vector<8x128xf32>
    %454 = math.tanh %453 : vector<8x128xf32>
    %455 = arith.mulf %450, %454 : vector<8x128xf32>
    %cst_87 = arith.constant dense<0.000000e+00> : vector<8x512xf32>
    %456 = tpu.matmul %455, %3, %cst_87 {dimension_numbers = #tpu.dot_dimension_numbers<[1], [0], [0], [1], [0, 0, 1, 1], [], []>} : vector<8x128xf32>, vector<128x512xf32>, vector<8x512xf32> -> vector<8x512xf32>
    %cst_88 = arith.constant dense<0.000000e+00> : vector<8x512xf32>
    %457 = tpu.matmul %418, %4, %cst_88 {dimension_numbers = #tpu.dot_dimension_numbers<[1], [0], [0], [1], [0, 0, 1, 1], [], []>} : vector<8x128xf32>, vector<128x512xf32>, vector<8x512xf32> -> vector<8x512xf32>
    %458 = arith.addf %456, %457 : vector<8x512xf32>
    %459 = vector.broadcast %5 : vector<1x512xf32> to vector<8x512xf32>
    %460 = arith.addf %458, %459 : vector<8x512xf32>
    %461 = vector.extract_strided_slice %460 {offsets = [0, 0], sizes = [8, 128], strides = [1, 1]} : vector<8x512xf32> to vector<8x128xf32>
    %462 = arith.negf %461 : vector<8x128xf32>
    %463 = math.exp %462 : vector<8x128xf32>
    %cst_89 = arith.constant 1.000000e+00 : f32
    %464 = vector.broadcast %cst_89 : f32 to vector<8x128xf32>
    %465 = arith.addf %464, %463 : vector<8x128xf32>
    %466 = arith.divf %464, %465 : vector<8x128xf32>
    %467 = vector.extract_strided_slice %460 {offsets = [0, 128], sizes = [8, 128], strides = [1, 1]} : vector<8x512xf32> to vector<8x128xf32>
    %468 = arith.negf %467 : vector<8x128xf32>
    %469 = math.exp %468 : vector<8x128xf32>
    %cst_90 = arith.constant 1.000000e+00 : f32
    %470 = vector.broadcast %cst_90 : f32 to vector<8x128xf32>
    %471 = arith.addf %470, %469 : vector<8x128xf32>
    %472 = arith.divf %470, %471 : vector<8x128xf32>
    %473 = vector.extract_strided_slice %460 {offsets = [0, 256], sizes = [8, 128], strides = [1, 1]} : vector<8x512xf32> to vector<8x128xf32>
    %474 = math.tanh %473 : vector<8x128xf32>
    %475 = vector.extract_strided_slice %460 {offsets = [0, 384], sizes = [8, 128], strides = [1, 1]} : vector<8x512xf32> to vector<8x128xf32>
    %476 = arith.negf %475 : vector<8x128xf32>
    %477 = math.exp %476 : vector<8x128xf32>
    %cst_91 = arith.constant 1.000000e+00 : f32
    %478 = vector.broadcast %cst_91 : f32 to vector<8x128xf32>
    %479 = arith.addf %478, %477 : vector<8x128xf32>
    %480 = arith.divf %478, %479 : vector<8x128xf32>
    %481 = arith.mulf %472, %416 : vector<8x128xf32>
    %482 = arith.mulf %466, %474 : vector<8x128xf32>
    %483 = arith.addf %481, %482 : vector<8x128xf32>
    %484 = math.tanh %483 : vector<8x128xf32>
    %485 = arith.mulf %480, %484 : vector<8x128xf32>
    %486 = vector.extract_strided_slice %9 {offsets = [6, 0], sizes = [1, 128], strides = [1, 1]} : vector<8x128xf32> to vector<1x128xf32>
    %487 = vector.broadcast %486 : vector<1x128xf32> to vector<8x128xf32>
    %488 = arith.mulf %485, %487 : vector<8x128xf32>
    %489 = arith.addf %422, %488 : vector<8x128xf32>
    %490 = vector.extract_strided_slice %7 {offsets = [0, 7], sizes = [8, 1], strides = [1, 1]} : vector<8x8xf32> to vector<8x1xf32>
    %491 = vector.broadcast %490 : vector<8x1xf32> to vector<8x512xf32>
    %492 = vector.broadcast %0 : vector<1x512xf32> to vector<8x512xf32>
    %493 = arith.mulf %491, %492 : vector<8x512xf32>
    %494 = vector.broadcast %2 : vector<1x512xf32> to vector<8x512xf32>
    %495 = arith.addf %493, %494 : vector<8x512xf32>
    %cst_92 = arith.constant dense<0.000000e+00> : vector<8x512xf32>
    %496 = tpu.matmul %455, %1, %cst_92 {dimension_numbers = #tpu.dot_dimension_numbers<[1], [0], [0], [1], [0, 0, 1, 1], [], []>} : vector<8x128xf32>, vector<128x512xf32>, vector<8x512xf32> -> vector<8x512xf32>
    %497 = arith.addf %495, %496 : vector<8x512xf32>
    %498 = vector.extract_strided_slice %497 {offsets = [0, 0], sizes = [8, 128], strides = [1, 1]} : vector<8x512xf32> to vector<8x128xf32>
    %499 = arith.negf %498 : vector<8x128xf32>
    %500 = math.exp %499 : vector<8x128xf32>
    %cst_93 = arith.constant 1.000000e+00 : f32
    %501 = vector.broadcast %cst_93 : f32 to vector<8x128xf32>
    %502 = arith.addf %501, %500 : vector<8x128xf32>
    %503 = arith.divf %501, %502 : vector<8x128xf32>
    %504 = vector.extract_strided_slice %497 {offsets = [0, 128], sizes = [8, 128], strides = [1, 1]} : vector<8x512xf32> to vector<8x128xf32>
    %505 = arith.negf %504 : vector<8x128xf32>
    %506 = math.exp %505 : vector<8x128xf32>
    %cst_94 = arith.constant 1.000000e+00 : f32
    %507 = vector.broadcast %cst_94 : f32 to vector<8x128xf32>
    %508 = arith.addf %507, %506 : vector<8x128xf32>
    %509 = arith.divf %507, %508 : vector<8x128xf32>
    %510 = vector.extract_strided_slice %497 {offsets = [0, 256], sizes = [8, 128], strides = [1, 1]} : vector<8x512xf32> to vector<8x128xf32>
    %511 = math.tanh %510 : vector<8x128xf32>
    %512 = vector.extract_strided_slice %497 {offsets = [0, 384], sizes = [8, 128], strides = [1, 1]} : vector<8x512xf32> to vector<8x128xf32>
    %513 = arith.negf %512 : vector<8x128xf32>
    %514 = math.exp %513 : vector<8x128xf32>
    %cst_95 = arith.constant 1.000000e+00 : f32
    %515 = vector.broadcast %cst_95 : f32 to vector<8x128xf32>
    %516 = arith.addf %515, %514 : vector<8x128xf32>
    %517 = arith.divf %515, %516 : vector<8x128xf32>
    %518 = arith.mulf %509, %453 : vector<8x128xf32>
    %519 = arith.mulf %503, %511 : vector<8x128xf32>
    %520 = arith.addf %518, %519 : vector<8x128xf32>
    %521 = math.tanh %520 : vector<8x128xf32>
    %522 = arith.mulf %517, %521 : vector<8x128xf32>
    %c0_96 = arith.constant 0 : index
    %c0_97 = arith.constant 0 : index
    %523 = vector.load %arg12[%c0_96, %c0_97] : memref<8x128xf32, #tpu.memory_space<vmem>>, vector<8x128xf32>
    tpu.vector_store %arg12[%c0_96, %c0_97], %522 {strides = array<i32>} : memref<8x128xf32, #tpu.memory_space<vmem>>, vector<8x128xf32>,
    %c0_98 = arith.constant 0 : index
    %c0_99 = arith.constant 0 : index
    %524 = vector.load %arg13[%c0_98, %c0_99] : memref<8x128xf32, #tpu.memory_space<vmem>>, vector<8x128xf32>
    tpu.vector_store %arg13[%c0_98, %c0_99], %520 {strides = array<i32>} : memref<8x128xf32, #tpu.memory_space<vmem>>, vector<8x128xf32>,
    %c0_100 = arith.constant 0 : index
    %c0_101 = arith.constant 0 : index
    %525 = vector.load %arg14[%c0_100, %c0_101] : memref<8x128xf32, #tpu.memory_space<vmem>>, vector<8x128xf32>
    tpu.vector_store %arg14[%c0_100, %c0_101], %485 {strides = array<i32>} : memref<8x128xf32, #tpu.memory_space<vmem>>, vector<8x128xf32>,
    %c0_102 = arith.constant 0 : index
    %c0_103 = arith.constant 0 : index
    %526 = vector.load %arg15[%c0_102, %c0_103] : memref<8x128xf32, #tpu.memory_space<vmem>>, vector<8x128xf32>
    tpu.vector_store %arg15[%c0_102, %c0_103], %483 {strides = array<i32>} : memref<8x128xf32, #tpu.memory_space<vmem>>, vector<8x128xf32>,
    %c0_104 = arith.constant 0 : index
    %c0_105 = arith.constant 0 : index
    %527 = vector.load %arg16[%c0_104, %c0_105] : memref<8x128xf32, #tpu.memory_space<vmem>>, vector<8x128xf32>
    tpu.vector_store %arg16[%c0_104, %c0_105], %489 {strides = array<i32>} : memref<8x128xf32, #tpu.memory_space<vmem>>, vector<8x128xf32>,
    %528 = vector.extract_strided_slice %9 {offsets = [7, 0], sizes = [1, 128], strides = [1, 1]} : vector<8x128xf32> to vector<1x128xf32>
    %c0_106 = arith.constant 0 : index
    %c0_107 = arith.constant 0 : index
    %529 = vector.load %arg17[%c0_106, %c0_107] : memref<1x128xf32, #tpu.memory_space<vmem>>, vector<1x128xf32>
    tpu.vector_store %arg17[%c0_106, %c0_107], %528 {strides = array<i32>} : memref<1x128xf32, #tpu.memory_space<vmem>>, vector<1x128xf32>,
    %c1_i32 = arith.constant 1 : i32
    %530 = arith.cmpi eq, %arg1, %c1_i32 : i32
    %531 = arith.extui %530 : i1 to i32
    %c0_i32_108 = arith.constant 0 : i32
    %532 = arith.cmpi ne, %531, %c0_i32_108 : i32
    scf.if %532 {
      %cst_109 = arith.constant dense<0.000000e+00> : vector<8x512xf32>
      %533 = tpu.matmul %522, %3, %cst_109 {dimension_numbers = #tpu.dot_dimension_numbers<[1], [0], [0], [1], [0, 0, 1, 1], [], []>} : vector<8x128xf32>, vector<128x512xf32>, vector<8x512xf32> -> vector<8x512xf32>
      %cst_110 = arith.constant dense<0.000000e+00> : vector<8x512xf32>
      %534 = tpu.matmul %485, %4, %cst_110 {dimension_numbers = #tpu.dot_dimension_numbers<[1], [0], [0], [1], [0, 0, 1, 1], [], []>} : vector<8x128xf32>, vector<128x512xf32>, vector<8x512xf32> -> vector<8x512xf32>
      %535 = arith.addf %533, %534 : vector<8x512xf32>
      %536 = vector.broadcast %5 : vector<1x512xf32> to vector<8x512xf32>
      %537 = arith.addf %535, %536 : vector<8x512xf32>
      %538 = vector.extract_strided_slice %537 {offsets = [0, 0], sizes = [8, 128], strides = [1, 1]} : vector<8x512xf32> to vector<8x128xf32>
      %539 = arith.negf %538 : vector<8x128xf32>
      %540 = math.exp %539 : vector<8x128xf32>
      %cst_111 = arith.constant 1.000000e+00 : f32
      %541 = vector.broadcast %cst_111 : f32 to vector<8x128xf32>
      %542 = arith.addf %541, %540 : vector<8x128xf32>
      %543 = arith.divf %541, %542 : vector<8x128xf32>
      %544 = vector.extract_strided_slice %537 {offsets = [0, 128], sizes = [8, 128], strides = [1, 1]} : vector<8x512xf32> to vector<8x128xf32>
      %545 = arith.negf %544 : vector<8x128xf32>
      %546 = math.exp %545 : vector<8x128xf32>
      %cst_112 = arith.constant 1.000000e+00 : f32
      %547 = vector.broadcast %cst_112 : f32 to vector<8x128xf32>
      %548 = arith.addf %547, %546 : vector<8x128xf32>
      %549 = arith.divf %547, %548 : vector<8x128xf32>
      %550 = vector.extract_strided_slice %537 {offsets = [0, 256], sizes = [8, 128], strides = [1, 1]} : vector<8x512xf32> to vector<8x128xf32>
      %551 = math.tanh %550 : vector<8x128xf32>
      %552 = vector.extract_strided_slice %537 {offsets = [0, 384], sizes = [8, 128], strides = [1, 1]} : vector<8x512xf32> to vector<8x128xf32>
      %553 = arith.negf %552 : vector<8x128xf32>
      %554 = math.exp %553 : vector<8x128xf32>
      %cst_113 = arith.constant 1.000000e+00 : f32
      %555 = vector.broadcast %cst_113 : f32 to vector<8x128xf32>
      %556 = arith.addf %555, %554 : vector<8x128xf32>
      %557 = arith.divf %555, %556 : vector<8x128xf32>
      %558 = arith.mulf %549, %483 : vector<8x128xf32>
      %559 = arith.mulf %543, %551 : vector<8x128xf32>
      %560 = arith.addf %558, %559 : vector<8x128xf32>
      %561 = math.tanh %560 : vector<8x128xf32>
      %562 = arith.mulf %557, %561 : vector<8x128xf32>
      %563 = vector.extract_strided_slice %9 {offsets = [7, 0], sizes = [1, 128], strides = [1, 1]} : vector<8x128xf32> to vector<1x128xf32>
      %564 = vector.broadcast %563 : vector<1x128xf32> to vector<8x128xf32>
      %565 = arith.mulf %562, %564 : vector<8x128xf32>
      %566 = arith.addf %489, %565 : vector<8x128xf32>
      %cst_114 = arith.constant dense<0.000000e+00> : vector<8xf32>
      %567 = vector.multi_reduction <add>, %566, %cst_114 [1] : vector<8x128xf32> to vector<8xf32>
      %568 = vector.shape_cast %567 : vector<8xf32> to vector<8x1xf32>
      %c0_115 = arith.constant 0 : index
      %c0_116 = arith.constant 0 : index
      %569 = vector.load %arg10[%c0_115, %c0_116] : memref<1x1xf32, #tpu.memory_space<vmem>>, vector<1x1xf32>
      %570 = vector.broadcast %569 : vector<1x1xf32> to vector<8x1xf32>
      %571 = arith.addf %568, %570 : vector<8x1xf32>
      %c0_117 = arith.constant 0 : index
      %c0_118 = arith.constant 0 : index
      %572 = vector.load %arg11[%c0_117, %c0_118] : memref<8x1xf32, #tpu.memory_space<vmem>>, vector<8x1xf32>
      tpu.vector_store %arg11[%c0_117, %c0_118], %571 {strides = array<i32>} : memref<8x1xf32, #tpu.memory_space<vmem>>, vector<8x1xf32>,
    } else {
    }
    return
  }
  func.func @transform_0(%arg0: i32, %arg1: i32) -> (i32, i32, i32) {
    %c0_i32 = arith.constant 0 : i32
    %c0_i32_0 = arith.constant 0 : i32
    return %arg1, %arg0, %c0_i32 : i32, i32, i32
  }
  func.func @transform_1(%arg0: i32, %arg1: i32) -> (i32, i32) {
    %c0_i32 = arith.constant 0 : i32
    %c0_i32_0 = arith.constant 0 : i32
    %c0_i32_1 = arith.constant 0 : i32
    return %c0_i32, %c0_i32_0 : i32, i32
  }
  func.func @transform_2(%arg0: i32, %arg1: i32) -> (i32, i32) {
    %c0_i32 = arith.constant 0 : i32
    %c0_i32_0 = arith.constant 0 : i32
    %c0_i32_1 = arith.constant 0 : i32
    return %c0_i32, %c0_i32_0 : i32, i32
  }
  func.func @transform_3(%arg0: i32, %arg1: i32) -> (i32, i32) {
    %c0_i32 = arith.constant 0 : i32
    %c0_i32_0 = arith.constant 0 : i32
    %c0_i32_1 = arith.constant 0 : i32
    return %c0_i32, %c0_i32_0 : i32, i32
  }
  func.func @transform_4(%arg0: i32, %arg1: i32) -> (i32, i32) {
    %c0_i32 = arith.constant 0 : i32
    %c0_i32_0 = arith.constant 0 : i32
    %c0_i32_1 = arith.constant 0 : i32
    return %c0_i32, %c0_i32_0 : i32, i32
  }
  func.func @transform_5(%arg0: i32, %arg1: i32) -> (i32, i32) {
    %c0_i32 = arith.constant 0 : i32
    %c0_i32_0 = arith.constant 0 : i32
    %c0_i32_1 = arith.constant 0 : i32
    return %c0_i32, %c0_i32_0 : i32, i32
  }
  func.func @transform_6(%arg0: i32, %arg1: i32) -> (i32, i32) {
    %c0_i32 = arith.constant 0 : i32
    %c0_i32_0 = arith.constant 0 : i32
    %c0_i32_1 = arith.constant 0 : i32
    return %c0_i32, %c0_i32_0 : i32, i32
  }
  func.func @transform_7(%arg0: i32, %arg1: i32) -> (i32, i32, i32) {
    %c0_i32 = arith.constant 0 : i32
    %c0_i32_0 = arith.constant 0 : i32
    %c0_i32_1 = arith.constant 0 : i32
    return %arg1, %c0_i32, %c0_i32_0 : i32, i32, i32
  }
  func.func @transform_8(%arg0: i32, %arg1: i32) -> (i32, i32) {
    %c0_i32 = arith.constant 0 : i32
    %c0_i32_0 = arith.constant 0 : i32
    %c0_i32_1 = arith.constant 0 : i32
    return %c0_i32, %c0_i32_0 : i32, i32
  }
  func.func @transform_9(%arg0: i32, %arg1: i32) -> (i32, i32) {
    %c0_i32 = arith.constant 0 : i32
    %c0_i32_0 = arith.constant 0 : i32
    return %arg0, %c0_i32 : i32, i32
  }
}

</mosaic_0001>

<bundles_post_ra>
// kernel: lstm_model_forward.1
= control target key start
LH: loop header
LB: loop body
LE: loop exit
PB: predicated region body
PF: predicated region fallthrough
CT: control target
= control target key end

     0   :  { %s7582_s0 = inlined_call_operand.vmem [shape: f32[2,16,8], index: 0, kind: input, shape index: {}]   ;;  %s7583_s1 = inlined_call_operand.vmem [shape: f32[1,512], index: 1, kind: input, shape index: {}]   ;;  %s7584_s2 = inlined_call_operand.hbm [shape: f32[128,512], index: 2, kind: input, shape index: {}]   ;;  %s7585_s3 = inlined_call_operand.vmem [shape: f32[1,512], index: 3, kind: input, shape index: {}]   ;;  %s7586_s4 = inlined_call_operand.hbm [shape: f32[128,512], index: 4, kind: input, shape index: {}]   ;;  %s7587_s5 = inlined_call_operand.hbm [shape: f32[128,512], index: 5, kind: input, shape index: {}]   ;;  %s7588_s6 = inlined_call_operand.vmem [shape: f32[1,512], index: 6, kind: input, shape index: {}]   ;;  %s7589_s7 = inlined_call_operand.vmem [shape: f32[2,8,128], index: 7, kind: input, shape index: {}]   ;;  %s7590_s8 = inlined_call_operand.<no memory space> [shape: f32[1,1], index: 8, kind: input, shape index: {}]   ;;  %s7591_s9 = inlined_call_operand.vmem [shape: f32[16,1], index: 9, kind: output, shape index: {}]  }
   0x1   :  { %v14_v0 = vstv %s7590_s8 }
   0x2   :  { %15 = vst [vmem:[#allocation8] sm:$0x1] %v14_v0 }
   0x3   :  { %16 = vsyncpa [#allocation10], 0 }
   0x4   :  { %17 = vsyncpa [#allocation12], 0  ;;  %s4802_s11 = smov 0   ;;  %s4804_s12 = smov 0  }
   0x5   :  { %s4806_s13 = smov 0   ;;  %s4808_s14 = smov 0  }
   0x6   :  { %s4810_s15 = smov 0  }
   0x7 LB: > { %s4161_s8 = sadd.s32 4294967295, %s4733_s15   ;;  %p4163_p0 = scmp.ge.s32.totalorder %s4733_s15, 1  ;;  %s4733_s15 = sphi %s4810_s15, %s23_s15   ;;  %s4729_s14 = sphi %s4808_s14, %s9562_s14   ;;  %s4725_s13 = sphi %s4806_s13, %s9561_s13   ;;  %s4721_s12 = sphi %s4804_s12, %s9560_s12   ;;  %s4717_s11 = sphi %s4802_s11, %s9559_s11  }
   0x8   : > { %p267_p1 = scmp.lt.s32.totalorder %s4733_s15, 5  ;;  %p4830_p2 = scmp.eq.s32.totalorder %s4161_s8, 0 }
   0x9   : > { %s298_s19 = sshll.u32 %s7586_s4, 4  ;;  %s4735_s21 = smov [#allocation11]   ;;  %s299_s19 = int_to_ptr.hbm [resolvable:$true] %s298_s19 }
   0xa   : > { %p4837_p3 = pnand %p4163_p0, %p267_p1  ;;  %s300_s22 = sshll.u32 %s4735_s21, 4  ;;  %s301_s22 = int_to_ptr.vmem [resolvable:$true] %s300_s22 }
   0xb   : > { %s4736_s24 = smov 512   ;;  %s4737_s25 = smov 32  }
   0xc   : > { %p4244_p4 = pneg %p4837_p3  ;;  %s32_s26 = sadd.s32 1, %s4725_s13 }
   0xd   : > { %s35_s27 = sadd.s32 1, %s4729_s14  ;;  %p33_p6 = scmp.ge.s32.totalorder %s32_s26, 2 }
   0xe   : > { %p4845_p5 = pnand %p4830_p2, %p4244_p4  ;;  %s281_s30 = sshll.u32 %s7584_s2, 4  ;;  %s282_s30 = int_to_ptr.hbm [resolvable:$true] %s281_s30 }
   0xf   : > { %s9564_s26 = smov (%p33_p6, %s32_s26), 0  ;;  %s9566_s27 = smov (!%p33_p6, %s35_s27), %s4729_s14 }
  0x10   : > { %4250 = dma.hbm_to_vmem [thread:$0]  (!%p4845_p5), %s299_s19, 8192, %s301_s22, [#allocation12], %s4736_s24, %s4736_s24, %s4737_s25  }
  0x11   : > { %s4738_s10 = smov [#allocation9]   ;;  %s312_s21 = sshll.u32 %s7587_s5, 4  ;;  %s313_s21 = int_to_ptr.hbm [resolvable:$true] %s312_s21 }
  0x12   : > { %s283_s8 = sshll.u32 %s4738_s10, 4  ;;  %p37_p7 = scmp.ge.s32.totalorder %s9566_s27, 2  ;;  %s284_s8 = int_to_ptr.vmem [resolvable:$true] %s283_s8 }
  0x13   : > { %4247 = dma.hbm_to_vmem [thread:$0]  (!%p4845_p5), %s282_s30, 8192, %s284_s8, [#allocation10], %s4736_s24, %s4736_s24, %s4737_s25  }
  0x14   : > { %s9568_s27 = smov (%p37_p7, %s9566_s27), 0  ;;  %s4739_s19 = smov [#allocation13]  }
  0x15   : > { %s314_s22 = sshll.u32 %s4739_s19, 4  ;;  %354 = sbr.rel (%p4837_p3) target bundleno = 2365 (0x93d), region = 56  ;;  %s315_s22 = int_to_ptr.vmem [resolvable:$true] %s314_s22 }
  0x16   : > { %4253 = dma.hbm_to_vmem [thread:$0]  (!%p4845_p5), %s313_s21, 8192, %s315_s22, [#allocation12], %s4736_s24, %s4736_s24, %s4737_s25  }
  0x1a   : > { %4708 = dma.done.wait (%p4830_p2), [#allocation10], 8192  }
  0x1b   : > { %4710 = vsyncadd (%p4830_p2), [#allocation10], 4294959104 }
  0x1c   : > { %4712 = dma.done.wait (%p4830_p2), [#allocation12], 16384  }
  0x1d   : > { %4714 = vsyncadd (%p4830_p2), [#allocation12], 4294950912  ;;  %p409_p8 = scmp.lt.s32.totalorder %s4721_s12, 1  ;;  %v4891_v1 = vld [vmem:[%s7583_s1] sm:$0xf]  ;;  %v4893_v2 = vld [vmem:[#allocation9] sm:$0xff] }
  0x1e   : > { %7922 = vst [vmem:[#allocation16_spill] sm:$0xff] %v4891_v1  ;;  %v4895_v3 = vld [vmem:[#allocation9 + $0x8] sm:$0xff]  ;;  %v4897_v4 = vld [vmem:[#allocation9 + $0x10] sm:$0xff]  ;;  %v4899_v5 = vld [vmem:[#allocation9 + $0x18] sm:$0xff]  ;;  %p407_p9 = scmp.lt.s32.totalorder %s4717_s11, 1  ;;  %p4176_p10 = scmp.ne.s32.totalorder %s4717_s11, 0 }
  0x1f   : > { %s9570_s12 = smov (!%p409_p8, %s4721_s12), 1  ;;  %7923 = vst [vmem:[#allocation17_spill] sm:$0xff] %v4893_v2  ;;  %v4901_v6 = vld [vmem:[#allocation9 + $0x20] sm:$0xff]  ;;  %v4903_v7 = vld [vmem:[#allocation9 + $0x28] sm:$0xff]  ;;  %v4905_v8 = vld [vmem:[#allocation9 + $0x30] sm:$0xff] }
  0x20   : > { %s4175_s20 = sshll.u32 %s9570_s12, 3  ;;  %7924 = vst [vmem:[#allocation18_spill] sm:$0xff] %v4895_v3  ;;  %v4907_v9 = vld [vmem:[#allocation9 + $0x38] sm:$0xff]  ;;  %v4909_v10 = vld [vmem:[#allocation9 + $0x40] sm:$0xff]  ;;  %v4911_v11 = vld [vmem:[#allocation9 + $0x48] sm:$0xff] }
  0x21   : > { %s4886_s25 = scalar_lea.vmem %s7591_s9, %s4175_s20  ;;  %7925 = vst [vmem:[#allocation19_spill] sm:$0xff] %v4897_v4  ;;  %v4913_v12 = vld [vmem:[#allocation9 + $0x50] sm:$0xff]  ;;  %v4915_v13 = vld [vmem:[#allocation9 + $0x58] sm:$0xff]  ;;  %v4917_v14 = vld [vmem:[#allocation9 + $0x60] sm:$0xff] }
  0x22   : > { %7926 = vst [vmem:[#allocation20_spill] sm:$0xff] %v4899_v5  ;;  %v4919_v15 = vld [vmem:[#allocation9 + $0x68] sm:$0xff]  ;;  %v4921_v16 = vld [vmem:[#allocation9 + $0x70] sm:$0xff]  ;;  %v4923_v17 = vld [vmem:[#allocation9 + $0x78] sm:$0xff]  ;;  %s5190_s10 = scalar_select %p407_p9, %s4717_s11, 1 }
  0x23   : > { %7927 = vst [vmem:[#allocation21_spill] sm:$0xff] %v4901_v6  ;;  %v4925_v18 = vld [vmem:[#allocation9 + $0x80] sm:$0xff]  ;;  %v4927_v19 = vld [vmem:[#allocation9 + $0x88] sm:$0xff]  ;;  %v4929_v20 = vld [vmem:[#allocation9 + $0x90] sm:$0xff] }
  0x24   : > { %7928 = vst [vmem:[#allocation22_spill] sm:$0xff] %v4903_v7  ;;  %v4931_v21 = vld [vmem:[#allocation9 + $0x98] sm:$0xff]  ;;  %v4933_v22 = vld [vmem:[#allocation9 + $0xa0] sm:$0xff]  ;;  %v4935_v23 = vld [vmem:[#allocation9 + $0xa8] sm:$0xff]  ;;  %s4172_s8 = sshll.u32 %s5190_s10, 1 }
  0x25   : > { %7929 = vst [vmem:[#allocation23_spill] sm:$0xff] %v4905_v8  ;;  %v4937_v24 = vld [vmem:[#allocation9 + $0xb0] sm:$0xff]  ;;  %v4939_v25 = vld [vmem:[#allocation9 + $0xb8] sm:$0xff]  ;;  %v4941_v26 = vld [vmem:[#allocation9 + $0xc0] sm:$0xff]  ;;  %s412_s17 = sadd.s32 %s4172_s8, %s9570_s12  ;;  %s4174_s12 = sshll.u32 %s5190_s10, 3 }
  0x26   : > { %7930 = vst [vmem:[#allocation24_spill] sm:$0xff] %v4907_v9  ;;  %v4943_v27 = vld [vmem:[#allocation9 + $0xc8] sm:$0xff]  ;;  %v4945_v28 = vld [vmem:[#allocation9 + $0xd0] sm:$0xff]  ;;  %v4947_v29 = vld [vmem:[#allocation9 + $0xd8] sm:$0xff]  ;;  %s4173_s18 = sshll.u32 %s412_s17, 3  ;;  %s418_s24 = scalar_lea.vmem %s7589_s7, %s4174_s12 }
  0x27   : > { %7931 = vst [vmem:[#allocation25_spill] sm:$0xff] %v4909_v10  ;;  %v4949_v30 = vld [vmem:[#allocation9 + $0xe0] sm:$0xff]  ;;  %v4951_v31 = vld [vmem:[#allocation9 + $0xe8] sm:$0xff]  ;;  %v4953_v32 = vld [vmem:[#allocation9 + $0xf0] sm:$0xff]  ;;  %s414_s22 = scalar_lea.vmem %s7582_s0, %s4173_s18 }
  0x28   : > { %7932 = vst [vmem:[#allocation26_spill] sm:$0xff] %v4911_v11  ;;  %v4955_v33 = vld [vmem:[#allocation9 + $0xf8] sm:$0xff]  ;;  %v4957_v34 = vld [vmem:[#allocation9 + $0x100] sm:$0xff]  ;;  %v4959_v35 = vld [vmem:[#allocation9 + $0x108] sm:$0xff] }
  0x29   : > { %7933 = vst [vmem:[#allocation27_spill] sm:$0xff] %v4913_v12  ;;  %v4961_v36 = vld [vmem:[#allocation9 + $0x110] sm:$0xff]  ;;  %v4963_v37 = vld [vmem:[#allocation9 + $0x118] sm:$0xff]  ;;  %v4965_v38 = vld [vmem:[#allocation9 + $0x120] sm:$0xff] }
  0x2a   : > { %7934 = vst [vmem:[#allocation28_spill] sm:$0xff] %v4915_v13  ;;  %v4967_v39 = vld [vmem:[#allocation9 + $0x128] sm:$0xff]  ;;  %v4969_v40 = vld [vmem:[#allocation9 + $0x130] sm:$0xff]  ;;  %v4971_v41 = vld [vmem:[#allocation9 + $0x138] sm:$0xff] }
  0x2b   : > { %7935 = vst [vmem:[#allocation29_spill] sm:$0xff] %v4917_v14  ;;  %v4973_v42 = vld [vmem:[#allocation9 + $0x140] sm:$0xff]  ;;  %v4975_v43 = vld [vmem:[#allocation9 + $0x148] sm:$0xff]  ;;  %v4977_v44 = vld [vmem:[#allocation9 + $0x150] sm:$0xff] }
  0x2c   : > { %7936 = vst [vmem:[#allocation30_spill] sm:$0xff] %v4919_v15  ;;  %v4979_v45 = vld [vmem:[#allocation9 + $0x158] sm:$0xff]  ;;  %v4981_v46 = vld [vmem:[#allocation9 + $0x160] sm:$0xff]  ;;  %v4983_v47 = vld [vmem:[#allocation9 + $0x168] sm:$0xff] }
  0x2d   : > { %7937 = vst [vmem:[#allocation31_spill] sm:$0xff] %v4921_v16  ;;  %v4985_v48 = vld [vmem:[#allocation9 + $0x170] sm:$0xff]  ;;  %v4987_v49 = vld [vmem:[#allocation9 + $0x178] sm:$0xff]  ;;  %v4989_v50 = vld [vmem:[#allocation9 + $0x180] sm:$0xff] }
  0x2e   : > { %7938 = vst [vmem:[#allocation32_spill] sm:$0xff] %v4923_v17  ;;  %v4991_v51 = vld [vmem:[#allocation9 + $0x188] sm:$0xff]  ;;  %v4993_v52 = vld [vmem:[#allocation9 + $0x190] sm:$0xff]  ;;  %v4995_v53 = vld [vmem:[#allocation9 + $0x198] sm:$0xff] }
  0x2f   : > { %7939 = vst [vmem:[#allocation33_spill] sm:$0xff] %v4925_v18  ;;  %v4997_v54 = vld [vmem:[#allocation9 + $0x1a0] sm:$0xff]  ;;  %v4999_v55 = vld [vmem:[#allocation9 + $0x1a8] sm:$0xff]  ;;  %v5001_v56 = vld [vmem:[#allocation9 + $0x1b0] sm:$0xff] }
  0x30   : > { %7940 = vst [vmem:[#allocation34_spill] sm:$0xff] %v4927_v19  ;;  %v5003_v57 = vld [vmem:[#allocation9 + $0x1b8] sm:$0xff]  ;;  %v5005_v58 = vld [vmem:[#allocation9 + $0x1c0] sm:$0xff]  ;;  %v5007_v59 = vld [vmem:[#allocation9 + $0x1c8] sm:$0xff] }
  0x31   : > { %7941 = vst [vmem:[#allocation35_spill] sm:$0xff] %v4929_v20  ;;  %v5009_v60 = vld [vmem:[#allocation9 + $0x1d0] sm:$0xff]  ;;  %v5011_v61 = vld [vmem:[#allocation9 + $0x1d8] sm:$0xff]  ;;  %v5013_v62 = vld [vmem:[#allocation9 + $0x1e0] sm:$0xff] }
  0x32   : > { %7942 = vst [vmem:[#allocation36_spill] sm:$0xff] %v4931_v21  ;;  %v5015_v63 = vld [vmem:[#allocation9 + $0x1e8] sm:$0xff]  ;;  %v5017_v0 = vld [vmem:[#allocation9 + $0x1f0] sm:$0xff]  ;;  %v5019_v1 = vld [vmem:[#allocation9 + $0x1f8] sm:$0xff] }
  0x33   : > { %7943 = vst [vmem:[#allocation37_spill] sm:$0xff] %v4933_v22  ;;  %v5024_v5 = vld [vmem:[%s7585_s3] sm:$0xf]  ;;  %v5026_v4 = vld [vmem:[#allocation11] sm:$0xff]  ;;  %v5028_v3 = vld [vmem:[#allocation11 + $0x8] sm:$0xff] }
  0x34   : > { %7944 = vst [vmem:[#allocation38_spill] sm:$0xff] %v4935_v23  ;;  %v5030_v2 = vld [vmem:[#allocation11 + $0x10] sm:$0xff]  ;;  %v5032_v9 = vld [vmem:[#allocation11 + $0x18] sm:$0xff]  ;;  %v5034_v8 = vld [vmem:[#allocation11 + $0x20] sm:$0xff] }
  0x35   : > { %7945 = vst [vmem:[#allocation39_spill] sm:$0xff] %v4937_v24  ;;  %v5036_v7 = vld [vmem:[#allocation11 + $0x28] sm:$0xff]  ;;  %v5038_v6 = vld [vmem:[#allocation11 + $0x30] sm:$0xff]  ;;  %v5040_v13 = vld [vmem:[#allocation11 + $0x38] sm:$0xff] }
  0x36   : > { %7946 = vst [vmem:[#allocation40_spill] sm:$0xff] %v4939_v25  ;;  %v5042_v12 = vld [vmem:[#allocation11 + $0x40] sm:$0xff]  ;;  %v5044_v11 = vld [vmem:[#allocation11 + $0x48] sm:$0xff]  ;;  %v5048_v10 = vld [vmem:[#allocation11 + $0x58] sm:$0xff] }
  0x37   : > { %7947 = vst [vmem:[#allocation41_spill] sm:$0xff] %v4941_v26  ;;  %v5050_v17 = vld [vmem:[#allocation11 + $0x60] sm:$0xff]  ;;  %v5052_v16 = vld [vmem:[#allocation11 + $0x68] sm:$0xff]  ;;  %v5054_v15 = vld [vmem:[#allocation11 + $0x70] sm:$0xff] }
  0x38   : > { %7948 = vst [vmem:[#allocation42_spill] sm:$0xff] %v4943_v27  ;;  %v5056_v14 = vld [vmem:[#allocation11 + $0x78] sm:$0xff]  ;;  %v5058_v21 = vld [vmem:[#allocation11 + $0x80] sm:$0xff]  ;;  %v5060_v20 = vld [vmem:[#allocation11 + $0x88] sm:$0xff] }
  0x39   : > { %7949 = vst [vmem:[#allocation43_spill] sm:$0xff] %v4945_v28  ;;  %v5062_v19 = vld [vmem:[#allocation11 + $0x90] sm:$0xff]  ;;  %v5064_v18 = vld [vmem:[#allocation11 + $0x98] sm:$0xff]  ;;  %v5066_v25 = vld [vmem:[#allocation11 + $0xa0] sm:$0xff] }
  0x3a   : > { %7950 = vst [vmem:[#allocation44_spill] sm:$0xff] %v4947_v29  ;;  %v5068_v24 = vld [vmem:[#allocation11 + $0xa8] sm:$0xff]  ;;  %v5070_v23 = vld [vmem:[#allocation11 + $0xb0] sm:$0xff]  ;;  %v5072_v22 = vld [vmem:[#allocation11 + $0xb8] sm:$0xff] }
  0x3b   : > { %7951 = vst [vmem:[#allocation45_spill] sm:$0xff] %v4949_v30  ;;  %v5074_v29 = vld [vmem:[#allocation11 + $0xc0] sm:$0xff]  ;;  %v5076_v28 = vld [vmem:[#allocation11 + $0xc8] sm:$0xff]  ;;  %v5078_v27 = vld [vmem:[#allocation11 + $0xd0] sm:$0xff] }
  0x3c   : > { %7952 = vst [vmem:[#allocation46_spill] sm:$0xff] %v4951_v31  ;;  %v5080_v26 = vld [vmem:[#allocation11 + $0xd8] sm:$0xff]  ;;  %v5086_v31 = vld [vmem:[#allocation11 + $0xf0] sm:$0xff] }
  0x3d   : > { %7953 = vst [vmem:[#allocation47_spill] sm:$0xff] %v4953_v32  ;;  %v5084_v32 = vld [vmem:[#allocation11 + $0xe8] sm:$0xff]  ;;  %v5088_v30 = vld [vmem:[#allocation11 + $0xf8] sm:$0xff] }
  0x3e   : > { %7954 = vst [vmem:[#allocation48_spill] sm:$0xff] %v4955_v33  ;;  %v5082_v33 = vld [vmem:[#allocation11 + $0xe0] sm:$0xff] }
  0x3f   : > { %7955 = vst [vmem:[#allocation49_spill] sm:$0xff] %v4957_v34  ;;  %v5096_v34 = vld [vmem:[#allocation11 + $0x118] sm:$0xff] }
  0x40   : > { %7956 = vst [vmem:[#allocation50_spill] sm:$0xff] %v4959_v35  ;;  %v5094_v35 = vld [vmem:[#allocation11 + $0x110] sm:$0xff] }
  0x41   : > { %7957 = vst [vmem:[#allocation51_spill] sm:$0xff] %v4961_v36  ;;  %v5092_v36 = vld [vmem:[#allocation11 + $0x108] sm:$0xff] }
  0x42   : > { %7958 = vst [vmem:[#allocation52_spill] sm:$0xff] %v4963_v37  ;;  %v5090_v37 = vld [vmem:[#allocation11 + $0x100] sm:$0xff] }
  0x43   : > { %7959 = vst [vmem:[#allocation53_spill] sm:$0xff] %v4965_v38  ;;  %v5104_v38 = vld [vmem:[#allocation11 + $0x138] sm:$0xff] }
  0x44   : > { %7960 = vst [vmem:[#allocation54_spill] sm:$0xff] %v4967_v39  ;;  %v5102_v39 = vld [vmem:[#allocation11 + $0x130] sm:$0xff] }
  0x45   : > { %7961 = vst [vmem:[#allocation55_spill] sm:$0xff] %v4969_v40  ;;  %v5100_v40 = vld [vmem:[#allocation11 + $0x128] sm:$0xff] }
  0x46   : > { %7962 = vst [vmem:[#allocation56_spill] sm:$0xff] %v4971_v41  ;;  %v5098_v41 = vld [vmem:[#allocation11 + $0x120] sm:$0xff] }
  0x47   : > { %7963 = vst [vmem:[#allocation57_spill] sm:$0xff] %v4973_v42  ;;  %v5112_v42 = vld [vmem:[#allocation11 + $0x158] sm:$0xff] }
  0x48   : > { %7964 = vst [vmem:[#allocation58_spill] sm:$0xff] %v4975_v43  ;;  %v5110_v43 = vld [vmem:[#allocation11 + $0x150] sm:$0xff] }
  0x49   : > { %7965 = vst [vmem:[#allocation59_spill] sm:$0xff] %v4977_v44  ;;  %v5108_v44 = vld [vmem:[#allocation11 + $0x148] sm:$0xff] }
  0x4a   : > { %7966 = vst [vmem:[#allocation60_spill] sm:$0xff] %v4979_v45  ;;  %v5106_v45 = vld [vmem:[#allocation11 + $0x140] sm:$0xff] }
  0x4b   : > { %7967 = vst [vmem:[#allocation61_spill] sm:$0xff] %v4981_v46  ;;  %v5120_v46 = vld [vmem:[#allocation11 + $0x178] sm:$0xff] }
  0x4c   : > { %7968 = vst [vmem:[#allocation62_spill] sm:$0xff] %v4983_v47  ;;  %v5118_v47 = vld [vmem:[#allocation11 + $0x170] sm:$0xff] }
  0x4d   : > { %7969 = vst [vmem:[#allocation63_spill] sm:$0xff] %v4985_v48  ;;  %v5116_v48 = vld [vmem:[#allocation11 + $0x168] sm:$0xff] }
  0x4e   : > { %7970 = vst [vmem:[#allocation64_spill] sm:$0xff] %v4987_v49  ;;  %v5114_v49 = vld [vmem:[#allocation11 + $0x160] sm:$0xff] }
  0x4f   : > { %7971 = vst [vmem:[#allocation65_spill] sm:$0xff] %v4989_v50  ;;  %v5128_v50 = vld [vmem:[#allocation11 + $0x198] sm:$0xff] }
  0x50   : > { %7972 = vst [vmem:[#allocation66_spill] sm:$0xff] %v4991_v51  ;;  %v5126_v51 = vld [vmem:[#allocation11 + $0x190] sm:$0xff] }
  0x51   : > { %7973 = vst [vmem:[#allocation67_spill] sm:$0xff] %v4993_v52  ;;  %v5124_v52 = vld [vmem:[#allocation11 + $0x188] sm:$0xff] }
  0x52   : > { %7974 = vst [vmem:[#allocation68_spill] sm:$0xff] %v4995_v53  ;;  %v5122_v53 = vld [vmem:[#allocation11 + $0x180] sm:$0xff] }
  0x53   : > { %7975 = vst [vmem:[#allocation69_spill] sm:$0xff] %v4997_v54  ;;  %v5136_v54 = vld [vmem:[#allocation11 + $0x1b8] sm:$0xff] }
  0x54   : > { %7976 = vst [vmem:[#allocation70_spill] sm:$0xff] %v4999_v55  ;;  %v5134_v55 = vld [vmem:[#allocation11 + $0x1b0] sm:$0xff] }
  0x55   : > { %7977 = vst [vmem:[#allocation71_spill] sm:$0xff] %v5001_v56  ;;  %v5132_v56 = vld [vmem:[#allocation11 + $0x1a8] sm:$0xff] }
  0x56   : > { %7978 = vst [vmem:[#allocation72_spill] sm:$0xff] %v5003_v57  ;;  %v5130_v57 = vld [vmem:[#allocation11 + $0x1a0] sm:$0xff] }
  0x57   : > { %7979 = vst [vmem:[#allocation73_spill] sm:$0xff] %v5005_v58  ;;  %v5144_v58 = vld [vmem:[#allocation11 + $0x1d8] sm:$0xff] }
  0x58   : > { %7980 = vst [vmem:[#allocation74_spill] sm:$0xff] %v5007_v59  ;;  %v5142_v59 = vld [vmem:[#allocation11 + $0x1d0] sm:$0xff] }
  0x59   : > { %7981 = vst [vmem:[#allocation75_spill] sm:$0xff] %v5009_v60  ;;  %v5140_v60 = vld [vmem:[#allocation11 + $0x1c8] sm:$0xff] }
  0x5a   : > { %7982 = vst [vmem:[#allocation76_spill] sm:$0xff] %v5011_v61  ;;  %v5138_v61 = vld [vmem:[#allocation11 + $0x1c0] sm:$0xff] }
  0x5b   : > { %7983 = vst [vmem:[#allocation77_spill] sm:$0xff] %v5013_v62  ;;  %v5152_v62 = vld [vmem:[#allocation11 + $0x1f8] sm:$0xff] }
  0x5c   : > { %7984 = vst [vmem:[#allocation78_spill] sm:$0xff] %v5015_v63  ;;  %v5150_v63 = vld [vmem:[#allocation11 + $0x1f0] sm:$0xff] }
  0x5d   : > { %7985 = vst [vmem:[#allocation79_spill] sm:$0xff] %v5017_v0  ;;  %v5148_v0 = vld [vmem:[#allocation11 + $0x1e8] sm:$0xff] }
  0x5e   : > { %7986 = vst [vmem:[#allocation80_spill] sm:$0xff] %v5019_v1  ;;  %v5146_v1 = vld [vmem:[#allocation11 + $0x1e0] sm:$0xff] }
  0x5f   : > { %7987 = vst [vmem:[#allocation81_spill] sm:$0xff] %v5024_v5  ;;  %v5046_v5 = vld [vmem:[#allocation11 + $0x50] sm:$0xff] }
  0x60   : > { %7988 = vst [vmem:[#allocation82_spill] sm:$0xff] %v5026_v4  ;;  %v5167_v4 = vld [vmem:[#allocation13 + $0x30] sm:$0xff] }
  0x61   : > { %7989 = vst [vmem:[#allocation83_spill] sm:$0xff] %v5028_v3  ;;  %v5165_v3 = vld [vmem:[#allocation13 + $0x28] sm:$0xff] }
  0x62   : > { %7990 = vst [vmem:[#allocation84_spill] sm:$0xff] %v5030_v2  ;;  %v5154_v2 = vld [vmem:[#allocation13] sm:$0xff] }
  0x63   : > { %7991 = vst [vmem:[#allocation85_spill] sm:$0xff] %v5032_v9  ;;  %v5162_v9 = vld [vmem:[#allocation13 + $0x20] sm:$0xff] }
  0x64   : > { %7992 = vst [vmem:[#allocation86_spill] sm:$0xff] %v5034_v8  ;;  %v5175_v8 = vld [vmem:[#allocation13 + $0x50] sm:$0xff] }
  0x65   : > { %7993 = vst [vmem:[#allocation87_spill] sm:$0xff] %v5036_v7  ;;  %v5173_v7 = vld [vmem:[#allocation13 + $0x48] sm:$0xff] }
  0x66   : > { %7994 = vst [vmem:[#allocation88_spill] sm:$0xff] %v5038_v6  ;;  %v5156_v6 = vld [vmem:[#allocation13 + $0x8] sm:$0xff] }
  0x67   : > { %7995 = vst [vmem:[#allocation89_spill] sm:$0xff] %v5040_v13  ;;  %v5171_v13 = vld [vmem:[#allocation13 + $0x40] sm:$0xff] }
  0x68   : > { %7996 = vst [vmem:[#allocation90_spill] sm:$0xff] %v5042_v12  ;;  %v5183_v12 = vld [vmem:[#allocation13 + $0x70] sm:$0xff] }
  0x69   : > { %7997 = vst [vmem:[#allocation91_spill] sm:$0xff] %v5044_v11  ;;  %v5181_v11 = vld [vmem:[#allocation13 + $0x68] sm:$0xff] }
  0x6a   : > { %7998 = vst [vmem:[#allocation92_spill] sm:$0xff] %v5046_v5  ;;  %v5158_v5 = vld [vmem:[#allocation13 + $0x10] sm:$0xff] }
  0x6b   : > { %7999 = vst [vmem:[#allocation93_spill] sm:$0xff] %v5048_v10  ;;  %v5179_v10 = vld [vmem:[#allocation13 + $0x60] sm:$0xff] }
  0x6c   : > { %8000 = vst [vmem:[#allocation94_spill] sm:$0xff] %v5050_v17  ;;  %v5194_v17 = vld [vmem:[#allocation13 + $0x90] sm:$0xff] }
  0x6d   : > { %8001 = vst [vmem:[#allocation95_spill] sm:$0xff] %v5052_v16  ;;  %v5192_v16 = vld [vmem:[#allocation13 + $0x88] sm:$0xff] }
  0x6e   : > { %8002 = vst [vmem:[#allocation96_spill] sm:$0xff] %v5054_v15  ;;  %v5160_v15 = vld [vmem:[#allocation13 + $0x18] sm:$0xff] }
  0x6f   : > { %8003 = vst [vmem:[#allocation97_spill] sm:$0xff] %v5056_v14  ;;  %v5187_v14 = vld [vmem:[#allocation13 + $0x80] sm:$0xff] }
  0x70   : > { %8004 = vst [vmem:[#allocation98_spill] sm:$0xff] %v5058_v21  ;;  %v5202_v21 = vld [vmem:[#allocation13 + $0xb0] sm:$0xff] }
  0x71   : > { %8005 = vst [vmem:[#allocation99_spill] sm:$0xff] %v5060_v20  ;;  %v5200_v20 = vld [vmem:[#allocation13 + $0xa8] sm:$0xff] }
  0x72   : > { %8006 = vst [vmem:[#allocation100_spill] sm:$0xff] %v5062_v19  ;;  %v5169_v19 = vld [vmem:[#allocation13 + $0x38] sm:$0xff] }
  0x73   : > { %8007 = vst [vmem:[#allocation101_spill] sm:$0xff] %v5064_v18  ;;  %v5198_v18 = vld [vmem:[#allocation13 + $0xa0] sm:$0xff] }
  0x74   : > { %8008 = vst [vmem:[#allocation102_spill] sm:$0xff] %v5066_v25  ;;  %v5208_v25 = vld [vmem:[#allocation13 + $0xc8] sm:$0xff] }
  0x75   : > { %8009 = vst [vmem:[#allocation103_spill] sm:$0xff] %v5068_v24  ;;  %v5206_v24 = vld [vmem:[#allocation13 + $0xc0] sm:$0xff] }
  0x76   : > { %8010 = vst [vmem:[#allocation104_spill] sm:$0xff] %v5070_v23  ;;  %v5177_v23 = vld [vmem:[#allocation13 + $0x58] sm:$0xff] }
  0x77   : > { %8011 = vst [vmem:[#allocation105_spill] sm:$0xff] %v5072_v22  ;;  %v5204_v22 = vld [vmem:[#allocation13 + $0xb8] sm:$0xff] }
  0x78   : > { %8012 = vst [vmem:[#allocation106_spill] sm:$0xff] %v5074_v29  ;;  %v5217_v29 = vld [vmem:[#allocation13 + $0xe8] sm:$0xff] }
  0x79   : > { %8013 = vst [vmem:[#allocation107_spill] sm:$0xff] %v5076_v28  ;;  %v5212_v28 = vld [vmem:[#allocation13 + $0xd8] sm:$0xff] }
  0x7a   : > { %8014 = vst [vmem:[#allocation108_spill] sm:$0xff] %v5078_v27  ;;  %v5185_v27 = vld [vmem:[#allocation13 + $0x78] sm:$0xff] }
  0x7b   : > { %8015 = vst [vmem:[#allocation109_spill] sm:$0xff] %v5080_v26  ;;  %v5210_v26 = vld [vmem:[#allocation13 + $0xd0] sm:$0xff] }
  0x7c   : > { %8016 = vst [vmem:[#allocation110_spill] sm:$0xff] %v5082_v33  ;;  %v5225_v33 = vld [vmem:[#allocation13 + $0x108] sm:$0xff] }
  0x7d   : > { %8017 = vst [vmem:[#allocation111_spill] sm:$0xff] %v5084_v32  ;;  %v5221_v32 = vld [vmem:[#allocation13 + $0xf8] sm:$0xff] }
  0x7e   : > { %8018 = vst [vmem:[#allocation112_spill] sm:$0xff] %v5086_v31  ;;  %v5196_v31 = vld [vmem:[#allocation13 + $0x98] sm:$0xff] }
  0x7f   : > { %8019 = vst [vmem:[#allocation113_spill] sm:$0xff] %v5088_v30  ;;  %v5219_v30 = vld [vmem:[#allocation13 + $0xf0] sm:$0xff] }
  0x80   : > { %8020 = vst [vmem:[#allocation114_spill] sm:$0xff] %v5090_v37  ;;  %v5233_v37 = vld [vmem:[#allocation13 + $0x128] sm:$0xff] }
  0x81   : > { %8021 = vst [vmem:[#allocation115_spill] sm:$0xff] %v5092_v36  ;;  %v5229_v36 = vld [vmem:[#allocation13 + $0x118] sm:$0xff] }
  0x82   : > { %8022 = vst [vmem:[#allocation116_spill] sm:$0xff] %v5094_v35  ;;  %v5214_v35 = vld [vmem:[#allocation13 + $0xe0] sm:$0xff] }
  0x83   : > { %8023 = vst [vmem:[#allocation117_spill] sm:$0xff] %v5096_v34  ;;  %v5227_v34 = vld [vmem:[#allocation13 + $0x110] sm:$0xff] }
  0x84   : > { %8024 = vst [vmem:[#allocation118_spill] sm:$0xff] %v5098_v41  ;;  %v5242_v41 = vld [vmem:[#allocation13 + $0x148] sm:$0xff] }
  0x85   : > { %8025 = vst [vmem:[#allocation119_spill] sm:$0xff] %v5100_v40  ;;  %v5238_v40 = vld [vmem:[#allocation13 + $0x138] sm:$0xff] }
  0x86   : > { %8026 = vst [vmem:[#allocation120_spill] sm:$0xff] %v5102_v39  ;;  %v5223_v39 = vld [vmem:[#allocation13 + $0x100] sm:$0xff] }
  0x87   : > { %8027 = vst [vmem:[#allocation121_spill] sm:$0xff] %v5104_v38  ;;  %v5236_v38 = vld [vmem:[#allocation13 + $0x130] sm:$0xff] }
  0x88   : > { %8028 = vst [vmem:[#allocation122_spill] sm:$0xff] %v5106_v45  ;;  %v5250_v45 = vld [vmem:[#allocation13 + $0x168] sm:$0xff] }
  0x89   : > { %8029 = vst [vmem:[#allocation123_spill] sm:$0xff] %v5108_v44  ;;  %v5246_v44 = vld [vmem:[#allocation13 + $0x158] sm:$0xff] }
  0x8a   : > { %8030 = vst [vmem:[#allocation124_spill] sm:$0xff] %v5110_v43  ;;  %v5231_v43 = vld [vmem:[#allocation13 + $0x120] sm:$0xff] }
  0x8b   : > { %8031 = vst [vmem:[#allocation125_spill] sm:$0xff] %v5112_v42  ;;  %v5244_v42 = vld [vmem:[#allocation13 + $0x150] sm:$0xff] }
  0x8c   : > { %8032 = vst [vmem:[#allocation126_spill] sm:$0xff] %v5114_v49  ;;  %v5259_v49 = vld [vmem:[#allocation13 + $0x188] sm:$0xff] }
  0x8d   : > { %8033 = vst [vmem:[#allocation127_spill] sm:$0xff] %v5116_v48  ;;  %v5255_v48 = vld [vmem:[#allocation13 + $0x178] sm:$0xff] }
  0x8e   : > { %8034 = vst [vmem:[#allocation128_spill] sm:$0xff] %v5118_v47  ;;  %v5240_v47 = vld [vmem:[#allocation13 + $0x140] sm:$0xff] }
  0x8f   : > { %8035 = vst [vmem:[#allocation129_spill] sm:$0xff] %v5120_v46  ;;  %v5252_v46 = vld [vmem:[#allocation13 + $0x170] sm:$0xff] }
  0x90   : > { %8036 = vst [vmem:[#allocation130_spill] sm:$0xff] %v5122_v53  ;;  %v5267_v53 = vld [vmem:[#allocation13 + $0x1a8] sm:$0xff] }
  0x91   : > { %8037 = vst [vmem:[#allocation131_spill] sm:$0xff] %v5124_v52  ;;  %v5263_v52 = vld [vmem:[#allocation13 + $0x198] sm:$0xff] }
  0x92   : > { %8038 = vst [vmem:[#allocation132_spill] sm:$0xff] %v5126_v51  ;;  %v5248_v51 = vld [vmem:[#allocation13 + $0x160] sm:$0xff] }
  0x93   : > { %8039 = vst [vmem:[#allocation133_spill] sm:$0xff] %v5128_v50  ;;  %v5261_v50 = vld [vmem:[#allocation13 + $0x190] sm:$0xff] }
  0x94   : > { %8040 = vst [vmem:[#allocation134_spill] sm:$0xff] %v5130_v57  ;;  %v5281_v57 = vld [vmem:[#allocation13 + $0x1c8] sm:$0xff] }
  0x95   : > { %8041 = vst [vmem:[#allocation135_spill] sm:$0xff] %v5132_v56  ;;  %v5271_v56 = vld [vmem:[#allocation13 + $0x1b8] sm:$0xff] }
  0x96   : > { %8042 = vst [vmem:[#allocation136_spill] sm:$0xff] %v5134_v55  ;;  %v5257_v55 = vld [vmem:[#allocation13 + $0x180] sm:$0xff] }
  0x97   : > { %8043 = vst [vmem:[#allocation137_spill] sm:$0xff] %v5136_v54  ;;  %v5269_v54 = vld [vmem:[#allocation13 + $0x1b0] sm:$0xff] }
  0x98   : > { %8044 = vst [vmem:[#allocation138_spill] sm:$0xff] %v5138_v61  ;;  %v5289_v61 = vld [vmem:[#allocation13 + $0x1e8] sm:$0xff] }
  0x99   : > { %8045 = vst [vmem:[#allocation139_spill] sm:$0xff] %v5140_v60  ;;  %v5285_v60 = vld [vmem:[#allocation13 + $0x1d8] sm:$0xff] }
  0x9a   : > { %8046 = vst [vmem:[#allocation140_spill] sm:$0xff] %v5142_v59  ;;  %v5265_v59 = vld [vmem:[#allocation13 + $0x1a0] sm:$0xff] }
  0x9b   : > { %8047 = vst [vmem:[#allocation141_spill] sm:$0xff] %v5144_v58  ;;  %v5283_v58 = vld [vmem:[#allocation13 + $0x1d0] sm:$0xff] }
  0x9c   : > { %8048 = vst [vmem:[#allocation142_spill] sm:$0xff] %v5146_v1  ;;  %v5298_v1 = vld [vmem:[%s7588_s6] sm:$0xf] }
  0x9d   : > { %8049 = vst [vmem:[#allocation143_spill] sm:$0xff] %v5148_v0  ;;  %v5293_v0 = vld [vmem:[#allocation13 + $0x1f8] sm:$0xff] }
  0x9e   : > { %8050 = vst [vmem:[#allocation144_spill] sm:$0xff] %v5150_v63  ;;  %v5279_v63 = vld [vmem:[#allocation13 + $0x1c0] sm:$0xff] }
  0x9f   : > { %8051 = vst [vmem:[#allocation145_spill] sm:$0xff] %v5152_v62  ;;  %v5291_v62 = vld [vmem:[#allocation13 + $0x1f0] sm:$0xff] }
  0xa0   : > { %8052 = vst [vmem:[#allocation146_spill] sm:$0xff] %v5154_v2 }
  0xa1   : > { %8053 = vst [vmem:[#allocation147_spill] sm:$0xff] %v5156_v6  ;;  %v5302_v6 = vld [vmem:[%s418_s24] sm:$0xff] }
  0xa2   : > { %8054 = vst [vmem:[#allocation148_spill] sm:$0xff] %v5158_v5  ;;  %v5287_v5 = vld [vmem:[#allocation13 + $0x1e0] sm:$0xff] }
  0xa3   : > { %8055 = vst [vmem:[#allocation149_spill] sm:$0xff] %v5160_v15  ;;  %v5300_v15 = vld [vmem:[%s414_s22] sm:$0xff] }
  0xa4   : > { %8056 = vst [vmem:[#allocation150_spill] sm:$0xff] %v5162_v9 }
  0xa5   : > { %8057 = vst [vmem:[#allocation151_spill] sm:$0xff] %v5165_v3 }
  0xa6   : > { %8058 = vst [vmem:[#allocation152_spill] sm:$0xff] %v5167_v4 }
  0xa7   : > { %8059 = vst [vmem:[#allocation153_spill] sm:$0xff] %v5169_v19 }
  0xa8   : > { %8060 = vst [vmem:[#allocation154_spill] sm:$0xff] %v5171_v13 }
  0xa9   : > { %8061 = vst [vmem:[#allocation155_spill] sm:$0xff] %v5173_v7 }
  0xaa   : > { %8062 = vst [vmem:[#allocation156_spill] sm:$0xff] %v5175_v8 }
  0xab   : > { %8063 = vst [vmem:[#allocation157_spill] sm:$0xff] %v5177_v23 }
  0xac   : > { %8064 = vst [vmem:[#allocation158_spill] sm:$0xff] %v5179_v10 }
  0xad   : > { %8065 = vst [vmem:[#allocation159_spill] sm:$0xff] %v5181_v11 }
  0xae   : > { %8066 = vst [vmem:[#allocation160_spill] sm:$0xff] %v5183_v12 }
  0xaf   : > { %8067 = vst [vmem:[#allocation161_spill] sm:$0xff] %v5185_v27 }
  0xb0   : > { %8068 = vst [vmem:[#allocation162_spill] sm:$0xff] %v5187_v14 }
  0xb1   : > { %8069 = vst [vmem:[#allocation163_spill] sm:$0xff] %v5192_v16 }
  0xb2   : > { %8070 = vst [vmem:[#allocation164_spill] sm:$0xff] %v5194_v17 }
  0xb3   : > { %8071 = vst [vmem:[#allocation165_spill] sm:$0xff] %v5196_v31 }
  0xb4   : > { %8072 = vst [vmem:[#allocation166_spill] sm:$0xff] %v5198_v18 }
  0xb5   : > { %8073 = vst [vmem:[#allocation167_spill] sm:$0xff] %v5200_v20 }
  0xb6   : > { %8074 = vst [vmem:[#allocation168_spill] sm:$0xff] %v5202_v21 }
  0xb7   : > { %8075 = vst [vmem:[#allocation169_spill] sm:$0xff] %v5204_v22 }
  0xb8   : > { %8076 = vst [vmem:[#allocation170_spill] sm:$0xff] %v5206_v24 }
  0xb9   : > { %8077 = vst [vmem:[#allocation171_spill] sm:$0xff] %v5208_v25 }
  0xba   : > { %8078 = vst [vmem:[#allocation172_spill] sm:$0xff] %v5210_v26 }
  0xbb   : > { %8079 = vst [vmem:[#allocation173_spill] sm:$0xff] %v5212_v28 }
  0xbc   : > { %8080 = vst [vmem:[#allocation174_spill] sm:$0xff] %v5214_v35 }
  0xbd   : > { %8081 = vst [vmem:[#allocation175_spill] sm:$0xff] %v5217_v29 }
  0xbe   : > { %8082 = vst [vmem:[#allocation176_spill] sm:$0xff] %v5219_v30 }
  0xbf   : > { %8083 = vst [vmem:[#allocation177_spill] sm:$0xff] %v5221_v32 }
  0xc0   : > { %8084 = vst [vmem:[#allocation178_spill] sm:$0xff] %v5223_v39 }
  0xc1   : > { %8085 = vst [vmem:[#allocation179_spill] sm:$0xff] %v5225_v33 }
  0xc2   : > { %8086 = vst [vmem:[#allocation180_spill] sm:$0xff] %v5227_v34 }
  0xc3   : > { %8087 = vst [vmem:[#allocation181_spill] sm:$0xff] %v5229_v36 }
  0xc4   : > { %8088 = vst [vmem:[#allocation182_spill] sm:$0xff] %v5231_v43 }
  0xc5   : > { %8089 = vst [vmem:[#allocation183_spill] sm:$0xff] %v5233_v37 }
  0xc6   : > { %8090 = vst [vmem:[#allocation184_spill] sm:$0xff] %v5236_v38 }
  0xc7   : > { %8091 = vst [vmem:[#allocation185_spill] sm:$0xff] %v5238_v40 }
  0xc8   : > { %8092 = vst [vmem:[#allocation186_spill] sm:$0xff] %v5240_v47 }
  0xc9   : > { %8093 = vst [vmem:[#allocation187_spill] sm:$0xff] %v5242_v41 }
  0xca   : > { %8094 = vst [vmem:[#allocation188_spill] sm:$0xff] %v5244_v42 }
  0xcb   : > { %8095 = vst [vmem:[#allocation189_spill] sm:$0xff] %v5246_v44 }
  0xcc   : > { %8096 = vst [vmem:[#allocation190_spill] sm:$0xff] %v5248_v51 }
  0xcd   : > { %8097 = vst [vmem:[#allocation191_spill] sm:$0xff] %v5250_v45 }
  0xce   : > { %8098 = vst [vmem:[#allocation192_spill] sm:$0xff] %v5252_v46 }
  0xcf   : > { %8099 = vst [vmem:[#allocation193_spill] sm:$0xff] %v5255_v48 }
  0xd0   : > { %8100 = vst [vmem:[#allocation194_spill] sm:$0xff] %v5257_v55 }
  0xd1   : > { %8101 = vst [vmem:[#allocation195_spill] sm:$0xff] %v5259_v49 }
  0xd2   : > { %8102 = vst [vmem:[#allocation196_spill] sm:$0xff] %v5261_v50 }
  0xd3   : > { %8103 = vst [vmem:[#allocation197_spill] sm:$0xff] %v5263_v52 }
  0xd4   : > { %8104 = vst [vmem:[#allocation198_spill] sm:$0xff] %v5265_v59 }
  0xd5   : > { %8105 = vst [vmem:[#allocation199_spill] sm:$0xff] %v5267_v53 }
  0xd6   : > { %8106 = vst [vmem:[#allocation200_spill] sm:$0xff] %v5269_v54 }
  0xd7   : > { %8107 = vst [vmem:[#allocation201_spill] sm:$0xff] %v5271_v56 }
  0xd8   : > { %8108 = vst [vmem:[#allocation202_spill] sm:$0xff] %v5279_v63 }
  0xd9   : > { %8109 = vst [vmem:[#allocation203_spill] sm:$0xff] %v5281_v57 }
  0xda   : > { %8110 = vst [vmem:[#allocation204_spill] sm:$0xff] %v5283_v58 }
  0xdb   : > { %8111 = vst [vmem:[#allocation205_spill] sm:$0xff] %v5285_v60 }
  0xdc   : > { %8112 = vst [vmem:[#allocation206_spill] sm:$0xff] %v5287_v5 }
  0xdd   : > { %8113 = vst [vmem:[#allocation207_spill] sm:$0xff] %v5289_v61 }
  0xde   : > { %8114 = vst [vmem:[#allocation208_spill] sm:$0xff] %v5291_v62  ;;  %623 = sbr.rel (%p4176_p10) target bundleno = 234 (0xea), region = 72 }
  0xdf   : > { %8115 = vst [vmem:[#allocation209_spill] sm:$0xff] %v5293_v0 }
  0xe0   : > { %8116 = vst [vmem:[#allocation210_spill] sm:$0xff] %v5298_v1 }
  0xe1   : > { %8117 = vst [vmem:[#allocation211_spill] sm:$0xff] %v5300_v15 }
  0xe2   : > { %8118 = vst [vmem:[#allocation212_spill] sm:$0xff] %v5302_v6 }
  0xe3   : > { %v4740_v2 = vmov 0.0  }
  0xe4   : > { %624 = vst [vmem:[#allocation2] sm:$0xff] %v4740_v2 }
  0xe5   : > { %625 = vst [vmem:[#allocation3] sm:$0xff] %v4740_v2 }
  0xe6   : > { %626 = vst [vmem:[#allocation4] sm:$0xff] %v4740_v2 }
  0xe7   : > { %627 = vst [vmem:[#allocation5] sm:$0xff] %v4740_v2 }
  0xe8   : > { %628 = vst [vmem:[#allocation6] sm:$0xff] %v4740_v2 }
  0xe9   : > { %629 = vst [vmem:[#allocation7] sm:$0x1] %v4740_v2 }
  0xea PF: > { %p4177_p11 = scmp.le.s32.totalorder %s4717_s11, 0 }
  0xec   : > { %633 = sbr.rel (%p4177_p11) target bundleno = 482 (0x1e2), region = 76 }
  0xf1   : > { %637 = vmatpush.msra.mxu0 %v5287_v5  ;;  %657 = vmatpush.msra.mxu1 %v5289_v61  ;;  %v8119_v2 = vld [vmem:[#allocation146_spill] sm:$0xff] }
  0xf2   : > { %697 = vmatpush.msra.mxu3 %v5293_v0  ;;  %677 = vmatpush.msra.mxu2 %v5291_v62 }
  0xf3   : > { %638 = vmatpush.msra.mxu0 %v5279_v63  ;;  %658 = vmatpush.msra.mxu1 %v5281_v57 }
  0xf4   : > { %698 = vmatpush.msra.mxu3 %v5285_v60  ;;  %678 = vmatpush.msra.mxu2 %v5283_v58 }
  0xf5   : > { %639 = vmatpush.msra.mxu0 %v5265_v59  ;;  %659 = vmatpush.msra.mxu1 %v5267_v53 }
  0xf6   : > { %699 = vmatpush.msra.mxu3 %v5271_v56  ;;  %679 = vmatpush.msra.mxu2 %v5269_v54 }
  0xf7   : > { %640 = vmatpush.msra.mxu0 %v5257_v55  ;;  %660 = vmatpush.msra.mxu1 %v5259_v49 }
  0xf8   : > { %700 = vmatpush.msra.mxu3 %v5263_v52  ;;  %680 = vmatpush.msra.mxu2 %v5261_v50 }
  0xf9   : > { %641 = vmatpush.msra.mxu0 %v5248_v51  ;;  %661 = vmatpush.msra.mxu1 %v5250_v45 }
  0xfa   : > { %701 = vmatpush.msra.mxu3 %v5255_v48  ;;  %681 = vmatpush.msra.mxu2 %v5252_v46 }
  0xfb   : > { %642 = vmatpush.msra.mxu0 %v5240_v47  ;;  %662 = vmatpush.msra.mxu1 %v5242_v41 }
  0xfc   : > { %702 = vmatpush.msra.mxu3 %v5246_v44  ;;  %682 = vmatpush.msra.mxu2 %v5244_v42 }
  0xfd   : > { %643 = vmatpush.msra.mxu0 %v5231_v43  ;;  %663 = vmatpush.msra.mxu1 %v5233_v37 }
  0xfe   : > { %703 = vmatpush.msra.mxu3 %v5238_v40  ;;  %683 = vmatpush.msra.mxu2 %v5236_v38 }
  0xff   : > { %644 = vmatpush.msra.mxu0 %v5223_v39  ;;  %664 = vmatpush.msra.mxu1 %v5225_v33 }
 0x100   : > { %704 = vmatpush.msra.mxu3 %v5229_v36  ;;  %684 = vmatpush.msra.mxu2 %v5227_v34 }
 0x101   : > { %645 = vmatpush.msra.mxu0 %v5214_v35  ;;  %665 = vmatpush.msra.mxu1 %v5217_v29 }
 0x102   : > { %705 = vmatpush.msra.mxu3 %v5221_v32  ;;  %685 = vmatpush.msra.mxu2 %v5219_v30 }
 0x103   : > { %646 = vmatpush.msra.mxu0 %v5206_v24  ;;  %666 = vmatpush.msra.mxu1 %v5208_v25 }
 0x104   : > { %706 = vmatpush.msra.mxu3 %v5212_v28  ;;  %686 = vmatpush.msra.mxu2 %v5210_v26 }
 0x105   : > { %647 = vmatpush.msra.mxu0 %v5198_v18  ;;  %667 = vmatpush.msra.mxu1 %v5200_v20 }
 0x106   : > { %707 = vmatpush.msra.mxu3 %v5204_v22  ;;  %687 = vmatpush.msra.mxu2 %v5202_v21 }
 0x107   : > { %648 = vmatpush.msra.mxu0 %v5187_v14  ;;  %668 = vmatpush.msra.mxu1 %v5192_v16 }
 0x108   : > { %708 = vmatpush.msra.mxu3 %v5196_v31  ;;  %688 = vmatpush.msra.mxu2 %v5194_v17 }
 0x109   : > { %649 = vmatpush.msra.mxu0 %v5179_v10  ;;  %669 = vmatpush.msra.mxu1 %v5181_v11  ;;  %v8177_v11 = vld [vmem:[#allocation87_spill] sm:$0xff] }
 0x10a   : > { %709 = vmatpush.msra.mxu3 %v5185_v27  ;;  %689 = vmatpush.msra.mxu2 %v5183_v12  ;;  %v8120_v27 = vld [vmem:[#allocation147_spill] sm:$0xff]  ;;  %v8121_v12 = vld [vmem:[#allocation149_spill] sm:$0xff] }
 0x10b   : > { %650 = vmatpush.msra.mxu0 %v5171_v13  ;;  %670 = vmatpush.msra.mxu1 %v5173_v7  ;;  %v8122_v13 = vld [vmem:[#allocation142_spill] sm:$0xff]  ;;  %v8123_v7 = vld [vmem:[#allocation143_spill] sm:$0xff] }
 0x10c   : > { %710 = vmatpush.msra.mxu3 %v5177_v23  ;;  %690 = vmatpush.msra.mxu2 %v5175_v8  ;;  %v8124_v23 = vld [vmem:[#allocation145_spill] sm:$0xff]  ;;  %v8125_v8 = vld [vmem:[#allocation138_spill] sm:$0xff] }
 0x10d   : > { %651 = vmatpush.msra.mxu0 %v5162_v9  ;;  %671 = vmatpush.msra.mxu1 %v5165_v3  ;;  %v8126_v9 = vld [vmem:[#allocation148_spill] sm:$0xff]  ;;  %v8127_v3 = vld [vmem:[#allocation139_spill] sm:$0xff] }
 0x10e   : > { %711 = vmatpush.msra.mxu3 %v5169_v19  ;;  %691 = vmatpush.msra.mxu2 %v5167_v4  ;;  %v8128_v19 = vld [vmem:[#allocation141_spill] sm:$0xff]  ;;  %v8129_v4 = vld [vmem:[#allocation134_spill] sm:$0xff] }
 0x10f   : > { %652 = vmatpush.msra.mxu0 %v8119_v2  ;;  %672 = vmatpush.msra.mxu1 %v8120_v27  ;;  %v8130_v2 = vld [vmem:[#allocation144_spill] sm:$0xff]  ;;  %v8131_v27 = vld [vmem:[#allocation135_spill] sm:$0xff] }
 0x110   : > { %712 = vmatpush.msra.mxu3 %v8121_v12  ;;  %692 = vmatpush.msra.mxu2 %v8126_v9  ;;  %v8132_v12 = vld [vmem:[#allocation137_spill] sm:$0xff]  ;;  %v8137_v9 = vld [vmem:[#allocation126_spill] sm:$0xff] }
 0x111   : > { %717 = vmatpush.msrb.mxu0 %v8122_v13  ;;  %737 = vmatpush.msrb.mxu1 %v8123_v7  ;;  %v8133_v13 = vld [vmem:[#allocation130_spill] sm:$0xff]  ;;  %v8134_v7 = vld [vmem:[#allocation140_spill] sm:$0xff] }
 0x112   : > { %777 = vmatpush.msrb.mxu3 %v8124_v23  ;;  %757 = vmatpush.msrb.mxu2 %v8130_v2  ;;  %v8135_v23 = vld [vmem:[#allocation131_spill] sm:$0xff]  ;;  %v8141_v2 = vld [vmem:[#allocation122_spill] sm:$0xff] }
 0x113   : > { %718 = vmatpush.msrb.mxu0 %v8125_v8  ;;  %738 = vmatpush.msrb.mxu1 %v8127_v3  ;;  %v8136_v8 = vld [vmem:[#allocation133_spill] sm:$0xff]  ;;  %v8138_v3 = vld [vmem:[#allocation136_spill] sm:$0xff] }
 0x114   : > { %778 = vmatpush.msrb.mxu3 %v8128_v19  ;;  %758 = vmatpush.msrb.mxu2 %v8134_v7  ;;  %v8139_v19 = vld [vmem:[#allocation127_spill] sm:$0xff]  ;;  %v8145_v7 = vld [vmem:[#allocation118_spill] sm:$0xff] }
 0x115   : > { %719 = vmatpush.msrb.mxu0 %v8129_v4  ;;  %739 = vmatpush.msrb.mxu1 %v8131_v27  ;;  %v8140_v4 = vld [vmem:[#allocation129_spill] sm:$0xff]  ;;  %v8142_v27 = vld [vmem:[#allocation132_spill] sm:$0xff] }
 0x116   : > { %779 = vmatpush.msrb.mxu3 %v8132_v12  ;;  %759 = vmatpush.msrb.mxu2 %v8138_v3  ;;  %v8143_v12 = vld [vmem:[#allocation123_spill] sm:$0xff]  ;;  %v8149_v3 = vld [vmem:[#allocation114_spill] sm:$0xff] }
 0x117   : > { %720 = vmatpush.msrb.mxu0 %v8133_v13  ;;  %740 = vmatpush.msrb.mxu1 %v8135_v23  ;;  %v8144_v13 = vld [vmem:[#allocation125_spill] sm:$0xff]  ;;  %v8146_v23 = vld [vmem:[#allocation128_spill] sm:$0xff] }
 0x118   : > { %780 = vmatpush.msrb.mxu3 %v8136_v8  ;;  %760 = vmatpush.msrb.mxu2 %v8142_v27  ;;  %v8147_v8 = vld [vmem:[#allocation119_spill] sm:$0xff]  ;;  %v8153_v27 = vld [vmem:[#allocation110_spill] sm:$0xff] }
 0x119   : > { %721 = vmatpush.msrb.mxu0 %v8137_v9  ;;  %741 = vmatpush.msrb.mxu1 %v8139_v19  ;;  %v8148_v9 = vld [vmem:[#allocation121_spill] sm:$0xff]  ;;  %v8150_v19 = vld [vmem:[#allocation124_spill] sm:$0xff] }
 0x11a   : > { %781 = vmatpush.msrb.mxu3 %v8140_v4  ;;  %761 = vmatpush.msrb.mxu2 %v8146_v23  ;;  %v8151_v4 = vld [vmem:[#allocation115_spill] sm:$0xff]  ;;  %v635_v23 = vld [vmem:[#allocation4] sm:$0xff] }
 0x11b   : > { %722 = vmatpush.msrb.mxu0 %v8141_v2  ;;  %742 = vmatpush.msrb.mxu1 %v8143_v12  ;;  %v8152_v2 = vld [vmem:[#allocation117_spill] sm:$0xff]  ;;  %v8154_v12 = vld [vmem:[#allocation120_spill] sm:$0xff] }
 0x11c   : > { %782 = vmatpush.msrb.mxu3 %v8144_v13  ;;  %762 = vmatpush.msrb.mxu2 %v8150_v19  ;;  %v8155_v13 = vld [vmem:[#allocation111_spill] sm:$0xff]  ;;  %v8160_v19 = vld [vmem:[#allocation109_spill] sm:$0xff] }
 0x11d   : > { %723 = vmatpush.msrb.mxu0 %v8145_v7  ;;  %743 = vmatpush.msrb.mxu1 %v8147_v8  ;;  %v8156_v7 = vld [vmem:[#allocation113_spill] sm:$0xff]  ;;  %v8157_v8 = vld [vmem:[#allocation106_spill] sm:$0xff] }
 0x11e   : > { %783 = vmatpush.msrb.mxu3 %v8148_v9  ;;  %763 = vmatpush.msrb.mxu2 %v8154_v12  ;;  %v8158_v9 = vld [vmem:[#allocation116_spill] sm:$0xff]  ;;  %v8164_v12 = vld [vmem:[#allocation98_spill] sm:$0xff] }
 0x11f   : > { %724 = vmatpush.msrb.mxu0 %v8149_v3  ;;  %744 = vmatpush.msrb.mxu1 %v8151_v4  ;;  %v8159_v3 = vld [vmem:[#allocation107_spill] sm:$0xff]  ;;  %v8161_v4 = vld [vmem:[#allocation102_spill] sm:$0xff] }
 0x120   : > { %784 = vmatpush.msrb.mxu3 %v8152_v2  ;;  %764 = vmatpush.msrb.mxu2 %v8158_v9  ;;  %v8162_v2 = vld [vmem:[#allocation103_spill] sm:$0xff]  ;;  %v8168_v9 = vld [vmem:[#allocation94_spill] sm:$0xff] }
 0x121   : > { %725 = vmatpush.msrb.mxu0 %v8153_v27  ;;  %745 = vmatpush.msrb.mxu1 %v8155_v13  ;;  %v8163_v27 = vld [vmem:[#allocation105_spill] sm:$0xff]  ;;  %v8165_v13 = vld [vmem:[#allocation99_spill] sm:$0xff] }
 0x122   : > { %785 = vmatpush.msrb.mxu3 %v8156_v7  ;;  %673 = vmatmul.f32.vlgmr.msra.gmra.mxu1 %v635_v23  ;;  %v8166_v7 = vld [vmem:[#allocation101_spill] sm:$0xff] }
 0x123   : > { %726 = vmatpush.msrb.mxu0 %v8157_v8  ;;  %746 = vmatpush.msrb.mxu1 %v8159_v3  ;;  %v8167_v8 = vld [vmem:[#allocation112_spill] sm:$0xff]  ;;  %v8169_v3 = vld [vmem:[#allocation95_spill] sm:$0xff] }
 0x124   : > { %786 = vmatpush.msrb.mxu3 %v8160_v19  ;;  %653 = vmatmul.f32.vlgmr.msra.gmra.mxu0 %v635_v23  ;;  %v8170_v19 = vld [vmem:[#allocation97_spill] sm:$0xff] }
 0x125   : > { %727 = vmatpush.msrb.mxu0 %v8161_v4  ;;  %747 = vmatpush.msrb.mxu1 %v8162_v2  ;;  %v8171_v4 = vld [vmem:[#allocation108_spill] sm:$0xff]  ;;  %v8172_v2 = vld [vmem:[#allocation90_spill] sm:$0xff] }
 0x126   : > { %787 = vmatpush.msrb.mxu3 %v8163_v27  ;;  %765 = vmatpush.msrb.mxu2 %v8167_v8  ;;  %v8173_v27 = vld [vmem:[#allocation91_spill] sm:$0xff]  ;;  %v8178_v8 = vld [vmem:[#allocation89_spill] sm:$0xff] }
 0x127   : > { %728 = vmatpush.msrb.mxu0 %v8164_v12  ;;  %713 = vmatmul.f32.vlgmr.msra.gmra.mxu3 %v635_v23  ;;  %v8174_v12 = vld [vmem:[#allocation93_spill] sm:$0xff] }
 0x128   : > { %748 = vmatpush.msrb.mxu1 %v8165_v13  ;;  %788 = vmatpush.msrb.mxu3 %v8166_v7  ;;  %v8175_v13 = vld [vmem:[#allocation104_spill] sm:$0xff]  ;;  %v8176_v7 = vld [vmem:[#allocation86_spill] sm:$0xff] }
 0x129   : > { %729 = vmatpush.msrb.mxu0 %v8168_v9  ;;  %766 = vmatpush.msrb.mxu2 %v8171_v4  ;;  %v8179_v9 = vld [vmem:[#allocation100_spill] sm:$0xff]  ;;  %v8181_v4 = vld [vmem:[#allocation83_spill] sm:$0xff] }
 0x12a   : > { %749 = vmatpush.msrb.mxu1 %v8169_v3  ;;  %789 = vmatpush.msrb.mxu3 %v8170_v19  ;;  %v634_v3 = vld [vmem:[#allocation2] sm:$0xff] }
 0x12b   : > { %730 = vmatpush.msrb.mxu0 %v8172_v2  ;;  %767 = vmatpush.msrb.mxu2 %v8175_v13  ;;  %v8180_v19 = vld [vmem:[#allocation82_spill] sm:$0xff]  ;;  %v8182_v2 = vld [vmem:[#allocation85_spill] sm:$0xff]  ;;  %v8186_v13 = vld [vmem:[#allocation84_spill] sm:$0xff] }
 0x12c   : > { %750 = vmatpush.msrb.mxu1 %v8173_v27  ;;  %790 = vmatpush.msrb.mxu3 %v8174_v12  ;;  %v8183_v27 = vld [vmem:[#allocation96_spill] sm:$0xff] }
 0x12d   : > { %731 = vmatpush.msrb.mxu0 %v8176_v7  ;;  %768 = vmatpush.msrb.mxu2 %v8179_v9  ;;  %v8184_v12 = vld [vmem:[#allocation92_spill] sm:$0xff]  ;;  %v798_v9 = vperm.slane %v5298_v1, 0 }
 0x12e   : > { %751 = vmatpush.msrb.mxu1 %v8177_v11  ;;  %791 = vmatpush.msrb.mxu3 %v8178_v8  ;;  %v8185_v11 = vld [vmem:[#allocation88_spill] sm:$0xff] }
 0x12f   : > { %693 = vmatmul.f32.vlgmr.msra.gmra.mxu2 %v635_v23  ;;  %732 = vmatpush.msrb.mxu0 %v8180_v19  ;;  %v799_v19 = vperm.slane %v5298_v1, 1 }
 0x130   : > { %752 = vmatpush.msrb.mxu1 %v8181_v4  ;;  %792 = vmatpush.msrb.mxu3 %v8182_v2 }
 0x131   : > { %733 = vmatmul.f32.vlgmr.msrb.gmra.mxu0 %v634_v3  ;;  %753 = vmatmul.f32.vlgmr.msrb.gmra.mxu1 %v634_v3 }
 0x132   : > { %769 = vmatpush.msrb.mxu2 %v8183_v27  ;;  %793 = vmatmul.f32.vlgmr.msrb.gmra.mxu3 %v634_v3 }
 0x134   : > { %770 = vmatpush.msrb.mxu2 %v8184_v12 }
 0x136   : > { %771 = vmatpush.msrb.mxu2 %v8185_v11  ;;  %v801_v11 = vperm.slane %v5298_v1, 3 }
 0x138   : > { %772 = vmatpush.msrb.mxu2 %v8186_v13 }
 0x139   : > { %773 = vmatmul.f32.vlgmr.msrb.gmra.mxu2 %v634_v3 }
 0x19f   : > { %v674_v7 = vpop.f32.mrf.mxu1 }
 0x1a1   : > { %v654_v23 = vpop.f32.mrf.mxu0 }
 0x1aa   : > { %v714_v8 = vpop.f32.mrf.mxu3 }
 0x1ae   : > { %v734_v4 = vpop.f32.mrf.mxu0  ;;  %v754_v2 = vpop.f32.mrf.mxu1 }
 0x1af   : > { %v735_v10 = vadd.f32 %v734_v4, %v654_v23  ;;  %v755_v31 = vadd.f32 %v754_v2, %v674_v7 }
 0x1b1   : > { %v806_v27 = vadd.f32 %v798_v9, %v735_v10  ;;  %v807_v17 = vadd.f32 %v799_v19, %v755_v31 }
 0x1b2   : > { %v694_v14 = vpop.f32.mrf.mxu2 }
 0x1b3   : > { %v4178_v16 = vmul.f32 -1.442695, %v806_v27  ;;  %v4179_v12 = vmul.f32 -1.442695, %v807_v17  ;;  %v800_v17 = vperm.slane %v5298_v1, 2 }
 0x1b5   : > { %4315 = vpow2.f32 %v4178_v16  ;;  %v794_v3 = vpop.f32.mrf.mxu3 }
 0x1b6   : > { %4317 = vpow2.f32 %v4179_v12  ;;  %v795_v13 = vadd.f32 %v794_v3, %v714_v8 }
 0x1b8   : > { %v809_v22 = vadd.f32 %v801_v11, %v795_v13 }
 0x1ba   : > { %v4180_v21 = vmul.f32 -1.442695, %v809_v22 }
 0x1bb   : > { %v4316_v20 = vpop.eup %4315 }
 0x1bc   : > { %v4318_v18 = vpop.eup %4317  ;;  %v813_v28 = vadd.f32 1.0, %v4316_v20  ;;  %4319 = vpow2.f32 %v4180_v21  ;;  %v774_v23 = vpop.f32.mrf.mxu2 }
 0x1bd   : > { %v832_v26 = vadd.f32 1.0, %v4318_v18  ;;  %v775_v10 = vadd.f32 %v774_v23, %v694_v14 }
 0x1be   : > { %4321 = vrcp.f32 %v813_v28  ;;  %v825_v27 = vand.u32 2147483648, %v813_v28  ;;  %v823_v21 = vand.u32 2147483647, %v813_v28  ;;  %vm819_vm2 = vweird.f32 %v813_v28 }
 0x1bf   : > { %4323 = vrcp.f32 %v832_v26  ;;  %v808_v16 = vadd.f32 %v800_v17, %v775_v10  ;;  %v844_v20 = vand.u32 2147483648, %v832_v26  ;;  %v842_v14 = vand.u32 2147483647, %v832_v26 }
 0x1c0   : > { %vm838_vm3 = vweird.f32 %v832_v26  ;;  %v826_v23 = vor.u32 1.1754944e-38, %v825_v27  ;;  %vm824_vm6 = vcmp.eq.f32.partialorder %v823_v21, 8.507059e+37  ;;  %v4314_v21 = vld [vmem:[#allocation7] ss:$0 sm:$0xff] }
 0x1c1   : > { %v845_v17 = vor.u32 1.1754944e-38, %v844_v20  ;;  %vm843_vm7 = vcmp.eq.f32.partialorder %v842_v14, 8.507059e+37 }
 0x1c2   : > { %v4320_v31 = vpop.eup %4319 }
 0x1c3   : > { %v852_v7 = vadd.f32 1.0, %v4320_v31  ;;  %v636_v31 = vld [vmem:[#allocation5] sm:$0xff] }
 0x1c4   : > { %v4322_v9 = vpop.eup %4321 }
 0x1c5   : > { %v4324_v19 = vpop.eup %4323  ;;  %v815_v4 = vmul.f32 %v4322_v9, %v813_v28  ;;  %4325 = vrcp.f32 %v852_v7  ;;  %vm820_vm0 = vweird.f32 %v4322_v9  ;;  %v864_v32 = vand.u32 2147483648, %v852_v7 }
 0x1c6   : > { %v834_v8 = vmul.f32 %v4324_v19, %v832_v26  ;;  %4327 = vtanh.f32 %v808_v16  ;;  %vm839_vm1 = vweird.f32 %v4324_v19  ;;  %vm821_vm4 = vmor %vm819_vm2, %vm820_vm0  ;;  %vm858_vm9 = vweird.f32 %v852_v7 }
 0x1c7   : > { %v816_v22 = vsub.f32 1.0, %v815_v4  ;;  %vm840_vm5 = vmor %vm838_vm3, %vm839_vm1  ;;  %v862_v27 = vand.u32 2147483647, %v852_v7  ;;  %v865_v20 = vor.u32 1.1754944e-38, %v864_v32 }
 0x1c8   : > { %v835_v2 = vsub.f32 1.0, %v834_v8 }
 0x1c9   : > { %v817_v18 = vmul.f32 %v4322_v9, %v816_v22  ;;  %vm863_vm11 = vcmp.eq.f32.partialorder %v862_v27, 8.507059e+37 }
 0x1ca   : > { %v836_v12 = vmul.f32 %v4324_v19, %v835_v2 }
 0x1cb   : > { %v4326_v11 = vpop.eup %4325  ;;  %v818_v3 = vadd.f32 %v4322_v9, %v817_v18 }
 0x1cc   : > { %v854_v13 = vmul.f32 %v4326_v11, %v852_v7  ;;  %v837_v10 = vadd.f32 %v4324_v19, %v836_v12  ;;  %v4328_v16 = vpop.eup %4327  ;;  %vm859_vm8 = vweird.f32 %v4326_v11 }
 0x1cd   : > { %v822_v4 = vsel %vm821_vm4, %v4322_v9, %v818_v3  ;;  %vm860_vm10 = vmor %vm858_vm9, %vm859_vm8 }
 0x1ce   : > { %v855_v8 = vsub.f32 1.0, %v854_v13  ;;  %v827_v22 = vsel %vm824_vm6, %v826_v23, %v822_v4  ;;  %v841_v1 = vsel %vm840_vm5, %v4324_v19, %v837_v10 }
 0x1cf   : > { %v846_v2 = vsel %vm843_vm7, %v845_v17, %v841_v1  ;;  %v869_v25 = vmul.f32 %v4328_v16, %v827_v22  ;;  %v875_v1 = vld [vmem:[#allocation6] sm:$0xff] }
 0x1d0   : > { %v856_v24 = vmul.f32 %v4326_v11, %v855_v8  ;;  %v868_v18 = vmul.f32 %v846_v2, %v636_v31 }
 0x1d2   : > { %v870_v28 = vadd.f32 %v869_v25, %v868_v18  ;;  %v857_v26 = vadd.f32 %v4326_v11, %v856_v24 }
 0x1d4   : > { %4329 = vtanh.f32 %v870_v28  ;;  %874 = vst [vmem:[#allocation5] sm:$0xff] %v870_v28  ;;  %v861_v9 = vsel %vm860_vm10, %v4326_v11, %v857_v26 }
 0x1d5   : > { %v866_v19 = vsel %vm863_vm11, %v865_v20, %v861_v9 }
 0x1da   : > { %v4330_v12 = vpop.eup %4329 }
 0x1db   : > { %v872_v14 = vmul.f32 %v4330_v12, %v866_v19 }
 0x1dd   : > { %873 = vst [vmem:[#allocation4] sm:$0xff] %v872_v14  ;;  %v880_v3 = vmul.f32 %v4314_v21, %v872_v14 }
 0x1df   : > { %v881_v13 = vadd.f32 %v880_v3, %v875_v1 }
 0x1e1   : > { %882 = vst [vmem:[#allocation6] sm:$0xff] %v881_v13 }
 0x1e2 PF: > { %v8187_v24 = vld [vmem:[#allocation77_spill] sm:$0xff]  ;;  %v8188_v25 = vld [vmem:[#allocation78_spill] sm:$0xff]  ;;  %3803 = vst [vmem:[#allocation7 - $0x7] sm:$0x80] %v5302_v6  ;;  %v8189_v7 = vld [vmem:[#allocation79_spill] sm:$0xff]  ;;  %p4226_p12 = scmp.ne.s32.totalorder %s4717_s11, 1 }
 0x1e3   : > { %919 = vmatpush.msra.mxu0 %v8187_v24  ;;  %939 = vmatpush.msra.mxu1 %v8188_v25  ;;  %v8190_v32 = vld [vmem:[#allocation80_spill] sm:$0xff]  ;;  %v8191_v11 = vld [vmem:[#allocation73_spill] sm:$0xff]  ;;  %v8192_v23 = vld [vmem:[#allocation74_spill] sm:$0xff] }
 0x1e4   : > { %959 = vmatpush.msra.mxu2 %v8189_v7  ;;  %979 = vmatpush.msra.mxu3 %v8190_v32  ;;  %v8193_v10 = vld [vmem:[#allocation75_spill] sm:$0xff]  ;;  %v8194_v17 = vld [vmem:[#allocation76_spill] sm:$0xff]  ;;  %v8195_v31 = vld [vmem:[#allocation69_spill] sm:$0xff] }
 0x1e5   : > { %920 = vmatpush.msra.mxu0 %v8191_v11  ;;  %940 = vmatpush.msra.mxu1 %v8192_v23  ;;  %v8196_v4 = vld [vmem:[#allocation70_spill] sm:$0xff]  ;;  %v8197_v16 = vld [vmem:[#allocation71_spill] sm:$0xff]  ;;  %v8198_v8 = vld [vmem:[#allocation72_spill] sm:$0xff] }
 0x1e6   : > { %960 = vmatpush.msra.mxu2 %v8193_v10  ;;  %980 = vmatpush.msra.mxu3 %v8194_v17  ;;  %v8199_v22 = vld [vmem:[#allocation65_spill] sm:$0xff]  ;;  %v8200_v2 = vld [vmem:[#allocation66_spill] sm:$0xff]  ;;  %v8201_v18 = vld [vmem:[#allocation67_spill] sm:$0xff] }
 0x1e7   : > { %921 = vmatpush.msra.mxu0 %v8195_v31  ;;  %941 = vmatpush.msra.mxu1 %v8196_v4  ;;  %v8202_v28 = vld [vmem:[#allocation68_spill] sm:$0xff]  ;;  %v8203_v26 = vld [vmem:[#allocation61_spill] sm:$0xff]  ;;  %v8204_v27 = vld [vmem:[#allocation62_spill] sm:$0xff] }
 0x1e8   : > { %961 = vmatpush.msra.mxu2 %v8197_v16  ;;  %981 = vmatpush.msra.mxu3 %v8198_v8  ;;  %v8205_v9 = vld [vmem:[#allocation63_spill] sm:$0xff]  ;;  %v8206_v20 = vld [vmem:[#allocation64_spill] sm:$0xff]  ;;  %v8207_v21 = vld [vmem:[#allocation57_spill] sm:$0xff] }
 0x1e9   : > { %922 = vmatpush.msra.mxu0 %v8199_v22  ;;  %942 = vmatpush.msra.mxu1 %v8200_v2  ;;  %v8208_v12 = vld [vmem:[#allocation58_spill] sm:$0xff]  ;;  %v8209_v19 = vld [vmem:[#allocation59_spill] sm:$0xff]  ;;  %v8210_v14 = vld [vmem:[#allocation60_spill] sm:$0xff] }
 0x1ea   : > { %962 = vmatpush.msra.mxu2 %v8201_v18  ;;  %982 = vmatpush.msra.mxu3 %v8202_v28  ;;  %v8211_v1 = vld [vmem:[#allocation53_spill] sm:$0xff]  ;;  %v8212_v3 = vld [vmem:[#allocation54_spill] sm:$0xff]  ;;  %v8213_v13 = vld [vmem:[#allocation55_spill] sm:$0xff] }
 0x1eb   : > { %923 = vmatpush.msra.mxu0 %v8203_v26  ;;  %943 = vmatpush.msra.mxu1 %v8204_v27  ;;  %v8214_v6 = vld [vmem:[#allocation56_spill] sm:$0xff]  ;;  %v8215_v27 = vld [vmem:[#allocation49_spill] sm:$0xff] }
 0x1ec   : > { %963 = vmatpush.msra.mxu2 %v8205_v9  ;;  %983 = vmatpush.msra.mxu3 %v8206_v20  ;;  %v8216_v9 = vld [vmem:[#allocation50_spill] sm:$0xff]  ;;  %v8217_v20 = vld [vmem:[#allocation51_spill] sm:$0xff] }
 0x1ed   : > { %924 = vmatpush.msra.mxu0 %v8207_v21  ;;  %944 = vmatpush.msra.mxu1 %v8208_v12  ;;  %v8218_v21 = vld [vmem:[#allocation52_spill] sm:$0xff]  ;;  %v8219_v12 = vld [vmem:[#allocation45_spill] sm:$0xff] }
 0x1ee   : > { %964 = vmatpush.msra.mxu2 %v8209_v19  ;;  %984 = vmatpush.msra.mxu3 %v8210_v14  ;;  %v8220_v19 = vld [vmem:[#allocation46_spill] sm:$0xff]  ;;  %v8221_v14 = vld [vmem:[#allocation47_spill] sm:$0xff] }
 0x1ef   : > { %925 = vmatpush.msra.mxu0 %v8211_v1  ;;  %945 = vmatpush.msra.mxu1 %v8212_v3  ;;  %v8222_v1 = vld [vmem:[#allocation48_spill] sm:$0xff]  ;;  %v8223_v3 = vld [vmem:[#allocation41_spill] sm:$0xff] }
 0x1f0   : > { %965 = vmatpush.msra.mxu2 %v8213_v13  ;;  %985 = vmatpush.msra.mxu3 %v8214_v6  ;;  %v8224_v13 = vld [vmem:[#allocation42_spill] sm:$0xff]  ;;  %v8225_v6 = vld [vmem:[#allocation43_spill] sm:$0xff] }
 0x1f1   : > { %926 = vmatpush.msra.mxu0 %v8215_v27  ;;  %946 = vmatpush.msra.mxu1 %v8216_v9  ;;  %v8226_v27 = vld [vmem:[#allocation44_spill] sm:$0xff]  ;;  %v8227_v9 = vld [vmem:[#allocation37_spill] sm:$0xff] }
 0x1f2   : > { %966 = vmatpush.msra.mxu2 %v8217_v20  ;;  %986 = vmatpush.msra.mxu3 %v8218_v21  ;;  %v8228_v20 = vld [vmem:[#allocation38_spill] sm:$0xff]  ;;  %v8229_v21 = vld [vmem:[#allocation39_spill] sm:$0xff] }
 0x1f3   : > { %927 = vmatpush.msra.mxu0 %v8219_v12  ;;  %947 = vmatpush.msra.mxu1 %v8220_v19  ;;  %v8230_v12 = vld [vmem:[#allocation40_spill] sm:$0xff]  ;;  %v8231_v19 = vld [vmem:[#allocation33_spill] sm:$0xff] }
 0x1f4   : > { %967 = vmatpush.msra.mxu2 %v8221_v14  ;;  %987 = vmatpush.msra.mxu3 %v8222_v1  ;;  %v8232_v14 = vld [vmem:[#allocation34_spill] sm:$0xff]  ;;  %v8233_v1 = vld [vmem:[#allocation35_spill] sm:$0xff] }
 0x1f5   : > { %928 = vmatpush.msra.mxu0 %v8223_v3  ;;  %948 = vmatpush.msra.mxu1 %v8224_v13  ;;  %v8234_v3 = vld [vmem:[#allocation36_spill] sm:$0xff]  ;;  %v8235_v13 = vld [vmem:[#allocation29_spill] sm:$0xff] }
 0x1f6   : > { %968 = vmatpush.msra.mxu2 %v8225_v6  ;;  %988 = vmatpush.msra.mxu3 %v8226_v27  ;;  %v8236_v6 = vld [vmem:[#allocation30_spill] sm:$0xff]  ;;  %v8237_v27 = vld [vmem:[#allocation31_spill] sm:$0xff] }
 0x1f7   : > { %929 = vmatpush.msra.mxu0 %v8227_v9  ;;  %949 = vmatpush.msra.mxu1 %v8228_v20  ;;  %v8238_v9 = vld [vmem:[#allocation32_spill] sm:$0xff]  ;;  %v8239_v20 = vld [vmem:[#allocation25_spill] sm:$0xff] }
 0x1f8   : > { %969 = vmatpush.msra.mxu2 %v8229_v21  ;;  %989 = vmatpush.msra.mxu3 %v8230_v12  ;;  %v8240_v21 = vld [vmem:[#allocation26_spill] sm:$0xff]  ;;  %v8241_v12 = vld [vmem:[#allocation27_spill] sm:$0xff] }
 0x1f9   : > { %930 = vmatpush.msra.mxu0 %v8231_v19  ;;  %950 = vmatpush.msra.mxu1 %v8232_v14  ;;  %v8242_v19 = vld [vmem:[#allocation28_spill] sm:$0xff]  ;;  %v8243_v14 = vld [vmem:[#allocation21_spill] sm:$0xff] }
 0x1fa   : > { %970 = vmatpush.msra.mxu2 %v8233_v1  ;;  %990 = vmatpush.msra.mxu3 %v8234_v3  ;;  %v8244_v1 = vld [vmem:[#allocation22_spill] sm:$0xff]  ;;  %v8245_v3 = vld [vmem:[#allocation23_spill] sm:$0xff] }
 0x1fb   : > { %931 = vmatpush.msra.mxu0 %v8235_v13  ;;  %951 = vmatpush.msra.mxu1 %v8236_v6  ;;  %v8246_v13 = vld [vmem:[#allocation24_spill] sm:$0xff]  ;;  %v883_v6 = vld [vmem:[#allocation2] sm:$0xff] }
 0x1fc   : > { %971 = vmatpush.msra.mxu2 %v8237_v27  ;;  %991 = vmatpush.msra.mxu3 %v8238_v9  ;;  %v8247_v27 = vld [vmem:[#allocation17_spill] sm:$0xff]  ;;  %v8248_v9 = vld [vmem:[#allocation18_spill] sm:$0xff] }
 0x1fd   : > { %932 = vmatpush.msra.mxu0 %v8239_v20  ;;  %952 = vmatpush.msra.mxu1 %v8240_v21  ;;  %v8249_v20 = vld [vmem:[#allocation19_spill] sm:$0xff]  ;;  %v8250_v21 = vld [vmem:[#allocation20_spill] sm:$0xff] }
 0x1fe   : > { %972 = vmatpush.msra.mxu2 %v8241_v12  ;;  %992 = vmatpush.msra.mxu3 %v8242_v19 }
 0x1ff   : > { %933 = vmatpush.msra.mxu0 %v8243_v14  ;;  %953 = vmatpush.msra.mxu1 %v8244_v1  ;;  %v4741_v14 = vmov 0  }
 0x200   : > { %973 = vmatpush.msra.mxu2 %v8245_v3  ;;  %993 = vmatpush.msra.mxu3 %v8246_v13 }
 0x201   : > { %934 = vmatpush.msra.mxu0 %v8247_v27  ;;  %954 = vmatpush.msra.mxu1 %v8248_v9 }
 0x202   : > { %974 = vmatpush.msra.mxu2 %v8249_v20  ;;  %994 = vmatpush.msra.mxu3 %v8250_v21 }
 0x203   : > { %935 = vmatmul.f32.vlgmr.msra.gmra.mxu0 %v883_v6  ;;  %955 = vmatmul.f32.vlgmr.msra.gmra.mxu1 %v883_v6 }
 0x204   : > { %975 = vmatmul.f32.vlgmr.msra.gmra.mxu2 %v883_v6  ;;  %995 = vmatmul.f32.vlgmr.msra.gmra.mxu3 %v883_v6  ;;  %v8251_v6 = vld [vmem:[#allocation177_spill] sm:$0xff] }
 0x205   : > { %4331 = vset.pattern.permute.xlu0 %v4741_v14  ;;  %1066 = vmatpush.msrb.mxu0 %v5287_v5  ;;  %v8252_v14 = vld [vmem:[#allocation170_spill] sm:$0xff] }
 0x206   : > { %890 = vperm.xlu0 %4331, %v5300_v15   ;;  %1086 = vmatpush.msrb.mxu1 %v5289_v61 }
 0x207   : > { %1106 = vmatpush.msrb.mxu2 %v5291_v62  ;;  %1126 = vmatpush.msrb.mxu3 %v5293_v0 }
 0x208   : > { %1067 = vmatpush.msrb.mxu0 %v5279_v63  ;;  %1087 = vmatpush.msrb.mxu1 %v5281_v57 }
 0x209   : > { %1107 = vmatpush.msrb.mxu2 %v5283_v58  ;;  %1127 = vmatpush.msrb.mxu3 %v5285_v60 }
 0x20a   : > { %1068 = vmatpush.msrb.mxu0 %v5265_v59  ;;  %1088 = vmatpush.msrb.mxu1 %v5267_v53 }
 0x20b   : > { %1108 = vmatpush.msrb.mxu2 %v5269_v54  ;;  %1128 = vmatpush.msrb.mxu3 %v5271_v56 }
 0x20c   : > { %1069 = vmatpush.msrb.mxu0 %v5257_v55  ;;  %1089 = vmatpush.msrb.mxu1 %v5259_v49 }
 0x20d   : > { %1109 = vmatpush.msrb.mxu2 %v5261_v50  ;;  %1129 = vmatpush.msrb.mxu3 %v5263_v52 }
 0x20e   : > { %1070 = vmatpush.msrb.mxu0 %v5248_v51  ;;  %1090 = vmatpush.msrb.mxu1 %v5250_v45 }
 0x20f   : > { %1110 = vmatpush.msrb.mxu2 %v5252_v46  ;;  %1130 = vmatpush.msrb.mxu3 %v5255_v48 }
 0x210   : > { %1071 = vmatpush.msrb.mxu0 %v5240_v47  ;;  %1091 = vmatpush.msrb.mxu1 %v5242_v41 }
 0x211   : > { %1111 = vmatpush.msrb.mxu2 %v5244_v42  ;;  %1131 = vmatpush.msrb.mxu3 %v5246_v44 }
 0x212   : > { %1072 = vmatpush.msrb.mxu0 %v5231_v43  ;;  %1092 = vmatpush.msrb.mxu1 %v5233_v37 }
 0x213   : > { %1112 = vmatpush.msrb.mxu2 %v5236_v38  ;;  %1132 = vmatpush.msrb.mxu3 %v5238_v40  ;;  %v8253_v38 = vld [vmem:[#allocation171_spill] sm:$0xff]  ;;  %v8254_v40 = vld [vmem:[#allocation172_spill] sm:$0xff] }
 0x214   : > { %1073 = vmatpush.msrb.mxu0 %v5223_v39  ;;  %1093 = vmatpush.msrb.mxu1 %v5225_v33  ;;  %v8255_v39 = vld [vmem:[#allocation173_spill] sm:$0xff]  ;;  %v8256_v33 = vld [vmem:[#allocation166_spill] sm:$0xff] }
 0x215   : > { %1113 = vmatpush.msrb.mxu2 %v5227_v34  ;;  %1133 = vmatpush.msrb.mxu3 %v5229_v36  ;;  %v8257_v34 = vld [vmem:[#allocation167_spill] sm:$0xff]  ;;  %v8258_v36 = vld [vmem:[#allocation168_spill] sm:$0xff] }
 0x216   : > { %1074 = vmatpush.msrb.mxu0 %v5214_v35  ;;  %1094 = vmatpush.msrb.mxu1 %v5217_v29  ;;  %v8259_v35 = vld [vmem:[#allocation169_spill] sm:$0xff]  ;;  %v8260_v29 = vld [vmem:[#allocation162_spill] sm:$0xff] }
 0x217   : > { %1114 = vmatpush.msrb.mxu2 %v5219_v30  ;;  %1134 = vmatpush.msrb.mxu3 %v8251_v6  ;;  %v8261_v30 = vld [vmem:[#allocation163_spill] sm:$0xff]  ;;  %v8262_v6 = vld [vmem:[#allocation164_spill] sm:$0xff] }
 0x218   : > { %1075 = vmatpush.msrb.mxu0 %v8252_v14  ;;  %1095 = vmatpush.msrb.mxu1 %v8253_v38  ;;  %v8263_v14 = vld [vmem:[#allocation165_spill] sm:$0xff]  ;;  %v8264_v38 = vld [vmem:[#allocation158_spill] sm:$0xff] }
 0x219   : > { %1115 = vmatpush.msrb.mxu2 %v8254_v40  ;;  %1135 = vmatpush.msrb.mxu3 %v8255_v39  ;;  %v8265_v40 = vld [vmem:[#allocation159_spill] sm:$0xff]  ;;  %v8266_v39 = vld [vmem:[#allocation160_spill] sm:$0xff] }
 0x21a   : > { %1076 = vmatpush.msrb.mxu0 %v8256_v33  ;;  %1096 = vmatpush.msrb.mxu1 %v8257_v34  ;;  %v8267_v33 = vld [vmem:[#allocation161_spill] sm:$0xff]  ;;  %v8268_v34 = vld [vmem:[#allocation154_spill] sm:$0xff] }
 0x21b   : > { %1116 = vmatpush.msrb.mxu2 %v8258_v36  ;;  %1136 = vmatpush.msrb.mxu3 %v8259_v35  ;;  %v8269_v36 = vld [vmem:[#allocation155_spill] sm:$0xff]  ;;  %v8270_v35 = vld [vmem:[#allocation156_spill] sm:$0xff] }
 0x21c   : > { %1077 = vmatpush.msrb.mxu0 %v8260_v29  ;;  %1097 = vmatpush.msrb.mxu1 %v8261_v30  ;;  %v8271_v29 = vld [vmem:[#allocation157_spill] sm:$0xff]  ;;  %v8272_v30 = vld [vmem:[#allocation150_spill] sm:$0xff] }
 0x21d   : > { %1117 = vmatpush.msrb.mxu2 %v8262_v6  ;;  %1137 = vmatpush.msrb.mxu3 %v8263_v14  ;;  %v8273_v6 = vld [vmem:[#allocation151_spill] sm:$0xff]  ;;  %v8274_v14 = vld [vmem:[#allocation152_spill] sm:$0xff] }
 0x21e   : > { %1078 = vmatpush.msrb.mxu0 %v8264_v38  ;;  %1098 = vmatpush.msrb.mxu1 %v8265_v40  ;;  %v8275_v38 = vld [vmem:[#allocation153_spill] sm:$0xff]  ;;  %v8276_v40 = vld [vmem:[#allocation146_spill] sm:$0xff] }
 0x21f   : > { %1118 = vmatpush.msrb.mxu2 %v8266_v39  ;;  %1138 = vmatpush.msrb.mxu3 %v8267_v33  ;;  %v8277_v39 = vld [vmem:[#allocation147_spill] sm:$0xff]  ;;  %v8278_v33 = vld [vmem:[#allocation148_spill] sm:$0xff] }
 0x220   : > { %1079 = vmatpush.msrb.mxu0 %v8268_v34  ;;  %1099 = vmatpush.msrb.mxu1 %v8269_v36  ;;  %v8279_v34 = vld [vmem:[#allocation149_spill] sm:$0xff]  ;;  %v8280_v36 = vld [vmem:[#allocation142_spill] sm:$0xff] }
 0x221   : > { %1119 = vmatpush.msrb.mxu2 %v8270_v35  ;;  %1139 = vmatpush.msrb.mxu3 %v8271_v29  ;;  %v8281_v35 = vld [vmem:[#allocation143_spill] sm:$0xff]  ;;  %v8282_v29 = vld [vmem:[#allocation144_spill] sm:$0xff] }
 0x222   : > { %1080 = vmatpush.msrb.mxu0 %v8272_v30  ;;  %1100 = vmatpush.msrb.mxu1 %v8273_v6  ;;  %v8283_v30 = vld [vmem:[#allocation145_spill] sm:$0xff]  ;;  %v8284_v6 = vld [vmem:[#allocation138_spill] sm:$0xff] }
 0x223   : > { %1120 = vmatpush.msrb.mxu2 %v8274_v14  ;;  %1140 = vmatpush.msrb.mxu3 %v8275_v38  ;;  %v8285_v14 = vld [vmem:[#allocation139_spill] sm:$0xff]  ;;  %v8286_v38 = vld [vmem:[#allocation140_spill] sm:$0xff] }
 0x224   : > { %1081 = vmatpush.msrb.mxu0 %v8276_v40  ;;  %1101 = vmatpush.msrb.mxu1 %v8277_v39  ;;  %v8287_v40 = vld [vmem:[#allocation141_spill] sm:$0xff]  ;;  %v8288_v39 = vld [vmem:[#allocation134_spill] sm:$0xff] }
 0x225   : > { %1121 = vmatpush.msrb.mxu2 %v8278_v33  ;;  %1141 = vmatpush.msrb.mxu3 %v8279_v34  ;;  %v8289_v33 = vld [vmem:[#allocation135_spill] sm:$0xff]  ;;  %v8290_v34 = vld [vmem:[#allocation136_spill] sm:$0xff] }
 0x226   : > { %1146 = vmatpush.msra.mxu0 %v8280_v36  ;;  %1166 = vmatpush.msra.mxu1 %v8281_v35  ;;  %v8291_v36 = vld [vmem:[#allocation137_spill] sm:$0xff]  ;;  %v8292_v35 = vld [vmem:[#allocation130_spill] sm:$0xff] }
 0x227   : > { %1186 = vmatpush.msra.mxu2 %v8282_v29  ;;  %1206 = vmatpush.msra.mxu3 %v8283_v30  ;;  %v8293_v29 = vld [vmem:[#allocation131_spill] sm:$0xff]  ;;  %v8294_v30 = vld [vmem:[#allocation132_spill] sm:$0xff] }
 0x228   : > { %1147 = vmatpush.msra.mxu0 %v8284_v6  ;;  %1167 = vmatpush.msra.mxu1 %v8285_v14  ;;  %v8295_v6 = vld [vmem:[#allocation133_spill] sm:$0xff]  ;;  %v8296_v14 = vld [vmem:[#allocation126_spill] sm:$0xff] }
 0x229   : > { %1187 = vmatpush.msra.mxu2 %v8286_v38  ;;  %1207 = vmatpush.msra.mxu3 %v8287_v40  ;;  %v8297_v38 = vld [vmem:[#allocation127_spill] sm:$0xff]  ;;  %v8298_v40 = vld [vmem:[#allocation128_spill] sm:$0xff] }
 0x22a   : > { %1148 = vmatpush.msra.mxu0 %v8288_v39  ;;  %1168 = vmatpush.msra.mxu1 %v8289_v33  ;;  %v8299_v39 = vld [vmem:[#allocation129_spill] sm:$0xff]  ;;  %v8300_v33 = vld [vmem:[#allocation122_spill] sm:$0xff] }
 0x22b   : > { %1188 = vmatpush.msra.mxu2 %v8290_v34  ;;  %1208 = vmatpush.msra.mxu3 %v8291_v36  ;;  %v8301_v34 = vld [vmem:[#allocation123_spill] sm:$0xff]  ;;  %v8302_v36 = vld [vmem:[#allocation124_spill] sm:$0xff] }
 0x22c   : > { %1149 = vmatpush.msra.mxu0 %v8292_v35  ;;  %1169 = vmatpush.msra.mxu1 %v8293_v29  ;;  %v8303_v35 = vld [vmem:[#allocation125_spill] sm:$0xff]  ;;  %v8304_v29 = vld [vmem:[#allocation118_spill] sm:$0xff] }
 0x22d   : > { %1189 = vmatpush.msra.mxu2 %v8294_v30  ;;  %1209 = vmatpush.msra.mxu3 %v8295_v6  ;;  %v8305_v30 = vld [vmem:[#allocation119_spill] sm:$0xff]  ;;  %v8306_v6 = vld [vmem:[#allocation120_spill] sm:$0xff] }
 0x22e   : > { %1150 = vmatpush.msra.mxu0 %v8296_v14  ;;  %1170 = vmatpush.msra.mxu1 %v8297_v38  ;;  %v8307_v14 = vld [vmem:[#allocation121_spill] sm:$0xff]  ;;  %v8308_v38 = vld [vmem:[#allocation114_spill] sm:$0xff] }
 0x22f   : > { %1190 = vmatpush.msra.mxu2 %v8298_v40  ;;  %1210 = vmatpush.msra.mxu3 %v8299_v39  ;;  %v8309_v40 = vld [vmem:[#allocation115_spill] sm:$0xff]  ;;  %v8310_v39 = vld [vmem:[#allocation116_spill] sm:$0xff] }
 0x230   : > { %1151 = vmatpush.msra.mxu0 %v8300_v33  ;;  %1171 = vmatpush.msra.mxu1 %v8301_v34  ;;  %v8311_v33 = vld [vmem:[#allocation117_spill] sm:$0xff]  ;;  %v8312_v34 = vld [vmem:[#allocation110_spill] sm:$0xff] }
 0x231   : > { %1191 = vmatpush.msra.mxu2 %v8302_v36  ;;  %1211 = vmatpush.msra.mxu3 %v8303_v35  ;;  %v8313_v36 = vld [vmem:[#allocation111_spill] sm:$0xff]  ;;  %v8314_v35 = vld [vmem:[#allocation112_spill] sm:$0xff] }
 0x232   : > { %1152 = vmatpush.msra.mxu0 %v8304_v29  ;;  %1172 = vmatpush.msra.mxu1 %v8305_v30  ;;  %v8315_v29 = vld [vmem:[#allocation113_spill] sm:$0xff]  ;;  %v8316_v30 = vld [vmem:[#allocation106_spill] sm:$0xff] }
 0x233   : > { %1192 = vmatpush.msra.mxu2 %v8306_v6  ;;  %1212 = vmatpush.msra.mxu3 %v8307_v14  ;;  %v8317_v6 = vld [vmem:[#allocation107_spill] sm:$0xff]  ;;  %v8318_v14 = vld [vmem:[#allocation108_spill] sm:$0xff] }
 0x234   : > { %1153 = vmatpush.msra.mxu0 %v8308_v38  ;;  %1173 = vmatpush.msra.mxu1 %v8309_v40  ;;  %v8319_v38 = vld [vmem:[#allocation109_spill] sm:$0xff]  ;;  %v8320_v40 = vld [vmem:[#allocation102_spill] sm:$0xff] }
 0x235   : > { %1193 = vmatpush.msra.mxu2 %v8310_v39  ;;  %1213 = vmatpush.msra.mxu3 %v8311_v33  ;;  %v8321_v39 = vld [vmem:[#allocation103_spill] sm:$0xff]  ;;  %v8322_v33 = vld [vmem:[#allocation104_spill] sm:$0xff] }
 0x236   : > { %1154 = vmatpush.msra.mxu0 %v8312_v34  ;;  %1174 = vmatpush.msra.mxu1 %v8313_v36  ;;  %v8323_v34 = vld [vmem:[#allocation105_spill] sm:$0xff]  ;;  %v8324_v36 = vld [vmem:[#allocation98_spill] sm:$0xff] }
 0x237   : > { %1194 = vmatpush.msra.mxu2 %v8314_v35  ;;  %1214 = vmatpush.msra.mxu3 %v8315_v29  ;;  %v8325_v35 = vld [vmem:[#allocation99_spill] sm:$0xff]  ;;  %v8326_v29 = vld [vmem:[#allocation100_spill] sm:$0xff] }
 0x238   : > { %1155 = vmatpush.msra.mxu0 %v8316_v30  ;;  %1175 = vmatpush.msra.mxu1 %v8317_v6  ;;  %v8327_v30 = vld [vmem:[#allocation101_spill] sm:$0xff]  ;;  %v8328_v6 = vld [vmem:[#allocation94_spill] sm:$0xff] }
 0x239   : > { %1195 = vmatpush.msra.mxu2 %v8318_v14  ;;  %1215 = vmatpush.msra.mxu3 %v8319_v38  ;;  %v8329_v14 = vld [vmem:[#allocation95_spill] sm:$0xff]  ;;  %v8330_v38 = vld [vmem:[#allocation96_spill] sm:$0xff] }
 0x23a   : > { %1156 = vmatpush.msra.mxu0 %v8320_v40  ;;  %1176 = vmatpush.msra.mxu1 %v8321_v39  ;;  %v8331_v40 = vld [vmem:[#allocation97_spill] sm:$0xff]  ;;  %v8332_v39 = vld [vmem:[#allocation90_spill] sm:$0xff] }
 0x23b   : > { %1196 = vmatpush.msra.mxu2 %v8322_v33  ;;  %1216 = vmatpush.msra.mxu3 %v8323_v34  ;;  %v8333_v33 = vld [vmem:[#allocation91_spill] sm:$0xff]  ;;  %v8334_v34 = vld [vmem:[#allocation92_spill] sm:$0xff] }
 0x23c   : > { %1157 = vmatpush.msra.mxu0 %v8324_v36  ;;  %1177 = vmatpush.msra.mxu1 %v8325_v35  ;;  %v8335_v36 = vld [vmem:[#allocation93_spill] sm:$0xff]  ;;  %v8336_v35 = vld [vmem:[#allocation86_spill] sm:$0xff] }
 0x23d   : > { %1197 = vmatpush.msra.mxu2 %v8326_v29  ;;  %1217 = vmatpush.msra.mxu3 %v8327_v30  ;;  %v8337_v29 = vld [vmem:[#allocation87_spill] sm:$0xff]  ;;  %v8338_v30 = vld [vmem:[#allocation88_spill] sm:$0xff] }
 0x23e   : > { %1158 = vmatpush.msra.mxu0 %v8328_v6  ;;  %1178 = vmatpush.msra.mxu1 %v8329_v14  ;;  %v8339_v6 = vld [vmem:[#allocation89_spill] sm:$0xff]  ;;  %v8340_v14 = vld [vmem:[#allocation82_spill] sm:$0xff] }
 0x23f   : > { %1198 = vmatpush.msra.mxu2 %v8330_v38  ;;  %1218 = vmatpush.msra.mxu3 %v8331_v40  ;;  %v8341_v38 = vld [vmem:[#allocation83_spill] sm:$0xff]  ;;  %v8342_v40 = vld [vmem:[#allocation84_spill] sm:$0xff] }
 0x240   : > { %1159 = vmatpush.msra.mxu0 %v8332_v39  ;;  %1179 = vmatpush.msra.mxu1 %v8333_v33  ;;  %v8343_v39 = vld [vmem:[#allocation85_spill] sm:$0xff]  ;;  %v8344_v33 = vld [vmem:[#allocation16_spill] sm:$0xff] }
 0x241   : > { %1199 = vmatpush.msra.mxu2 %v8334_v34  ;;  %1219 = vmatpush.msra.mxu3 %v8335_v36  ;;  %v5633_v34 = vperm.slane %v8344_v33, 0  ;;  %v5636_v36 = vperm.slane %v8344_v33, 1 }
 0x242   : > { %1160 = vmatpush.msra.mxu0 %v8336_v35  ;;  %1180 = vmatpush.msra.mxu1 %v8337_v29  ;;  %v885_v35 = vld [vmem:[#allocation4] sm:$0xff] }
 0x243   : > { %1200 = vmatpush.msra.mxu2 %v8338_v30  ;;  %1220 = vmatpush.msra.mxu3 %v8339_v6  ;;  %8345 = vst [vmem:[#allocation78_spill] sm:$0xff] %v5633_v34 }
 0x244   : > { %1161 = vmatpush.msra.mxu0 %v8340_v14  ;;  %1181 = vmatpush.msra.mxu1 %v8341_v38  ;;  %8346 = vst [vmem:[#allocation79_spill] sm:$0xff] %v5636_v36  ;;  %v8347_v14 = vld [vmem:[#allocation81_spill] sm:$0xff] }
 0x245   : > { %1201 = vmatpush.msra.mxu2 %v8342_v40  ;;  %1221 = vmatpush.msra.mxu3 %v8343_v39  ;;  %v5643_v40 = vperm.slane %v8347_v14, 0  ;;  %v5648_v6 = vperm.slane %v8347_v14, 1 }
 0x246   : > { %1082 = vmatmul.f32.vlgmr.msrb.gmra.mxu0 %v885_v35  ;;  %1102 = vmatmul.f32.vlgmr.msrb.gmra.mxu1 %v885_v35 }
 0x247   : > { %1122 = vmatmul.f32.vlgmr.msrb.gmra.mxu2 %v885_v35  ;;  %1142 = vmatmul.f32.vlgmr.msrb.gmra.mxu3 %v885_v35  ;;  %8348 = vst [vmem:[#allocation80_spill] sm:$0xff] %v5643_v40 }
 0x248   : > { %8349 = vst [vmem:[#allocation16_spill] sm:$0xff] %v5648_v6  ;;  %1317 = vmatpush.msrb.mxu0 %v8187_v24  ;;  %1337 = vmatpush.msrb.mxu1 %v8188_v25  ;;  %v5661_v24 = vperm.slane %v8344_v33, 3 }
 0x249   : > { %1357 = vmatpush.msrb.mxu2 %v8189_v7  ;;  %1377 = vmatpush.msrb.mxu3 %v8190_v32 }
 0x24a   : > { %1318 = vmatpush.msrb.mxu0 %v8191_v11  ;;  %1338 = vmatpush.msrb.mxu1 %v8192_v23  ;;  %8350 = vst [vmem:[#allocation81_spill] sm:$0xff] %v5661_v24 }
 0x24b   : > { %1358 = vmatpush.msrb.mxu2 %v8193_v10  ;;  %1378 = vmatpush.msrb.mxu3 %v8194_v17  ;;  %v8353_v17 = vld [vmem:[#allocation63_spill] sm:$0xff] }
 0x24c   : > { %1319 = vmatpush.msrb.mxu0 %v8195_v31  ;;  %1339 = vmatpush.msrb.mxu1 %v8196_v4  ;;  %v5674_v4 = vperm.slane %v8347_v14, 3 }
 0x24d   : > { %1359 = vmatpush.msrb.mxu2 %v8197_v16  ;;  %1379 = vmatpush.msrb.mxu3 %v8198_v8  ;;  %v8352_v8 = vld [vmem:[#allocation62_spill] sm:$0xff] }
 0x24e   : > { %1320 = vmatpush.msrb.mxu0 %v8199_v22  ;;  %1340 = vmatpush.msrb.mxu1 %v8200_v2  ;;  %8351 = vst [vmem:[#allocation213_spill] sm:$0xff] %v5674_v4  ;;  %v8389_v2 = vld [vmem:[#allocation25_spill] sm:$0xff] }
 0x24f   : > { %1360 = vmatpush.msrb.mxu2 %v8201_v18  ;;  %1380 = vmatpush.msrb.mxu3 %v8202_v28  ;;  %v8358_v28 = vld [vmem:[#allocation60_spill] sm:$0xff]  ;;  %v8359_v18 = vld [vmem:[#allocation53_spill] sm:$0xff] }
 0x250   : > { %1321 = vmatpush.msrb.mxu0 %v8203_v26  ;;  %1341 = vmatpush.msrb.mxu1 %v8352_v8  ;;  %v8363_v8 = vld [vmem:[#allocation49_spill] sm:$0xff] }
 0x251   : > { %1361 = vmatpush.msrb.mxu2 %v8353_v17  ;;  %v8361_v17 = vld [vmem:[#allocation55_spill] sm:$0xff] }
 0x278   : > { %v5638_v30 = vpop.permute.xlu0 %890 }
 0x279   : > { %v902_v38 = vmul.f32 %v5633_v34, %v5638_v30  ;;  %v903_v39 = vmul.f32 %v5636_v36, %v5638_v30  ;;  %v905_v31 = vmul.f32 %v5661_v24, %v5638_v30 }
 0x27b   : > { %v915_v35 = vadd.f32 %v5643_v40, %v902_v38  ;;  %v916_v34 = vadd.f32 %v5648_v6, %v903_v39  ;;  %v918_v26 = vadd.f32 %v5674_v4, %v905_v31  ;;  %v5694_v31 = vperm.slane %v8344_v33, 2 }
 0x27d   : > { %8367 = vst [vmem:[#allocation214_spill] sm:$0xff] %v5694_v31 }
 0x280   : > { %v936_v23 = vpop.f32.mrf.mxu0  ;;  %v956_v11 = vpop.f32.mrf.mxu1 }
 0x281   : > { %v999_v38 = vadd.f32 %v936_v23, %v915_v35  ;;  %v1000_v39 = vadd.f32 %v956_v11, %v916_v34  ;;  %v8354_v23 = vld [vmem:[#allocation64_spill] sm:$0xff]  ;;  %v8355_v34 = vld [vmem:[#allocation57_spill] sm:$0xff]  ;;  %v8356_v11 = vld [vmem:[#allocation58_spill] sm:$0xff] }
 0x282   : > { %1381 = vmatpush.msrb.mxu3 %v8354_v23  ;;  %1322 = vmatpush.msrb.mxu0 %v8355_v34  ;;  %v8357_v35 = vld [vmem:[#allocation59_spill] sm:$0xff]  ;;  %v8362_v23 = vld [vmem:[#allocation56_spill] sm:$0xff] }
 0x283   : > { %v4181_v16 = vmul.f32 -1.442695, %v999_v38  ;;  %v4182_v22 = vmul.f32 -1.442695, %v1000_v39  ;;  %1342 = vmatpush.msrb.mxu1 %v8356_v11  ;;  %1362 = vmatpush.msrb.mxu2 %v8357_v35  ;;  %v8360_v38 = vld [vmem:[#allocation54_spill] sm:$0xff]  ;;  %v8365_v35 = vld [vmem:[#allocation51_spill] sm:$0xff] }
 0x284   : > { %1382 = vmatpush.msrb.mxu3 %v8358_v28  ;;  %1323 = vmatpush.msrb.mxu0 %v8359_v18  ;;  %v8366_v28 = vld [vmem:[#allocation52_spill] sm:$0xff]  ;;  %v8368_v18 = vld [vmem:[#allocation45_spill] sm:$0xff]  ;;  %v8370_v11 = vld [vmem:[#allocation47_spill] sm:$0xff] }
 0x285   : > { %4340 = vpow2.f32 %v4181_v16  ;;  %1343 = vmatpush.msrb.mxu1 %v8360_v38  ;;  %1363 = vmatpush.msrb.mxu2 %v8361_v17  ;;  %v8364_v16 = vld [vmem:[#allocation50_spill] sm:$0xff] }
 0x286   : > { %4342 = vpow2.f32 %v4182_v22  ;;  %1383 = vmatpush.msrb.mxu3 %v8362_v23  ;;  %1324 = vmatpush.msrb.mxu0 %v8363_v8  ;;  %v8369_v38 = vld [vmem:[#allocation46_spill] sm:$0xff] }
 0x287   : > { %v996_v39 = vpop.f32.mrf.mxu3  ;;  %1344 = vmatpush.msrb.mxu1 %v8364_v16  ;;  %1364 = vmatpush.msrb.mxu2 %v8365_v35  ;;  %v8372_v35 = vld [vmem:[#allocation41_spill] sm:$0xff] }
 0x288   : > { %v1002_v34 = vadd.f32 %v996_v39, %v918_v26  ;;  %1384 = vmatpush.msrb.mxu3 %v8366_v28  ;;  %1325 = vmatpush.msrb.mxu0 %v8368_v18  ;;  %v8371_v26 = vld [vmem:[#allocation48_spill] sm:$0xff]  ;;  %v8373_v28 = vld [vmem:[#allocation42_spill] sm:$0xff]  ;;  %v8385_v16 = vld [vmem:[#allocation29_spill] sm:$0xff] }
 0x289   : > { %1345 = vmatpush.msrb.mxu1 %v8369_v38  ;;  %1365 = vmatpush.msrb.mxu2 %v8370_v11  ;;  %v8375_v18 = vld [vmem:[#allocation44_spill] sm:$0xff]  ;;  %v904_v11 = vmul.f32 %v5694_v31, %v5638_v30  ;;  %v8383_v38 = vld [vmem:[#allocation35_spill] sm:$0xff] }
 0x28a   : > { %v4183_v22 = vmul.f32 -1.442695, %v1002_v34  ;;  %1385 = vmatpush.msrb.mxu3 %v8371_v26  ;;  %1326 = vmatpush.msrb.mxu0 %v8372_v35  ;;  %v8374_v34 = vld [vmem:[#allocation43_spill] sm:$0xff]  ;;  %v5712_v26 = vperm.slane %v8347_v14, 2  ;;  %v976_v35 = vpop.f32.mrf.mxu2  ;;  %v8384_v30 = vld [vmem:[#allocation36_spill] sm:$0xff] }
 0x28b   : > { %v4341_v17 = vpop.eup %4340  ;;  %1346 = vmatpush.msrb.mxu1 %v8373_v28  ;;  %1366 = vmatpush.msrb.mxu2 %v8374_v34  ;;  %v8380_v28 = vld [vmem:[#allocation40_spill] sm:$0xff]  ;;  %v8381_v34 = vld [vmem:[#allocation33_spill] sm:$0xff] }
 0x28c   : > { %v4343_v39 = vpop.eup %4342  ;;  %v5700_v8 = vadd.f32 1.0, %v4341_v17  ;;  %4344 = vpow2.f32 %v4183_v22  ;;  %1386 = vmatpush.msrb.mxu3 %v8375_v18  ;;  %8376 = vst [vmem:[#allocation215_spill] sm:$0xff] %v5712_v26  ;;  %v8377_v17 = vld [vmem:[#allocation37_spill] sm:$0xff]  ;;  %v8378_v22 = vld [vmem:[#allocation38_spill] sm:$0xff] }
 0x28d   : > { %v5704_v33 = vadd.f32 1.0, %v4343_v39  ;;  %1327 = vmatpush.msrb.mxu0 %v8377_v17  ;;  %1347 = vmatpush.msrb.mxu1 %v8378_v22  ;;  %v8379_v39 = vld [vmem:[#allocation39_spill] sm:$0xff]  ;;  %v8382_v18 = vld [vmem:[#allocation34_spill] sm:$0xff]  ;;  %v917_v17 = vadd.f32 %v5712_v26, %v904_v11 }
 0x28e   : > { %4346 = vrcp.f32 %v5700_v8  ;;  %1367 = vmatpush.msrb.mxu2 %v8379_v39  ;;  %1387 = vmatpush.msrb.mxu3 %v8380_v28  ;;  %v8386_v22 = vld [vmem:[#allocation30_spill] sm:$0xff]  ;;  %v8387_v39 = vld [vmem:[#allocation31_spill] sm:$0xff]  ;;  %v8388_v28 = vld [vmem:[#allocation32_spill] sm:$0xff]  ;;  %vm1012_vm14 = vweird.f32 %v5700_v8 }
 0x28f   : > { %4348 = vrcp.f32 %v5704_v33  ;;  %1328 = vmatpush.msrb.mxu0 %v8381_v34  ;;  %1348 = vmatpush.msrb.mxu1 %v8382_v18  ;;  %v1001_v18 = vadd.f32 %v976_v35, %v917_v17  ;;  %vm1031_vm15 = vweird.f32 %v5704_v33 }
 0x290   : > { %1368 = vmatpush.msrb.mxu2 %v8383_v38  ;;  %1388 = vmatpush.msrb.mxu3 %v8384_v30  ;;  %v8390_v38 = vld [vmem:[#allocation26_spill] sm:$0xff] }
 0x291   : > { %1329 = vmatpush.msrb.mxu0 %v8385_v16  ;;  %1349 = vmatpush.msrb.mxu1 %v8386_v22 }
 0x292   : > { %v4345_v14 = vpop.eup %4344  ;;  %1369 = vmatpush.msrb.mxu2 %v8387_v39  ;;  %1389 = vmatpush.msrb.mxu3 %v8388_v28 }
 0x293   : > { %v5726_v23 = vadd.f32 1.0, %v4345_v14  ;;  %1330 = vmatpush.msrb.mxu0 %v8389_v2  ;;  %1350 = vmatpush.msrb.mxu1 %v8390_v38  ;;  %v8391_v14 = vld [vmem:[#allocation21_spill] sm:$0xff]  ;;  %v1018_v38 = vand.u32 2147483648, %v5700_v8 }
 0x294   : > { %v4347_v34 = vpop.eup %4346  ;;  %1370 = vmatpush.msrb.mxu2 %v8241_v12  ;;  %1390 = vmatpush.msrb.mxu3 %v8242_v19  ;;  %v1037_v19 = vand.u32 2147483648, %v5704_v33 }
 0x295   : > { %v4349_v30 = vpop.eup %4348  ;;  %v1008_v10 = vmul.f32 %v4347_v34, %v5700_v8  ;;  %4350 = vrcp.f32 %v5726_v23  ;;  %1331 = vmatpush.msrb.mxu0 %v8391_v14  ;;  %1351 = vmatpush.msrb.mxu1 %v8244_v1  ;;  %vm1013_vm12 = vweird.f32 %v4347_v34  ;;  %v1016_v14 = vand.u32 2147483647, %v5700_v8 }
 0x296   : > { %v1027_v11 = vmul.f32 %v4349_v30, %v5704_v33  ;;  %1371 = vmatpush.msrb.mxu2 %v8245_v3  ;;  %1391 = vmatpush.msrb.mxu3 %v8246_v13  ;;  %4352 = vtanh.f32 %v1001_v18  ;;  %vm1032_vm13 = vweird.f32 %v4349_v30  ;;  %v4742_v13 = vmov 1   ;;  %vm1014_vm0 = vmor %vm1012_vm14, %vm1013_vm12 }
 0x297   : > { %v1009_v35 = vsub.f32 1.0, %v1008_v10  ;;  %1332 = vmatpush.msrb.mxu0 %v8247_v27  ;;  %1352 = vmatpush.msrb.mxu1 %v8248_v9  ;;  %vm1033_vm1 = vmor %vm1031_vm15, %vm1032_vm13  ;;  %vm1017_vm2 = vcmp.eq.f32.partialorder %v1016_v14, 8.507059e+37  ;;  %vm1051_vm5 = vweird.f32 %v5726_v23  ;;  %v8399_v14 = vld [vmem:[#allocation175_spill] sm:$0xff] }
 0x298   : > { %v1028_v17 = vsub.f32 1.0, %v1027_v11  ;;  %1372 = vmatpush.msrb.mxu2 %v8249_v20  ;;  %1392 = vmatpush.msrb.mxu3 %v8250_v21  ;;  %v1035_v11 = vand.u32 2147483647, %v5704_v33  ;;  %v884_v21 = vld [vmem:[#allocation3] sm:$0xff] }
 0x299   : > { %v1010_v12 = vmul.f32 %v4347_v34, %v1009_v35  ;;  %4332 = vset.pattern.permute.xlu0 %v4742_v13  ;;  %v1019_v35 = vor.u32 1.1754944e-38, %v1018_v38 }
 0x29a   : > { %v1029_v10 = vmul.f32 %v4349_v30, %v1028_v17  ;;  %1306 = vperm.xlu0 %4332, %v5300_v15   ;;  %v1038_v17 = vor.u32 1.1754944e-38, %v1037_v19  ;;  %vm1036_vm3 = vcmp.eq.f32.partialorder %v1035_v11, 8.507059e+37  ;;  %v1057_v19 = vand.u32 2147483648, %v5726_v23  ;;  %v8401_v11 = vld [vmem:[#allocation177_spill] sm:$0xff] }
 0x29b   : > { %v4351_v18 = vpop.eup %4350  ;;  %v1011_v27 = vadd.f32 %v4347_v34, %v1010_v12 }
 0x29c   : > { %v1030_v9 = vadd.f32 %v4349_v30, %v1029_v10  ;;  %v1047_v20 = vmul.f32 %v4351_v18, %v5726_v23  ;;  %v4353_v1 = vpop.eup %4352  ;;  %vm1052_vm4 = vweird.f32 %v4351_v18  ;;  %v8400_v10 = vld [vmem:[#allocation176_spill] sm:$0xff] }
 0x29d   : > { %v1015_v3 = vsel %vm1014_vm0, %v4347_v34, %v1011_v27  ;;  %v1055_v27 = vand.u32 2147483647, %v5726_v23  ;;  %vm1053_vm6 = vmor %vm1051_vm5, %vm1052_vm4  ;;  %v8395_v23 = vld [vmem:[#allocation179_spill] sm:$0xff]  ;;  %v8396_v34 = vld [vmem:[#allocation180_spill] sm:$0xff] }
 0x29e   : > { %v1020_v13 = vsel %vm1017_vm2, %v1019_v35, %v1015_v3  ;;  %v1034_v2 = vsel %vm1033_vm1, %v4349_v30, %v1030_v9  ;;  %v1048_v12 = vsub.f32 1.0, %v1047_v20  ;;  %v1058_v3 = vor.u32 1.1754944e-38, %v1057_v19  ;;  %v8398_v30 = vld [vmem:[#allocation174_spill] sm:$0xff]  ;;  %v8403_v35 = vld [vmem:[#allocation171_spill] sm:$0xff]  ;;  %v8409_v19 = vld [vmem:[#allocation169_spill] sm:$0xff] }
 0x29f   : > { %v1039_v8 = vsel %vm1036_vm3, %v1038_v17, %v1034_v2  ;;  %v1062_v28 = vmul.f32 %v4353_v1, %v1020_v13  ;;  %vm1056_vm7 = vcmp.eq.f32.partialorder %v1055_v27, 8.507059e+37  ;;  %v8394_v1 = vld [vmem:[#allocation178_spill] sm:$0xff]  ;;  %v8404_v17 = vld [vmem:[#allocation172_spill] sm:$0xff]  ;;  %v8405_v13 = vld [vmem:[#allocation173_spill] sm:$0xff] }
 0x2a0   : > { %v1061_v15 = vmul.f32 %v1039_v8, %v884_v21  ;;  %v1049_v39 = vmul.f32 %v4351_v18, %v1048_v12  ;;  %v8406_v12 = vld [vmem:[#allocation166_spill] sm:$0xff]  ;;  %v8407_v8 = vld [vmem:[#allocation167_spill] sm:$0xff] }
 0x2a1   : > { %v8410_v27 = vld [vmem:[#allocation162_spill] sm:$0xff] }
 0x2a2   : > { %v5753_v33 = vadd.f32 %v1062_v28, %v1061_v15  ;;  %v1050_v38 = vadd.f32 %v4351_v18, %v1049_v39  ;;  %v8392_v15 = vld [vmem:[#allocation184_spill] sm:$0xff]  ;;  %v8393_v28 = vld [vmem:[#allocation185_spill] sm:$0xff] }
 0x2a3   : > { %v8397_v39 = vld [vmem:[#allocation181_spill] sm:$0xff] }
 0x2a4   : > { %4354 = vtanh.f32 %v5753_v33  ;;  %v1054_v9 = vsel %vm1053_vm6, %v4351_v18, %v1050_v38  ;;  %v8402_v18 = vld [vmem:[#allocation170_spill] sm:$0xff]  ;;  %v8408_v38 = vld [vmem:[#allocation168_spill] sm:$0xff] }
 0x2a5   : > { %v1059_v20 = vsel %vm1056_vm7, %v1058_v3, %v1054_v9  ;;  %v8411_v9 = vld [vmem:[#allocation163_spill] sm:$0xff]  ;;  %v8412_v3 = vld [vmem:[#allocation164_spill] sm:$0xff] }
 0x2aa   : > { %v4355_v2 = vpop.eup %4354 }
 0x2ab   : > { %v1065_v21 = vmul.f32 %v4355_v2, %v1059_v20  ;;  %v8413_v2 = vld [vmem:[#allocation165_spill] sm:$0xff]  ;;  %v8414_v20 = vld [vmem:[#allocation158_spill] sm:$0xff] }
 0x2ad   : > { %1162 = vmatmul.f32.vlgmr.msra.gmra.mxu0 %v1065_v21  ;;  %1182 = vmatmul.f32.vlgmr.msra.gmra.mxu1 %v1065_v21 }
 0x2ae   : > { %1202 = vmatmul.f32.vlgmr.msra.gmra.mxu2 %v1065_v21  ;;  %1222 = vmatmul.f32.vlgmr.msra.gmra.mxu3 %v1065_v21 }
 0x2af   : > { %1464 = vmatpush.msra.mxu0 %v5287_v5  ;;  %1484 = vmatpush.msra.mxu1 %v5289_v61 }
 0x2b0   : > { %1504 = vmatpush.msra.mxu2 %v5291_v62  ;;  %1524 = vmatpush.msra.mxu3 %v5293_v0 }
 0x2b1   : > { %1465 = vmatpush.msra.mxu0 %v5279_v63  ;;  %1485 = vmatpush.msra.mxu1 %v5281_v57 }
 0x2b2   : > { %1505 = vmatpush.msra.mxu2 %v5283_v58  ;;  %1525 = vmatpush.msra.mxu3 %v5285_v60 }
 0x2b3   : > { %1466 = vmatpush.msra.mxu0 %v5265_v59  ;;  %1486 = vmatpush.msra.mxu1 %v5267_v53 }
 0x2b4   : > { %1506 = vmatpush.msra.mxu2 %v5269_v54  ;;  %1526 = vmatpush.msra.mxu3 %v5271_v56 }
 0x2b5   : > { %1333 = vmatmul.f32.vlgmr.msrb.gmra.mxu0 %v1065_v21  ;;  %1353 = vmatmul.f32.vlgmr.msrb.gmra.mxu1 %v1065_v21 }
 0x2b6   : > { %1373 = vmatmul.f32.vlgmr.msrb.gmra.mxu2 %v1065_v21  ;;  %1393 = vmatmul.f32.vlgmr.msrb.gmra.mxu3 %v1065_v21  ;;  %v8415_v21 = vld [vmem:[#allocation159_spill] sm:$0xff] }
 0x2b7   : > { %1467 = vmatpush.msra.mxu0 %v5257_v55  ;;  %1487 = vmatpush.msra.mxu1 %v5259_v49 }
 0x2b8   : > { %1507 = vmatpush.msra.mxu2 %v5261_v50  ;;  %1527 = vmatpush.msra.mxu3 %v5263_v52 }
 0x2b9   : > { %1468 = vmatpush.msra.mxu0 %v5248_v51  ;;  %1488 = vmatpush.msra.mxu1 %v5250_v45 }
 0x2ba   : > { %1508 = vmatpush.msra.mxu2 %v5252_v46  ;;  %1528 = vmatpush.msra.mxu3 %v5255_v48 }
 0x2bb   : > { %1469 = vmatpush.msra.mxu0 %v5240_v47  ;;  %1489 = vmatpush.msra.mxu1 %v5242_v41 }
 0x2bc   : > { %1509 = vmatpush.msra.mxu2 %v5244_v42  ;;  %1529 = vmatpush.msra.mxu3 %v5246_v44 }
 0x2bd   : > { %1470 = vmatpush.msra.mxu0 %v5231_v43  ;;  %1490 = vmatpush.msra.mxu1 %v5233_v37 }
 0x2be   : > { %1510 = vmatpush.msra.mxu2 %v8392_v15  ;;  %1530 = vmatpush.msra.mxu3 %v8393_v28 }
 0x2bf   : > { %1471 = vmatpush.msra.mxu0 %v8394_v1  ;;  %1491 = vmatpush.msra.mxu1 %v8395_v23 }
 0x2c0   : > { %1511 = vmatpush.msra.mxu2 %v8396_v34  ;;  %1531 = vmatpush.msra.mxu3 %v8397_v39 }
 0x2c1   : > { %1472 = vmatpush.msra.mxu0 %v8398_v30  ;;  %1492 = vmatpush.msra.mxu1 %v8399_v14 }
 0x2c2   : > { %1512 = vmatpush.msra.mxu2 %v8400_v10  ;;  %1532 = vmatpush.msra.mxu3 %v8401_v11 }
 0x2c3   : > { %1473 = vmatpush.msra.mxu0 %v8402_v18  ;;  %1493 = vmatpush.msra.mxu1 %v8403_v35  ;;  %v8496_v18 = vld [vmem:[#allocation78_spill] sm:$0xff] }
 0x2c4   : > { %1513 = vmatpush.msra.mxu2 %v8404_v17  ;;  %1533 = vmatpush.msra.mxu3 %v8405_v13  ;;  %v8416_v13 = vld [vmem:[#allocation160_spill] sm:$0xff]  ;;  %v8493_v17 = vld [vmem:[#allocation210_spill] sm:$0xff] }
 0x2c5   : > { %1474 = vmatpush.msra.mxu0 %v8406_v12  ;;  %1494 = vmatpush.msra.mxu1 %v8407_v8  ;;  %v8417_v12 = vld [vmem:[#allocation161_spill] sm:$0xff]  ;;  %v8418_v8 = vld [vmem:[#allocation154_spill] sm:$0xff]  ;;  %v5900_v23 = vperm.slane %v8493_v17, 3 }
 0x2c6   : > { %1514 = vmatpush.msra.mxu2 %v8408_v38  ;;  %1534 = vmatpush.msra.mxu3 %v8409_v19  ;;  %v8419_v38 = vld [vmem:[#allocation155_spill] sm:$0xff]  ;;  %v8420_v19 = vld [vmem:[#allocation156_spill] sm:$0xff] }
 0x2c7   : > { %1475 = vmatpush.msra.mxu0 %v8410_v27  ;;  %1495 = vmatpush.msra.mxu1 %v8411_v9  ;;  %v8421_v27 = vld [vmem:[#allocation157_spill] sm:$0xff]  ;;  %v8422_v9 = vld [vmem:[#allocation150_spill] sm:$0xff]  ;;  %8497 = vst [vmem:[#allocation217_spill] sm:$0xff] %v5900_v23 }
 0x2c8   : > { %1515 = vmatpush.msra.mxu2 %v8412_v3  ;;  %1535 = vmatpush.msra.mxu3 %v8413_v2  ;;  %v8423_v3 = vld [vmem:[#allocation151_spill] sm:$0xff]  ;;  %v8424_v2 = vld [vmem:[#allocation152_spill] sm:$0xff] }
 0x2c9   : > { %1476 = vmatpush.msra.mxu0 %v8414_v20  ;;  %1496 = vmatpush.msra.mxu1 %v8415_v21  ;;  %v8425_v20 = vld [vmem:[#allocation153_spill] sm:$0xff]  ;;  %v8426_v21 = vld [vmem:[#allocation146_spill] sm:$0xff] }
 0x2ca   : > { %1516 = vmatpush.msra.mxu2 %v8416_v13  ;;  %1536 = vmatpush.msra.mxu3 %v8417_v12  ;;  %v8427_v13 = vld [vmem:[#allocation147_spill] sm:$0xff]  ;;  %v8428_v12 = vld [vmem:[#allocation148_spill] sm:$0xff]  ;;  %v1123_v11 = vpop.f32.mrf.mxu2 }
 0x2cb   : > { %1477 = vmatpush.msra.mxu0 %v8418_v8  ;;  %1497 = vmatpush.msra.mxu1 %v8419_v38  ;;  %v8429_v8 = vld [vmem:[#allocation149_spill] sm:$0xff]  ;;  %v8430_v38 = vld [vmem:[#allocation142_spill] sm:$0xff] }
 0x2cc   : > { %1517 = vmatpush.msra.mxu2 %v8420_v19  ;;  %1537 = vmatpush.msra.mxu3 %v8421_v27  ;;  %v8431_v19 = vld [vmem:[#allocation143_spill] sm:$0xff]  ;;  %v8432_v27 = vld [vmem:[#allocation144_spill] sm:$0xff] }
 0x2cd   : > { %1478 = vmatpush.msra.mxu0 %v8422_v9  ;;  %1498 = vmatpush.msra.mxu1 %v8423_v3  ;;  %v8433_v9 = vld [vmem:[#allocation145_spill] sm:$0xff]  ;;  %v8434_v3 = vld [vmem:[#allocation138_spill] sm:$0xff] }
 0x2ce   : > { %1518 = vmatpush.msra.mxu2 %v8424_v2  ;;  %1538 = vmatpush.msra.mxu3 %v8425_v20  ;;  %v8435_v2 = vld [vmem:[#allocation139_spill] sm:$0xff]  ;;  %v8436_v20 = vld [vmem:[#allocation140_spill] sm:$0xff] }
 0x2cf   : > { %1479 = vmatpush.msra.mxu0 %v8426_v21  ;;  %1499 = vmatpush.msra.mxu1 %v8427_v13  ;;  %v8437_v21 = vld [vmem:[#allocation141_spill] sm:$0xff]  ;;  %v8438_v13 = vld [vmem:[#allocation134_spill] sm:$0xff] }
 0x2d0   : > { %1519 = vmatpush.msra.mxu2 %v8428_v12  ;;  %1539 = vmatpush.msra.mxu3 %v8429_v8  ;;  %v8439_v12 = vld [vmem:[#allocation135_spill] sm:$0xff]  ;;  %v8440_v8 = vld [vmem:[#allocation136_spill] sm:$0xff] }
 0x2d1   : > { %1544 = vmatpush.msrb.mxu0 %v8430_v38  ;;  %1564 = vmatpush.msrb.mxu1 %v8431_v19  ;;  %v8441_v38 = vld [vmem:[#allocation137_spill] sm:$0xff]  ;;  %v8442_v19 = vld [vmem:[#allocation130_spill] sm:$0xff] }
 0x2d2   : > { %1584 = vmatpush.msrb.mxu2 %v8432_v27  ;;  %1604 = vmatpush.msrb.mxu3 %v8433_v9  ;;  %v8443_v27 = vld [vmem:[#allocation131_spill] sm:$0xff]  ;;  %v8444_v9 = vld [vmem:[#allocation132_spill] sm:$0xff] }
 0x2d3   : > { %1545 = vmatpush.msrb.mxu0 %v8434_v3  ;;  %1565 = vmatpush.msrb.mxu1 %v8435_v2  ;;  %v8445_v3 = vld [vmem:[#allocation133_spill] sm:$0xff]  ;;  %v8446_v2 = vld [vmem:[#allocation126_spill] sm:$0xff] }
 0x2d4   : > { %1585 = vmatpush.msrb.mxu2 %v8436_v20  ;;  %1605 = vmatpush.msrb.mxu3 %v8437_v21  ;;  %v8447_v20 = vld [vmem:[#allocation127_spill] sm:$0xff]  ;;  %v8448_v21 = vld [vmem:[#allocation128_spill] sm:$0xff] }
 0x2d5   : > { %1546 = vmatpush.msrb.mxu0 %v8438_v13  ;;  %1566 = vmatpush.msrb.mxu1 %v8439_v12  ;;  %v8449_v13 = vld [vmem:[#allocation129_spill] sm:$0xff]  ;;  %v8450_v12 = vld [vmem:[#allocation122_spill] sm:$0xff] }
 0x2d6   : > { %1586 = vmatpush.msrb.mxu2 %v8440_v8  ;;  %1606 = vmatpush.msrb.mxu3 %v8441_v38  ;;  %v8451_v8 = vld [vmem:[#allocation123_spill] sm:$0xff]  ;;  %v8452_v38 = vld [vmem:[#allocation124_spill] sm:$0xff] }
 0x2d7   : > { %1547 = vmatpush.msrb.mxu0 %v8442_v19  ;;  %1567 = vmatpush.msrb.mxu1 %v8443_v27  ;;  %v8453_v19 = vld [vmem:[#allocation125_spill] sm:$0xff]  ;;  %v8454_v27 = vld [vmem:[#allocation118_spill] sm:$0xff] }
 0x2d8   : > { %1587 = vmatpush.msrb.mxu2 %v8444_v9  ;;  %1607 = vmatpush.msrb.mxu3 %v8445_v3  ;;  %v8455_v9 = vld [vmem:[#allocation119_spill] sm:$0xff]  ;;  %v8456_v3 = vld [vmem:[#allocation120_spill] sm:$0xff] }
 0x2d9   : > { %1548 = vmatpush.msrb.mxu0 %v8446_v2  ;;  %1568 = vmatpush.msrb.mxu1 %v8447_v20  ;;  %v8457_v2 = vld [vmem:[#allocation121_spill] sm:$0xff]  ;;  %v8458_v20 = vld [vmem:[#allocation114_spill] sm:$0xff] }
 0x2da   : > { %1588 = vmatpush.msrb.mxu2 %v8448_v21  ;;  %1608 = vmatpush.msrb.mxu3 %v8449_v13  ;;  %v8459_v21 = vld [vmem:[#allocation115_spill] sm:$0xff]  ;;  %v8460_v13 = vld [vmem:[#allocation116_spill] sm:$0xff] }
 0x2db   : > { %1549 = vmatpush.msrb.mxu0 %v8450_v12  ;;  %1569 = vmatpush.msrb.mxu1 %v8451_v8  ;;  %v8461_v12 = vld [vmem:[#allocation117_spill] sm:$0xff]  ;;  %v8462_v8 = vld [vmem:[#allocation110_spill] sm:$0xff] }
 0x2dc   : > { %1589 = vmatpush.msrb.mxu2 %v8452_v38  ;;  %1609 = vmatpush.msrb.mxu3 %v8453_v19  ;;  %v8463_v38 = vld [vmem:[#allocation111_spill] sm:$0xff]  ;;  %v8464_v19 = vld [vmem:[#allocation112_spill] sm:$0xff] }
 0x2dd   : > { %1550 = vmatpush.msrb.mxu0 %v8454_v27  ;;  %1570 = vmatpush.msrb.mxu1 %v8455_v9  ;;  %v8465_v27 = vld [vmem:[#allocation113_spill] sm:$0xff]  ;;  %v8466_v9 = vld [vmem:[#allocation106_spill] sm:$0xff] }
 0x2de   : > { %1590 = vmatpush.msrb.mxu2 %v8456_v3  ;;  %1610 = vmatpush.msrb.mxu3 %v8457_v2  ;;  %v8467_v3 = vld [vmem:[#allocation107_spill] sm:$0xff]  ;;  %v8468_v2 = vld [vmem:[#allocation108_spill] sm:$0xff] }
 0x2df   : > { %1551 = vmatpush.msrb.mxu0 %v8458_v20  ;;  %1571 = vmatpush.msrb.mxu1 %v8459_v21  ;;  %v8469_v20 = vld [vmem:[#allocation109_spill] sm:$0xff]  ;;  %v8470_v21 = vld [vmem:[#allocation102_spill] sm:$0xff] }
 0x2e0   : > { %1591 = vmatpush.msrb.mxu2 %v8460_v13  ;;  %1611 = vmatpush.msrb.mxu3 %v8461_v12  ;;  %v8471_v13 = vld [vmem:[#allocation103_spill] sm:$0xff]  ;;  %v8472_v12 = vld [vmem:[#allocation104_spill] sm:$0xff] }
 0x2e1   : > { %1552 = vmatpush.msrb.mxu0 %v8462_v8  ;;  %1572 = vmatpush.msrb.mxu1 %v8463_v38  ;;  %v8473_v8 = vld [vmem:[#allocation105_spill] sm:$0xff]  ;;  %v8474_v38 = vld [vmem:[#allocation98_spill] sm:$0xff] }
 0x2e2   : > { %1592 = vmatpush.msrb.mxu2 %v8464_v19  ;;  %1612 = vmatpush.msrb.mxu3 %v8465_v27  ;;  %v8475_v19 = vld [vmem:[#allocation99_spill] sm:$0xff]  ;;  %v8476_v27 = vld [vmem:[#allocation100_spill] sm:$0xff] }
 0x2e3   : > { %1553 = vmatpush.msrb.mxu0 %v8466_v9  ;;  %1573 = vmatpush.msrb.mxu1 %v8467_v3  ;;  %v8477_v9 = vld [vmem:[#allocation101_spill] sm:$0xff]  ;;  %v8478_v3 = vld [vmem:[#allocation94_spill] sm:$0xff] }
 0x2e4   : > { %1593 = vmatpush.msrb.mxu2 %v8468_v2  ;;  %1613 = vmatpush.msrb.mxu3 %v8469_v20  ;;  %v8479_v2 = vld [vmem:[#allocation95_spill] sm:$0xff]  ;;  %v8480_v20 = vld [vmem:[#allocation96_spill] sm:$0xff] }
 0x2e5   : > { %1554 = vmatpush.msrb.mxu0 %v8470_v21  ;;  %1574 = vmatpush.msrb.mxu1 %v8471_v13  ;;  %v8481_v21 = vld [vmem:[#allocation97_spill] sm:$0xff]  ;;  %v8482_v13 = vld [vmem:[#allocation90_spill] sm:$0xff] }
 0x2e6   : > { %1594 = vmatpush.msrb.mxu2 %v8472_v12  ;;  %1614 = vmatpush.msrb.mxu3 %v8473_v8  ;;  %v8483_v12 = vld [vmem:[#allocation91_spill] sm:$0xff]  ;;  %v8484_v8 = vld [vmem:[#allocation92_spill] sm:$0xff] }
 0x2e7   : > { %1555 = vmatpush.msrb.mxu0 %v8474_v38  ;;  %1575 = vmatpush.msrb.mxu1 %v8475_v19  ;;  %v8485_v38 = vld [vmem:[#allocation93_spill] sm:$0xff]  ;;  %v8486_v19 = vld [vmem:[#allocation86_spill] sm:$0xff] }
 0x2e8   : > { %1595 = vmatpush.msrb.mxu2 %v8476_v27  ;;  %1615 = vmatpush.msrb.mxu3 %v8477_v9  ;;  %v8487_v9 = vld [vmem:[#allocation88_spill] sm:$0xff] }
 0x2e9   : > { %1556 = vmatpush.msrb.mxu0 %v8478_v3  ;;  %1576 = vmatpush.msrb.mxu1 %v8479_v2  ;;  %v8488_v3 = vld [vmem:[#allocation89_spill] sm:$0xff]  ;;  %v8489_v2 = vld [vmem:[#allocation82_spill] sm:$0xff] }
 0x2ea   : > { %1596 = vmatpush.msrb.mxu2 %v8480_v20  ;;  %1616 = vmatpush.msrb.mxu3 %v8481_v21  ;;  %v8490_v20 = vld [vmem:[#allocation83_spill] sm:$0xff]  ;;  %v8491_v21 = vld [vmem:[#allocation84_spill] sm:$0xff] }
 0x2eb   : > { %1557 = vmatpush.msrb.mxu0 %v8482_v13  ;;  %1577 = vmatpush.msrb.mxu1 %v8483_v12  ;;  %v8492_v13 = vld [vmem:[#allocation85_spill] sm:$0xff]  ;;  %v1083_v12 = vpop.f32.mrf.mxu0 }
 0x2ec   : > { %1597 = vmatpush.msrb.mxu2 %v8484_v8  ;;  %1617 = vmatpush.msrb.mxu3 %v8485_v38  ;;  %v1103_v8 = vpop.f32.mrf.mxu1  ;;  %v1143_v38 = vpop.f32.mrf.mxu3 }
 0x2ed   : > { %1558 = vmatpush.msrb.mxu0 %v8486_v19  ;;  %1578 = vmatpush.msrb.mxu1 %v8337_v29  ;;  %v5888_v19 = vperm.slane %v8493_v17, 0  ;;  %v5891_v29 = vperm.slane %v8493_v17, 1 }
 0x2ee   : > { %1598 = vmatpush.msrb.mxu2 %v8487_v9  ;;  %1618 = vmatpush.msrb.mxu3 %v8488_v3 }
 0x2ef   : > { %1559 = vmatpush.msrb.mxu0 %v8489_v2  ;;  %1579 = vmatpush.msrb.mxu1 %v8490_v20  ;;  %8494 = vst [vmem:[#allocation210_spill] sm:$0xff] %v5888_v19 }
 0x2f0   : > { %1599 = vmatpush.msrb.mxu2 %v8491_v21  ;;  %1619 = vmatpush.msrb.mxu3 %v8492_v13  ;;  %8495 = vst [vmem:[#allocation216_spill] sm:$0xff] %v5891_v29 }
 0x30c   : > { %v1307_v27 = vpop.permute.xlu0 %1306 }
 0x30d   : > { %v1309_v20 = vmul.f32 %v1307_v27, %v8496_v18  ;;  %v1310_v21 = vmul.f32 %v1307_v27, %v5636_v36 }
 0x30f   : > { %v1313_v39 = vadd.f32 %v1309_v20, %v5643_v40  ;;  %v1314_v34 = vadd.f32 %v1310_v21, %v5648_v6 }
 0x32a   : > { %v1163_v9 = vpop.f32.mrf.mxu0  ;;  %v1183_v3 = vpop.f32.mrf.mxu1 }
 0x32b   : > { %v1164_v35 = vadd.f32 %v1163_v9, %v1083_v12  ;;  %v1184_v2 = vadd.f32 %v1183_v3, %v1103_v8 }
 0x32d   : > { %v1235_v13 = vadd.f32 %v5888_v19, %v1164_v35  ;;  %v1236_v10 = vadd.f32 %v5891_v29, %v1184_v2 }
 0x32f   : > { %v4184_v14 = vmul.f32 -1.442695, %v1235_v13  ;;  %v4185_v30 = vmul.f32 -1.442695, %v1236_v10  ;;  %v1312_v10 = vmul.f32 %v1307_v27, %v5661_v24 }
 0x331   : > { %4356 = vpow2.f32 %v4184_v14  ;;  %v1223_v12 = vpop.f32.mrf.mxu3  ;;  %v1203_v20 = vpop.f32.mrf.mxu2 }
 0x332   : > { %4358 = vpow2.f32 %v4185_v30  ;;  %v1224_v8 = vadd.f32 %v1223_v12, %v1143_v38  ;;  %v1334_v9 = vpop.f32.mrf.mxu0  ;;  %v1354_v3 = vpop.f32.mrf.mxu1 }
 0x333   : > { %v1397_v36 = vadd.f32 %v1334_v9, %v1313_v39  ;;  %v1398_v18 = vadd.f32 %v1354_v3, %v1314_v34  ;;  %v1316_v39 = vadd.f32 %v1312_v10, %v5674_v4  ;;  %v1204_v34 = vadd.f32 %v1203_v20, %v1123_v11 }
 0x334   : > { %v1238_v35 = vadd.f32 %v5900_v23, %v1224_v8 }
 0x335   : > { %v4187_v2 = vmul.f32 -1.442695, %v1397_v36  ;;  %v4188_v13 = vmul.f32 -1.442695, %v1398_v18  ;;  %v5906_v36 = vperm.slane %v8493_v17, 2  ;;  %v1311_v18 = vmul.f32 %v1307_v27, %v5694_v31 }
 0x336   : > { %v4186_v40 = vmul.f32 -1.442695, %v1238_v35 }
 0x337   : > { %v4357_v21 = vpop.eup %4356  ;;  %4360 = vpow2.f32 %v4187_v2  ;;  %8498 = vst [vmem:[#allocation218_spill] sm:$0xff] %v5906_v36  ;;  %v1315_v11 = vadd.f32 %v1311_v18, %v5712_v26 }
 0x338   : > { %v4359_v6 = vpop.eup %4358  ;;  %v1242_v29 = vadd.f32 1.0, %v4357_v21  ;;  %4362 = vpow2.f32 %v4186_v40  ;;  %v1237_v40 = vadd.f32 %v5906_v36, %v1204_v34 }
 0x339   : > { %v1261_v14 = vadd.f32 1.0, %v4359_v6  ;;  %4364 = vpow2.f32 %v4188_v13  ;;  %v1394_v30 = vpop.f32.mrf.mxu3  ;;  %v1374_v17 = vpop.f32.mrf.mxu2 }
 0x33a   : > { %4366 = vrcp.f32 %v1242_v29  ;;  %v1400_v38 = vadd.f32 %v1394_v30, %v1316_v39  ;;  %v1252_v20 = vand.u32 2147483647, %v1242_v29  ;;  %v1254_v21 = vand.u32 2147483648, %v1242_v29 }
 0x33b   : > { %4368 = vrcp.f32 %v1261_v14  ;;  %v1273_v39 = vand.u32 2147483648, %v1261_v14  ;;  %v1271_v34 = vand.u32 2147483647, %v1261_v14  ;;  %vm1267_vm8 = vweird.f32 %v1261_v14 }
 0x33c   : > { %v4189_v13 = vmul.f32 -1.442695, %v1400_v38  ;;  %vm1248_vm9 = vweird.f32 %v1242_v29  ;;  %vm5920_vm11 = vcmp.eq.f32.partialorder %v1252_v20, 8.507059e+37  ;;  %v1255_v26 = vor.u32 1.1754944e-38, %v1254_v21 }
 0x33d   : > { %v4361_v12 = vpop.eup %4360  ;;  %v1274_v24 = vor.u32 1.1754944e-38, %v1273_v39  ;;  %vm5924_vm13 = vcmp.eq.f32.partialorder %v1271_v34, 8.507059e+37  ;;  %v886_v39 = vld [vmem:[#allocation5] sm:$0xff] }
 0x33e   : > { %v4363_v8 = vpop.eup %4362  ;;  %v5909_v9 = vadd.f32 1.0, %v4361_v12 }
 0x33f   : > { %v4365_v3 = vpop.eup %4364  ;;  %v5912_v6 = vadd.f32 1.0, %v4363_v8  ;;  %v1399_v8 = vadd.f32 %v1374_v17, %v1315_v11 }
 0x340   : > { %v4367_v35 = vpop.eup %4366  ;;  %4370 = vrcp.f32 %v5909_v9  ;;  %v5915_v2 = vadd.f32 1.0, %v4365_v3  ;;  %vm1410_vm14 = vweird.f32 %v5909_v9  ;;  %v1414_v21 = vand.u32 2147483647, %v5909_v9 }
 0x341   : > { %v4369_v27 = vpop.eup %4368  ;;  %v1244_v10 = vmul.f32 %v4367_v35, %v1242_v29  ;;  %4372 = vrcp.f32 %v5912_v6  ;;  %vm1249_vm10 = vweird.f32 %v4367_v35  ;;  %vm1287_vm2 = vweird.f32 %v5912_v6 }
 0x342   : > { %v1263_v30 = vmul.f32 %v4369_v27, %v1261_v14  ;;  %4374 = vrcp.f32 %v5915_v2  ;;  %vm1268_vm12 = vweird.f32 %v4369_v27  ;;  %vm1250_vm15 = vmor %vm1248_vm9, %vm1249_vm10  ;;  %vm1429_vm0 = vweird.f32 %v5915_v2 }
 0x343   : > { %v1245_v12 = vsub.f32 1.0, %v1244_v10  ;;  %4376 = vtanh.f32 %v1237_v40  ;;  %vm1269_vm1 = vmor %vm1267_vm8, %vm1268_vm12  ;;  %v1435_v28 = vand.u32 2147483648, %v5915_v2  ;;  %vm1415_vm6 = vcmp.eq.f32.partialorder %v1414_v21, 8.507059e+37 }
 0x344   : > { %v1264_v3 = vsub.f32 1.0, %v1263_v30  ;;  %4378 = vpow2.f32 %v4189_v13 }
 0x345   : > { %v1246_v18 = vmul.f32 %v4367_v35, %v1245_v12  ;;  %4380 = vtanh.f32 %v1399_v8 }
 0x346   : > { %v4371_v31 = vpop.eup %4370  ;;  %v1265_v4 = vmul.f32 %v4369_v27, %v1264_v3 }
 0x347   : > { %v5928_v40 = vpop.eup %4372  ;;  %v1247_v11 = vadd.f32 %v4367_v35, %v1246_v18  ;;  %v1406_v17 = vmul.f32 %v4371_v31, %v5909_v9  ;;  %vm1411_vm3 = vweird.f32 %v4371_v31 }
 0x348   : > { %v4375_v13 = vpop.eup %4374  ;;  %v1266_v10 = vadd.f32 %v4369_v27, %v1265_v4  ;;  %v1283_v20 = vmul.f32 %v5928_v40, %v5912_v6  ;;  %v1416_v4 = vand.u32 2147483648, %v5909_v9  ;;  %vm1412_vm5 = vmor %vm1410_vm14, %vm1411_vm3  ;;  %vm1288_vm7 = vweird.f32 %v5928_v40 }
 0x349   : > { %v4377_v30 = vpop.eup %4376  ;;  %v1251_v34 = vsel %vm1250_vm15, %v4367_v35, %v1247_v11  ;;  %v1407_v12 = vsub.f32 1.0, %v1406_v17  ;;  %v1425_v29 = vmul.f32 %v4375_v13, %v5915_v2  ;;  %vm1430_vm4 = vweird.f32 %v4375_v13  ;;  %vm1289_vm10 = vmor %vm1287_vm2, %vm1288_vm7 }
 0x34a   : > { %v4379_v8 = vpop.eup %4378  ;;  %v1256_v3 = vsel %vm5920_vm11, %v1255_v26, %v1251_v34  ;;  %v1270_v18 = vsel %vm1269_vm1, %v4369_v27, %v1266_v10  ;;  %v1284_v23 = vsub.f32 1.0, %v1283_v20  ;;  %v1433_v26 = vand.u32 2147483647, %v5915_v2  ;;  %vm1431_vm8 = vmor %vm1429_vm0, %vm1430_vm4 }
 0x34b   : > { %v1275_v14 = vsel %vm5924_vm13, %v1274_v24, %v1270_v18  ;;  %v1298_v19 = vmul.f32 %v4377_v30, %v1256_v3  ;;  %v1426_v1 = vsub.f32 1.0, %v1425_v29  ;;  %v1408_v35 = vmul.f32 %v4371_v31, %v1407_v12  ;;  %v4381_v37 = vpop.eup %4380  ;;  %v8503_v3 = vld [vmem:[#allocation77_spill] sm:$0xff] }
 0x34c   : > { %v1297_v11 = vmul.f32 %v1275_v14, %v886_v39  ;;  %v1285_v17 = vmul.f32 %v5928_v40, %v1284_v23  ;;  %v1443_v15 = vadd.f32 1.0, %v4379_v8  ;;  %v1417_v24 = vor.u32 1.1754944e-38, %v1416_v4  ;;  %v8504_v14 = vld [vmem:[#allocation73_spill] sm:$0xff] }
 0x34d   : > { %v1427_v43 = vmul.f32 %v4375_v13, %v1426_v1  ;;  %v1409_v38 = vadd.f32 %v4371_v31, %v1408_v35  ;;  %v1293_v1 = vand.u32 2147483648, %v5912_v6  ;;  %vm1434_vm9 = vcmp.eq.f32.partialorder %v1433_v26, 8.507059e+37  ;;  %v8505_v35 = vld [vmem:[#allocation74_spill] sm:$0xff]  ;;  %v8507_v26 = vld [vmem:[#allocation76_spill] sm:$0xff] }
 0x34e   : > { %v5949_v27 = vadd.f32 %v1298_v19, %v1297_v11  ;;  %4382 = vrcp.f32 %v1443_v15  ;;  %v1286_v10 = vadd.f32 %v5928_v40, %v1285_v17  ;;  %v1436_v19 = vor.u32 1.1754944e-38, %v1435_v28 }
 0x34f   : > { %v1413_v36 = vsel %vm1412_vm5, %v4371_v31, %v1409_v38  ;;  %v1428_v23 = vadd.f32 %v4375_v13, %v1427_v43  ;;  %v1291_v30 = vand.u32 2147483647, %v5912_v6  ;;  %v1294_v12 = vor.u32 1.1754944e-38, %v1293_v1  ;;  %v8506_v38 = vld [vmem:[#allocation75_spill] sm:$0xff] }
 0x350   : > { %4384 = vtanh.f32 %v5949_v27  ;;  %v1418_v20 = vsel %vm1415_vm6, %v1417_v24, %v1413_v36  ;;  %v1290_v39 = vsel %vm1289_vm10, %v5928_v40, %v1286_v10  ;;  %vm1449_vm13 = vweird.f32 %v1443_v15  ;;  %v8509_v24 = vld [vmem:[#allocation70_spill] sm:$0xff]  ;;  %v8511_v10 = vld [vmem:[#allocation72_spill] sm:$0xff] }
 0x351   : > { %v1432_v9 = vsel %vm1431_vm8, %v4375_v13, %v1428_v23  ;;  %v1460_v21 = vmul.f32 %v4381_v37, %v1418_v20  ;;  %vm1292_vm11 = vcmp.eq.f32.partialorder %v1291_v30, 8.507059e+37  ;;  %v1453_v40 = vand.u32 2147483647, %v1443_v15  ;;  %v8510_v23 = vld [vmem:[#allocation71_spill] sm:$0xff]  ;;  %v8513_v20 = vld [vmem:[#allocation66_spill] sm:$0xff]  ;;  %v8516_v30 = vld [vmem:[#allocation61_spill] sm:$0xff] }
 0x352   : > { %v1437_v31 = vsel %vm1434_vm9, %v1436_v19, %v1432_v9  ;;  %v1295_v13 = vsel %vm1292_vm11, %v1294_v12, %v1290_v39  ;;  %v8512_v19 = vld [vmem:[#allocation65_spill] sm:$0xff]  ;;  %v8514_v9 = vld [vmem:[#allocation67_spill] sm:$0xff]  ;;  %v8519_v39 = vld [vmem:[#allocation64_spill] sm:$0xff] }
 0x353   : > { %v1459_v43 = vmul.f32 %v1437_v31, %v5753_v33  ;;  %v1455_v33 = vand.u32 2147483648, %v1443_v15  ;;  %vm1454_vm15 = vcmp.eq.f32.partialorder %v1453_v40, 8.507059e+37  ;;  %v8517_v31 = vld [vmem:[#allocation62_spill] sm:$0xff] }
 0x354   : > { %v4383_v34 = vpop.eup %4382  ;;  %v8521_v12 = vld [vmem:[#allocation58_spill] sm:$0xff] }
 0x355   : > { %v5965_v29 = vadd.f32 %v1460_v21, %v1459_v43  ;;  %v1445_v2 = vmul.f32 %v4383_v34, %v1443_v15  ;;  %vm1450_vm12 = vweird.f32 %v4383_v34  ;;  %v1456_v17 = vor.u32 1.1754944e-38, %v1455_v33  ;;  %v8508_v15 = vld [vmem:[#allocation69_spill] sm:$0xff]  ;;  %v8515_v21 = vld [vmem:[#allocation68_spill] sm:$0xff]  ;;  %v8518_v43 = vld [vmem:[#allocation63_spill] sm:$0xff] }
 0x356   : > { %v4385_v28 = vpop.eup %4384  ;;  %vm1451_vm14 = vmor %vm1449_vm13, %vm1450_vm12  ;;  %v8527_v33 = vld [vmem:[#allocation56_spill] sm:$0xff]  ;;  %v8529_v40 = vld [vmem:[#allocation50_spill] sm:$0xff] }
 0x357   : > { %v1446_v4 = vsub.f32 1.0, %v1445_v2  ;;  %v5967_v37 = vmul.f32 %v4385_v28, %v1295_v13  ;;  %4386 = vtanh.f32 %v5965_v29  ;;  %v8522_v2 = vld [vmem:[#allocation59_spill] sm:$0xff]  ;;  %v8523_v28 = vld [vmem:[#allocation60_spill] sm:$0xff]  ;;  %v8524_v13 = vld [vmem:[#allocation53_spill] sm:$0xff] }
 0x359   : > { %v1447_v8 = vmul.f32 %v4383_v34, %v1446_v4  ;;  %1480 = vmatmul.f32.vlgmr.msra.gmra.mxu0 %v5967_v37  ;;  %1500 = vmatmul.f32.vlgmr.msra.gmra.mxu1 %v5967_v37  ;;  %v8525_v4 = vld [vmem:[#allocation54_spill] sm:$0xff] }
 0x35a   : > { %1520 = vmatmul.f32.vlgmr.msra.gmra.mxu2 %v5967_v37  ;;  %1540 = vmatmul.f32.vlgmr.msra.gmra.mxu3 %v5967_v37 }
 0x35b   : > { %v1448_v6 = vadd.f32 %v4383_v34, %v1447_v8  ;;  %1706 = vmatpush.msra.mxu0 %v8503_v3  ;;  %1726 = vmatpush.msra.mxu1 %v8188_v25  ;;  %v8526_v8 = vld [vmem:[#allocation55_spill] sm:$0xff] }
 0x35c   : > { %1746 = vmatpush.msra.mxu2 %v8189_v7  ;;  %1766 = vmatpush.msra.mxu3 %v8190_v32 }
 0x35d   : > { %v1452_v18 = vsel %vm1451_vm14, %v4383_v34, %v1448_v6  ;;  %1707 = vmatpush.msra.mxu0 %v8504_v14  ;;  %1727 = vmatpush.msra.mxu1 %v8505_v35  ;;  %v4387_v11 = vpop.eup %4386  ;;  %v8520_v34 = vld [vmem:[#allocation57_spill] sm:$0xff] }
 0x35e   : > { %1747 = vmatpush.msra.mxu2 %v8506_v38  ;;  %1767 = vmatpush.msra.mxu3 %v8507_v26  ;;  %v1457_v36 = vsel %vm1454_vm15, %v1456_v17, %v1452_v18  ;;  %v8528_v6 = vld [vmem:[#allocation49_spill] sm:$0xff]  ;;  %v8530_v18 = vld [vmem:[#allocation51_spill] sm:$0xff] }
 0x35f   : > { %1708 = vmatpush.msra.mxu0 %v8508_v15  ;;  %1728 = vmatpush.msra.mxu1 %v8509_v24  ;;  %v1463_v1 = vmul.f32 %v4387_v11, %v1457_v36  ;;  %v8531_v11 = vld [vmem:[#allocation52_spill] sm:$0xff]  ;;  %v8532_v17 = vld [vmem:[#allocation45_spill] sm:$0xff]  ;;  %v8533_v36 = vld [vmem:[#allocation46_spill] sm:$0xff] }
 0x360   : > { %1748 = vmatpush.msra.mxu2 %v8510_v23  ;;  %1768 = vmatpush.msra.mxu3 %v8511_v10 }
 0x361   : > { %1709 = vmatpush.msra.mxu0 %v8512_v19  ;;  %1729 = vmatpush.msra.mxu1 %v8513_v20 }
 0x362   : > { %1749 = vmatpush.msra.mxu2 %v8514_v9  ;;  %1769 = vmatpush.msra.mxu3 %v8515_v21 }
 0x363   : > { %1560 = vmatmul.f32.vlgmr.msrb.gmra.mxu0 %v1463_v1  ;;  %1580 = vmatmul.f32.vlgmr.msrb.gmra.mxu1 %v1463_v1 }
 0x364   : > { %1600 = vmatmul.f32.vlgmr.msrb.gmra.mxu2 %v1463_v1  ;;  %1620 = vmatmul.f32.vlgmr.msrb.gmra.mxu3 %v1463_v1 }
 0x365   : > { %1710 = vmatpush.msra.mxu0 %v8516_v30  ;;  %1730 = vmatpush.msra.mxu1 %v8517_v31 }
 0x366   : > { %1750 = vmatpush.msra.mxu2 %v8518_v43  ;;  %1770 = vmatpush.msra.mxu3 %v8519_v39 }
 0x367   : > { %1711 = vmatpush.msra.mxu0 %v8520_v34  ;;  %1731 = vmatpush.msra.mxu1 %v8521_v12 }
 0x368   : > { %1751 = vmatpush.msra.mxu2 %v8522_v2  ;;  %1771 = vmatpush.msra.mxu3 %v8523_v28  ;;  %v8534_v28 = vld [vmem:[#allocation47_spill] sm:$0xff] }
 0x369   : > { %1712 = vmatpush.msra.mxu0 %v8524_v13  ;;  %1732 = vmatpush.msra.mxu1 %v8525_v4  ;;  %v8535_v13 = vld [vmem:[#allocation48_spill] sm:$0xff]  ;;  %v8536_v4 = vld [vmem:[#allocation41_spill] sm:$0xff] }
 0x36a   : > { %1752 = vmatpush.msra.mxu2 %v8526_v8  ;;  %1772 = vmatpush.msra.mxu3 %v8527_v33  ;;  %v8537_v8 = vld [vmem:[#allocation42_spill] sm:$0xff]  ;;  %v8538_v33 = vld [vmem:[#allocation43_spill] sm:$0xff] }
 0x36b   : > { %1713 = vmatpush.msra.mxu0 %v8528_v6  ;;  %1733 = vmatpush.msra.mxu1 %v8529_v40  ;;  %v8539_v6 = vld [vmem:[#allocation44_spill] sm:$0xff]  ;;  %v8540_v40 = vld [vmem:[#allocation37_spill] sm:$0xff] }
 0x36c   : > { %1753 = vmatpush.msra.mxu2 %v8530_v18  ;;  %1773 = vmatpush.msra.mxu3 %v8531_v11  ;;  %v8541_v18 = vld [vmem:[#allocation38_spill] sm:$0xff]  ;;  %v8542_v11 = vld [vmem:[#allocation39_spill] sm:$0xff] }
 0x36d   : > { %1714 = vmatpush.msra.mxu0 %v8532_v17  ;;  %1734 = vmatpush.msra.mxu1 %v8533_v36  ;;  %v8543_v17 = vld [vmem:[#allocation40_spill] sm:$0xff]  ;;  %v8544_v36 = vld [vmem:[#allocation33_spill] sm:$0xff] }
 0x36e   : > { %1754 = vmatpush.msra.mxu2 %v8534_v28  ;;  %1774 = vmatpush.msra.mxu3 %v8535_v13  ;;  %v8545_v28 = vld [vmem:[#allocation34_spill] sm:$0xff]  ;;  %v8546_v13 = vld [vmem:[#allocation35_spill] sm:$0xff] }
 0x36f   : > { %1715 = vmatpush.msra.mxu0 %v8536_v4  ;;  %1735 = vmatpush.msra.mxu1 %v8537_v8  ;;  %v8547_v4 = vld [vmem:[#allocation36_spill] sm:$0xff] }
 0x370   : > { %1755 = vmatpush.msra.mxu2 %v8538_v33  ;;  %1775 = vmatpush.msra.mxu3 %v8539_v6  ;;  %v8548_v6 = vld [vmem:[#allocation31_spill] sm:$0xff] }
 0x371   : > { %1716 = vmatpush.msra.mxu0 %v8540_v40  ;;  %1736 = vmatpush.msra.mxu1 %v8541_v18  ;;  %v8549_v40 = vld [vmem:[#allocation32_spill] sm:$0xff]  ;;  %v8550_v18 = vld [vmem:[#allocation25_spill] sm:$0xff] }
 0x372   : > { %1756 = vmatpush.msra.mxu2 %v8542_v11  ;;  %1776 = vmatpush.msra.mxu3 %v8543_v17  ;;  %v8551_v11 = vld [vmem:[#allocation26_spill] sm:$0xff]  ;;  %v8552_v17 = vld [vmem:[#allocation27_spill] sm:$0xff] }
 0x373   : > { %1717 = vmatpush.msra.mxu0 %v8544_v36  ;;  %1737 = vmatpush.msra.mxu1 %v8545_v28  ;;  %v8553_v36 = vld [vmem:[#allocation28_spill] sm:$0xff]  ;;  %v8554_v28 = vld [vmem:[#allocation21_spill] sm:$0xff] }
 0x374   : > { %1757 = vmatpush.msra.mxu2 %v8546_v13  ;;  %1777 = vmatpush.msra.mxu3 %v8547_v4  ;;  %v8555_v13 = vld [vmem:[#allocation22_spill] sm:$0xff]  ;;  %v8556_v4 = vld [vmem:[#allocation23_spill] sm:$0xff] }
 0x375   : > { %1718 = vmatpush.msra.mxu0 %v8385_v16  ;;  %1738 = vmatpush.msra.mxu1 %v8386_v22  ;;  %v8557_v16 = vld [vmem:[#allocation24_spill] sm:$0xff]  ;;  %v8558_v22 = vld [vmem:[#allocation17_spill] sm:$0xff] }
 0x376   : > { %1758 = vmatpush.msra.mxu2 %v8548_v6  ;;  %1778 = vmatpush.msra.mxu3 %v8549_v40  ;;  %v8559_v6 = vld [vmem:[#allocation18_spill] sm:$0xff]  ;;  %v8560_v40 = vld [vmem:[#allocation19_spill] sm:$0xff] }
 0x377   : > { %1719 = vmatpush.msra.mxu0 %v8550_v18  ;;  %1739 = vmatpush.msra.mxu1 %v8551_v11  ;;  %v8561_v18 = vld [vmem:[#allocation20_spill] sm:$0xff] }
 0x378   : > { %1759 = vmatpush.msra.mxu2 %v8552_v17  ;;  %1779 = vmatpush.msra.mxu3 %v8553_v36  ;;  %v4743_v36 = vmov 2  }
 0x379   : > { %1720 = vmatpush.msra.mxu0 %v8554_v28  ;;  %1740 = vmatpush.msra.mxu1 %v8555_v13  ;;  %v8562_v13 = vld [vmem:[#allocation211_spill] sm:$0xff] }
 0x37a   : > { %1760 = vmatpush.msra.mxu2 %v8556_v4  ;;  %1780 = vmatpush.msra.mxu3 %v8557_v16 }
 0x37b   : > { %1721 = vmatpush.msra.mxu0 %v8558_v22  ;;  %1741 = vmatpush.msra.mxu1 %v8559_v6 }
 0x37c   : > { %1761 = vmatpush.msra.mxu2 %v8560_v40  ;;  %1781 = vmatpush.msra.mxu3 %v8561_v18 }
 0x37d   : > { %1722 = vmatmul.f32.vlgmr.msra.gmra.mxu0 %v1463_v1  ;;  %1742 = vmatmul.f32.vlgmr.msra.gmra.mxu1 %v1463_v1 }
 0x37e   : > { %1762 = vmatmul.f32.vlgmr.msra.gmra.mxu2 %v1463_v1  ;;  %1782 = vmatmul.f32.vlgmr.msra.gmra.mxu3 %v1463_v1  ;;  %v8563_v1 = vld [vmem:[#allocation182_spill] sm:$0xff] }
 0x37f   : > { %4333 = vset.pattern.permute.xlu1 %v4743_v36  ;;  %1853 = vmatpush.msrb.mxu0 %v5287_v5  ;;  %v8564_v36 = vld [vmem:[#allocation183_spill] sm:$0xff] }
 0x380   : > { %1695 = vperm.xlu1 %4333, %v8562_v13   ;;  %1873 = vmatpush.msrb.mxu1 %v5289_v61 }
 0x381   : > { %1893 = vmatpush.msrb.mxu2 %v5291_v62  ;;  %1913 = vmatpush.msrb.mxu3 %v5293_v0 }
 0x382   : > { %1854 = vmatpush.msrb.mxu0 %v5279_v63  ;;  %1874 = vmatpush.msrb.mxu1 %v5281_v57 }
 0x383   : > { %1894 = vmatpush.msrb.mxu2 %v5283_v58  ;;  %1914 = vmatpush.msrb.mxu3 %v5285_v60 }
 0x384   : > { %1855 = vmatpush.msrb.mxu0 %v5265_v59  ;;  %1875 = vmatpush.msrb.mxu1 %v5267_v53  ;;  %v8669_v59 = vld [vmem:[#allocation217_spill] sm:$0xff] }
 0x385   : > { %1895 = vmatpush.msrb.mxu2 %v5269_v54  ;;  %1915 = vmatpush.msrb.mxu3 %v5271_v56 }
 0x386   : > { %1856 = vmatpush.msrb.mxu0 %v5257_v55  ;;  %1876 = vmatpush.msrb.mxu1 %v5259_v49 }
 0x387   : > { %1896 = vmatpush.msrb.mxu2 %v5261_v50  ;;  %1916 = vmatpush.msrb.mxu3 %v5263_v52  ;;  %v8565_v52 = vld [vmem:[#allocation184_spill] sm:$0xff] }
 0x388   : > { %1857 = vmatpush.msrb.mxu0 %v5248_v51  ;;  %1877 = vmatpush.msrb.mxu1 %v5250_v45  ;;  %v8566_v51 = vld [vmem:[#allocation185_spill] sm:$0xff]  ;;  %v8567_v45 = vld [vmem:[#allocation178_spill] sm:$0xff] }
 0x389   : > { %1897 = vmatpush.msrb.mxu2 %v5252_v46  ;;  %1917 = vmatpush.msrb.mxu3 %v5255_v48  ;;  %v8568_v46 = vld [vmem:[#allocation179_spill] sm:$0xff]  ;;  %v8569_v48 = vld [vmem:[#allocation180_spill] sm:$0xff] }
 0x38a   : > { %1858 = vmatpush.msrb.mxu0 %v5240_v47  ;;  %1878 = vmatpush.msrb.mxu1 %v5242_v41  ;;  %v8570_v47 = vld [vmem:[#allocation181_spill] sm:$0xff]  ;;  %v8571_v41 = vld [vmem:[#allocation174_spill] sm:$0xff] }
 0x38b   : > { %1898 = vmatpush.msrb.mxu2 %v5244_v42  ;;  %1918 = vmatpush.msrb.mxu3 %v5246_v44  ;;  %v8572_v42 = vld [vmem:[#allocation175_spill] sm:$0xff]  ;;  %v8573_v44 = vld [vmem:[#allocation176_spill] sm:$0xff] }
 0x38c   : > { %1859 = vmatpush.msrb.mxu0 %v8563_v1  ;;  %1879 = vmatpush.msrb.mxu1 %v8564_v36  ;;  %v8574_v1 = vld [vmem:[#allocation177_spill] sm:$0xff]  ;;  %v8575_v36 = vld [vmem:[#allocation170_spill] sm:$0xff] }
 0x38d   : > { %1899 = vmatpush.msrb.mxu2 %v8565_v52  ;;  %1919 = vmatpush.msrb.mxu3 %v8566_v51  ;;  %v8576_v52 = vld [vmem:[#allocation171_spill] sm:$0xff]  ;;  %v8577_v51 = vld [vmem:[#allocation172_spill] sm:$0xff] }
 0x38e   : > { %1860 = vmatpush.msrb.mxu0 %v8567_v45  ;;  %1880 = vmatpush.msrb.mxu1 %v8568_v46  ;;  %v8578_v45 = vld [vmem:[#allocation173_spill] sm:$0xff]  ;;  %v8579_v46 = vld [vmem:[#allocation166_spill] sm:$0xff] }
 0x38f   : > { %1900 = vmatpush.msrb.mxu2 %v8569_v48  ;;  %1920 = vmatpush.msrb.mxu3 %v8570_v47  ;;  %v8580_v48 = vld [vmem:[#allocation167_spill] sm:$0xff]  ;;  %v8581_v47 = vld [vmem:[#allocation168_spill] sm:$0xff] }
 0x390   : > { %1861 = vmatpush.msrb.mxu0 %v8571_v41  ;;  %1881 = vmatpush.msrb.mxu1 %v8572_v42  ;;  %v8582_v41 = vld [vmem:[#allocation169_spill] sm:$0xff]  ;;  %v8583_v42 = vld [vmem:[#allocation162_spill] sm:$0xff] }
 0x391   : > { %1901 = vmatpush.msrb.mxu2 %v8573_v44  ;;  %1921 = vmatpush.msrb.mxu3 %v8574_v1  ;;  %v8584_v44 = vld [vmem:[#allocation163_spill] sm:$0xff]  ;;  %v8585_v1 = vld [vmem:[#allocation164_spill] sm:$0xff] }
 0x392   : > { %1862 = vmatpush.msrb.mxu0 %v8575_v36  ;;  %1882 = vmatpush.msrb.mxu1 %v8576_v52  ;;  %v8586_v36 = vld [vmem:[#allocation165_spill] sm:$0xff]  ;;  %v8587_v52 = vld [vmem:[#allocation158_spill] sm:$0xff] }
 0x393   : > { %1902 = vmatpush.msrb.mxu2 %v8577_v51  ;;  %1922 = vmatpush.msrb.mxu3 %v8578_v45  ;;  %v8588_v51 = vld [vmem:[#allocation159_spill] sm:$0xff]  ;;  %v8589_v45 = vld [vmem:[#allocation160_spill] sm:$0xff] }
 0x394   : > { %1863 = vmatpush.msrb.mxu0 %v8579_v46  ;;  %1883 = vmatpush.msrb.mxu1 %v8580_v48  ;;  %v8590_v46 = vld [vmem:[#allocation161_spill] sm:$0xff]  ;;  %v8591_v48 = vld [vmem:[#allocation154_spill] sm:$0xff] }
 0x395   : > { %1903 = vmatpush.msrb.mxu2 %v8581_v47  ;;  %1923 = vmatpush.msrb.mxu3 %v8582_v41  ;;  %v8592_v47 = vld [vmem:[#allocation155_spill] sm:$0xff]  ;;  %v8593_v41 = vld [vmem:[#allocation156_spill] sm:$0xff] }
 0x396   : > { %1864 = vmatpush.msrb.mxu0 %v8583_v42  ;;  %1884 = vmatpush.msrb.mxu1 %v8584_v44  ;;  %v8594_v42 = vld [vmem:[#allocation157_spill] sm:$0xff]  ;;  %v8595_v44 = vld [vmem:[#allocation150_spill] sm:$0xff] }
 0x397   : > { %1904 = vmatpush.msrb.mxu2 %v8585_v1  ;;  %1924 = vmatpush.msrb.mxu3 %v8586_v36  ;;  %v8596_v1 = vld [vmem:[#allocation151_spill] sm:$0xff]  ;;  %v8597_v36 = vld [vmem:[#allocation152_spill] sm:$0xff] }
 0x398   : > { %1865 = vmatpush.msrb.mxu0 %v8587_v52  ;;  %1885 = vmatpush.msrb.mxu1 %v8588_v51  ;;  %v8598_v52 = vld [vmem:[#allocation153_spill] sm:$0xff]  ;;  %v8599_v51 = vld [vmem:[#allocation146_spill] sm:$0xff] }
 0x399   : > { %1905 = vmatpush.msrb.mxu2 %v8589_v45  ;;  %1925 = vmatpush.msrb.mxu3 %v8590_v46  ;;  %v8600_v45 = vld [vmem:[#allocation147_spill] sm:$0xff]  ;;  %v8601_v46 = vld [vmem:[#allocation148_spill] sm:$0xff] }
 0x39a   : > { %1866 = vmatpush.msrb.mxu0 %v8591_v48  ;;  %1886 = vmatpush.msrb.mxu1 %v8592_v47  ;;  %v8602_v48 = vld [vmem:[#allocation149_spill] sm:$0xff]  ;;  %v8603_v47 = vld [vmem:[#allocation142_spill] sm:$0xff] }
 0x39b   : > { %1906 = vmatpush.msrb.mxu2 %v8593_v41  ;;  %1926 = vmatpush.msrb.mxu3 %v8594_v42  ;;  %v8604_v41 = vld [vmem:[#allocation143_spill] sm:$0xff]  ;;  %v8605_v42 = vld [vmem:[#allocation144_spill] sm:$0xff] }
 0x39c   : > { %1867 = vmatpush.msrb.mxu0 %v8595_v44  ;;  %1887 = vmatpush.msrb.mxu1 %v8596_v1  ;;  %v8606_v44 = vld [vmem:[#allocation145_spill] sm:$0xff]  ;;  %v8607_v1 = vld [vmem:[#allocation138_spill] sm:$0xff] }
 0x39d   : > { %1907 = vmatpush.msrb.mxu2 %v8597_v36  ;;  %1927 = vmatpush.msrb.mxu3 %v8598_v52  ;;  %v8608_v36 = vld [vmem:[#allocation139_spill] sm:$0xff]  ;;  %v8609_v52 = vld [vmem:[#allocation140_spill] sm:$0xff] }
 0x39e   : > { %1868 = vmatpush.msrb.mxu0 %v8599_v51  ;;  %1888 = vmatpush.msrb.mxu1 %v8600_v45  ;;  %v8610_v51 = vld [vmem:[#allocation141_spill] sm:$0xff]  ;;  %v8611_v45 = vld [vmem:[#allocation134_spill] sm:$0xff] }
 0x39f   : > { %1908 = vmatpush.msrb.mxu2 %v8601_v46  ;;  %1928 = vmatpush.msrb.mxu3 %v8602_v48  ;;  %v8612_v46 = vld [vmem:[#allocation135_spill] sm:$0xff]  ;;  %v8613_v48 = vld [vmem:[#allocation136_spill] sm:$0xff] }
 0x3a0   : > { %1933 = vmatpush.msra.mxu0 %v8603_v47  ;;  %1953 = vmatpush.msra.mxu1 %v8604_v41  ;;  %v8614_v47 = vld [vmem:[#allocation137_spill] sm:$0xff]  ;;  %v8615_v41 = vld [vmem:[#allocation130_spill] sm:$0xff] }
 0x3a1   : > { %1973 = vmatpush.msra.mxu2 %v8605_v42  ;;  %1993 = vmatpush.msra.mxu3 %v8606_v44  ;;  %v8616_v42 = vld [vmem:[#allocation131_spill] sm:$0xff]  ;;  %v8617_v44 = vld [vmem:[#allocation132_spill] sm:$0xff] }
 0x3a2   : > { %1934 = vmatpush.msra.mxu0 %v8607_v1  ;;  %1954 = vmatpush.msra.mxu1 %v8608_v36  ;;  %v8618_v1 = vld [vmem:[#allocation133_spill] sm:$0xff]  ;;  %v8619_v36 = vld [vmem:[#allocation126_spill] sm:$0xff] }
 0x3a3   : > { %1974 = vmatpush.msra.mxu2 %v8609_v52  ;;  %1994 = vmatpush.msra.mxu3 %v8610_v51  ;;  %v8620_v52 = vld [vmem:[#allocation127_spill] sm:$0xff]  ;;  %v8621_v51 = vld [vmem:[#allocation128_spill] sm:$0xff] }
 0x3a4   : > { %1935 = vmatpush.msra.mxu0 %v8611_v45  ;;  %1955 = vmatpush.msra.mxu1 %v8612_v46  ;;  %v8622_v45 = vld [vmem:[#allocation129_spill] sm:$0xff]  ;;  %v8623_v46 = vld [vmem:[#allocation122_spill] sm:$0xff] }
 0x3a5   : > { %1975 = vmatpush.msra.mxu2 %v8613_v48  ;;  %1995 = vmatpush.msra.mxu3 %v8614_v47  ;;  %v8624_v48 = vld [vmem:[#allocation123_spill] sm:$0xff]  ;;  %v8625_v47 = vld [vmem:[#allocation124_spill] sm:$0xff] }
 0x3a6   : > { %1936 = vmatpush.msra.mxu0 %v8615_v41  ;;  %1956 = vmatpush.msra.mxu1 %v8616_v42  ;;  %v8626_v41 = vld [vmem:[#allocation125_spill] sm:$0xff]  ;;  %v8627_v42 = vld [vmem:[#allocation118_spill] sm:$0xff] }
 0x3a7   : > { %1976 = vmatpush.msra.mxu2 %v8617_v44  ;;  %1996 = vmatpush.msra.mxu3 %v8618_v1  ;;  %v8628_v44 = vld [vmem:[#allocation119_spill] sm:$0xff]  ;;  %v8629_v1 = vld [vmem:[#allocation120_spill] sm:$0xff] }
 0x3a8   : > { %1937 = vmatpush.msra.mxu0 %v8619_v36  ;;  %1957 = vmatpush.msra.mxu1 %v8620_v52  ;;  %v8630_v36 = vld [vmem:[#allocation121_spill] sm:$0xff]  ;;  %v8631_v52 = vld [vmem:[#allocation114_spill] sm:$0xff] }
 0x3a9   : > { %1977 = vmatpush.msra.mxu2 %v8621_v51  ;;  %1997 = vmatpush.msra.mxu3 %v8622_v45  ;;  %v8632_v51 = vld [vmem:[#allocation115_spill] sm:$0xff]  ;;  %v8633_v45 = vld [vmem:[#allocation116_spill] sm:$0xff] }
 0x3aa   : > { %1938 = vmatpush.msra.mxu0 %v8623_v46  ;;  %1958 = vmatpush.msra.mxu1 %v8624_v48  ;;  %v8634_v46 = vld [vmem:[#allocation117_spill] sm:$0xff]  ;;  %v8635_v48 = vld [vmem:[#allocation110_spill] sm:$0xff] }
 0x3ab   : > { %1978 = vmatpush.msra.mxu2 %v8625_v47  ;;  %1998 = vmatpush.msra.mxu3 %v8626_v41  ;;  %v8636_v47 = vld [vmem:[#allocation111_spill] sm:$0xff]  ;;  %v8637_v41 = vld [vmem:[#allocation112_spill] sm:$0xff] }
 0x3ac   : > { %1939 = vmatpush.msra.mxu0 %v8627_v42  ;;  %1959 = vmatpush.msra.mxu1 %v8628_v44  ;;  %v8638_v42 = vld [vmem:[#allocation113_spill] sm:$0xff]  ;;  %v8639_v44 = vld [vmem:[#allocation106_spill] sm:$0xff] }
 0x3ad   : > { %1979 = vmatpush.msra.mxu2 %v8629_v1  ;;  %1999 = vmatpush.msra.mxu3 %v8630_v36  ;;  %v8640_v1 = vld [vmem:[#allocation107_spill] sm:$0xff]  ;;  %v8641_v36 = vld [vmem:[#allocation108_spill] sm:$0xff] }
 0x3ae   : > { %1940 = vmatpush.msra.mxu0 %v8631_v52  ;;  %1960 = vmatpush.msra.mxu1 %v8632_v51  ;;  %v8642_v52 = vld [vmem:[#allocation109_spill] sm:$0xff]  ;;  %v8643_v51 = vld [vmem:[#allocation102_spill] sm:$0xff] }
 0x3af   : > { %1980 = vmatpush.msra.mxu2 %v8633_v45  ;;  %2000 = vmatpush.msra.mxu3 %v8634_v46  ;;  %v8644_v45 = vld [vmem:[#allocation103_spill] sm:$0xff]  ;;  %v8645_v46 = vld [vmem:[#allocation104_spill] sm:$0xff] }
 0x3b0   : > { %1941 = vmatpush.msra.mxu0 %v8635_v48  ;;  %1961 = vmatpush.msra.mxu1 %v8636_v47  ;;  %v8646_v48 = vld [vmem:[#allocation105_spill] sm:$0xff]  ;;  %v8647_v47 = vld [vmem:[#allocation98_spill] sm:$0xff] }
 0x3b1   : > { %1981 = vmatpush.msra.mxu2 %v8637_v41  ;;  %2001 = vmatpush.msra.mxu3 %v8638_v42  ;;  %v8648_v41 = vld [vmem:[#allocation99_spill] sm:$0xff]  ;;  %v8649_v42 = vld [vmem:[#allocation100_spill] sm:$0xff] }
 0x3b2   : > { %1942 = vmatpush.msra.mxu0 %v8639_v44  ;;  %1962 = vmatpush.msra.mxu1 %v8640_v1  ;;  %v8650_v44 = vld [vmem:[#allocation101_spill] sm:$0xff]  ;;  %v8651_v1 = vld [vmem:[#allocation94_spill] sm:$0xff] }
 0x3b3   : > { %1982 = vmatpush.msra.mxu2 %v8641_v36  ;;  %2002 = vmatpush.msra.mxu3 %v8642_v52  ;;  %v8652_v36 = vld [vmem:[#allocation95_spill] sm:$0xff]  ;;  %v8653_v52 = vld [vmem:[#allocation96_spill] sm:$0xff] }
 0x3b4   : > { %1943 = vmatpush.msra.mxu0 %v8643_v51  ;;  %1963 = vmatpush.msra.mxu1 %v8644_v45  ;;  %v8654_v51 = vld [vmem:[#allocation97_spill] sm:$0xff]  ;;  %v8655_v45 = vld [vmem:[#allocation90_spill] sm:$0xff] }
 0x3b5   : > { %1983 = vmatpush.msra.mxu2 %v8645_v46  ;;  %2003 = vmatpush.msra.mxu3 %v8646_v48  ;;  %v8656_v46 = vld [vmem:[#allocation91_spill] sm:$0xff]  ;;  %v8657_v48 = vld [vmem:[#allocation92_spill] sm:$0xff] }
 0x3b6   : > { %1944 = vmatpush.msra.mxu0 %v8647_v47  ;;  %1964 = vmatpush.msra.mxu1 %v8648_v41  ;;  %v8658_v47 = vld [vmem:[#allocation93_spill] sm:$0xff]  ;;  %v8659_v41 = vld [vmem:[#allocation86_spill] sm:$0xff] }
 0x3b7   : > { %1984 = vmatpush.msra.mxu2 %v8649_v42  ;;  %2004 = vmatpush.msra.mxu3 %v8650_v44  ;;  %v8660_v42 = vld [vmem:[#allocation87_spill] sm:$0xff]  ;;  %v8661_v44 = vld [vmem:[#allocation88_spill] sm:$0xff] }
 0x3b8   : > { %1945 = vmatpush.msra.mxu0 %v8651_v1  ;;  %1965 = vmatpush.msra.mxu1 %v8652_v36  ;;  %v8662_v1 = vld [vmem:[#allocation89_spill] sm:$0xff]  ;;  %v8663_v36 = vld [vmem:[#allocation82_spill] sm:$0xff] }
 0x3b9   : > { %1985 = vmatpush.msra.mxu2 %v8653_v52  ;;  %2005 = vmatpush.msra.mxu3 %v8654_v51  ;;  %v8664_v52 = vld [vmem:[#allocation83_spill] sm:$0xff]  ;;  %v8665_v51 = vld [vmem:[#allocation84_spill] sm:$0xff] }
 0x3ba   : > { %1946 = vmatpush.msra.mxu0 %v8655_v45  ;;  %1966 = vmatpush.msra.mxu1 %v8656_v46  ;;  %v8666_v45 = vld [vmem:[#allocation85_spill] sm:$0xff] }
 0x3bb   : > { %1986 = vmatpush.msra.mxu2 %v8657_v48  ;;  %2006 = vmatpush.msra.mxu3 %v8658_v47 }
 0x3bc   : > { %1947 = vmatpush.msra.mxu0 %v8659_v41  ;;  %1967 = vmatpush.msra.mxu1 %v8660_v42  ;;  %v8667_v42 = vld [vmem:[#allocation210_spill] sm:$0xff] }
 0x3bd   : > { %1987 = vmatpush.msra.mxu2 %v8661_v44  ;;  %2007 = vmatpush.msra.mxu3 %v8662_v1  ;;  %v8668_v44 = vld [vmem:[#allocation216_spill] sm:$0xff] }
 0x3be   : > { %1948 = vmatpush.msra.mxu0 %v8663_v36  ;;  %1968 = vmatpush.msra.mxu1 %v8664_v52 }
 0x3bf   : > { %1988 = vmatpush.msra.mxu2 %v8665_v51  ;;  %2008 = vmatpush.msra.mxu3 %v8666_v45 }
 0x3d6   : > { %v1481_v46 = vpop.f32.mrf.mxu0  ;;  %v1501_v48 = vpop.f32.mrf.mxu1 }
 0x3dd   : > { %v1541_v50 = vpop.f32.mrf.mxu3  ;;  %v1521_v1 = vpop.f32.mrf.mxu2 }
 0x3e0   : > { %v1561_v47 = vpop.f32.mrf.mxu0  ;;  %v1581_v49 = vpop.f32.mrf.mxu1 }
 0x3e1   : > { %v1562_v41 = vadd.f32 %v1561_v47, %v1481_v46  ;;  %v1582_v55 = vadd.f32 %v1581_v49, %v1501_v48  ;;  %v8670_v48 = vld [vmem:[#allocation78_spill] sm:$0xff] }
 0x3e3   : > { %v1624_v56 = vadd.f32 %v1562_v41, %v8667_v42  ;;  %v1625_v54 = vadd.f32 %v1582_v55, %v8668_v44 }
 0x3e5   : > { %v4190_v53 = vmul.f32 -1.442695, %v1624_v56  ;;  %v4191_v36 = vmul.f32 -1.442695, %v1625_v54 }
 0x3e7   : > { %4388 = vpow2.f32 %v4190_v53  ;;  %v1621_v52 = vpop.f32.mrf.mxu3  ;;  %v1601_v0 = vpop.f32.mrf.mxu2  ;;  %v8671_v53 = vld [vmem:[#allocation79_spill] sm:$0xff] }
 0x3e8   : > { %4390 = vpow2.f32 %v4191_v36  ;;  %v1622_v51 = vadd.f32 %v1621_v52, %v1541_v50  ;;  %v1602_v41 = vadd.f32 %v1601_v0, %v1521_v1  ;;  %v8674_v0 = vld [vmem:[#allocation16_spill] sm:$0xff] }
 0x3ea   : > { %v1627_v45 = vadd.f32 %v1622_v51, %v8669_v59  ;;  %v8672_v51 = vld [vmem:[#allocation218_spill] sm:$0xff] }
 0x3ec   : > { %v4192_v60 = vmul.f32 -1.442695, %v1627_v45  ;;  %v1626_v45 = vadd.f32 %v1602_v41, %v8672_v51  ;;  %v8675_v51 = vld [vmem:[#allocation81_spill] sm:$0xff] }
 0x3ed   : > { %v4389_v58 = vpop.eup %4388 }
 0x3ee   : > { %v4391_v57 = vpop.eup %4390  ;;  %v1631_v63 = vadd.f32 1.0, %v4389_v58  ;;  %4392 = vpow2.f32 %v4192_v60 }
 0x3ef   : > { %v1650_v46 = vadd.f32 1.0, %v4391_v57  ;;  %v8673_v57 = vld [vmem:[#allocation80_spill] sm:$0xff] }
 0x3f0   : > { %4394 = vrcp.f32 %v1631_v63  ;;  %v1643_v44 = vand.u32 2147483648, %v1631_v63  ;;  %vm1637_vm3 = vweird.f32 %v1631_v63 }
 0x3f1   : > { %4396 = vrcp.f32 %v1650_v46  ;;  %v1662_v42 = vand.u32 2147483648, %v1650_v46  ;;  %v1660_v62 = vand.u32 2147483647, %v1650_v46  ;;  %vm1656_vm1 = vweird.f32 %v1650_v46 }
 0x3f2   : > { %v6170_v47 = vpop.permute.xlu1 %1695 }
 0x3f3   : > { %v1698_v49 = vmul.f32 %v6170_v47, %v8670_v48  ;;  %v1699_v50 = vmul.f32 %v6170_v47, %v8671_v53  ;;  %v1641_v48 = vand.u32 2147483647, %v1631_v63  ;;  %v1701_v61 = vmul.f32 %v6170_v47, %v8675_v51 }
 0x3f4   : > { %v4393_v52 = vpop.eup %4392  ;;  %vm1661_vm7 = vcmp.eq.f32.partialorder %v1660_v62, 8.507059e+37 }
 0x3f5   : > { %v6177_v54 = vadd.f32 1.0, %v4393_v52  ;;  %v1702_v60 = vadd.f32 %v1698_v49, %v8673_v57  ;;  %v1703_v1 = vadd.f32 %v1699_v50, %v8674_v0  ;;  %vm1642_vm4 = vcmp.eq.f32.partialorder %v1641_v48, 8.507059e+37 }
 0x3f6   : > { %v4395_v55 = vpop.eup %4394  ;;  %v1663_v0 = vor.u32 1.1754944e-38, %v1662_v42  ;;  %v1644_v57 = vor.u32 1.1754944e-38, %v1643_v44 }
 0x3f7   : > { %v4397_v56 = vpop.eup %4396  ;;  %v1633_v58 = vmul.f32 %v4395_v55, %v1631_v63  ;;  %4398 = vrcp.f32 %v6177_v54  ;;  %vm1638_vm0 = vweird.f32 %v4395_v55  ;;  %vm1676_vm9 = vweird.f32 %v6177_v54 }
 0x3f8   : > { %v1652_v36 = vmul.f32 %v4397_v56, %v1650_v46  ;;  %4400 = vtanh.f32 %v1626_v45  ;;  %vm1657_vm2 = vweird.f32 %v4397_v56  ;;  %vm1639_vm5 = vmor %vm1637_vm3, %vm1638_vm0 }
 0x3f9   : > { %v1634_v59 = vsub.f32 1.0, %v1633_v58  ;;  %vm1658_vm6 = vmor %vm1656_vm1, %vm1657_vm2 }
 0x3fa   : > { %v1653_v53 = vsub.f32 1.0, %v1652_v36  ;;  %v1723_v41 = vpop.f32.mrf.mxu0  ;;  %v1743_v52 = vpop.f32.mrf.mxu1 }
 0x3fb   : > { %v1635_v13 = vmul.f32 %v4395_v55, %v1634_v59  ;;  %v1786_v5 = vadd.f32 %v1723_v41, %v1702_v60  ;;  %v1787_v18 = vadd.f32 %v1743_v52, %v1703_v1 }
 0x3fc   : > { %v1654_v49 = vmul.f32 %v4397_v56, %v1653_v53  ;;  %v8676_v53 = vld [vmem:[#allocation213_spill] sm:$0xff] }
 0x3fd   : > { %v4399_v50 = vpop.eup %4398  ;;  %v1636_v58 = vadd.f32 %v4395_v55, %v1635_v13  ;;  %v4193_v45 = vmul.f32 -1.442695, %v1786_v5  ;;  %v4194_v36 = vmul.f32 -1.442695, %v1787_v18  ;;  %v1705_v46 = vadd.f32 %v1701_v61, %v8676_v53 }
 0x3fe   : > { %v1655_v40 = vadd.f32 %v4397_v56, %v1654_v49  ;;  %v1672_v6 = vmul.f32 %v4399_v50, %v6177_v54  ;;  %v4401_v51 = vpop.eup %4400  ;;  %vm1677_vm8 = vweird.f32 %v4399_v50 }
 0x3ff   : > { %v1640_v59 = vsel %vm1639_vm5, %v4395_v55, %v1636_v58  ;;  %4402 = vpow2.f32 %v4193_v45  ;;  %v8677_v58 = vld [vmem:[#allocation212_spill] sm:$0xff]  ;;  %vm1678_vm10 = vmor %vm1676_vm9, %vm1677_vm8 }
 0x400   : > { %v1645_v60 = vsel %vm1642_vm4, %v1644_v57, %v1640_v59  ;;  %v1659_v63 = vsel %vm1658_vm6, %v4397_v56, %v1655_v40  ;;  %v1673_v1 = vsub.f32 1.0, %v1672_v6  ;;  %4404 = vpow2.f32 %v4194_v36  ;;  %v8678_v56 = vld [vmem:[#allocation214_spill] sm:$0xff] }
 0x401   : > { %v1664_v13 = vsel %vm1661_vm7, %v1663_v0, %v1659_v63  ;;  %v1687_v5 = vmul.f32 %v4401_v51, %v1645_v60  ;;  %v1783_v18 = vpop.f32.mrf.mxu3  ;;  %v1302_v61 = vperm.slane %v8677_v58, 0  ;;  %v1682_v6 = vand.u32 2147483648, %v6177_v54  ;;  %v1763_v59 = vpop.f32.mrf.mxu2  ;;  %v887_v63 = vld [vmem:[#allocation6] sm:$0xff] }
 0x402   : > { %v1686_v42 = vmul.f32 %v1664_v13, %v5949_v27  ;;  %v1674_v44 = vmul.f32 %v4399_v50, %v1673_v1  ;;  %v1789_v48 = vadd.f32 %v1783_v18, %v1705_v46  ;;  %v1680_v51 = vand.u32 2147483647, %v6177_v54  ;;  %v8679_v1 = vld [vmem:[#allocation215_spill] sm:$0xff] }
 0x403   : > { %v1700_v57 = vmul.f32 %v6170_v47, %v8678_v56  ;;  %v1683_v45 = vor.u32 1.1754944e-38, %v1682_v6  ;;  %v1303_v36 = vmul.f32 %v1302_v61, %v5967_v37  ;;  %v1691_v46 = vperm.slane %v8677_v58, 1 }
 0x404   : > { %v6187_v41 = vadd.f32 %v1687_v5, %v1686_v42  ;;  %v4195_v52 = vmul.f32 -1.442695, %v1789_v48  ;;  %v1675_v55 = vadd.f32 %v4399_v50, %v1674_v44  ;;  %vm1681_vm11 = vcmp.eq.f32.partialorder %v1680_v51, 8.507059e+37 }
 0x405   : > { %v4403_v49 = vpop.eup %4402  ;;  %v1704_v54 = vadd.f32 %v1700_v57, %v8679_v1 }
 0x406   : > { %v4405_v62 = vpop.eup %4404  ;;  %4406 = vtanh.f32 %v6187_v41  ;;  %v6192_v40 = vadd.f32 1.0, %v4403_v49  ;;  %v1679_v0 = vsel %vm1678_vm10, %v4399_v50, %v1675_v55  ;;  %v1304_v50 = vadd.f32 %v1303_v36, %v887_v63 }
 0x407   : > { %v6195_v27 = vadd.f32 1.0, %v4405_v62  ;;  %4408 = vpow2.f32 %v4195_v52  ;;  %v1684_v13 = vsel %vm1681_vm11, %v1683_v45, %v1679_v0  ;;  %v1788_v47 = vadd.f32 %v1763_v59, %v1704_v54 }
 0x408   : > { %4410 = vrcp.f32 %v6192_v40  ;;  %v1805_v6 = vand.u32 2147483648, %v6192_v40  ;;  %v1803_v0 = vand.u32 2147483647, %v6192_v40  ;;  %vm1799_vm14 = vweird.f32 %v6192_v40 }
 0x409   : > { %4412 = vrcp.f32 %v6195_v27  ;;  %v1824_v51 = vand.u32 2147483648, %v6195_v27  ;;  %v1822_v36 = vand.u32 2147483647, %v6195_v27  ;;  %vm1818_vm15 = vweird.f32 %v6195_v27 }
 0x40a   : > { %vm1804_vm2 = vcmp.eq.f32.partialorder %v1803_v0, 8.507059e+37 }
 0x40b   : > { %v1825_v54 = vor.u32 1.1754944e-38, %v1824_v51  ;;  %vm1823_vm3 = vcmp.eq.f32.partialorder %v1822_v36, 8.507059e+37  ;;  %v8683_v51 = vld [vmem:[#allocation55_spill] sm:$0xff]  ;;  %v8686_v36 = vld [vmem:[#allocation50_spill] sm:$0xff] }
 0x40c   : > { %v4407_v60 = vpop.eup %4406 }
 0x40d   : > { %v4409_v5 = vpop.eup %4408  ;;  %v1690_v18 = vmul.f32 %v4407_v60, %v1684_v13  ;;  %v1806_v60 = vor.u32 1.1754944e-38, %v1805_v6 }
 0x40e   : > { %v4411_v42 = vpop.eup %4410  ;;  %v6205_v44 = vadd.f32 1.0, %v4409_v5 }
 0x40f   : > { %v4413_v48 = vpop.eup %4412  ;;  %v1795_v52 = vmul.f32 %v4411_v42, %v6192_v40  ;;  %v1692_v37 = vmul.f32 %v1691_v46, %v1690_v18  ;;  %1869 = vmatmul.f32.vlgmr.msrb.gmra.mxu0 %v1690_v18  ;;  %1889 = vmatmul.f32.vlgmr.msrb.gmra.mxu1 %v1690_v18  ;;  %vm1800_vm12 = vweird.f32 %v4411_v42 }
 0x410   : > { %v1814_v49 = vmul.f32 %v4413_v48, %v6195_v27  ;;  %4414 = vrcp.f32 %v6205_v44  ;;  %1909 = vmatmul.f32.vlgmr.msrb.gmra.mxu2 %v1690_v18  ;;  %1929 = vmatmul.f32.vlgmr.msrb.gmra.mxu3 %v1690_v18  ;;  %vm1819_vm13 = vweird.f32 %v4413_v48  ;;  %vm1801_vm0 = vmor %vm1799_vm14, %vm1800_vm12  ;;  %v1844_v6 = vand.u32 2147483648, %v6205_v44 }
 0x411   : > { %v1796_v55 = vsub.f32 1.0, %v1795_v52  ;;  %v6210_v62 = vadd.f32 %v1692_v37, %v1304_v50  ;;  %2095 = vmatpush.msrb.mxu0 %v8503_v3  ;;  %2115 = vmatpush.msrb.mxu1 %v8188_v25  ;;  %4416 = vtanh.f32 %v1788_v47  ;;  %vm1820_vm1 = vmor %vm1818_vm15, %vm1819_vm13  ;;  %vm1838_vm5 = vweird.f32 %v6205_v44 }
 0x412   : > { %v1815_v61 = vsub.f32 1.0, %v1814_v49  ;;  %2135 = vmatpush.msrb.mxu2 %v8189_v7  ;;  %2155 = vmatpush.msrb.mxu3 %v8190_v32  ;;  %v8680_v49 = vld [vmem:[#allocation60_spill] sm:$0xff]  ;;  %v1842_v0 = vand.u32 2147483647, %v6205_v44 }
 0x413   : > { %v1797_v57 = vmul.f32 %v4411_v42, %v1796_v55  ;;  %2096 = vmatpush.msrb.mxu0 %v8504_v14  ;;  %2116 = vmatpush.msrb.mxu1 %v8505_v35 }
 0x414   : > { %v1816_v45 = vmul.f32 %v4413_v48, %v1815_v61  ;;  %2136 = vmatpush.msrb.mxu2 %v8506_v38  ;;  %2156 = vmatpush.msrb.mxu3 %v8507_v26  ;;  %v8681_v61 = vld [vmem:[#allocation53_spill] sm:$0xff]  ;;  %vm1843_vm7 = vcmp.eq.f32.partialorder %v1842_v0, 8.507059e+37  ;;  %v8700_v0 = vld [vmem:[#allocation34_spill] sm:$0xff] }
 0x415   : > { %v1798_v59 = vadd.f32 %v4411_v42, %v1797_v57  ;;  %2097 = vmatpush.msrb.mxu0 %v8508_v15  ;;  %2117 = vmatpush.msrb.mxu1 %v8509_v24  ;;  %v8684_v57 = vld [vmem:[#allocation56_spill] sm:$0xff] }
 0x416   : > { %v4415_v46 = vpop.eup %4414  ;;  %v1817_v63 = vadd.f32 %v4413_v48, %v1816_v45  ;;  %2137 = vmatpush.msrb.mxu2 %v8510_v23  ;;  %2157 = vmatpush.msrb.mxu3 %v8511_v10  ;;  %v8685_v45 = vld [vmem:[#allocation49_spill] sm:$0xff] }
 0x417   : > { %v1802_v13 = vsel %vm1801_vm0, %v4411_v42, %v1798_v59  ;;  %v1834_v40 = vmul.f32 %v4415_v46, %v6205_v44  ;;  %2098 = vmatpush.msrb.mxu0 %v8512_v19  ;;  %2118 = vmatpush.msrb.mxu1 %v8513_v20  ;;  %v4417_v27 = vpop.eup %4416  ;;  %vm1839_vm4 = vweird.f32 %v4415_v46  ;;  %v8687_v59 = vld [vmem:[#allocation51_spill] sm:$0xff]  ;;  %v8693_v44 = vld [vmem:[#allocation41_spill] sm:$0xff] }
 0x418   : > { %v1807_v5 = vsel %vm1804_vm2, %v1806_v60, %v1802_v13  ;;  %v1821_v18 = vsel %vm1820_vm1, %v4413_v48, %v1817_v63  ;;  %2138 = vmatpush.msrb.mxu2 %v8514_v9  ;;  %2158 = vmatpush.msrb.mxu3 %v8515_v21  ;;  %vm1840_vm6 = vmor %vm1838_vm5, %vm1839_vm4  ;;  %v8688_v60 = vld [vmem:[#allocation52_spill] sm:$0xff]  ;;  %v8690_v13 = vld [vmem:[#allocation46_spill] sm:$0xff] }
 0x419   : > { %v1826_v47 = vsel %vm1823_vm3, %v1825_v54, %v1821_v18  ;;  %v1849_v50 = vmul.f32 %v4417_v27, %v1807_v5  ;;  %v1835_v52 = vsub.f32 1.0, %v1834_v40  ;;  %2099 = vmatpush.msrb.mxu0 %v8516_v30  ;;  %2119 = vmatpush.msrb.mxu1 %v8517_v31  ;;  %v8689_v54 = vld [vmem:[#allocation45_spill] sm:$0xff]  ;;  %v1845_v40 = vor.u32 1.1754944e-38, %v1844_v6  ;;  %v8691_v27 = vld [vmem:[#allocation47_spill] sm:$0xff]  ;;  %v8692_v5 = vld [vmem:[#allocation48_spill] sm:$0xff] }
 0x41a   : > { %v1848_v42 = vmul.f32 %v1826_v47, %v5965_v29  ;;  %2139 = vmatpush.msrb.mxu2 %v8518_v43  ;;  %2159 = vmatpush.msrb.mxu3 %v8519_v39  ;;  %v8682_v29 = vld [vmem:[#allocation54_spill] sm:$0xff]  ;;  %v8699_v6 = vld [vmem:[#allocation33_spill] sm:$0xff] }
 0x41b   : > { %v1836_v37 = vmul.f32 %v4415_v46, %v1835_v52  ;;  %2100 = vmatpush.msrb.mxu0 %v8520_v34  ;;  %2120 = vmatpush.msrb.mxu1 %v8521_v12  ;;  %v8695_v52 = vld [vmem:[#allocation37_spill] sm:$0xff] }
 0x41c   : > { %v6244_v48 = vadd.f32 %v1849_v50, %v1848_v42  ;;  %2140 = vmatpush.msrb.mxu2 %v8522_v2  ;;  %2160 = vmatpush.msrb.mxu3 %v8680_v49  ;;  %v8694_v50 = vld [vmem:[#allocation44_spill] sm:$0xff]  ;;  %v8696_v42 = vld [vmem:[#allocation38_spill] sm:$0xff] }
 0x41d   : > { %v1837_v55 = vadd.f32 %v4415_v46, %v1836_v37  ;;  %2101 = vmatpush.msrb.mxu0 %v8681_v61  ;;  %2121 = vmatpush.msrb.mxu1 %v8682_v29  ;;  %v8697_v37 = vld [vmem:[#allocation39_spill] sm:$0xff] }
 0x41e   : > { %4418 = vtanh.f32 %v6244_v48  ;;  %2141 = vmatpush.msrb.mxu2 %v8683_v51  ;;  %2161 = vmatpush.msrb.mxu3 %v8684_v57 }
 0x41f   : > { %2102 = vmatpush.msrb.mxu0 %v8685_v45  ;;  %2122 = vmatpush.msrb.mxu1 %v8686_v36  ;;  %v1841_v63 = vsel %vm1840_vm6, %v4415_v46, %v1837_v55  ;;  %v8698_v55 = vld [vmem:[#allocation40_spill] sm:$0xff] }
 0x420   : > { %2142 = vmatpush.msrb.mxu2 %v8687_v59  ;;  %2162 = vmatpush.msrb.mxu3 %v8688_v60  ;;  %v1846_v47 = vsel %vm1843_vm7, %v1845_v40, %v1841_v63  ;;  %v8701_v63 = vld [vmem:[#allocation35_spill] sm:$0xff]  ;;  %v8702_v40 = vld [vmem:[#allocation36_spill] sm:$0xff] }
 0x421   : > { %2103 = vmatpush.msrb.mxu0 %v8689_v54  ;;  %2123 = vmatpush.msrb.mxu1 %v8690_v13 }
 0x422   : > { %2143 = vmatpush.msrb.mxu2 %v8691_v27  ;;  %2163 = vmatpush.msrb.mxu3 %v8692_v5  ;;  %v8846_v5 = vld [vmem:[#allocation80_spill] sm:$0xff] }
 0x423   : > { %2104 = vmatpush.msrb.mxu0 %v8693_v44  ;;  %2124 = vmatpush.msrb.mxu1 %v8537_v8 }
 0x424   : > { %v4419_v18 = vpop.eup %4418  ;;  %2144 = vmatpush.msrb.mxu2 %v8538_v33  ;;  %2164 = vmatpush.msrb.mxu3 %v8694_v50  ;;  %v8844_v50 = vld [vmem:[#allocation78_spill] sm:$0xff]  ;;  %v8845_v33 = vld [vmem:[#allocation79_spill] sm:$0xff] }
 0x425   : > { %v1852_v46 = vmul.f32 %v4419_v18, %v1846_v47  ;;  %2105 = vmatpush.msrb.mxu0 %v8695_v52  ;;  %2125 = vmatpush.msrb.mxu1 %v8696_v42  ;;  %v8703_v18 = vld [vmem:[#allocation29_spill] sm:$0xff]  ;;  %v8704_v47 = vld [vmem:[#allocation30_spill] sm:$0xff]  ;;  %v8705_v42 = vld [vmem:[#allocation31_spill] sm:$0xff] }
 0x426   : > { %2145 = vmatpush.msrb.mxu2 %v8697_v37  ;;  %2165 = vmatpush.msrb.mxu3 %v8698_v55  ;;  %v8706_v37 = vld [vmem:[#allocation32_spill] sm:$0xff]  ;;  %v8707_v55 = vld [vmem:[#allocation25_spill] sm:$0xff] }
 0x427   : > { %1949 = vmatmul.f32.vlgmr.msra.gmra.mxu0 %v1852_v46  ;;  %1969 = vmatmul.f32.vlgmr.msra.gmra.mxu1 %v1852_v46 }
 0x428   : > { %1989 = vmatmul.f32.vlgmr.msra.gmra.mxu2 %v1852_v46  ;;  %2009 = vmatmul.f32.vlgmr.msra.gmra.mxu3 %v1852_v46 }
 0x429   : > { %2106 = vmatpush.msrb.mxu0 %v8699_v6  ;;  %2126 = vmatpush.msrb.mxu1 %v8700_v0  ;;  %v8708_v6 = vld [vmem:[#allocation28_spill] sm:$0xff] }
 0x42a   : > { %2146 = vmatpush.msrb.mxu2 %v8701_v63  ;;  %2166 = vmatpush.msrb.mxu3 %v8702_v40  ;;  %v8709_v63 = vld [vmem:[#allocation22_spill] sm:$0xff] }
 0x42b   : > { %2107 = vmatpush.msrb.mxu0 %v8703_v18  ;;  %2127 = vmatpush.msrb.mxu1 %v8704_v47 }
 0x42c   : > { %2147 = vmatpush.msrb.mxu2 %v8705_v42  ;;  %2167 = vmatpush.msrb.mxu3 %v8706_v37  ;;  %v8710_v42 = vld [vmem:[#allocation18_spill] sm:$0xff]  ;;  %v8711_v37 = vld [vmem:[#allocation19_spill] sm:$0xff] }
 0x42d   : > { %2108 = vmatpush.msrb.mxu0 %v8707_v55  ;;  %2128 = vmatpush.msrb.mxu1 %v8551_v11  ;;  %v8712_v55 = vld [vmem:[#allocation20_spill] sm:$0xff] }
 0x42e   : > { %2148 = vmatpush.msrb.mxu2 %v8552_v17  ;;  %2168 = vmatpush.msrb.mxu3 %v8708_v6  ;;  %v4744_v6 = vmov 3   ;;  %v8721_v17 = vld [vmem:[#allocation205_spill] sm:$0xff] }
 0x42f   : > { %2109 = vmatpush.msrb.mxu0 %v8554_v28  ;;  %2129 = vmatpush.msrb.mxu1 %v8709_v63  ;;  %v8713_v28 = vld [vmem:[#allocation206_spill] sm:$0xff]  ;;  %v8714_v63 = vld [vmem:[#allocation211_spill] sm:$0xff] }
 0x430   : > { %2149 = vmatpush.msrb.mxu2 %v8556_v4  ;;  %2169 = vmatpush.msrb.mxu3 %v8557_v16  ;;  %v8715_v4 = vld [vmem:[#allocation207_spill] sm:$0xff]  ;;  %v8716_v16 = vld [vmem:[#allocation208_spill] sm:$0xff] }
 0x431   : > { %2110 = vmatpush.msrb.mxu0 %v8558_v22  ;;  %2130 = vmatpush.msrb.mxu1 %v8710_v42  ;;  %v8717_v22 = vld [vmem:[#allocation209_spill] sm:$0xff]  ;;  %v8718_v42 = vld [vmem:[#allocation202_spill] sm:$0xff] }
 0x432   : > { %2150 = vmatpush.msrb.mxu2 %v8711_v37  ;;  %2170 = vmatpush.msrb.mxu3 %v8712_v55  ;;  %v8719_v37 = vld [vmem:[#allocation203_spill] sm:$0xff]  ;;  %v8720_v55 = vld [vmem:[#allocation204_spill] sm:$0xff] }
 0x433   : > { %2111 = vmatmul.f32.vlgmr.msrb.gmra.mxu0 %v1852_v46  ;;  %2131 = vmatmul.f32.vlgmr.msrb.gmra.mxu1 %v1852_v46 }
 0x434   : > { %2151 = vmatmul.f32.vlgmr.msrb.gmra.mxu2 %v1852_v46  ;;  %2171 = vmatmul.f32.vlgmr.msrb.gmra.mxu3 %v1852_v46  ;;  %v8722_v46 = vld [vmem:[#allocation198_spill] sm:$0xff] }
 0x435   : > { %4334 = vset.pattern.permute.xlu1 %v4744_v6  ;;  %2242 = vmatpush.msra.mxu0 %v8713_v28  ;;  %v8723_v6 = vld [vmem:[#allocation199_spill] sm:$0xff]  ;;  %v8724_v28 = vld [vmem:[#allocation200_spill] sm:$0xff] }
 0x436   : > { %2084 = vperm.xlu1 %4334, %v8714_v63   ;;  %2262 = vmatpush.msra.mxu1 %v8715_v4  ;;  %v8725_v63 = vld [vmem:[#allocation201_spill] sm:$0xff]  ;;  %v8726_v4 = vld [vmem:[#allocation194_spill] sm:$0xff] }
 0x437   : > { %2282 = vmatpush.msra.mxu2 %v8716_v16  ;;  %2302 = vmatpush.msra.mxu3 %v8717_v22  ;;  %v8727_v16 = vld [vmem:[#allocation195_spill] sm:$0xff]  ;;  %v8728_v22 = vld [vmem:[#allocation196_spill] sm:$0xff] }
 0x438   : > { %2243 = vmatpush.msra.mxu0 %v8718_v42  ;;  %2263 = vmatpush.msra.mxu1 %v8719_v37  ;;  %v8729_v42 = vld [vmem:[#allocation197_spill] sm:$0xff]  ;;  %v8730_v37 = vld [vmem:[#allocation190_spill] sm:$0xff] }
 0x439   : > { %2283 = vmatpush.msra.mxu2 %v8720_v55  ;;  %2303 = vmatpush.msra.mxu3 %v8721_v17  ;;  %v8731_v55 = vld [vmem:[#allocation191_spill] sm:$0xff]  ;;  %v8732_v17 = vld [vmem:[#allocation192_spill] sm:$0xff] }
 0x43a   : > { %2244 = vmatpush.msra.mxu0 %v8722_v46  ;;  %2264 = vmatpush.msra.mxu1 %v8723_v6  ;;  %v8733_v46 = vld [vmem:[#allocation193_spill] sm:$0xff]  ;;  %v8734_v6 = vld [vmem:[#allocation186_spill] sm:$0xff] }
 0x43b   : > { %2284 = vmatpush.msra.mxu2 %v8724_v28  ;;  %2304 = vmatpush.msra.mxu3 %v8725_v63  ;;  %v8735_v28 = vld [vmem:[#allocation187_spill] sm:$0xff]  ;;  %v8736_v63 = vld [vmem:[#allocation188_spill] sm:$0xff] }
 0x43c   : > { %2245 = vmatpush.msra.mxu0 %v8726_v4  ;;  %2265 = vmatpush.msra.mxu1 %v8727_v16  ;;  %v8737_v4 = vld [vmem:[#allocation189_spill] sm:$0xff]  ;;  %v8738_v16 = vld [vmem:[#allocation182_spill] sm:$0xff] }
 0x43d   : > { %2285 = vmatpush.msra.mxu2 %v8728_v22  ;;  %2305 = vmatpush.msra.mxu3 %v8729_v42  ;;  %v8739_v22 = vld [vmem:[#allocation183_spill] sm:$0xff]  ;;  %v8740_v42 = vld [vmem:[#allocation184_spill] sm:$0xff] }
 0x43e   : > { %2246 = vmatpush.msra.mxu0 %v8730_v37  ;;  %2266 = vmatpush.msra.mxu1 %v8731_v55  ;;  %v8741_v37 = vld [vmem:[#allocation185_spill] sm:$0xff]  ;;  %v8742_v55 = vld [vmem:[#allocation178_spill] sm:$0xff] }
 0x43f   : > { %2286 = vmatpush.msra.mxu2 %v8732_v17  ;;  %2306 = vmatpush.msra.mxu3 %v8733_v46  ;;  %v8743_v17 = vld [vmem:[#allocation179_spill] sm:$0xff]  ;;  %v8744_v46 = vld [vmem:[#allocation180_spill] sm:$0xff] }
 0x440   : > { %2247 = vmatpush.msra.mxu0 %v8734_v6  ;;  %2267 = vmatpush.msra.mxu1 %v8735_v28  ;;  %v8745_v6 = vld [vmem:[#allocation181_spill] sm:$0xff]  ;;  %v8746_v28 = vld [vmem:[#allocation174_spill] sm:$0xff] }
 0x441   : > { %2287 = vmatpush.msra.mxu2 %v8736_v63  ;;  %2307 = vmatpush.msra.mxu3 %v8737_v4  ;;  %v8747_v63 = vld [vmem:[#allocation175_spill] sm:$0xff]  ;;  %v8748_v4 = vld [vmem:[#allocation176_spill] sm:$0xff] }
 0x442   : > { %2248 = vmatpush.msra.mxu0 %v8738_v16  ;;  %2268 = vmatpush.msra.mxu1 %v8739_v22  ;;  %v8749_v16 = vld [vmem:[#allocation177_spill] sm:$0xff]  ;;  %v8750_v22 = vld [vmem:[#allocation170_spill] sm:$0xff] }
 0x443   : > { %2288 = vmatpush.msra.mxu2 %v8740_v42  ;;  %2308 = vmatpush.msra.mxu3 %v8741_v37  ;;  %v8751_v42 = vld [vmem:[#allocation171_spill] sm:$0xff]  ;;  %v8752_v37 = vld [vmem:[#allocation172_spill] sm:$0xff] }
 0x444   : > { %2249 = vmatpush.msra.mxu0 %v8742_v55  ;;  %2269 = vmatpush.msra.mxu1 %v8743_v17  ;;  %v8753_v55 = vld [vmem:[#allocation173_spill] sm:$0xff]  ;;  %v8754_v17 = vld [vmem:[#allocation166_spill] sm:$0xff] }
 0x445   : > { %2289 = vmatpush.msra.mxu2 %v8744_v46  ;;  %2309 = vmatpush.msra.mxu3 %v8745_v6  ;;  %v8755_v46 = vld [vmem:[#allocation167_spill] sm:$0xff]  ;;  %v8756_v6 = vld [vmem:[#allocation168_spill] sm:$0xff] }
 0x446   : > { %2250 = vmatpush.msra.mxu0 %v8746_v28  ;;  %2270 = vmatpush.msra.mxu1 %v8747_v63  ;;  %v8757_v28 = vld [vmem:[#allocation169_spill] sm:$0xff]  ;;  %v8758_v63 = vld [vmem:[#allocation162_spill] sm:$0xff] }
 0x447   : > { %2290 = vmatpush.msra.mxu2 %v8748_v4  ;;  %2310 = vmatpush.msra.mxu3 %v8749_v16  ;;  %v8759_v4 = vld [vmem:[#allocation163_spill] sm:$0xff]  ;;  %v8760_v16 = vld [vmem:[#allocation164_spill] sm:$0xff] }
 0x448   : > { %2251 = vmatpush.msra.mxu0 %v8750_v22  ;;  %2271 = vmatpush.msra.mxu1 %v8751_v42  ;;  %v8761_v22 = vld [vmem:[#allocation165_spill] sm:$0xff]  ;;  %v8762_v42 = vld [vmem:[#allocation158_spill] sm:$0xff] }
 0x449   : > { %2291 = vmatpush.msra.mxu2 %v8752_v37  ;;  %2311 = vmatpush.msra.mxu3 %v8753_v55  ;;  %v8763_v37 = vld [vmem:[#allocation159_spill] sm:$0xff]  ;;  %v8764_v55 = vld [vmem:[#allocation160_spill] sm:$0xff] }
 0x44a   : > { %2252 = vmatpush.msra.mxu0 %v8754_v17  ;;  %2272 = vmatpush.msra.mxu1 %v8755_v46  ;;  %v8765_v17 = vld [vmem:[#allocation161_spill] sm:$0xff]  ;;  %v8766_v46 = vld [vmem:[#allocation154_spill] sm:$0xff] }
 0x44b   : > { %2292 = vmatpush.msra.mxu2 %v8756_v6  ;;  %2312 = vmatpush.msra.mxu3 %v8757_v28  ;;  %v8767_v6 = vld [vmem:[#allocation155_spill] sm:$0xff]  ;;  %v8768_v28 = vld [vmem:[#allocation156_spill] sm:$0xff] }
 0x44c   : > { %2253 = vmatpush.msra.mxu0 %v8758_v63  ;;  %2273 = vmatpush.msra.mxu1 %v8759_v4  ;;  %v8769_v63 = vld [vmem:[#allocation157_spill] sm:$0xff]  ;;  %v8770_v4 = vld [vmem:[#allocation150_spill] sm:$0xff] }
 0x44d   : > { %2293 = vmatpush.msra.mxu2 %v8760_v16  ;;  %2313 = vmatpush.msra.mxu3 %v8761_v22  ;;  %v8771_v16 = vld [vmem:[#allocation151_spill] sm:$0xff]  ;;  %v8772_v22 = vld [vmem:[#allocation152_spill] sm:$0xff] }
 0x44e   : > { %2254 = vmatpush.msra.mxu0 %v8762_v42  ;;  %2274 = vmatpush.msra.mxu1 %v8763_v37  ;;  %v8773_v42 = vld [vmem:[#allocation153_spill] sm:$0xff]  ;;  %v8774_v37 = vld [vmem:[#allocation146_spill] sm:$0xff] }
 0x44f   : > { %2294 = vmatpush.msra.mxu2 %v8764_v55  ;;  %2314 = vmatpush.msra.mxu3 %v8765_v17  ;;  %v8775_v55 = vld [vmem:[#allocation147_spill] sm:$0xff]  ;;  %v8776_v17 = vld [vmem:[#allocation148_spill] sm:$0xff] }
 0x450   : > { %2255 = vmatpush.msra.mxu0 %v8766_v46  ;;  %2275 = vmatpush.msra.mxu1 %v8767_v6  ;;  %v8777_v46 = vld [vmem:[#allocation149_spill] sm:$0xff]  ;;  %v8778_v6 = vld [vmem:[#allocation142_spill] sm:$0xff] }
 0x451   : > { %2295 = vmatpush.msra.mxu2 %v8768_v28  ;;  %2315 = vmatpush.msra.mxu3 %v8769_v63  ;;  %v8779_v28 = vld [vmem:[#allocation143_spill] sm:$0xff]  ;;  %v8780_v63 = vld [vmem:[#allocation144_spill] sm:$0xff] }
 0x452   : > { %2256 = vmatpush.msra.mxu0 %v8770_v4  ;;  %2276 = vmatpush.msra.mxu1 %v8771_v16  ;;  %v8781_v4 = vld [vmem:[#allocation145_spill] sm:$0xff]  ;;  %v8782_v16 = vld [vmem:[#allocation138_spill] sm:$0xff] }
 0x453   : > { %2296 = vmatpush.msra.mxu2 %v8772_v22  ;;  %2316 = vmatpush.msra.mxu3 %v8773_v42  ;;  %v8783_v22 = vld [vmem:[#allocation139_spill] sm:$0xff]  ;;  %v8784_v42 = vld [vmem:[#allocation140_spill] sm:$0xff] }
 0x454   : > { %2257 = vmatpush.msra.mxu0 %v8774_v37  ;;  %2277 = vmatpush.msra.mxu1 %v8775_v55  ;;  %v8785_v37 = vld [vmem:[#allocation141_spill] sm:$0xff]  ;;  %v8786_v55 = vld [vmem:[#allocation134_spill] sm:$0xff] }
 0x455   : > { %2297 = vmatpush.msra.mxu2 %v8776_v17  ;;  %2317 = vmatpush.msra.mxu3 %v8777_v46  ;;  %v8787_v17 = vld [vmem:[#allocation135_spill] sm:$0xff]  ;;  %v8788_v46 = vld [vmem:[#allocation136_spill] sm:$0xff] }
 0x456   : > { %2322 = vmatpush.msrb.mxu0 %v8778_v6  ;;  %2342 = vmatpush.msrb.mxu1 %v8779_v28  ;;  %v8789_v6 = vld [vmem:[#allocation137_spill] sm:$0xff]  ;;  %v8790_v28 = vld [vmem:[#allocation130_spill] sm:$0xff] }
 0x457   : > { %2362 = vmatpush.msrb.mxu2 %v8780_v63  ;;  %2382 = vmatpush.msrb.mxu3 %v8781_v4  ;;  %v8791_v63 = vld [vmem:[#allocation131_spill] sm:$0xff]  ;;  %v8792_v4 = vld [vmem:[#allocation132_spill] sm:$0xff] }
 0x458   : > { %2323 = vmatpush.msrb.mxu0 %v8782_v16  ;;  %2343 = vmatpush.msrb.mxu1 %v8783_v22  ;;  %v8793_v16 = vld [vmem:[#allocation133_spill] sm:$0xff]  ;;  %v8794_v22 = vld [vmem:[#allocation126_spill] sm:$0xff] }
 0x459   : > { %2363 = vmatpush.msrb.mxu2 %v8784_v42  ;;  %2383 = vmatpush.msrb.mxu3 %v8785_v37  ;;  %v8795_v42 = vld [vmem:[#allocation127_spill] sm:$0xff]  ;;  %v8796_v37 = vld [vmem:[#allocation128_spill] sm:$0xff] }
 0x45a   : > { %2324 = vmatpush.msrb.mxu0 %v8786_v55  ;;  %2344 = vmatpush.msrb.mxu1 %v8787_v17  ;;  %v8797_v55 = vld [vmem:[#allocation129_spill] sm:$0xff]  ;;  %v8798_v17 = vld [vmem:[#allocation122_spill] sm:$0xff] }
 0x45b   : > { %2364 = vmatpush.msrb.mxu2 %v8788_v46  ;;  %2384 = vmatpush.msrb.mxu3 %v8789_v6  ;;  %v8799_v46 = vld [vmem:[#allocation123_spill] sm:$0xff]  ;;  %v8800_v6 = vld [vmem:[#allocation124_spill] sm:$0xff] }
 0x45c   : > { %2325 = vmatpush.msrb.mxu0 %v8790_v28  ;;  %2345 = vmatpush.msrb.mxu1 %v8791_v63  ;;  %v8801_v28 = vld [vmem:[#allocation125_spill] sm:$0xff]  ;;  %v8802_v63 = vld [vmem:[#allocation118_spill] sm:$0xff] }
 0x45d   : > { %2365 = vmatpush.msrb.mxu2 %v8792_v4  ;;  %2385 = vmatpush.msrb.mxu3 %v8793_v16  ;;  %v8803_v4 = vld [vmem:[#allocation119_spill] sm:$0xff]  ;;  %v8804_v16 = vld [vmem:[#allocation120_spill] sm:$0xff] }
 0x45e   : > { %2326 = vmatpush.msrb.mxu0 %v8794_v22  ;;  %2346 = vmatpush.msrb.mxu1 %v8795_v42  ;;  %v8805_v22 = vld [vmem:[#allocation121_spill] sm:$0xff]  ;;  %v8806_v42 = vld [vmem:[#allocation114_spill] sm:$0xff] }
 0x45f   : > { %2366 = vmatpush.msrb.mxu2 %v8796_v37  ;;  %2386 = vmatpush.msrb.mxu3 %v8797_v55  ;;  %v8807_v37 = vld [vmem:[#allocation115_spill] sm:$0xff]  ;;  %v8808_v55 = vld [vmem:[#allocation116_spill] sm:$0xff] }
 0x460   : > { %2327 = vmatpush.msrb.mxu0 %v8798_v17  ;;  %2347 = vmatpush.msrb.mxu1 %v8799_v46  ;;  %v8809_v17 = vld [vmem:[#allocation117_spill] sm:$0xff]  ;;  %v8810_v46 = vld [vmem:[#allocation110_spill] sm:$0xff] }
 0x461   : > { %2367 = vmatpush.msrb.mxu2 %v8800_v6  ;;  %2387 = vmatpush.msrb.mxu3 %v8801_v28  ;;  %v8811_v6 = vld [vmem:[#allocation111_spill] sm:$0xff]  ;;  %v8812_v28 = vld [vmem:[#allocation112_spill] sm:$0xff] }
 0x462   : > { %2328 = vmatpush.msrb.mxu0 %v8802_v63  ;;  %2348 = vmatpush.msrb.mxu1 %v8803_v4  ;;  %v8813_v63 = vld [vmem:[#allocation113_spill] sm:$0xff]  ;;  %v8814_v4 = vld [vmem:[#allocation106_spill] sm:$0xff] }
 0x463   : > { %2368 = vmatpush.msrb.mxu2 %v8804_v16  ;;  %2388 = vmatpush.msrb.mxu3 %v8805_v22  ;;  %v8815_v16 = vld [vmem:[#allocation107_spill] sm:$0xff]  ;;  %v8816_v22 = vld [vmem:[#allocation108_spill] sm:$0xff] }
 0x464   : > { %2329 = vmatpush.msrb.mxu0 %v8806_v42  ;;  %2349 = vmatpush.msrb.mxu1 %v8807_v37  ;;  %v8817_v42 = vld [vmem:[#allocation109_spill] sm:$0xff]  ;;  %v8818_v37 = vld [vmem:[#allocation102_spill] sm:$0xff] }
 0x465   : > { %2369 = vmatpush.msrb.mxu2 %v8808_v55  ;;  %2389 = vmatpush.msrb.mxu3 %v8809_v17  ;;  %v8819_v55 = vld [vmem:[#allocation103_spill] sm:$0xff]  ;;  %v8820_v17 = vld [vmem:[#allocation104_spill] sm:$0xff] }
 0x466   : > { %2330 = vmatpush.msrb.mxu0 %v8810_v46  ;;  %2350 = vmatpush.msrb.mxu1 %v8811_v6  ;;  %v8821_v46 = vld [vmem:[#allocation105_spill] sm:$0xff]  ;;  %v8822_v6 = vld [vmem:[#allocation98_spill] sm:$0xff] }
 0x467   : > { %2370 = vmatpush.msrb.mxu2 %v8812_v28  ;;  %2390 = vmatpush.msrb.mxu3 %v8813_v63  ;;  %v8823_v28 = vld [vmem:[#allocation99_spill] sm:$0xff]  ;;  %v8824_v63 = vld [vmem:[#allocation100_spill] sm:$0xff] }
 0x468   : > { %2331 = vmatpush.msrb.mxu0 %v8814_v4  ;;  %2351 = vmatpush.msrb.mxu1 %v8815_v16  ;;  %v8825_v4 = vld [vmem:[#allocation101_spill] sm:$0xff]  ;;  %v8826_v16 = vld [vmem:[#allocation94_spill] sm:$0xff] }
 0x469   : > { %2371 = vmatpush.msrb.mxu2 %v8816_v22  ;;  %2391 = vmatpush.msrb.mxu3 %v8817_v42  ;;  %v8827_v22 = vld [vmem:[#allocation95_spill] sm:$0xff]  ;;  %v8828_v42 = vld [vmem:[#allocation96_spill] sm:$0xff] }
 0x46a   : > { %2332 = vmatpush.msrb.mxu0 %v8818_v37  ;;  %2352 = vmatpush.msrb.mxu1 %v8819_v55  ;;  %v8829_v37 = vld [vmem:[#allocation97_spill] sm:$0xff]  ;;  %v8830_v55 = vld [vmem:[#allocation90_spill] sm:$0xff] }
 0x46b   : > { %2372 = vmatpush.msrb.mxu2 %v8820_v17  ;;  %2392 = vmatpush.msrb.mxu3 %v8821_v46  ;;  %v8831_v17 = vld [vmem:[#allocation91_spill] sm:$0xff]  ;;  %v8832_v46 = vld [vmem:[#allocation92_spill] sm:$0xff] }
 0x46c   : > { %2333 = vmatpush.msrb.mxu0 %v8822_v6  ;;  %2353 = vmatpush.msrb.mxu1 %v8823_v28  ;;  %v8833_v6 = vld [vmem:[#allocation93_spill] sm:$0xff]  ;;  %v8834_v28 = vld [vmem:[#allocation86_spill] sm:$0xff] }
 0x46d   : > { %2373 = vmatpush.msrb.mxu2 %v8824_v63  ;;  %2393 = vmatpush.msrb.mxu3 %v8825_v4  ;;  %v8835_v63 = vld [vmem:[#allocation87_spill] sm:$0xff]  ;;  %v8836_v4 = vld [vmem:[#allocation88_spill] sm:$0xff] }
 0x46e   : > { %2334 = vmatpush.msrb.mxu0 %v8826_v16  ;;  %2354 = vmatpush.msrb.mxu1 %v8827_v22  ;;  %v8837_v16 = vld [vmem:[#allocation89_spill] sm:$0xff]  ;;  %v8838_v22 = vld [vmem:[#allocation82_spill] sm:$0xff] }
 0x46f   : > { %2374 = vmatpush.msrb.mxu2 %v8828_v42  ;;  %2394 = vmatpush.msrb.mxu3 %v8829_v37  ;;  %v8839_v42 = vld [vmem:[#allocation83_spill] sm:$0xff]  ;;  %v8840_v37 = vld [vmem:[#allocation84_spill] sm:$0xff] }
 0x470   : > { %2335 = vmatpush.msrb.mxu0 %v8830_v55  ;;  %2355 = vmatpush.msrb.mxu1 %v8831_v17  ;;  %v8841_v55 = vld [vmem:[#allocation85_spill] sm:$0xff] }
 0x471   : > { %2375 = vmatpush.msrb.mxu2 %v8832_v46  ;;  %2395 = vmatpush.msrb.mxu3 %v8833_v6 }
 0x472   : > { %2336 = vmatpush.msrb.mxu0 %v8834_v28  ;;  %2356 = vmatpush.msrb.mxu1 %v8835_v63  ;;  %v8842_v63 = vld [vmem:[#allocation210_spill] sm:$0xff] }
 0x473   : > { %2376 = vmatpush.msrb.mxu2 %v8836_v4  ;;  %2396 = vmatpush.msrb.mxu3 %v8837_v16  ;;  %v8843_v4 = vld [vmem:[#allocation216_spill] sm:$0xff] }
 0x474   : > { %2337 = vmatpush.msrb.mxu0 %v8838_v22  ;;  %2357 = vmatpush.msrb.mxu1 %v8839_v42 }
 0x475   : > { %2377 = vmatpush.msrb.mxu2 %v8840_v37  ;;  %2397 = vmatpush.msrb.mxu3 %v8841_v55 }
 0x48c   : > { %v1870_v17 = vpop.f32.mrf.mxu0  ;;  %v1890_v46 = vpop.f32.mrf.mxu1 }
 0x493   : > { %v1930_v11 = vpop.f32.mrf.mxu3  ;;  %v1910_v8 = vpop.f32.mrf.mxu2 }
 0x4a4   : > { %v1950_v6 = vpop.f32.mrf.mxu0  ;;  %v1970_v47 = vpop.f32.mrf.mxu1 }
 0x4a5   : > { %v1951_v28 = vadd.f32 %v1950_v6, %v1870_v17  ;;  %v1971_v18 = vadd.f32 %v1970_v47, %v1890_v46  ;;  %v8847_v17 = vld [vmem:[#allocation16_spill] sm:$0xff]  ;;  %v8848_v46 = vld [vmem:[#allocation217_spill] sm:$0xff] }
 0x4a7   : > { %v2013_v40 = vadd.f32 %v1951_v28, %v8842_v63  ;;  %v2014_v0 = vadd.f32 %v1971_v18, %v8843_v4 }
 0x4a8   : > { %v2085_v16 = vpop.permute.xlu1 %2084 }
 0x4a9   : > { %v4196_v52 = vmul.f32 -1.442695, %v2013_v40  ;;  %v4197_v22 = vmul.f32 -1.442695, %v2014_v0  ;;  %v2087_v42 = vmul.f32 %v2085_v16, %v8844_v50  ;;  %v2088_v37 = vmul.f32 %v2085_v16, %v8845_v33 }
 0x4ab   : > { %4420 = vpow2.f32 %v4196_v52  ;;  %v2010_v55 = vpop.f32.mrf.mxu3  ;;  %v2091_v27 = vadd.f32 %v2087_v42, %v8846_v5  ;;  %v2092_v47 = vadd.f32 %v2088_v37, %v8847_v17  ;;  %v1990_v33 = vpop.f32.mrf.mxu2  ;;  %v8849_v52 = vld [vmem:[#allocation81_spill] sm:$0xff] }
 0x4ac   : > { %4422 = vpow2.f32 %v4197_v22  ;;  %v2011_v44 = vadd.f32 %v2010_v55, %v1930_v11  ;;  %v2090_v54 = vmul.f32 %v2085_v16, %v8849_v52  ;;  %v1991_v42 = vadd.f32 %v1990_v33, %v1910_v8 }
 0x4ae   : > { %v2016_v28 = vadd.f32 %v2011_v44, %v8848_v46  ;;  %v2094_v44 = vadd.f32 %v2090_v54, %v8676_v53 }
 0x4b0   : > { %v4198_v6 = vmul.f32 -1.442695, %v2016_v28  ;;  %v2112_v18 = vpop.f32.mrf.mxu0  ;;  %v2132_v4 = vpop.f32.mrf.mxu1 }
 0x4b1   : > { %v4421_v40 = vpop.eup %4420  ;;  %v2175_v0 = vadd.f32 %v2112_v18, %v2091_v27  ;;  %v2176_v63 = vadd.f32 %v2132_v4, %v2092_v47  ;;  %v8850_v4 = vld [vmem:[#allocation218_spill] sm:$0xff] }
 0x4b2   : > { %v4423_v50 = vpop.eup %4422  ;;  %v2020_v13 = vadd.f32 1.0, %v4421_v40  ;;  %4424 = vpow2.f32 %v4198_v6  ;;  %v2015_v47 = vadd.f32 %v1991_v42, %v8850_v4 }
 0x4b3   : > { %v2039_v22 = vadd.f32 1.0, %v4423_v50  ;;  %v4199_v11 = vmul.f32 -1.442695, %v2175_v0  ;;  %v4200_v55 = vmul.f32 -1.442695, %v2176_v63 }
 0x4b4   : > { %4426 = vrcp.f32 %v2020_v13  ;;  %v2030_v42 = vand.u32 2147483647, %v2020_v13  ;;  %vm2026_vm11 = vweird.f32 %v2020_v13 }
 0x4b5   : > { %4428 = vrcp.f32 %v2039_v22  ;;  %vm2045_vm10 = vweird.f32 %v2039_v22 }
 0x4b6   : > { %4430 = vpow2.f32 %v4199_v11  ;;  %v2089_v11 = vmul.f32 %v2085_v16, %v8678_v56  ;;  %vm2031_vm13 = vcmp.eq.f32.partialorder %v2030_v42, 8.507059e+37 }
 0x4b7   : > { %4432 = vpow2.f32 %v4200_v55  ;;  %v2172_v37 = vpop.f32.mrf.mxu3 }
 0x4b8   : > { %v4425_v28 = vpop.eup %4424  ;;  %v2178_v27 = vadd.f32 %v2172_v37, %v2094_v44  ;;  %v2032_v44 = vand.u32 2147483648, %v2020_v13 }
 0x4b9   : > { %v6431_v18 = vadd.f32 1.0, %v4425_v28  ;;  %v2051_v28 = vand.u32 2147483648, %v2039_v22 }
 0x4ba   : > { %v4427_v6 = vpop.eup %4426  ;;  %v4201_v40 = vmul.f32 -1.442695, %v2178_v27 }
 0x4bb   : > { %v4429_v52 = vpop.eup %4428  ;;  %v2022_v50 = vmul.f32 %v4427_v6, %v2020_v13  ;;  %4434 = vrcp.f32 %v6431_v18  ;;  %vm2027_vm8 = vweird.f32 %v4427_v6  ;;  %v2052_v17 = vor.u32 1.1754944e-38, %v2051_v28 }
 0x4bc   : > { %v4431_v63 = vpop.eup %4430  ;;  %v2041_v0 = vmul.f32 %v4429_v52, %v2039_v22  ;;  %4436 = vpow2.f32 %v4201_v40  ;;  %vm2046_vm9 = vweird.f32 %v4429_v52  ;;  %v2049_v40 = vand.u32 2147483647, %v2039_v22  ;;  %vm2028_vm12 = vmor %vm2026_vm11, %vm2027_vm8 }
 0x4bd   : > { %v4433_v8 = vpop.eup %4432  ;;  %v2023_v33 = vsub.f32 1.0, %v2022_v50  ;;  %4438 = vtanh.f32 %v2015_v47  ;;  %v6434_v54 = vadd.f32 1.0, %v4431_v63  ;;  %v2152_v47 = vpop.f32.mrf.mxu2  ;;  %v2093_v63 = vadd.f32 %v2089_v11, %v8679_v1  ;;  %vm2047_vm14 = vmor %vm2045_vm10, %vm2046_vm9 }
 0x4be   : > { %v2042_v55 = vsub.f32 1.0, %v2041_v0  ;;  %v6437_v37 = vadd.f32 1.0, %v4433_v8  ;;  %v2033_v8 = vor.u32 1.1754944e-38, %v2032_v44  ;;  %vm2050_vm15 = vcmp.eq.f32.partialorder %v2049_v40, 8.507059e+37 }
 0x4bf   : > { %v2024_v27 = vmul.f32 %v4427_v6, %v2023_v33  ;;  %4440 = vrcp.f32 %v6434_v54  ;;  %v2177_v4 = vadd.f32 %v2152_v47, %v2093_v63  ;;  %vm2065_vm0 = vweird.f32 %v6431_v18 }
 0x4c0   : > { %v2043_v53 = vmul.f32 %v4429_v52, %v2042_v55  ;;  %4442 = vrcp.f32 %v6437_v37  ;;  %v2192_v40 = vand.u32 2147483647, %v6434_v54  ;;  %vm2188_vm4 = vweird.f32 %v6434_v54 }
 0x4c1   : > { %v6441_v50 = vpop.eup %4434  ;;  %v2025_v16 = vadd.f32 %v4427_v6, %v2024_v27  ;;  %vm2207_vm6 = vweird.f32 %v6437_v37 }
 0x4c2   : > { %v4437_v0 = vpop.eup %4436  ;;  %v2044_v33 = vadd.f32 %v4429_v52, %v2043_v53  ;;  %v2061_v55 = vmul.f32 %v6441_v50, %v6431_v18  ;;  %vm2066_vm1 = vweird.f32 %v6441_v50  ;;  %vm2193_vm9 = vcmp.eq.f32.partialorder %v2192_v40, 8.507059e+37 }
 0x4c3   : > { %v4439_v56 = vpop.eup %4438  ;;  %v2029_v5 = vsel %vm2028_vm12, %v4427_v6, %v2025_v16  ;;  %v6447_v46 = vadd.f32 1.0, %v4437_v0  ;;  %vm6474_vm5 = vmor %vm2065_vm0, %vm2066_vm1 }
 0x4c4   : > { %v2034_v22 = vsel %vm2031_vm13, %v2033_v8, %v2029_v5  ;;  %v2048_v13 = vsel %vm2047_vm14, %v4429_v52, %v2044_v33  ;;  %v2062_v11 = vsub.f32 1.0, %v2061_v55  ;;  %v2080_v5 = vperm.slane %v8677_v58, 2 }
 0x4c5   : > { %v4441_v27 = vpop.eup %4440  ;;  %v2053_v1 = vsel %vm2050_vm15, %v2052_v17, %v2048_v13  ;;  %v2076_v42 = vmul.f32 %v4439_v56, %v2034_v22  ;;  %4444 = vrcp.f32 %v6447_v46  ;;  %v2071_v56 = vand.u32 2147483648, %v6431_v18 }
 0x4c6   : > { %v4443_v53 = vpop.eup %4442  ;;  %v2075_v44 = vmul.f32 %v2053_v1, %v6187_v41  ;;  %v2063_v60 = vmul.f32 %v6441_v50, %v2062_v11  ;;  %v2184_v28 = vmul.f32 %v4441_v27, %v6434_v54  ;;  %4446 = vtanh.f32 %v2177_v4 }
 0x4c7   : > { %v2203_v6 = vmul.f32 %v4443_v53, %v6437_v37  ;;  %v2194_v41 = vand.u32 2147483648, %v6434_v54  ;;  %v2213_v4 = vand.u32 2147483648, %v6437_v37  ;;  %vm2189_vm2 = vweird.f32 %v4441_v27 }
 0x4c8   : > { %v6456_v52 = vadd.f32 %v2076_v42, %v2075_v44  ;;  %v2185_v17 = vsub.f32 1.0, %v2184_v28  ;;  %v2064_v1 = vadd.f32 %v6441_v50, %v2063_v60  ;;  %vm2208_vm3 = vweird.f32 %v4443_v53  ;;  %vm2190_vm7 = vmor %vm2188_vm4, %vm2189_vm2 }
 0x4c9   : > { %v2204_v47 = vsub.f32 1.0, %v2203_v6  ;;  %v2211_v8 = vand.u32 2147483647, %v6437_v37  ;;  %v2069_v33 = vand.u32 2147483647, %v6431_v18  ;;  %v2072_v13 = vor.u32 1.1754944e-38, %v2071_v56  ;;  %vm2209_vm8 = vmor %vm2207_vm6, %vm2208_vm3 }
 0x4ca   : > { %8851 = vst [vmem:[#allocation77_spill] sm:$0xff] %v6456_v52  ;;  %4448 = vtanh.f32 %v6456_v52  ;;  %v2186_v16 = vmul.f32 %v4441_v27, %v2185_v17  ;;  %v2195_v42 = vor.u32 1.1754944e-38, %v2194_v41  ;;  %v2068_v54 = vsel %vm6474_vm5, %v6441_v50, %v2064_v1  ;;  %v8854_v1 = vld [vmem:[#allocation52_spill] sm:$0xff] }
 0x4cb   : > { %v6465_v63 = vpop.eup %4444  ;;  %v2205_v0 = vmul.f32 %v4443_v53, %v2204_v47  ;;  %v2214_v28 = vor.u32 1.1754944e-38, %v2213_v4  ;;  %vm2212_vm10 = vcmp.eq.f32.partialorder %v2211_v8, 8.507059e+37  ;;  %vm2070_vm11 = vcmp.eq.f32.partialorder %v2069_v33, 8.507059e+37  ;;  %v8855_v4 = vld [vmem:[#allocation45_spill] sm:$0xff]  ;;  %v8857_v8 = vld [vmem:[#allocation47_spill] sm:$0xff]  ;;  %v8858_v33 = vld [vmem:[#allocation48_spill] sm:$0xff] }
 0x4cc   : > { %v2187_v55 = vadd.f32 %v4441_v27, %v2186_v16  ;;  %v2223_v60 = vmul.f32 %v6465_v63, %v6447_v46  ;;  %v4447_v11 = vpop.eup %4446  ;;  %v2073_v41 = vsel %vm2070_vm11, %v2072_v13, %v2068_v54  ;;  %vm2228_vm12 = vweird.f32 %v6465_v63  ;;  %v8861_v13 = vld [vmem:[#allocation43_spill] sm:$0xff] }
 0x4cd   : > { %v2206_v44 = vadd.f32 %v4443_v53, %v2205_v0  ;;  %vm2227_vm13 = vweird.f32 %v6447_v46  ;;  %v8865_v54 = vld [vmem:[#allocation39_spill] sm:$0xff] }
 0x4ce   : > { %v2191_v6 = vsel %vm2190_vm7, %v4441_v27, %v2187_v55  ;;  %v2224_v18 = vsub.f32 1.0, %v2223_v60  ;;  %vm2229_vm14 = vmor %vm2227_vm13, %vm2228_vm12  ;;  %v8859_v55 = vld [vmem:[#allocation41_spill] sm:$0xff]  ;;  %v8860_v60 = vld [vmem:[#allocation42_spill] sm:$0xff] }
 0x4cf   : > { %v2196_v17 = vsel %vm2193_vm9, %v2195_v42, %v2191_v6  ;;  %v2210_v47 = vsel %vm2209_vm8, %v4443_v53, %v2206_v44  ;;  %v2233_v53 = vand.u32 2147483648, %v6447_v46  ;;  %v8863_v42 = vld [vmem:[#allocation37_spill] sm:$0xff]  ;;  %v8864_v44 = vld [vmem:[#allocation38_spill] sm:$0xff] }
 0x4d0   : > { %v4449_v56 = vpop.eup %4448  ;;  %v2215_v16 = vsel %vm2212_vm10, %v2214_v28, %v2210_v47  ;;  %v2238_v58 = vmul.f32 %v4447_v11, %v2196_v17  ;;  %v2225_v37 = vmul.f32 %v6465_v63, %v2224_v18  ;;  %v8862_v11 = vld [vmem:[#allocation44_spill] sm:$0xff]  ;;  %v8867_v6 = vld [vmem:[#allocation33_spill] sm:$0xff]  ;;  %v8868_v18 = vld [vmem:[#allocation34_spill] sm:$0xff] }
 0x4d1   : > { %v2237_v0 = vmul.f32 %v2215_v16, %v6244_v48  ;;  %v2079_v52 = vmul.f32 %v4449_v56, %v2073_v41  ;;  %v2234_v48 = vor.u32 1.1754944e-38, %v2233_v53  ;;  %v8866_v28 = vld [vmem:[#allocation40_spill] sm:$0xff]  ;;  %v8869_v17 = vld [vmem:[#allocation35_spill] sm:$0xff]  ;;  %v8871_v56 = vld [vmem:[#allocation29_spill] sm:$0xff] }
 0x4d2   : > { %v2226_v27 = vadd.f32 %v6465_v63, %v2225_v37  ;;  %v8870_v47 = vld [vmem:[#allocation36_spill] sm:$0xff]  ;;  %v8872_v16 = vld [vmem:[#allocation30_spill] sm:$0xff]  ;;  %v8873_v37 = vld [vmem:[#allocation31_spill] sm:$0xff] }
 0x4d3   : > { %v6484_v22 = vadd.f32 %v2238_v58, %v2237_v0  ;;  %v2081_v50 = vmul.f32 %v2080_v5, %v2079_v52  ;;  %2258 = vmatmul.f32.vlgmr.msra.gmra.mxu0 %v2079_v52  ;;  %2278 = vmatmul.f32.vlgmr.msra.gmra.mxu1 %v2079_v52  ;;  %v2231_v58 = vand.u32 2147483647, %v6447_v46  ;;  %v8874_v41 = vld [vmem:[#allocation32_spill] sm:$0xff]  ;;  %v8875_v0 = vld [vmem:[#allocation25_spill] sm:$0xff] }
 0x4d4   : > { %2298 = vmatmul.f32.vlgmr.msra.gmra.mxu2 %v2079_v52  ;;  %2318 = vmatmul.f32.vlgmr.msra.gmra.mxu3 %v2079_v52  ;;  %v8878_v53 = vld [vmem:[#allocation28_spill] sm:$0xff] }
 0x4d5   : > { %4450 = vtanh.f32 %v6484_v22  ;;  %v6491_v40 = vadd.f32 %v2081_v50, %v6210_v62  ;;  %2484 = vmatpush.msra.mxu0 %v8503_v3  ;;  %2504 = vmatpush.msra.mxu1 %v8188_v25  ;;  %v2230_v62 = vsel %vm2229_vm14, %v6465_v63, %v2226_v27  ;;  %vm2232_vm15 = vcmp.eq.f32.partialorder %v2231_v58, 8.507059e+37  ;;  %v8856_v63 = vld [vmem:[#allocation46_spill] sm:$0xff]  ;;  %v8877_v27 = vld [vmem:[#allocation27_spill] sm:$0xff]  ;;  %v8879_v58 = vld [vmem:[#allocation21_spill] sm:$0xff] }
 0x4d6   : > { %2524 = vmatpush.msra.mxu2 %v8189_v7  ;;  %2544 = vmatpush.msra.mxu3 %v8190_v32  ;;  %v2235_v5 = vsel %vm2232_vm15, %v2234_v48, %v2230_v62  ;;  %v8876_v50 = vld [vmem:[#allocation26_spill] sm:$0xff]  ;;  %v8881_v48 = vld [vmem:[#allocation23_spill] sm:$0xff] }
 0x4d7   : > { %2485 = vmatpush.msra.mxu0 %v8504_v14  ;;  %2505 = vmatpush.msra.mxu1 %v8505_v35  ;;  %v8880_v62 = vld [vmem:[#allocation22_spill] sm:$0xff] }
 0x4d8   : > { %2525 = vmatpush.msra.mxu2 %v8506_v38  ;;  %2545 = vmatpush.msra.mxu3 %v8507_v26 }
 0x4d9   : > { %2486 = vmatpush.msra.mxu0 %v8508_v15  ;;  %2506 = vmatpush.msra.mxu1 %v8509_v24 }
 0x4da   : > { %2526 = vmatpush.msra.mxu2 %v8510_v23  ;;  %2546 = vmatpush.msra.mxu3 %v8511_v10 }
 0x4db   : > { %v4451_v46 = vpop.eup %4450  ;;  %2487 = vmatpush.msra.mxu0 %v8512_v19  ;;  %2507 = vmatpush.msra.mxu1 %v8513_v20 }
 0x4dc   : > { %v2241_v52 = vmul.f32 %v4451_v46, %v2235_v5  ;;  %2527 = vmatpush.msra.mxu2 %v8514_v9  ;;  %2547 = vmatpush.msra.mxu3 %v8515_v21  ;;  %v8882_v46 = vld [vmem:[#allocation24_spill] sm:$0xff]  ;;  %v8883_v5 = vld [vmem:[#allocation17_spill] sm:$0xff] }
 0x4dd   : > { %2488 = vmatpush.msra.mxu0 %v8516_v30  ;;  %2508 = vmatpush.msra.mxu1 %v8517_v31 }
 0x4de   : > { %2338 = vmatmul.f32.vlgmr.msrb.gmra.mxu0 %v2241_v52  ;;  %2358 = vmatmul.f32.vlgmr.msrb.gmra.mxu1 %v2241_v52 }
 0x4df   : > { %2378 = vmatmul.f32.vlgmr.msrb.gmra.mxu2 %v2241_v52  ;;  %2398 = vmatmul.f32.vlgmr.msrb.gmra.mxu3 %v2241_v52 }
 0x4e0   : > { %2528 = vmatpush.msra.mxu2 %v8518_v43  ;;  %2548 = vmatpush.msra.mxu3 %v8519_v39 }
 0x4e1   : > { %2489 = vmatpush.msra.mxu0 %v8520_v34  ;;  %2509 = vmatpush.msra.mxu1 %v8521_v12 }
 0x4e2   : > { %2529 = vmatpush.msra.mxu2 %v8522_v2  ;;  %2549 = vmatpush.msra.mxu3 %v8680_v49 }
 0x4e3   : > { %2490 = vmatpush.msra.mxu0 %v8681_v61  ;;  %2510 = vmatpush.msra.mxu1 %v8682_v29 }
 0x4e4   : > { %2530 = vmatpush.msra.mxu2 %v8683_v51  ;;  %2550 = vmatpush.msra.mxu3 %v8684_v57 }
 0x4e5   : > { %2491 = vmatpush.msra.mxu0 %v8685_v45  ;;  %2511 = vmatpush.msra.mxu1 %v8686_v36 }
 0x4e6   : > { %2531 = vmatpush.msra.mxu2 %v8687_v59  ;;  %2551 = vmatpush.msra.mxu3 %v8854_v1 }
 0x4e7   : > { %2492 = vmatpush.msra.mxu0 %v8855_v4  ;;  %2512 = vmatpush.msra.mxu1 %v8856_v63 }
 0x4e8   : > { %2532 = vmatpush.msra.mxu2 %v8857_v8  ;;  %2552 = vmatpush.msra.mxu3 %v8858_v33  ;;  %v9025_v8 = vld [vmem:[#allocation213_spill] sm:$0xff] }
 0x4e9   : > { %2493 = vmatpush.msra.mxu0 %v8859_v55  ;;  %2513 = vmatpush.msra.mxu1 %v8860_v60 }
 0x4ea   : > { %2533 = vmatpush.msra.mxu2 %v8861_v13  ;;  %2553 = vmatpush.msra.mxu3 %v8862_v11 }
 0x4eb   : > { %2494 = vmatpush.msra.mxu0 %v8863_v42  ;;  %2514 = vmatpush.msra.mxu1 %v8864_v44 }
 0x4ec   : > { %2534 = vmatpush.msra.mxu2 %v8865_v54  ;;  %2554 = vmatpush.msra.mxu3 %v8866_v28 }
 0x4ed   : > { %2495 = vmatpush.msra.mxu0 %v8867_v6  ;;  %2515 = vmatpush.msra.mxu1 %v8868_v18  ;;  %v9018_v6 = vld [vmem:[#allocation217_spill] sm:$0xff] }
 0x4ee   : > { %2535 = vmatpush.msra.mxu2 %v8869_v17  ;;  %2555 = vmatpush.msra.mxu3 %v8870_v47 }
 0x4ef   : > { %2496 = vmatpush.msra.mxu0 %v8871_v56  ;;  %2516 = vmatpush.msra.mxu1 %v8872_v16 }
 0x4f0   : > { %2536 = vmatpush.msra.mxu2 %v8873_v37  ;;  %2556 = vmatpush.msra.mxu3 %v8874_v41  ;;  %v8884_v37 = vld [vmem:[#allocation18_spill] sm:$0xff]  ;;  %v8885_v41 = vld [vmem:[#allocation19_spill] sm:$0xff] }
 0x4f1   : > { %2497 = vmatpush.msra.mxu0 %v8875_v0  ;;  %2517 = vmatpush.msra.mxu1 %v8876_v50  ;;  %v8886_v0 = vld [vmem:[#allocation20_spill] sm:$0xff] }
 0x4f2   : > { %2537 = vmatpush.msra.mxu2 %v8877_v27  ;;  %2557 = vmatpush.msra.mxu3 %v8878_v53  ;;  %v4745_v53 = vmov 4   ;;  %v8895_v27 = vld [vmem:[#allocation205_spill] sm:$0xff] }
 0x4f3   : > { %2498 = vmatpush.msra.mxu0 %v8879_v58  ;;  %2518 = vmatpush.msra.mxu1 %v8880_v62  ;;  %v8887_v58 = vld [vmem:[#allocation206_spill] sm:$0xff]  ;;  %v8888_v62 = vld [vmem:[#allocation211_spill] sm:$0xff] }
 0x4f4   : > { %2538 = vmatpush.msra.mxu2 %v8881_v48  ;;  %2558 = vmatpush.msra.mxu3 %v8882_v46  ;;  %v8889_v48 = vld [vmem:[#allocation207_spill] sm:$0xff]  ;;  %v8890_v46 = vld [vmem:[#allocation208_spill] sm:$0xff] }
 0x4f5   : > { %2499 = vmatpush.msra.mxu0 %v8883_v5  ;;  %2519 = vmatpush.msra.mxu1 %v8884_v37  ;;  %v8891_v5 = vld [vmem:[#allocation209_spill] sm:$0xff]  ;;  %v8892_v37 = vld [vmem:[#allocation202_spill] sm:$0xff] }
 0x4f6   : > { %2539 = vmatpush.msra.mxu2 %v8885_v41  ;;  %2559 = vmatpush.msra.mxu3 %v8886_v0  ;;  %v8893_v41 = vld [vmem:[#allocation203_spill] sm:$0xff]  ;;  %v8894_v0 = vld [vmem:[#allocation204_spill] sm:$0xff] }
 0x4f7   : > { %2500 = vmatmul.f32.vlgmr.msra.gmra.mxu0 %v2241_v52  ;;  %2520 = vmatmul.f32.vlgmr.msra.gmra.mxu1 %v2241_v52 }
 0x4f8   : > { %2540 = vmatmul.f32.vlgmr.msra.gmra.mxu2 %v2241_v52  ;;  %2560 = vmatmul.f32.vlgmr.msra.gmra.mxu3 %v2241_v52  ;;  %v8896_v52 = vld [vmem:[#allocation198_spill] sm:$0xff] }
 0x4f9   : > { %4335 = vset.pattern.permute.xlu2 %v4745_v53  ;;  %2631 = vmatpush.msrb.mxu0 %v8887_v58  ;;  %v8897_v53 = vld [vmem:[#allocation199_spill] sm:$0xff]  ;;  %v8898_v58 = vld [vmem:[#allocation200_spill] sm:$0xff] }
 0x4fa   : > { %2473 = vperm.xlu2 %4335, %v8888_v62   ;;  %2651 = vmatpush.msrb.mxu1 %v8889_v48  ;;  %v8899_v62 = vld [vmem:[#allocation201_spill] sm:$0xff]  ;;  %v8900_v48 = vld [vmem:[#allocation194_spill] sm:$0xff] }
 0x4fb   : > { %2671 = vmatpush.msrb.mxu2 %v8890_v46  ;;  %2691 = vmatpush.msrb.mxu3 %v8891_v5  ;;  %v8901_v46 = vld [vmem:[#allocation195_spill] sm:$0xff]  ;;  %v8902_v5 = vld [vmem:[#allocation196_spill] sm:$0xff] }
 0x4fc   : > { %2632 = vmatpush.msrb.mxu0 %v8892_v37  ;;  %2652 = vmatpush.msrb.mxu1 %v8893_v41  ;;  %v8903_v37 = vld [vmem:[#allocation197_spill] sm:$0xff]  ;;  %v8904_v41 = vld [vmem:[#allocation190_spill] sm:$0xff] }
 0x4fd   : > { %2672 = vmatpush.msrb.mxu2 %v8894_v0  ;;  %2692 = vmatpush.msrb.mxu3 %v8895_v27  ;;  %v8905_v0 = vld [vmem:[#allocation191_spill] sm:$0xff]  ;;  %v8906_v27 = vld [vmem:[#allocation192_spill] sm:$0xff] }
 0x4fe   : > { %2633 = vmatpush.msrb.mxu0 %v8896_v52  ;;  %2653 = vmatpush.msrb.mxu1 %v8897_v53  ;;  %v8907_v52 = vld [vmem:[#allocation193_spill] sm:$0xff]  ;;  %v8908_v53 = vld [vmem:[#allocation186_spill] sm:$0xff] }
 0x4ff   : > { %2673 = vmatpush.msrb.mxu2 %v8898_v58  ;;  %2693 = vmatpush.msrb.mxu3 %v8899_v62  ;;  %v8909_v58 = vld [vmem:[#allocation187_spill] sm:$0xff]  ;;  %v8910_v62 = vld [vmem:[#allocation188_spill] sm:$0xff] }
 0x500   : > { %2634 = vmatpush.msrb.mxu0 %v8900_v48  ;;  %2654 = vmatpush.msrb.mxu1 %v8901_v46  ;;  %v8911_v48 = vld [vmem:[#allocation189_spill] sm:$0xff]  ;;  %v8912_v46 = vld [vmem:[#allocation182_spill] sm:$0xff] }
 0x501   : > { %2674 = vmatpush.msrb.mxu2 %v8902_v5  ;;  %2694 = vmatpush.msrb.mxu3 %v8903_v37  ;;  %v8913_v5 = vld [vmem:[#allocation183_spill] sm:$0xff]  ;;  %v8914_v37 = vld [vmem:[#allocation184_spill] sm:$0xff] }
 0x502   : > { %2635 = vmatpush.msrb.mxu0 %v8904_v41  ;;  %2655 = vmatpush.msrb.mxu1 %v8905_v0  ;;  %v8915_v41 = vld [vmem:[#allocation185_spill] sm:$0xff]  ;;  %v8916_v0 = vld [vmem:[#allocation178_spill] sm:$0xff] }
 0x503   : > { %2675 = vmatpush.msrb.mxu2 %v8906_v27  ;;  %2695 = vmatpush.msrb.mxu3 %v8907_v52  ;;  %v8917_v27 = vld [vmem:[#allocation179_spill] sm:$0xff]  ;;  %v8918_v52 = vld [vmem:[#allocation180_spill] sm:$0xff] }
 0x504   : > { %2636 = vmatpush.msrb.mxu0 %v8908_v53  ;;  %2656 = vmatpush.msrb.mxu1 %v8909_v58  ;;  %v8919_v53 = vld [vmem:[#allocation181_spill] sm:$0xff]  ;;  %v8920_v58 = vld [vmem:[#allocation174_spill] sm:$0xff] }
 0x505   : > { %2676 = vmatpush.msrb.mxu2 %v8910_v62  ;;  %2696 = vmatpush.msrb.mxu3 %v8911_v48  ;;  %v8921_v62 = vld [vmem:[#allocation175_spill] sm:$0xff]  ;;  %v8922_v48 = vld [vmem:[#allocation176_spill] sm:$0xff] }
 0x506   : > { %2637 = vmatpush.msrb.mxu0 %v8912_v46  ;;  %2657 = vmatpush.msrb.mxu1 %v8913_v5  ;;  %v8923_v46 = vld [vmem:[#allocation177_spill] sm:$0xff]  ;;  %v8924_v5 = vld [vmem:[#allocation170_spill] sm:$0xff] }
 0x507   : > { %2677 = vmatpush.msrb.mxu2 %v8914_v37  ;;  %2697 = vmatpush.msrb.mxu3 %v8915_v41  ;;  %v8925_v37 = vld [vmem:[#allocation171_spill] sm:$0xff]  ;;  %v8926_v41 = vld [vmem:[#allocation172_spill] sm:$0xff] }
 0x508   : > { %2638 = vmatpush.msrb.mxu0 %v8916_v0  ;;  %2658 = vmatpush.msrb.mxu1 %v8917_v27  ;;  %v8927_v0 = vld [vmem:[#allocation173_spill] sm:$0xff]  ;;  %v8928_v27 = vld [vmem:[#allocation166_spill] sm:$0xff] }
 0x509   : > { %2678 = vmatpush.msrb.mxu2 %v8918_v52  ;;  %2698 = vmatpush.msrb.mxu3 %v8919_v53  ;;  %v8929_v52 = vld [vmem:[#allocation167_spill] sm:$0xff]  ;;  %v8930_v53 = vld [vmem:[#allocation168_spill] sm:$0xff] }
 0x50a   : > { %2639 = vmatpush.msrb.mxu0 %v8920_v58  ;;  %2659 = vmatpush.msrb.mxu1 %v8921_v62  ;;  %v8931_v58 = vld [vmem:[#allocation169_spill] sm:$0xff]  ;;  %v8932_v62 = vld [vmem:[#allocation162_spill] sm:$0xff] }
 0x50b   : > { %2679 = vmatpush.msrb.mxu2 %v8922_v48  ;;  %2699 = vmatpush.msrb.mxu3 %v8923_v46  ;;  %v8933_v48 = vld [vmem:[#allocation163_spill] sm:$0xff]  ;;  %v8934_v46 = vld [vmem:[#allocation164_spill] sm:$0xff] }
 0x50c   : > { %2640 = vmatpush.msrb.mxu0 %v8924_v5  ;;  %2660 = vmatpush.msrb.mxu1 %v8925_v37  ;;  %v8935_v5 = vld [vmem:[#allocation165_spill] sm:$0xff]  ;;  %v8936_v37 = vld [vmem:[#allocation158_spill] sm:$0xff] }
 0x50d   : > { %2680 = vmatpush.msrb.mxu2 %v8926_v41  ;;  %2700 = vmatpush.msrb.mxu3 %v8927_v0  ;;  %v8937_v41 = vld [vmem:[#allocation159_spill] sm:$0xff]  ;;  %v8938_v0 = vld [vmem:[#allocation160_spill] sm:$0xff] }
 0x50e   : > { %2641 = vmatpush.msrb.mxu0 %v8928_v27  ;;  %2661 = vmatpush.msrb.mxu1 %v8929_v52  ;;  %v8939_v27 = vld [vmem:[#allocation161_spill] sm:$0xff]  ;;  %v8940_v52 = vld [vmem:[#allocation154_spill] sm:$0xff] }
 0x50f   : > { %2681 = vmatpush.msrb.mxu2 %v8930_v53  ;;  %2701 = vmatpush.msrb.mxu3 %v8931_v58  ;;  %v8941_v53 = vld [vmem:[#allocation155_spill] sm:$0xff]  ;;  %v8942_v58 = vld [vmem:[#allocation156_spill] sm:$0xff] }
 0x510   : > { %2642 = vmatpush.msrb.mxu0 %v8932_v62  ;;  %2662 = vmatpush.msrb.mxu1 %v8933_v48  ;;  %v8943_v62 = vld [vmem:[#allocation157_spill] sm:$0xff]  ;;  %v8944_v48 = vld [vmem:[#allocation150_spill] sm:$0xff] }
 0x511   : > { %2682 = vmatpush.msrb.mxu2 %v8934_v46  ;;  %2702 = vmatpush.msrb.mxu3 %v8935_v5  ;;  %v8945_v46 = vld [vmem:[#allocation151_spill] sm:$0xff]  ;;  %v8946_v5 = vld [vmem:[#allocation152_spill] sm:$0xff] }
 0x512   : > { %2643 = vmatpush.msrb.mxu0 %v8936_v37  ;;  %2663 = vmatpush.msrb.mxu1 %v8937_v41  ;;  %v8947_v37 = vld [vmem:[#allocation153_spill] sm:$0xff]  ;;  %v8948_v41 = vld [vmem:[#allocation146_spill] sm:$0xff] }
 0x513   : > { %2683 = vmatpush.msrb.mxu2 %v8938_v0  ;;  %2703 = vmatpush.msrb.mxu3 %v8939_v27  ;;  %v8949_v0 = vld [vmem:[#allocation147_spill] sm:$0xff]  ;;  %v8950_v27 = vld [vmem:[#allocation148_spill] sm:$0xff] }
 0x514   : > { %2644 = vmatpush.msrb.mxu0 %v8940_v52  ;;  %2664 = vmatpush.msrb.mxu1 %v8941_v53  ;;  %v8951_v52 = vld [vmem:[#allocation149_spill] sm:$0xff]  ;;  %v8952_v53 = vld [vmem:[#allocation142_spill] sm:$0xff] }
 0x515   : > { %2684 = vmatpush.msrb.mxu2 %v8942_v58  ;;  %2704 = vmatpush.msrb.mxu3 %v8943_v62  ;;  %v8953_v58 = vld [vmem:[#allocation143_spill] sm:$0xff]  ;;  %v8954_v62 = vld [vmem:[#allocation144_spill] sm:$0xff] }
 0x516   : > { %2645 = vmatpush.msrb.mxu0 %v8944_v48  ;;  %2665 = vmatpush.msrb.mxu1 %v8945_v46  ;;  %v8955_v48 = vld [vmem:[#allocation145_spill] sm:$0xff]  ;;  %v8956_v46 = vld [vmem:[#allocation138_spill] sm:$0xff] }
 0x517   : > { %2685 = vmatpush.msrb.mxu2 %v8946_v5  ;;  %2705 = vmatpush.msrb.mxu3 %v8947_v37  ;;  %v8957_v5 = vld [vmem:[#allocation139_spill] sm:$0xff]  ;;  %v8958_v37 = vld [vmem:[#allocation140_spill] sm:$0xff] }
 0x518   : > { %2646 = vmatpush.msrb.mxu0 %v8948_v41  ;;  %2666 = vmatpush.msrb.mxu1 %v8949_v0  ;;  %v8959_v41 = vld [vmem:[#allocation141_spill] sm:$0xff]  ;;  %v8960_v0 = vld [vmem:[#allocation134_spill] sm:$0xff] }
 0x519   : > { %2686 = vmatpush.msrb.mxu2 %v8950_v27  ;;  %2706 = vmatpush.msrb.mxu3 %v8951_v52  ;;  %v8961_v27 = vld [vmem:[#allocation135_spill] sm:$0xff]  ;;  %v8962_v52 = vld [vmem:[#allocation136_spill] sm:$0xff] }
 0x51a   : > { %2711 = vmatpush.msra.mxu0 %v8952_v53  ;;  %2731 = vmatpush.msra.mxu1 %v8953_v58  ;;  %v8963_v53 = vld [vmem:[#allocation137_spill] sm:$0xff]  ;;  %v8964_v58 = vld [vmem:[#allocation130_spill] sm:$0xff] }
 0x51b   : > { %2751 = vmatpush.msra.mxu2 %v8954_v62  ;;  %2771 = vmatpush.msra.mxu3 %v8955_v48  ;;  %v8965_v62 = vld [vmem:[#allocation131_spill] sm:$0xff]  ;;  %v8966_v48 = vld [vmem:[#allocation132_spill] sm:$0xff] }
 0x51c   : > { %2712 = vmatpush.msra.mxu0 %v8956_v46  ;;  %2732 = vmatpush.msra.mxu1 %v8957_v5  ;;  %v8967_v46 = vld [vmem:[#allocation133_spill] sm:$0xff]  ;;  %v8968_v5 = vld [vmem:[#allocation126_spill] sm:$0xff] }
 0x51d   : > { %2752 = vmatpush.msra.mxu2 %v8958_v37  ;;  %2772 = vmatpush.msra.mxu3 %v8959_v41  ;;  %v8969_v37 = vld [vmem:[#allocation127_spill] sm:$0xff]  ;;  %v8970_v41 = vld [vmem:[#allocation128_spill] sm:$0xff] }
 0x51e   : > { %2713 = vmatpush.msra.mxu0 %v8960_v0  ;;  %2733 = vmatpush.msra.mxu1 %v8961_v27  ;;  %v8971_v0 = vld [vmem:[#allocation129_spill] sm:$0xff]  ;;  %v8972_v27 = vld [vmem:[#allocation122_spill] sm:$0xff] }
 0x51f   : > { %2753 = vmatpush.msra.mxu2 %v8962_v52  ;;  %2773 = vmatpush.msra.mxu3 %v8963_v53  ;;  %v8973_v52 = vld [vmem:[#allocation123_spill] sm:$0xff]  ;;  %v8974_v53 = vld [vmem:[#allocation124_spill] sm:$0xff] }
 0x520   : > { %2714 = vmatpush.msra.mxu0 %v8964_v58  ;;  %2734 = vmatpush.msra.mxu1 %v8965_v62  ;;  %v8975_v58 = vld [vmem:[#allocation125_spill] sm:$0xff]  ;;  %v8976_v62 = vld [vmem:[#allocation118_spill] sm:$0xff] }
 0x521   : > { %2754 = vmatpush.msra.mxu2 %v8966_v48  ;;  %2774 = vmatpush.msra.mxu3 %v8967_v46  ;;  %v8977_v48 = vld [vmem:[#allocation119_spill] sm:$0xff]  ;;  %v8978_v46 = vld [vmem:[#allocation120_spill] sm:$0xff] }
 0x522   : > { %2715 = vmatpush.msra.mxu0 %v8968_v5  ;;  %2735 = vmatpush.msra.mxu1 %v8969_v37  ;;  %v8979_v5 = vld [vmem:[#allocation121_spill] sm:$0xff]  ;;  %v8980_v37 = vld [vmem:[#allocation114_spill] sm:$0xff] }
 0x523   : > { %2755 = vmatpush.msra.mxu2 %v8970_v41  ;;  %2775 = vmatpush.msra.mxu3 %v8971_v0  ;;  %v8981_v41 = vld [vmem:[#allocation115_spill] sm:$0xff]  ;;  %v8982_v0 = vld [vmem:[#allocation116_spill] sm:$0xff] }
 0x524   : > { %2716 = vmatpush.msra.mxu0 %v8972_v27  ;;  %2736 = vmatpush.msra.mxu1 %v8973_v52  ;;  %v8983_v27 = vld [vmem:[#allocation117_spill] sm:$0xff]  ;;  %v8984_v52 = vld [vmem:[#allocation110_spill] sm:$0xff] }
 0x525   : > { %2756 = vmatpush.msra.mxu2 %v8974_v53  ;;  %2776 = vmatpush.msra.mxu3 %v8975_v58  ;;  %v8985_v53 = vld [vmem:[#allocation111_spill] sm:$0xff]  ;;  %v8986_v58 = vld [vmem:[#allocation112_spill] sm:$0xff] }
 0x526   : > { %2717 = vmatpush.msra.mxu0 %v8976_v62  ;;  %2737 = vmatpush.msra.mxu1 %v8977_v48  ;;  %v8987_v62 = vld [vmem:[#allocation113_spill] sm:$0xff]  ;;  %v8988_v48 = vld [vmem:[#allocation106_spill] sm:$0xff] }
 0x527   : > { %2757 = vmatpush.msra.mxu2 %v8978_v46  ;;  %2777 = vmatpush.msra.mxu3 %v8979_v5  ;;  %v8989_v46 = vld [vmem:[#allocation107_spill] sm:$0xff]  ;;  %v8990_v5 = vld [vmem:[#allocation108_spill] sm:$0xff] }
 0x528   : > { %2718 = vmatpush.msra.mxu0 %v8980_v37  ;;  %2738 = vmatpush.msra.mxu1 %v8981_v41  ;;  %v8991_v37 = vld [vmem:[#allocation109_spill] sm:$0xff]  ;;  %v8992_v41 = vld [vmem:[#allocation102_spill] sm:$0xff] }
 0x529   : > { %2758 = vmatpush.msra.mxu2 %v8982_v0  ;;  %2778 = vmatpush.msra.mxu3 %v8983_v27  ;;  %v8993_v0 = vld [vmem:[#allocation103_spill] sm:$0xff]  ;;  %v8994_v27 = vld [vmem:[#allocation104_spill] sm:$0xff] }
 0x52a   : > { %2719 = vmatpush.msra.mxu0 %v8984_v52  ;;  %2739 = vmatpush.msra.mxu1 %v8985_v53  ;;  %v8995_v52 = vld [vmem:[#allocation105_spill] sm:$0xff]  ;;  %v8996_v53 = vld [vmem:[#allocation98_spill] sm:$0xff] }
 0x52b   : > { %2759 = vmatpush.msra.mxu2 %v8986_v58  ;;  %2779 = vmatpush.msra.mxu3 %v8987_v62  ;;  %v8997_v58 = vld [vmem:[#allocation99_spill] sm:$0xff]  ;;  %v8998_v62 = vld [vmem:[#allocation100_spill] sm:$0xff] }
 0x52c   : > { %2720 = vmatpush.msra.mxu0 %v8988_v48  ;;  %2740 = vmatpush.msra.mxu1 %v8989_v46  ;;  %v8999_v48 = vld [vmem:[#allocation101_spill] sm:$0xff]  ;;  %v9000_v46 = vld [vmem:[#allocation94_spill] sm:$0xff] }
 0x52d   : > { %2760 = vmatpush.msra.mxu2 %v8990_v5  ;;  %2780 = vmatpush.msra.mxu3 %v8991_v37  ;;  %v9001_v5 = vld [vmem:[#allocation95_spill] sm:$0xff]  ;;  %v9002_v37 = vld [vmem:[#allocation96_spill] sm:$0xff] }
 0x52e   : > { %2721 = vmatpush.msra.mxu0 %v8992_v41  ;;  %2741 = vmatpush.msra.mxu1 %v8993_v0  ;;  %v9003_v41 = vld [vmem:[#allocation97_spill] sm:$0xff]  ;;  %v9004_v0 = vld [vmem:[#allocation90_spill] sm:$0xff] }
 0x52f   : > { %2761 = vmatpush.msra.mxu2 %v8994_v27  ;;  %2781 = vmatpush.msra.mxu3 %v8995_v52  ;;  %v9005_v27 = vld [vmem:[#allocation91_spill] sm:$0xff]  ;;  %v9006_v52 = vld [vmem:[#allocation92_spill] sm:$0xff] }
 0x530   : > { %2722 = vmatpush.msra.mxu0 %v8996_v53  ;;  %2742 = vmatpush.msra.mxu1 %v8997_v58  ;;  %v9007_v53 = vld [vmem:[#allocation93_spill] sm:$0xff]  ;;  %v9008_v58 = vld [vmem:[#allocation86_spill] sm:$0xff] }
 0x531   : > { %2762 = vmatpush.msra.mxu2 %v8998_v62  ;;  %2782 = vmatpush.msra.mxu3 %v8999_v48  ;;  %v9009_v62 = vld [vmem:[#allocation87_spill] sm:$0xff]  ;;  %v9010_v48 = vld [vmem:[#allocation88_spill] sm:$0xff] }
 0x532   : > { %2723 = vmatpush.msra.mxu0 %v9000_v46  ;;  %2743 = vmatpush.msra.mxu1 %v9001_v5  ;;  %v9011_v46 = vld [vmem:[#allocation89_spill] sm:$0xff]  ;;  %v9012_v5 = vld [vmem:[#allocation82_spill] sm:$0xff] }
 0x533   : > { %2763 = vmatpush.msra.mxu2 %v9002_v37  ;;  %2783 = vmatpush.msra.mxu3 %v9003_v41  ;;  %v9013_v37 = vld [vmem:[#allocation83_spill] sm:$0xff]  ;;  %v9014_v41 = vld [vmem:[#allocation84_spill] sm:$0xff] }
 0x534   : > { %2724 = vmatpush.msra.mxu0 %v9004_v0  ;;  %2744 = vmatpush.msra.mxu1 %v9005_v27  ;;  %v9015_v0 = vld [vmem:[#allocation85_spill] sm:$0xff] }
 0x535   : > { %2764 = vmatpush.msra.mxu2 %v9006_v52  ;;  %2784 = vmatpush.msra.mxu3 %v9007_v53 }
 0x536   : > { %2725 = vmatpush.msra.mxu0 %v9008_v58  ;;  %2745 = vmatpush.msra.mxu1 %v9009_v62  ;;  %v9016_v62 = vld [vmem:[#allocation210_spill] sm:$0xff] }
 0x537   : > { %2765 = vmatpush.msra.mxu2 %v9010_v48  ;;  %2785 = vmatpush.msra.mxu3 %v9011_v46  ;;  %v9017_v48 = vld [vmem:[#allocation216_spill] sm:$0xff] }
 0x538   : > { %2726 = vmatpush.msra.mxu0 %v9012_v5  ;;  %2746 = vmatpush.msra.mxu1 %v9013_v37 }
 0x539   : > { %2766 = vmatpush.msra.mxu2 %v9014_v41  ;;  %2786 = vmatpush.msra.mxu3 %v9015_v0 }
 0x550   : > { %v2259_v27 = vpop.f32.mrf.mxu0  ;;  %v2279_v52 = vpop.f32.mrf.mxu1 }
 0x557   : > { %v2319_v50 = vpop.f32.mrf.mxu3  ;;  %v2299_v46 = vpop.f32.mrf.mxu2 }
 0x55b   : > { %v2339_v53 = vpop.f32.mrf.mxu0  ;;  %v2359_v16 = vpop.f32.mrf.mxu1 }
 0x55c   : > { %v2340_v58 = vadd.f32 %v2339_v53, %v2259_v27  ;;  %v2360_v56 = vadd.f32 %v2359_v16, %v2279_v52  ;;  %v6692_v27 = vpop.permute.xlu2 %2473 }
 0x55e   : > { %v2402_v47 = vadd.f32 %v2340_v58, %v9016_v62  ;;  %v2403_v17 = vadd.f32 %v2360_v56, %v9017_v48  ;;  %v9024_v62 = vld [vmem:[#allocation81_spill] sm:$0xff] }
 0x560   : > { %v4202_v18 = vmul.f32 -1.442695, %v2402_v47  ;;  %v4203_v5 = vmul.f32 -1.442695, %v2403_v17  ;;  %v9019_v47 = vld [vmem:[#allocation78_spill] sm:$0xff]  ;;  %v9020_v17 = vld [vmem:[#allocation79_spill] sm:$0xff] }
 0x562   : > { %4452 = vpow2.f32 %v4202_v18  ;;  %v2399_v37 = vpop.f32.mrf.mxu3  ;;  %v2379_v11 = vpop.f32.mrf.mxu2  ;;  %v2476_v18 = vmul.f32 %v6692_v27, %v9019_v47 }
 0x563   : > { %4454 = vpow2.f32 %v4203_v5  ;;  %v2400_v41 = vadd.f32 %v2399_v37, %v2319_v50  ;;  %v2380_v56 = vadd.f32 %v2379_v11, %v2299_v46  ;;  %v2477_v37 = vmul.f32 %v6692_v27, %v9020_v17  ;;  %v9022_v5 = vld [vmem:[#allocation80_spill] sm:$0xff] }
 0x565   : > { %v2405_v0 = vadd.f32 %v2400_v41, %v9018_v6  ;;  %v9021_v41 = vld [vmem:[#allocation218_spill] sm:$0xff] }
 0x567   : > { %v4204_v28 = vmul.f32 -1.442695, %v2405_v0  ;;  %v2404_v0 = vadd.f32 %v2380_v56, %v9021_v41  ;;  %v2479_v56 = vmul.f32 %v6692_v27, %v9024_v62 }
 0x568   : > { %v4453_v54 = vpop.eup %4452 }
 0x569   : > { %v4455_v44 = vpop.eup %4454  ;;  %v2409_v42 = vadd.f32 1.0, %v4453_v54  ;;  %4456 = vpow2.f32 %v4204_v28  ;;  %v2480_v28 = vadd.f32 %v2476_v18, %v9022_v5  ;;  %v2483_v63 = vadd.f32 %v2479_v56, %v9025_v8 }
 0x56a   : > { %v2428_v16 = vadd.f32 1.0, %v4455_v44  ;;  %v9023_v44 = vld [vmem:[#allocation16_spill] sm:$0xff] }
 0x56b   : > { %4458 = vrcp.f32 %v2409_v42  ;;  %v2481_v52 = vadd.f32 %v2477_v37, %v9023_v44  ;;  %v2419_v47 = vand.u32 2147483647, %v2409_v42  ;;  %v2421_v41 = vand.u32 2147483648, %v2409_v42 }
 0x56c   : > { %4460 = vrcp.f32 %v2428_v16  ;;  %v2440_v18 = vand.u32 2147483648, %v2428_v16  ;;  %v2438_v37 = vand.u32 2147483647, %v2428_v16  ;;  %vm2434_vm2 = vweird.f32 %v2428_v16 }
 0x56d   : > { %vm2415_vm3 = vweird.f32 %v2409_v42  ;;  %v2422_v62 = vor.u32 1.1754944e-38, %v2421_v41  ;;  %vm2420_vm6 = vcmp.eq.f32.partialorder %v2419_v47, 8.507059e+37 }
 0x56e   : > { %vm2439_vm7 = vcmp.eq.f32.partialorder %v2438_v37, 8.507059e+37 }
 0x56f   : > { %v4457_v50 = vpop.eup %4456 }
 0x570   : > { %v6699_v58 = vadd.f32 1.0, %v4457_v50 }
 0x571   : > { %v4459_v54 = vpop.eup %4458 }
 0x572   : > { %v4461_v53 = vpop.eup %4460  ;;  %v2411_v6 = vmul.f32 %v4459_v54, %v2409_v42  ;;  %4462 = vrcp.f32 %v6699_v58  ;;  %vm2416_vm0 = vweird.f32 %v4459_v54  ;;  %vm2454_vm9 = vweird.f32 %v6699_v58 }
 0x573   : > { %v2430_v11 = vmul.f32 %v4461_v53, %v2428_v16  ;;  %4464 = vtanh.f32 %v2404_v0  ;;  %vm2435_vm1 = vweird.f32 %v4461_v53  ;;  %vm2417_vm4 = vmor %vm2415_vm3, %vm2416_vm0 }
 0x574   : > { %v2412_v46 = vsub.f32 1.0, %v2411_v6  ;;  %v2501_v48 = vpop.f32.mrf.mxu0  ;;  %v2521_v17 = vpop.f32.mrf.mxu1  ;;  %vm2436_vm5 = vmor %vm2434_vm2, %vm2435_vm1 }
 0x575   : > { %v2431_v50 = vsub.f32 1.0, %v2430_v11  ;;  %v2564_v13 = vadd.f32 %v2501_v48, %v2480_v28  ;;  %v2565_v60 = vadd.f32 %v2521_v17, %v2481_v52  ;;  %v2441_v28 = vor.u32 1.1754944e-38, %v2440_v18 }
 0x576   : > { %v2413_v5 = vmul.f32 %v4459_v54, %v2412_v46 }
 0x577   : > { %v2432_v44 = vmul.f32 %v4461_v53, %v2431_v50  ;;  %v4205_v55 = vmul.f32 -1.442695, %v2564_v13  ;;  %v4206_v33 = vmul.f32 -1.442695, %v2565_v60  ;;  %v9026_v50 = vld [vmem:[#allocation77_spill] sm:$0xff] }
 0x578   : > { %v4463_v6 = vpop.eup %4462  ;;  %v2414_v0 = vadd.f32 %v4459_v54, %v2413_v5 }
 0x579   : > { %v2433_v11 = vadd.f32 %v4461_v53, %v2432_v44  ;;  %v2450_v48 = vmul.f32 %v4463_v6, %v6699_v58  ;;  %4466 = vpow2.f32 %v4205_v55  ;;  %v4465_v17 = vpop.eup %4464  ;;  %vm2455_vm8 = vweird.f32 %v4463_v6 }
 0x57a   : > { %v2418_v52 = vsel %vm2417_vm4, %v4459_v54, %v2414_v0  ;;  %4468 = vpow2.f32 %v4206_v33  ;;  %vm2456_vm10 = vmor %vm2454_vm9, %vm2455_vm8 }
 0x57b   : > { %v2423_v13 = vsel %vm2420_vm6, %v2422_v62, %v2418_v52  ;;  %v2437_v60 = vsel %vm2436_vm5, %v4461_v53, %v2433_v11  ;;  %v2451_v16 = vsub.f32 1.0, %v2450_v48  ;;  %v2561_v5 = vpop.f32.mrf.mxu3  ;;  %v2460_v62 = vand.u32 2147483648, %v6699_v58  ;;  %v9028_v11 = vld [vmem:[#allocation215_spill] sm:$0xff]  ;;  %v9029_v52 = vld [vmem:[#allocation212_spill] sm:$0xff] }
 0x57c   : > { %v2442_v42 = vsel %vm2439_vm7, %v2441_v28, %v2437_v60  ;;  %v2465_v46 = vmul.f32 %v4465_v17, %v2423_v13  ;;  %v2567_v56 = vadd.f32 %v2561_v5, %v2483_v63  ;;  %v9027_v63 = vld [vmem:[#allocation214_spill] sm:$0xff]  ;;  %v2458_v53 = vand.u32 2147483647, %v6699_v58 }
 0x57d   : > { %v2464_v41 = vmul.f32 %v2442_v42, %v9026_v50  ;;  %v2452_v44 = vmul.f32 %v4463_v6, %v2451_v16  ;;  %v2478_v54 = vmul.f32 %v6692_v27, %v9027_v63  ;;  %v2461_v37 = vor.u32 1.1754944e-38, %v2460_v62 }
 0x57e   : > { %v4207_v8 = vmul.f32 -1.442695, %v2567_v56  ;;  %vm2459_vm11 = vcmp.eq.f32.partialorder %v2458_v53, 8.507059e+37  ;;  %v2469_v13 = vperm.slane %v9029_v52, 3 }
 0x57f   : > { %v4467_v4 = vpop.eup %4466  ;;  %v6709_v55 = vadd.f32 %v2465_v46, %v2464_v41  ;;  %v2453_v33 = vadd.f32 %v4463_v6, %v2452_v44  ;;  %v2482_v48 = vadd.f32 %v2478_v54, %v9028_v11 }
 0x580   : > { %v4469_v1 = vpop.eup %4468  ;;  %v6711_v18 = vadd.f32 1.0, %v4467_v4  ;;  %4470 = vpow2.f32 %v4207_v8  ;;  %v2541_v8 = vpop.f32.mrf.mxu2 }
 0x581   : > { %4472 = vtanh.f32 %v6709_v55  ;;  %v6715_v47 = vadd.f32 1.0, %v4469_v1  ;;  %v2457_v4 = vsel %vm2456_vm10, %v4463_v6, %v2453_v33  ;;  %v2566_v27 = vadd.f32 %v2541_v8, %v2482_v48 }
 0x582   : > { %4474 = vrcp.f32 %v6711_v18  ;;  %v2462_v28 = vsel %vm2459_vm11, %v2461_v37, %v2457_v4  ;;  %v2581_v50 = vand.u32 2147483647, %v6711_v18  ;;  %v2583_v41 = vand.u32 2147483648, %v6711_v18 }
 0x583   : > { %4476 = vrcp.f32 %v6715_v47  ;;  %v2602_v44 = vand.u32 2147483648, %v6715_v47  ;;  %v2600_v53 = vand.u32 2147483647, %v6715_v47  ;;  %vm2577_vm14 = vweird.f32 %v6711_v18 }
 0x584   : > { %vm2596_vm15 = vweird.f32 %v6715_v47  ;;  %vm2582_vm2 = vcmp.eq.f32.partialorder %v2581_v50, 8.507059e+37 }
 0x585   : > { %vm2601_vm3 = vcmp.eq.f32.partialorder %v2600_v53, 8.507059e+37 }
 0x586   : > { %v4471_v0 = vpop.eup %4470 }
 0x587   : > { %v4473_v1 = vpop.eup %4472  ;;  %v6724_v17 = vadd.f32 1.0, %v4471_v0 }
 0x588   : > { %v4475_v60 = vpop.eup %4474  ;;  %v2468_v16 = vmul.f32 %v4473_v1, %v2462_v28 }
 0x589   : > { %v4477_v58 = vpop.eup %4476  ;;  %v2573_v5 = vmul.f32 %v4475_v60, %v6711_v18  ;;  %4478 = vrcp.f32 %v6724_v17  ;;  %vm2578_vm12 = vweird.f32 %v4475_v60  ;;  %v2603_v18 = vor.u32 1.1754944e-38, %v2602_v44  ;;  %v9032_v44 = vld [vmem:[#allocation46_spill] sm:$0xff] }
 0x58a   : > { %v2592_v6 = vmul.f32 %v4477_v58, %v6715_v47  ;;  %2647 = vmatmul.f32.vlgmr.msrb.gmra.mxu0 %v2468_v16  ;;  %2667 = vmatmul.f32.vlgmr.msrb.gmra.mxu1 %v2468_v16  ;;  %v2470_v46 = vmul.f32 %v2469_v13, %v2468_v16  ;;  %4480 = vtanh.f32 %v2566_v27  ;;  %vm2597_vm13 = vweird.f32 %v4477_v58  ;;  %vm2579_vm0 = vmor %vm2577_vm14, %vm2578_vm12 }
 0x58b   : > { %v2574_v42 = vsub.f32 1.0, %v2573_v5  ;;  %2687 = vmatmul.f32.vlgmr.msrb.gmra.mxu2 %v2468_v16  ;;  %2707 = vmatmul.f32.vlgmr.msrb.gmra.mxu3 %v2468_v16  ;;  %vm2598_vm1 = vmor %vm2596_vm15, %vm2597_vm13  ;;  %vm2616_vm5 = vweird.f32 %v6724_v17 }
 0x58c   : > { %v2593_v56 = vsub.f32 1.0, %v2592_v6  ;;  %2873 = vmatpush.msrb.mxu0 %v8503_v3  ;;  %2893 = vmatpush.msrb.mxu1 %v8188_v25  ;;  %v6736_v62 = vadd.f32 %v2470_v46, %v6491_v40  ;;  %v2584_v40 = vor.u32 1.1754944e-38, %v2583_v41  ;;  %v9031_v41 = vld [vmem:[#allocation45_spill] sm:$0xff] }
 0x58d   : > { %v2575_v33 = vmul.f32 %v4475_v60, %v2574_v42  ;;  %2913 = vmatpush.msrb.mxu2 %v8189_v7  ;;  %2933 = vmatpush.msrb.mxu3 %v8190_v32  ;;  %v2620_v42 = vand.u32 2147483647, %v6724_v17 }
 0x58e   : > { %v2594_v54 = vmul.f32 %v4477_v58, %v2593_v56  ;;  %2874 = vmatpush.msrb.mxu0 %v8504_v14  ;;  %2894 = vmatpush.msrb.mxu1 %v8505_v35  ;;  %v9030_v56 = vld [vmem:[#allocation52_spill] sm:$0xff] }
 0x58f   : > { %v6743_v4 = vpop.eup %4478  ;;  %v2576_v8 = vadd.f32 %v4475_v60, %v2575_v33  ;;  %2914 = vmatpush.msrb.mxu2 %v8506_v38  ;;  %2934 = vmatpush.msrb.mxu3 %v8507_v26  ;;  %vm2621_vm7 = vcmp.eq.f32.partialorder %v2620_v42, 8.507059e+37  ;;  %v9034_v33 = vld [vmem:[#allocation48_spill] sm:$0xff]  ;;  %v9051_v42 = vld [vmem:[#allocation25_spill] sm:$0xff] }
 0x590   : > { %v2595_v37 = vadd.f32 %v4477_v58, %v2594_v54  ;;  %v2612_v0 = vmul.f32 %v6743_v4, %v6724_v17  ;;  %2875 = vmatpush.msrb.mxu0 %v8508_v15  ;;  %2895 = vmatpush.msrb.mxu1 %v8509_v24  ;;  %v4481_v47 = vpop.eup %4480  ;;  %vm2617_vm4 = vweird.f32 %v6743_v4 }
 0x591   : > { %v2580_v48 = vsel %vm2579_vm0, %v4475_v60, %v2576_v8  ;;  %2915 = vmatpush.msrb.mxu2 %v8510_v23  ;;  %2935 = vmatpush.msrb.mxu3 %v8511_v10  ;;  %vm2618_vm6 = vmor %vm2616_vm5, %vm2617_vm4  ;;  %v9035_v8 = vld [vmem:[#allocation41_spill] sm:$0xff] }
 0x592   : > { %v2585_v1 = vsel %vm2582_vm2, %v2584_v40, %v2580_v48  ;;  %v2599_v28 = vsel %vm2598_vm1, %v4477_v58, %v2595_v37  ;;  %v2613_v13 = vsub.f32 1.0, %v2612_v0  ;;  %2876 = vmatpush.msrb.mxu0 %v8512_v19  ;;  %2896 = vmatpush.msrb.mxu1 %v8513_v20  ;;  %v9036_v40 = vld [vmem:[#allocation42_spill] sm:$0xff]  ;;  %v9037_v37 = vld [vmem:[#allocation43_spill] sm:$0xff]  ;;  %v9038_v0 = vld [vmem:[#allocation44_spill] sm:$0xff] }
 0x593   : > { %v2604_v27 = vsel %vm2601_vm3, %v2603_v18, %v2599_v28  ;;  %v2627_v16 = vmul.f32 %v4481_v47, %v2585_v1  ;;  %2916 = vmatpush.msrb.mxu2 %v8514_v9  ;;  %2936 = vmatpush.msrb.mxu3 %v8515_v21  ;;  %v9039_v18 = vld [vmem:[#allocation37_spill] sm:$0xff]  ;;  %v9040_v48 = vld [vmem:[#allocation38_spill] sm:$0xff]  ;;  %v9041_v47 = vld [vmem:[#allocation39_spill] sm:$0xff] }
 0x594   : > { %v2626_v60 = vmul.f32 %v2604_v27, %v6484_v22  ;;  %v2614_v5 = vmul.f32 %v6743_v4, %v2613_v13  ;;  %2877 = vmatpush.msrb.mxu0 %v8516_v30  ;;  %2897 = vmatpush.msrb.mxu1 %v8517_v31  ;;  %v2622_v22 = vand.u32 2147483648, %v6724_v17  ;;  %v9033_v17 = vld [vmem:[#allocation47_spill] sm:$0xff]  ;;  %v9042_v1 = vld [vmem:[#allocation40_spill] sm:$0xff]  ;;  %v9043_v28 = vld [vmem:[#allocation33_spill] sm:$0xff] }
 0x595   : > { %2917 = vmatpush.msrb.mxu2 %v8518_v43  ;;  %2937 = vmatpush.msrb.mxu3 %v8519_v39  ;;  %v9044_v13 = vld [vmem:[#allocation34_spill] sm:$0xff]  ;;  %v9045_v27 = vld [vmem:[#allocation35_spill] sm:$0xff] }
 0x596   : > { %v6767_v58 = vadd.f32 %v2627_v16, %v2626_v60  ;;  %2878 = vmatpush.msrb.mxu0 %v8520_v34  ;;  %2898 = vmatpush.msrb.mxu1 %v8521_v12  ;;  %v2615_v6 = vadd.f32 %v6743_v4, %v2614_v5  ;;  %v2623_v50 = vor.u32 1.1754944e-38, %v2622_v22  ;;  %v9046_v16 = vld [vmem:[#allocation36_spill] sm:$0xff]  ;;  %v9047_v60 = vld [vmem:[#allocation29_spill] sm:$0xff]  ;;  %v9048_v5 = vld [vmem:[#allocation30_spill] sm:$0xff] }
 0x597   : > { %2918 = vmatpush.msrb.mxu2 %v8522_v2  ;;  %2938 = vmatpush.msrb.mxu3 %v8680_v49  ;;  %v9050_v22 = vld [vmem:[#allocation32_spill] sm:$0xff] }
 0x598   : > { %4482 = vtanh.f32 %v6767_v58  ;;  %2879 = vmatpush.msrb.mxu0 %v8681_v61  ;;  %2899 = vmatpush.msrb.mxu1 %v8682_v29  ;;  %v2619_v46 = vsel %vm2618_vm6, %v6743_v4, %v2615_v6  ;;  %v9049_v6 = vld [vmem:[#allocation31_spill] sm:$0xff] }
 0x599   : > { %2919 = vmatpush.msrb.mxu2 %v8683_v51  ;;  %2939 = vmatpush.msrb.mxu3 %v8684_v57  ;;  %v2624_v53 = vsel %vm2621_vm7, %v2623_v50, %v2619_v46  ;;  %v9052_v46 = vld [vmem:[#allocation26_spill] sm:$0xff]  ;;  %v9053_v50 = vld [vmem:[#allocation27_spill] sm:$0xff] }
 0x59a   : > { %2880 = vmatpush.msrb.mxu0 %v8685_v45  ;;  %2900 = vmatpush.msrb.mxu1 %v8686_v36 }
 0x59b   : > { %2920 = vmatpush.msrb.mxu2 %v8687_v59  ;;  %2940 = vmatpush.msrb.mxu3 %v9030_v56 }
 0x59c   : > { %2881 = vmatpush.msrb.mxu0 %v9031_v41  ;;  %2901 = vmatpush.msrb.mxu1 %v9032_v44 }
 0x59d   : > { %2921 = vmatpush.msrb.mxu2 %v9033_v17  ;;  %2941 = vmatpush.msrb.mxu3 %v9034_v33 }
 0x59e   : > { %v4483_v54 = vpop.eup %4482  ;;  %2882 = vmatpush.msrb.mxu0 %v9035_v8  ;;  %2902 = vmatpush.msrb.mxu1 %v9036_v40  ;;  %v9196_v8 = vld [vmem:[#allocation80_spill] sm:$0xff] }
 0x59f   : > { %v2630_v4 = vmul.f32 %v4483_v54, %v2624_v53  ;;  %2922 = vmatpush.msrb.mxu2 %v9037_v37  ;;  %2942 = vmatpush.msrb.mxu3 %v9038_v0  ;;  %v9054_v54 = vld [vmem:[#allocation28_spill] sm:$0xff]  ;;  %v9055_v53 = vld [vmem:[#allocation21_spill] sm:$0xff]  ;;  %v9195_v0 = vld [vmem:[#allocation79_spill] sm:$0xff] }
 0x5a0   : > { %2883 = vmatpush.msrb.mxu0 %v9039_v18  ;;  %2903 = vmatpush.msrb.mxu1 %v9040_v48  ;;  %v9194_v18 = vld [vmem:[#allocation78_spill] sm:$0xff] }
 0x5a1   : > { %2923 = vmatpush.msrb.mxu2 %v9041_v47  ;;  %2943 = vmatpush.msrb.mxu3 %v9042_v1  ;;  %v9192_v1 = vld [vmem:[#allocation210_spill] sm:$0xff]  ;;  %v9193_v47 = vld [vmem:[#allocation216_spill] sm:$0xff] }
 0x5a2   : > { %2727 = vmatmul.f32.vlgmr.msra.gmra.mxu0 %v2630_v4  ;;  %2747 = vmatmul.f32.vlgmr.msra.gmra.mxu1 %v2630_v4 }
 0x5a3   : > { %2767 = vmatmul.f32.vlgmr.msra.gmra.mxu2 %v2630_v4  ;;  %2787 = vmatmul.f32.vlgmr.msra.gmra.mxu3 %v2630_v4 }
 0x5a4   : > { %2884 = vmatpush.msrb.mxu0 %v9043_v28  ;;  %2904 = vmatpush.msrb.mxu1 %v9044_v13 }
 0x5a5   : > { %2924 = vmatpush.msrb.mxu2 %v9045_v27  ;;  %2944 = vmatpush.msrb.mxu3 %v9046_v16  ;;  %v9056_v27 = vld [vmem:[#allocation22_spill] sm:$0xff]  ;;  %v9057_v16 = vld [vmem:[#allocation23_spill] sm:$0xff] }
 0x5a6   : > { %2885 = vmatpush.msrb.mxu0 %v9047_v60  ;;  %2905 = vmatpush.msrb.mxu1 %v9048_v5  ;;  %v9058_v60 = vld [vmem:[#allocation24_spill] sm:$0xff]  ;;  %v9059_v5 = vld [vmem:[#allocation17_spill] sm:$0xff] }
 0x5a7   : > { %2925 = vmatpush.msrb.mxu2 %v9049_v6  ;;  %2945 = vmatpush.msrb.mxu3 %v9050_v22  ;;  %v9060_v6 = vld [vmem:[#allocation18_spill] sm:$0xff]  ;;  %v9061_v22 = vld [vmem:[#allocation19_spill] sm:$0xff] }
 0x5a8   : > { %2886 = vmatpush.msrb.mxu0 %v9051_v42  ;;  %2906 = vmatpush.msrb.mxu1 %v9052_v46  ;;  %v9062_v42 = vld [vmem:[#allocation20_spill] sm:$0xff] }
 0x5a9   : > { %2926 = vmatpush.msrb.mxu2 %v9053_v50  ;;  %2946 = vmatpush.msrb.mxu3 %v9054_v54  ;;  %v4746_v54 = vmov 5   ;;  %v9071_v50 = vld [vmem:[#allocation205_spill] sm:$0xff] }
 0x5aa   : > { %2887 = vmatpush.msrb.mxu0 %v9055_v53  ;;  %2907 = vmatpush.msrb.mxu1 %v9056_v27  ;;  %v9063_v53 = vld [vmem:[#allocation206_spill] sm:$0xff]  ;;  %v9064_v27 = vld [vmem:[#allocation211_spill] sm:$0xff] }
 0x5ab   : > { %2927 = vmatpush.msrb.mxu2 %v9057_v16  ;;  %2947 = vmatpush.msrb.mxu3 %v9058_v60  ;;  %v9065_v16 = vld [vmem:[#allocation207_spill] sm:$0xff]  ;;  %v9066_v60 = vld [vmem:[#allocation208_spill] sm:$0xff] }
 0x5ac   : > { %2888 = vmatpush.msrb.mxu0 %v9059_v5  ;;  %2908 = vmatpush.msrb.mxu1 %v9060_v6  ;;  %v9067_v5 = vld [vmem:[#allocation209_spill] sm:$0xff]  ;;  %v9068_v6 = vld [vmem:[#allocation202_spill] sm:$0xff] }
 0x5ad   : > { %2928 = vmatpush.msrb.mxu2 %v9061_v22  ;;  %2948 = vmatpush.msrb.mxu3 %v9062_v42  ;;  %v9069_v22 = vld [vmem:[#allocation203_spill] sm:$0xff]  ;;  %v9070_v42 = vld [vmem:[#allocation204_spill] sm:$0xff] }
 0x5ae   : > { %2889 = vmatmul.f32.vlgmr.msrb.gmra.mxu0 %v2630_v4  ;;  %2909 = vmatmul.f32.vlgmr.msrb.gmra.mxu1 %v2630_v4 }
 0x5af   : > { %2929 = vmatmul.f32.vlgmr.msrb.gmra.mxu2 %v2630_v4  ;;  %2949 = vmatmul.f32.vlgmr.msrb.gmra.mxu3 %v2630_v4  ;;  %v9072_v4 = vld [vmem:[#allocation198_spill] sm:$0xff] }
 0x5b0   : > { %4336 = vset.pattern.permute.xlu2 %v4746_v54  ;;  %3020 = vmatpush.msra.mxu0 %v9063_v53  ;;  %v9073_v54 = vld [vmem:[#allocation199_spill] sm:$0xff]  ;;  %v9074_v53 = vld [vmem:[#allocation200_spill] sm:$0xff] }
 0x5b1   : > { %2862 = vperm.xlu2 %4336, %v9064_v27   ;;  %3040 = vmatpush.msra.mxu1 %v9065_v16  ;;  %v9075_v27 = vld [vmem:[#allocation201_spill] sm:$0xff]  ;;  %v9076_v16 = vld [vmem:[#allocation194_spill] sm:$0xff] }
 0x5b2   : > { %3060 = vmatpush.msra.mxu2 %v9066_v60  ;;  %3080 = vmatpush.msra.mxu3 %v9067_v5  ;;  %v9077_v60 = vld [vmem:[#allocation195_spill] sm:$0xff]  ;;  %v9078_v5 = vld [vmem:[#allocation196_spill] sm:$0xff] }
 0x5b3   : > { %3021 = vmatpush.msra.mxu0 %v9068_v6  ;;  %3041 = vmatpush.msra.mxu1 %v9069_v22  ;;  %v9079_v6 = vld [vmem:[#allocation197_spill] sm:$0xff]  ;;  %v9080_v22 = vld [vmem:[#allocation190_spill] sm:$0xff] }
 0x5b4   : > { %3061 = vmatpush.msra.mxu2 %v9070_v42  ;;  %3081 = vmatpush.msra.mxu3 %v9071_v50  ;;  %v9081_v42 = vld [vmem:[#allocation191_spill] sm:$0xff]  ;;  %v9082_v50 = vld [vmem:[#allocation192_spill] sm:$0xff] }
 0x5b5   : > { %3022 = vmatpush.msra.mxu0 %v9072_v4  ;;  %3042 = vmatpush.msra.mxu1 %v9073_v54  ;;  %v9083_v4 = vld [vmem:[#allocation193_spill] sm:$0xff]  ;;  %v9084_v54 = vld [vmem:[#allocation186_spill] sm:$0xff] }
 0x5b6   : > { %3062 = vmatpush.msra.mxu2 %v9074_v53  ;;  %3082 = vmatpush.msra.mxu3 %v9075_v27  ;;  %v9085_v53 = vld [vmem:[#allocation187_spill] sm:$0xff]  ;;  %v9086_v27 = vld [vmem:[#allocation188_spill] sm:$0xff] }
 0x5b7   : > { %3023 = vmatpush.msra.mxu0 %v9076_v16  ;;  %3043 = vmatpush.msra.mxu1 %v9077_v60  ;;  %v9087_v16 = vld [vmem:[#allocation189_spill] sm:$0xff]  ;;  %v9088_v60 = vld [vmem:[#allocation182_spill] sm:$0xff] }
 0x5b8   : > { %3063 = vmatpush.msra.mxu2 %v9078_v5  ;;  %3083 = vmatpush.msra.mxu3 %v9079_v6  ;;  %v9089_v5 = vld [vmem:[#allocation183_spill] sm:$0xff]  ;;  %v9090_v6 = vld [vmem:[#allocation184_spill] sm:$0xff] }
 0x5b9   : > { %3024 = vmatpush.msra.mxu0 %v9080_v22  ;;  %3044 = vmatpush.msra.mxu1 %v9081_v42  ;;  %v9091_v22 = vld [vmem:[#allocation185_spill] sm:$0xff]  ;;  %v9092_v42 = vld [vmem:[#allocation178_spill] sm:$0xff] }
 0x5ba   : > { %3064 = vmatpush.msra.mxu2 %v9082_v50  ;;  %3084 = vmatpush.msra.mxu3 %v9083_v4  ;;  %v9093_v50 = vld [vmem:[#allocation179_spill] sm:$0xff]  ;;  %v9094_v4 = vld [vmem:[#allocation180_spill] sm:$0xff] }
 0x5bb   : > { %3025 = vmatpush.msra.mxu0 %v9084_v54  ;;  %3045 = vmatpush.msra.mxu1 %v9085_v53  ;;  %v9095_v54 = vld [vmem:[#allocation181_spill] sm:$0xff]  ;;  %v9096_v53 = vld [vmem:[#allocation174_spill] sm:$0xff] }
 0x5bc   : > { %3065 = vmatpush.msra.mxu2 %v9086_v27  ;;  %3085 = vmatpush.msra.mxu3 %v9087_v16  ;;  %v9097_v27 = vld [vmem:[#allocation175_spill] sm:$0xff]  ;;  %v9098_v16 = vld [vmem:[#allocation176_spill] sm:$0xff] }
 0x5bd   : > { %3026 = vmatpush.msra.mxu0 %v9088_v60  ;;  %3046 = vmatpush.msra.mxu1 %v9089_v5  ;;  %v9099_v60 = vld [vmem:[#allocation177_spill] sm:$0xff]  ;;  %v9100_v5 = vld [vmem:[#allocation170_spill] sm:$0xff] }
 0x5be   : > { %3066 = vmatpush.msra.mxu2 %v9090_v6  ;;  %3086 = vmatpush.msra.mxu3 %v9091_v22  ;;  %v9101_v6 = vld [vmem:[#allocation171_spill] sm:$0xff]  ;;  %v9102_v22 = vld [vmem:[#allocation172_spill] sm:$0xff] }
 0x5bf   : > { %3027 = vmatpush.msra.mxu0 %v9092_v42  ;;  %3047 = vmatpush.msra.mxu1 %v9093_v50  ;;  %v9103_v42 = vld [vmem:[#allocation173_spill] sm:$0xff]  ;;  %v9104_v50 = vld [vmem:[#allocation166_spill] sm:$0xff] }
 0x5c0   : > { %3067 = vmatpush.msra.mxu2 %v9094_v4  ;;  %3087 = vmatpush.msra.mxu3 %v9095_v54  ;;  %v9105_v4 = vld [vmem:[#allocation167_spill] sm:$0xff]  ;;  %v9106_v54 = vld [vmem:[#allocation168_spill] sm:$0xff] }
 0x5c1   : > { %3028 = vmatpush.msra.mxu0 %v9096_v53  ;;  %3048 = vmatpush.msra.mxu1 %v9097_v27  ;;  %v9107_v53 = vld [vmem:[#allocation169_spill] sm:$0xff]  ;;  %v9108_v27 = vld [vmem:[#allocation162_spill] sm:$0xff] }
 0x5c2   : > { %3068 = vmatpush.msra.mxu2 %v9098_v16  ;;  %3088 = vmatpush.msra.mxu3 %v9099_v60  ;;  %v9109_v16 = vld [vmem:[#allocation163_spill] sm:$0xff]  ;;  %v9110_v60 = vld [vmem:[#allocation164_spill] sm:$0xff] }
 0x5c3   : > { %3029 = vmatpush.msra.mxu0 %v9100_v5  ;;  %3049 = vmatpush.msra.mxu1 %v9101_v6  ;;  %v9111_v5 = vld [vmem:[#allocation165_spill] sm:$0xff]  ;;  %v9112_v6 = vld [vmem:[#allocation158_spill] sm:$0xff] }
 0x5c4   : > { %3069 = vmatpush.msra.mxu2 %v9102_v22  ;;  %3089 = vmatpush.msra.mxu3 %v9103_v42  ;;  %v9113_v22 = vld [vmem:[#allocation159_spill] sm:$0xff]  ;;  %v9114_v42 = vld [vmem:[#allocation160_spill] sm:$0xff] }
 0x5c5   : > { %3030 = vmatpush.msra.mxu0 %v9104_v50  ;;  %3050 = vmatpush.msra.mxu1 %v9105_v4  ;;  %v9115_v50 = vld [vmem:[#allocation161_spill] sm:$0xff]  ;;  %v9116_v4 = vld [vmem:[#allocation154_spill] sm:$0xff] }
 0x5c6   : > { %3070 = vmatpush.msra.mxu2 %v9106_v54  ;;  %3090 = vmatpush.msra.mxu3 %v9107_v53  ;;  %v9117_v54 = vld [vmem:[#allocation155_spill] sm:$0xff]  ;;  %v9118_v53 = vld [vmem:[#allocation156_spill] sm:$0xff] }
 0x5c7   : > { %3031 = vmatpush.msra.mxu0 %v9108_v27  ;;  %3051 = vmatpush.msra.mxu1 %v9109_v16  ;;  %v9119_v27 = vld [vmem:[#allocation157_spill] sm:$0xff]  ;;  %v9120_v16 = vld [vmem:[#allocation150_spill] sm:$0xff] }
 0x5c8   : > { %3071 = vmatpush.msra.mxu2 %v9110_v60  ;;  %3091 = vmatpush.msra.mxu3 %v9111_v5  ;;  %v9121_v60 = vld [vmem:[#allocation151_spill] sm:$0xff]  ;;  %v9122_v5 = vld [vmem:[#allocation152_spill] sm:$0xff] }
 0x5c9   : > { %3032 = vmatpush.msra.mxu0 %v9112_v6  ;;  %3052 = vmatpush.msra.mxu1 %v9113_v22  ;;  %v9123_v6 = vld [vmem:[#allocation153_spill] sm:$0xff]  ;;  %v9124_v22 = vld [vmem:[#allocation146_spill] sm:$0xff] }
 0x5ca   : > { %3072 = vmatpush.msra.mxu2 %v9114_v42  ;;  %3092 = vmatpush.msra.mxu3 %v9115_v50  ;;  %v9125_v42 = vld [vmem:[#allocation147_spill] sm:$0xff]  ;;  %v9126_v50 = vld [vmem:[#allocation148_spill] sm:$0xff] }
 0x5cb   : > { %3033 = vmatpush.msra.mxu0 %v9116_v4  ;;  %3053 = vmatpush.msra.mxu1 %v9117_v54  ;;  %v9127_v4 = vld [vmem:[#allocation149_spill] sm:$0xff]  ;;  %v9128_v54 = vld [vmem:[#allocation142_spill] sm:$0xff] }
 0x5cc   : > { %3073 = vmatpush.msra.mxu2 %v9118_v53  ;;  %3093 = vmatpush.msra.mxu3 %v9119_v27  ;;  %v9129_v53 = vld [vmem:[#allocation143_spill] sm:$0xff]  ;;  %v9130_v27 = vld [vmem:[#allocation144_spill] sm:$0xff] }
 0x5cd   : > { %3034 = vmatpush.msra.mxu0 %v9120_v16  ;;  %3054 = vmatpush.msra.mxu1 %v9121_v60  ;;  %v9131_v16 = vld [vmem:[#allocation145_spill] sm:$0xff]  ;;  %v9132_v60 = vld [vmem:[#allocation138_spill] sm:$0xff] }
 0x5ce   : > { %3074 = vmatpush.msra.mxu2 %v9122_v5  ;;  %3094 = vmatpush.msra.mxu3 %v9123_v6  ;;  %v9133_v5 = vld [vmem:[#allocation139_spill] sm:$0xff]  ;;  %v9134_v6 = vld [vmem:[#allocation140_spill] sm:$0xff] }
 0x5cf   : > { %3035 = vmatpush.msra.mxu0 %v9124_v22  ;;  %3055 = vmatpush.msra.mxu1 %v9125_v42  ;;  %v9135_v22 = vld [vmem:[#allocation141_spill] sm:$0xff]  ;;  %v9136_v42 = vld [vmem:[#allocation134_spill] sm:$0xff] }
 0x5d0   : > { %3075 = vmatpush.msra.mxu2 %v9126_v50  ;;  %3095 = vmatpush.msra.mxu3 %v9127_v4  ;;  %v9137_v50 = vld [vmem:[#allocation135_spill] sm:$0xff]  ;;  %v9138_v4 = vld [vmem:[#allocation136_spill] sm:$0xff] }
 0x5d1   : > { %3100 = vmatpush.msrb.mxu0 %v9128_v54  ;;  %3120 = vmatpush.msrb.mxu1 %v9129_v53  ;;  %v9139_v54 = vld [vmem:[#allocation137_spill] sm:$0xff]  ;;  %v9140_v53 = vld [vmem:[#allocation130_spill] sm:$0xff] }
 0x5d2   : > { %3140 = vmatpush.msrb.mxu2 %v9130_v27  ;;  %3160 = vmatpush.msrb.mxu3 %v9131_v16  ;;  %v9141_v27 = vld [vmem:[#allocation131_spill] sm:$0xff]  ;;  %v9142_v16 = vld [vmem:[#allocation132_spill] sm:$0xff] }
 0x5d3   : > { %3101 = vmatpush.msrb.mxu0 %v9132_v60  ;;  %3121 = vmatpush.msrb.mxu1 %v9133_v5  ;;  %v9143_v60 = vld [vmem:[#allocation133_spill] sm:$0xff]  ;;  %v9144_v5 = vld [vmem:[#allocation126_spill] sm:$0xff] }
 0x5d4   : > { %3141 = vmatpush.msrb.mxu2 %v9134_v6  ;;  %3161 = vmatpush.msrb.mxu3 %v9135_v22  ;;  %v9145_v6 = vld [vmem:[#allocation127_spill] sm:$0xff]  ;;  %v9146_v22 = vld [vmem:[#allocation128_spill] sm:$0xff] }
 0x5d5   : > { %3102 = vmatpush.msrb.mxu0 %v9136_v42  ;;  %3122 = vmatpush.msrb.mxu1 %v9137_v50  ;;  %v9147_v42 = vld [vmem:[#allocation129_spill] sm:$0xff]  ;;  %v9148_v50 = vld [vmem:[#allocation122_spill] sm:$0xff] }
 0x5d6   : > { %3142 = vmatpush.msrb.mxu2 %v9138_v4  ;;  %3162 = vmatpush.msrb.mxu3 %v9139_v54  ;;  %v9149_v4 = vld [vmem:[#allocation123_spill] sm:$0xff]  ;;  %v9150_v54 = vld [vmem:[#allocation124_spill] sm:$0xff] }
 0x5d7   : > { %3103 = vmatpush.msrb.mxu0 %v9140_v53  ;;  %3123 = vmatpush.msrb.mxu1 %v9141_v27  ;;  %v9151_v53 = vld [vmem:[#allocation125_spill] sm:$0xff]  ;;  %v9152_v27 = vld [vmem:[#allocation118_spill] sm:$0xff] }
 0x5d8   : > { %3143 = vmatpush.msrb.mxu2 %v9142_v16  ;;  %3163 = vmatpush.msrb.mxu3 %v9143_v60  ;;  %v9153_v16 = vld [vmem:[#allocation119_spill] sm:$0xff]  ;;  %v9154_v60 = vld [vmem:[#allocation120_spill] sm:$0xff] }
 0x5d9   : > { %3104 = vmatpush.msrb.mxu0 %v9144_v5  ;;  %3124 = vmatpush.msrb.mxu1 %v9145_v6  ;;  %v9155_v5 = vld [vmem:[#allocation121_spill] sm:$0xff]  ;;  %v9156_v6 = vld [vmem:[#allocation114_spill] sm:$0xff] }
 0x5da   : > { %3144 = vmatpush.msrb.mxu2 %v9146_v22  ;;  %3164 = vmatpush.msrb.mxu3 %v9147_v42  ;;  %v9157_v22 = vld [vmem:[#allocation115_spill] sm:$0xff]  ;;  %v9158_v42 = vld [vmem:[#allocation116_spill] sm:$0xff] }
 0x5db   : > { %3105 = vmatpush.msrb.mxu0 %v9148_v50  ;;  %3125 = vmatpush.msrb.mxu1 %v9149_v4  ;;  %v9159_v50 = vld [vmem:[#allocation117_spill] sm:$0xff]  ;;  %v9160_v4 = vld [vmem:[#allocation110_spill] sm:$0xff] }
 0x5dc   : > { %3145 = vmatpush.msrb.mxu2 %v9150_v54  ;;  %3165 = vmatpush.msrb.mxu3 %v9151_v53  ;;  %v9161_v54 = vld [vmem:[#allocation111_spill] sm:$0xff]  ;;  %v9162_v53 = vld [vmem:[#allocation112_spill] sm:$0xff] }
 0x5dd   : > { %3106 = vmatpush.msrb.mxu0 %v9152_v27  ;;  %3126 = vmatpush.msrb.mxu1 %v9153_v16  ;;  %v9163_v27 = vld [vmem:[#allocation113_spill] sm:$0xff]  ;;  %v9164_v16 = vld [vmem:[#allocation106_spill] sm:$0xff] }
 0x5de   : > { %3146 = vmatpush.msrb.mxu2 %v9154_v60  ;;  %3166 = vmatpush.msrb.mxu3 %v9155_v5  ;;  %v9165_v60 = vld [vmem:[#allocation107_spill] sm:$0xff]  ;;  %v9166_v5 = vld [vmem:[#allocation108_spill] sm:$0xff] }
 0x5df   : > { %3107 = vmatpush.msrb.mxu0 %v9156_v6  ;;  %3127 = vmatpush.msrb.mxu1 %v9157_v22  ;;  %v9167_v6 = vld [vmem:[#allocation109_spill] sm:$0xff]  ;;  %v9168_v22 = vld [vmem:[#allocation102_spill] sm:$0xff] }
 0x5e0   : > { %3147 = vmatpush.msrb.mxu2 %v9158_v42  ;;  %3167 = vmatpush.msrb.mxu3 %v9159_v50  ;;  %v9169_v42 = vld [vmem:[#allocation103_spill] sm:$0xff]  ;;  %v9170_v50 = vld [vmem:[#allocation104_spill] sm:$0xff] }
 0x5e1   : > { %3108 = vmatpush.msrb.mxu0 %v9160_v4  ;;  %3128 = vmatpush.msrb.mxu1 %v9161_v54  ;;  %v9171_v4 = vld [vmem:[#allocation105_spill] sm:$0xff]  ;;  %v9172_v54 = vld [vmem:[#allocation98_spill] sm:$0xff] }
 0x5e2   : > { %3148 = vmatpush.msrb.mxu2 %v9162_v53  ;;  %3168 = vmatpush.msrb.mxu3 %v9163_v27  ;;  %v9173_v53 = vld [vmem:[#allocation99_spill] sm:$0xff]  ;;  %v9174_v27 = vld [vmem:[#allocation100_spill] sm:$0xff] }
 0x5e3   : > { %3109 = vmatpush.msrb.mxu0 %v9164_v16  ;;  %3129 = vmatpush.msrb.mxu1 %v9165_v60  ;;  %v9175_v16 = vld [vmem:[#allocation101_spill] sm:$0xff]  ;;  %v9176_v60 = vld [vmem:[#allocation94_spill] sm:$0xff] }
 0x5e4   : > { %3149 = vmatpush.msrb.mxu2 %v9166_v5  ;;  %3169 = vmatpush.msrb.mxu3 %v9167_v6  ;;  %v9177_v5 = vld [vmem:[#allocation95_spill] sm:$0xff]  ;;  %v9178_v6 = vld [vmem:[#allocation96_spill] sm:$0xff] }
 0x5e5   : > { %3110 = vmatpush.msrb.mxu0 %v9168_v22  ;;  %3130 = vmatpush.msrb.mxu1 %v9169_v42  ;;  %v9179_v22 = vld [vmem:[#allocation97_spill] sm:$0xff]  ;;  %v9180_v42 = vld [vmem:[#allocation90_spill] sm:$0xff] }
 0x5e6   : > { %3150 = vmatpush.msrb.mxu2 %v9170_v50  ;;  %3170 = vmatpush.msrb.mxu3 %v9171_v4  ;;  %v9181_v50 = vld [vmem:[#allocation91_spill] sm:$0xff]  ;;  %v9182_v4 = vld [vmem:[#allocation92_spill] sm:$0xff] }
 0x5e7   : > { %3111 = vmatpush.msrb.mxu0 %v9172_v54  ;;  %3131 = vmatpush.msrb.mxu1 %v9173_v53  ;;  %v9183_v54 = vld [vmem:[#allocation93_spill] sm:$0xff]  ;;  %v9184_v53 = vld [vmem:[#allocation86_spill] sm:$0xff] }
 0x5e8   : > { %3151 = vmatpush.msrb.mxu2 %v9174_v27  ;;  %3171 = vmatpush.msrb.mxu3 %v9175_v16  ;;  %v9185_v27 = vld [vmem:[#allocation87_spill] sm:$0xff]  ;;  %v9186_v16 = vld [vmem:[#allocation88_spill] sm:$0xff] }
 0x5e9   : > { %3112 = vmatpush.msrb.mxu0 %v9176_v60  ;;  %3132 = vmatpush.msrb.mxu1 %v9177_v5  ;;  %v9187_v60 = vld [vmem:[#allocation89_spill] sm:$0xff]  ;;  %v9188_v5 = vld [vmem:[#allocation82_spill] sm:$0xff] }
 0x5ea   : > { %3152 = vmatpush.msrb.mxu2 %v9178_v6  ;;  %3172 = vmatpush.msrb.mxu3 %v9179_v22  ;;  %v9189_v6 = vld [vmem:[#allocation83_spill] sm:$0xff]  ;;  %v9190_v22 = vld [vmem:[#allocation84_spill] sm:$0xff] }
 0x5eb   : > { %3113 = vmatpush.msrb.mxu0 %v9180_v42  ;;  %3133 = vmatpush.msrb.mxu1 %v9181_v50  ;;  %v9191_v42 = vld [vmem:[#allocation85_spill] sm:$0xff] }
 0x5ec   : > { %3153 = vmatpush.msrb.mxu2 %v9182_v4  ;;  %3173 = vmatpush.msrb.mxu3 %v9183_v54 }
 0x5ed   : > { %3114 = vmatpush.msrb.mxu0 %v9184_v53  ;;  %3134 = vmatpush.msrb.mxu1 %v9185_v27 }
 0x5ee   : > { %3154 = vmatpush.msrb.mxu2 %v9186_v16  ;;  %3174 = vmatpush.msrb.mxu3 %v9187_v60 }
 0x5ef   : > { %3115 = vmatpush.msrb.mxu0 %v9188_v5  ;;  %3135 = vmatpush.msrb.mxu1 %v9189_v6 }
 0x5f0   : > { %3155 = vmatpush.msrb.mxu2 %v9190_v22  ;;  %3175 = vmatpush.msrb.mxu3 %v9191_v42 }
 0x607   : > { %v2648_v50 = vpop.f32.mrf.mxu0  ;;  %v2668_v4 = vpop.f32.mrf.mxu1 }
 0x60b   : > { %v2863_v27 = vpop.permute.xlu2 %2862 }
 0x60c   : > { %v2865_v6 = vmul.f32 %v2863_v27, %v9194_v18  ;;  %v2866_v22 = vmul.f32 %v2863_v27, %v9195_v0 }
 0x60e   : > { %v2708_v46 = vpop.f32.mrf.mxu3  ;;  %v2688_v37 = vpop.f32.mrf.mxu2  ;;  %v2869_v33 = vadd.f32 %v2865_v6, %v9196_v8 }
 0x61f   : > { %v2728_v54 = vpop.f32.mrf.mxu0  ;;  %v2748_v13 = vpop.f32.mrf.mxu1 }
 0x620   : > { %v2729_v53 = vadd.f32 %v2728_v54, %v2648_v50  ;;  %v2749_v28 = vadd.f32 %v2748_v13, %v2668_v4  ;;  %v9197_v50 = vld [vmem:[#allocation16_spill] sm:$0xff]  ;;  %v9198_v4 = vld [vmem:[#allocation217_spill] sm:$0xff] }
 0x621   : > { %v2870_v13 = vadd.f32 %v2866_v22, %v9197_v50 }
 0x622   : > { %v2791_v16 = vadd.f32 %v2729_v53, %v9192_v1  ;;  %v2792_v60 = vadd.f32 %v2749_v28, %v9193_v47 }
 0x624   : > { %v4208_v48 = vmul.f32 -1.442695, %v2791_v16  ;;  %v4209_v5 = vmul.f32 -1.442695, %v2792_v60 }
 0x626   : > { %4484 = vpow2.f32 %v4208_v48  ;;  %v2788_v42 = vpop.f32.mrf.mxu3  ;;  %v2768_v0 = vpop.f32.mrf.mxu2  ;;  %v9199_v48 = vld [vmem:[#allocation81_spill] sm:$0xff] }
 0x627   : > { %4486 = vpow2.f32 %v4209_v5  ;;  %v2789_v40 = vadd.f32 %v2788_v42, %v2708_v46  ;;  %v2868_v44 = vmul.f32 %v2863_v27, %v9199_v48  ;;  %v2769_v6 = vadd.f32 %v2768_v0, %v2688_v37 }
 0x629   : > { %v2794_v54 = vadd.f32 %v2789_v40, %v9198_v4  ;;  %v9200_v40 = vld [vmem:[#allocation213_spill] sm:$0xff] }
 0x62a   : > { %v2872_v22 = vadd.f32 %v2868_v44, %v9200_v40 }
 0x62b   : > { %v4210_v53 = vmul.f32 -1.442695, %v2794_v54  ;;  %v2890_v1 = vpop.f32.mrf.mxu0  ;;  %v2910_v28 = vpop.f32.mrf.mxu1 }
 0x62c   : > { %v4485_v16 = vpop.eup %4484  ;;  %v2953_v60 = vadd.f32 %v2890_v1, %v2869_v33  ;;  %v2954_v47 = vadd.f32 %v2910_v28, %v2870_v13  ;;  %v9201_v1 = vld [vmem:[#allocation218_spill] sm:$0xff] }
 0x62d   : > { %v4487_v18 = vpop.eup %4486  ;;  %v2798_v17 = vadd.f32 1.0, %v4485_v16  ;;  %4488 = vpow2.f32 %v4210_v53  ;;  %v2793_v13 = vadd.f32 %v2769_v6, %v9201_v1 }
 0x62e   : > { %v2817_v5 = vadd.f32 1.0, %v4487_v18  ;;  %v4211_v42 = vmul.f32 -1.442695, %v2953_v60  ;;  %v4212_v46 = vmul.f32 -1.442695, %v2954_v47 }
 0x62f   : > { %4490 = vrcp.f32 %v2798_v17  ;;  %v2808_v6 = vand.u32 2147483647, %v2798_v17  ;;  %vm2804_vm11 = vweird.f32 %v2798_v17 }
 0x630   : > { %4492 = vrcp.f32 %v2817_v5  ;;  %vm2823_vm10 = vweird.f32 %v2817_v5 }
 0x631   : > { %4494 = vpow2.f32 %v4211_v42  ;;  %v2867_v42 = vmul.f32 %v2863_v27, %v9027_v63  ;;  %vm2809_vm13 = vcmp.eq.f32.partialorder %v2808_v6, 8.507059e+37 }
 0x632   : > { %4496 = vpow2.f32 %v4212_v46  ;;  %v2950_v54 = vpop.f32.mrf.mxu3 }
 0x633   : > { %v4489_v50 = vpop.eup %4488  ;;  %v2956_v33 = vadd.f32 %v2950_v54, %v2872_v22  ;;  %v2829_v54 = vand.u32 2147483648, %v2817_v5 }
 0x634   : > { %v6959_v28 = vadd.f32 1.0, %v4489_v50  ;;  %v2810_v50 = vand.u32 2147483648, %v2798_v17 }
 0x635   : > { %v4491_v53 = vpop.eup %4490  ;;  %v4213_v16 = vmul.f32 -1.442695, %v2956_v33  ;;  %v2830_v8 = vor.u32 1.1754944e-38, %v2829_v54 }
 0x636   : > { %v4493_v48 = vpop.eup %4492  ;;  %v2800_v18 = vmul.f32 %v4491_v53, %v2798_v17  ;;  %4498 = vrcp.f32 %v6959_v28  ;;  %vm2805_vm8 = vweird.f32 %v4491_v53  ;;  %vm2843_vm0 = vweird.f32 %v6959_v28 }
 0x637   : > { %v4495_v47 = vpop.eup %4494  ;;  %v2819_v60 = vmul.f32 %v4493_v48, %v2817_v5  ;;  %4500 = vpow2.f32 %v4213_v16  ;;  %vm2824_vm9 = vweird.f32 %v4493_v48  ;;  %v2827_v16 = vand.u32 2147483647, %v2817_v5  ;;  %vm2806_vm12 = vmor %vm2804_vm11, %vm2805_vm8 }
 0x638   : > { %v4497_v37 = vpop.eup %4496  ;;  %v2801_v0 = vsub.f32 1.0, %v2800_v18  ;;  %4502 = vtanh.f32 %v2793_v13  ;;  %v6962_v44 = vadd.f32 1.0, %v4495_v47  ;;  %v2930_v13 = vpop.f32.mrf.mxu2  ;;  %v2871_v47 = vadd.f32 %v2867_v42, %v9028_v11  ;;  %vm2825_vm14 = vmor %vm2823_vm10, %vm2824_vm9 }
 0x639   : > { %v2820_v46 = vsub.f32 1.0, %v2819_v60  ;;  %v6965_v22 = vadd.f32 1.0, %v4497_v37  ;;  %v2811_v37 = vor.u32 1.1754944e-38, %v2810_v50  ;;  %vm2828_vm15 = vcmp.eq.f32.partialorder %v2827_v16, 8.507059e+37 }
 0x63a   : > { %v2802_v33 = vmul.f32 %v4491_v53, %v2801_v0  ;;  %4504 = vrcp.f32 %v6962_v44  ;;  %v2955_v4 = vadd.f32 %v2930_v13, %v2871_v47  ;;  %v2970_v16 = vand.u32 2147483647, %v6962_v44 }
 0x63b   : > { %v2821_v40 = vmul.f32 %v4493_v48, %v2820_v46  ;;  %4506 = vrcp.f32 %v6965_v22  ;;  %vm2966_vm4 = vweird.f32 %v6962_v44  ;;  %vm2985_vm6 = vweird.f32 %v6965_v22 }
 0x63c   : > { %v6969_v18 = vpop.eup %4498  ;;  %v2803_v27 = vadd.f32 %v4491_v53, %v2802_v33  ;;  %vm2971_vm9 = vcmp.eq.f32.partialorder %v2970_v16, 8.507059e+37 }
 0x63d   : > { %v4501_v60 = vpop.eup %4500  ;;  %v2822_v0 = vadd.f32 %v4493_v48, %v2821_v40  ;;  %v2839_v46 = vmul.f32 %v6969_v18, %v6959_v28  ;;  %vm2844_vm1 = vweird.f32 %v6969_v18 }
 0x63e   : > { %v4503_v63 = vpop.eup %4502  ;;  %v2807_v1 = vsel %vm2806_vm12, %v4491_v53, %v2803_v27  ;;  %v6975_v41 = vadd.f32 1.0, %v4501_v60  ;;  %vm7002_vm5 = vmor %vm2843_vm0, %vm2844_vm1 }
 0x63f   : > { %v2812_v5 = vsel %vm2809_vm13, %v2811_v37, %v2807_v1  ;;  %v2826_v17 = vsel %vm2825_vm14, %v4493_v48, %v2822_v0  ;;  %v2840_v42 = vsub.f32 1.0, %v2839_v46  ;;  %v2858_v48 = vperm.slane %v9029_v52, 4 }
 0x640   : > { %v4505_v33 = vpop.eup %4504  ;;  %v2831_v11 = vsel %vm2828_vm15, %v2830_v8, %v2826_v17  ;;  %v2854_v6 = vmul.f32 %v4503_v63, %v2812_v5  ;;  %4508 = vrcp.f32 %v6975_v41  ;;  %v2849_v63 = vand.u32 2147483648, %v6959_v28 }
 0x641   : > { %v4507_v40 = vpop.eup %4506  ;;  %v2853_v50 = vmul.f32 %v2831_v11, %v6709_v55  ;;  %v2841_v56 = vmul.f32 %v6969_v18, %v2840_v42  ;;  %v2962_v54 = vmul.f32 %v4505_v33, %v6962_v44  ;;  %4510 = vtanh.f32 %v2955_v4 }
 0x642   : > { %v2981_v53 = vmul.f32 %v4507_v40, %v6965_v22  ;;  %v2972_v55 = vand.u32 2147483648, %v6962_v44  ;;  %v2991_v4 = vand.u32 2147483648, %v6965_v22  ;;  %vm2967_vm2 = vweird.f32 %v4505_v33 }
 0x643   : > { %v6984_v1 = vadd.f32 %v2854_v6, %v2853_v50  ;;  %v2963_v8 = vsub.f32 1.0, %v2962_v54  ;;  %v2842_v11 = vadd.f32 %v6969_v18, %v2841_v56  ;;  %vm2986_vm3 = vweird.f32 %v4507_v40  ;;  %vm2968_vm7 = vmor %vm2966_vm4, %vm2967_vm2 }
 0x644   : > { %v2982_v13 = vsub.f32 1.0, %v2981_v53  ;;  %v2989_v37 = vand.u32 2147483647, %v6965_v22  ;;  %v2847_v0 = vand.u32 2147483647, %v6959_v28  ;;  %v2850_v17 = vor.u32 1.1754944e-38, %v2849_v63  ;;  %vm2987_vm8 = vmor %vm2985_vm6, %vm2986_vm3 }
 0x645   : > { %9202 = vst [vmem:[#allocation73_spill] sm:$0xff] %v6984_v1  ;;  %4512 = vtanh.f32 %v6984_v1  ;;  %v2964_v27 = vmul.f32 %v4505_v33, %v2963_v8  ;;  %v2973_v6 = vor.u32 1.1754944e-38, %v2972_v55  ;;  %v2846_v44 = vsel %vm7002_vm5, %v6969_v18, %v2842_v11  ;;  %v9205_v11 = vld [vmem:[#allocation52_spill] sm:$0xff] }
 0x646   : > { %v6993_v47 = vpop.eup %4508  ;;  %v2983_v60 = vmul.f32 %v4507_v40, %v2982_v13  ;;  %v2992_v54 = vor.u32 1.1754944e-38, %v2991_v4  ;;  %vm2990_vm10 = vcmp.eq.f32.partialorder %v2989_v37, 8.507059e+37  ;;  %vm2848_vm11 = vcmp.eq.f32.partialorder %v2847_v0, 8.507059e+37  ;;  %v9206_v4 = vld [vmem:[#allocation45_spill] sm:$0xff]  ;;  %v9208_v37 = vld [vmem:[#allocation47_spill] sm:$0xff]  ;;  %v9209_v0 = vld [vmem:[#allocation48_spill] sm:$0xff] }
 0x647   : > { %v2965_v46 = vadd.f32 %v4505_v33, %v2964_v27  ;;  %v3001_v56 = vmul.f32 %v6993_v47, %v6975_v41  ;;  %v4511_v42 = vpop.eup %4510  ;;  %v2851_v55 = vsel %vm2848_vm11, %v2850_v17, %v2846_v44  ;;  %vm3006_vm12 = vweird.f32 %v6993_v47  ;;  %v9212_v17 = vld [vmem:[#allocation43_spill] sm:$0xff] }
 0x648   : > { %v2984_v50 = vadd.f32 %v4507_v40, %v2983_v60  ;;  %vm3005_vm13 = vweird.f32 %v6975_v41  ;;  %v9216_v44 = vld [vmem:[#allocation39_spill] sm:$0xff] }
 0x649   : > { %v2969_v53 = vsel %vm2968_vm7, %v4505_v33, %v2965_v46  ;;  %v3002_v28 = vsub.f32 1.0, %v3001_v56  ;;  %vm3007_vm14 = vmor %vm3005_vm13, %vm3006_vm12  ;;  %v9210_v46 = vld [vmem:[#allocation41_spill] sm:$0xff]  ;;  %v9211_v56 = vld [vmem:[#allocation42_spill] sm:$0xff] }
 0x64a   : > { %v2974_v8 = vsel %vm2971_vm9, %v2973_v6, %v2969_v53  ;;  %v2988_v13 = vsel %vm2987_vm8, %v4507_v40, %v2984_v50  ;;  %v3011_v40 = vand.u32 2147483648, %v6975_v41  ;;  %v9214_v6 = vld [vmem:[#allocation37_spill] sm:$0xff]  ;;  %v9215_v50 = vld [vmem:[#allocation38_spill] sm:$0xff] }
 0x64b   : > { %v4513_v63 = vpop.eup %4512  ;;  %v2993_v27 = vsel %vm2990_vm10, %v2992_v54, %v2988_v13  ;;  %v3016_v52 = vmul.f32 %v4511_v42, %v2974_v8  ;;  %v3003_v22 = vmul.f32 %v6993_v47, %v3002_v28  ;;  %v9213_v42 = vld [vmem:[#allocation44_spill] sm:$0xff]  ;;  %v9218_v53 = vld [vmem:[#allocation33_spill] sm:$0xff]  ;;  %v9219_v28 = vld [vmem:[#allocation34_spill] sm:$0xff] }
 0x64c   : > { %v3015_v60 = vmul.f32 %v2993_v27, %v6767_v58  ;;  %v2857_v1 = vmul.f32 %v4513_v63, %v2851_v55  ;;  %v3012_v58 = vor.u32 1.1754944e-38, %v3011_v40  ;;  %v9217_v54 = vld [vmem:[#allocation40_spill] sm:$0xff]  ;;  %v9220_v8 = vld [vmem:[#allocation35_spill] sm:$0xff]  ;;  %v9222_v63 = vld [vmem:[#allocation29_spill] sm:$0xff] }
 0x64d   : > { %v3004_v33 = vadd.f32 %v6993_v47, %v3003_v22  ;;  %v9221_v13 = vld [vmem:[#allocation36_spill] sm:$0xff]  ;;  %v9223_v27 = vld [vmem:[#allocation30_spill] sm:$0xff]  ;;  %v9224_v22 = vld [vmem:[#allocation31_spill] sm:$0xff] }
 0x64e   : > { %v7012_v5 = vadd.f32 %v3016_v52, %v3015_v60  ;;  %v2859_v18 = vmul.f32 %v2858_v48, %v2857_v1  ;;  %3036 = vmatmul.f32.vlgmr.msra.gmra.mxu0 %v2857_v1  ;;  %3056 = vmatmul.f32.vlgmr.msra.gmra.mxu1 %v2857_v1  ;;  %v3009_v52 = vand.u32 2147483647, %v6975_v41  ;;  %v9225_v55 = vld [vmem:[#allocation32_spill] sm:$0xff]  ;;  %v9226_v60 = vld [vmem:[#allocation25_spill] sm:$0xff] }
 0x64f   : > { %3076 = vmatmul.f32.vlgmr.msra.gmra.mxu2 %v2857_v1  ;;  %3096 = vmatmul.f32.vlgmr.msra.gmra.mxu3 %v2857_v1  ;;  %v9229_v40 = vld [vmem:[#allocation28_spill] sm:$0xff] }
 0x650   : > { %4514 = vtanh.f32 %v7012_v5  ;;  %v7019_v16 = vadd.f32 %v2859_v18, %v6736_v62  ;;  %3262 = vmatpush.msra.mxu0 %v8503_v3  ;;  %3282 = vmatpush.msra.mxu1 %v8188_v25  ;;  %v3008_v62 = vsel %vm3007_vm14, %v6993_v47, %v3004_v33  ;;  %vm3010_vm15 = vcmp.eq.f32.partialorder %v3009_v52, 8.507059e+37  ;;  %v9207_v47 = vld [vmem:[#allocation46_spill] sm:$0xff]  ;;  %v9228_v33 = vld [vmem:[#allocation27_spill] sm:$0xff]  ;;  %v9230_v52 = vld [vmem:[#allocation21_spill] sm:$0xff] }
 0x651   : > { %3302 = vmatpush.msra.mxu2 %v8189_v7  ;;  %3322 = vmatpush.msra.mxu3 %v8190_v32  ;;  %v3013_v48 = vsel %vm3010_vm15, %v3012_v58, %v3008_v62  ;;  %v9227_v18 = vld [vmem:[#allocation26_spill] sm:$0xff]  ;;  %v9232_v58 = vld [vmem:[#allocation23_spill] sm:$0xff] }
 0x652   : > { %3263 = vmatpush.msra.mxu0 %v8504_v14  ;;  %3283 = vmatpush.msra.mxu1 %v8505_v35  ;;  %v9231_v62 = vld [vmem:[#allocation22_spill] sm:$0xff] }
 0x653   : > { %3303 = vmatpush.msra.mxu2 %v8506_v38  ;;  %3323 = vmatpush.msra.mxu3 %v8507_v26 }
 0x654   : > { %3264 = vmatpush.msra.mxu0 %v8508_v15  ;;  %3284 = vmatpush.msra.mxu1 %v8509_v24 }
 0x655   : > { %3304 = vmatpush.msra.mxu2 %v8510_v23  ;;  %3324 = vmatpush.msra.mxu3 %v8511_v10 }
 0x656   : > { %v4515_v41 = vpop.eup %4514  ;;  %3265 = vmatpush.msra.mxu0 %v8512_v19  ;;  %3285 = vmatpush.msra.mxu1 %v8513_v20 }
 0x657   : > { %v3019_v1 = vmul.f32 %v4515_v41, %v3013_v48  ;;  %3305 = vmatpush.msra.mxu2 %v8514_v9  ;;  %3325 = vmatpush.msra.mxu3 %v8515_v21  ;;  %v9233_v41 = vld [vmem:[#allocation24_spill] sm:$0xff]  ;;  %v9234_v48 = vld [vmem:[#allocation17_spill] sm:$0xff] }
 0x658   : > { %3266 = vmatpush.msra.mxu0 %v8516_v30  ;;  %3286 = vmatpush.msra.mxu1 %v8517_v31 }
 0x659   : > { %3116 = vmatmul.f32.vlgmr.msrb.gmra.mxu0 %v3019_v1  ;;  %3136 = vmatmul.f32.vlgmr.msrb.gmra.mxu1 %v3019_v1 }
 0x65a   : > { %3156 = vmatmul.f32.vlgmr.msrb.gmra.mxu2 %v3019_v1  ;;  %3176 = vmatmul.f32.vlgmr.msrb.gmra.mxu3 %v3019_v1 }
 0x65b   : > { %3306 = vmatpush.msra.mxu2 %v8518_v43  ;;  %3326 = vmatpush.msra.mxu3 %v8519_v39 }
 0x65c   : > { %3267 = vmatpush.msra.mxu0 %v8520_v34  ;;  %3287 = vmatpush.msra.mxu1 %v8521_v12 }
 0x65d   : > { %3307 = vmatpush.msra.mxu2 %v8522_v2  ;;  %3327 = vmatpush.msra.mxu3 %v8680_v49 }
 0x65e   : > { %3268 = vmatpush.msra.mxu0 %v8681_v61  ;;  %3288 = vmatpush.msra.mxu1 %v8682_v29 }
 0x65f   : > { %3308 = vmatpush.msra.mxu2 %v8683_v51  ;;  %3328 = vmatpush.msra.mxu3 %v8684_v57 }
 0x660   : > { %3269 = vmatpush.msra.mxu0 %v8685_v45  ;;  %3289 = vmatpush.msra.mxu1 %v8686_v36 }
 0x661   : > { %3309 = vmatpush.msra.mxu2 %v8687_v59  ;;  %3329 = vmatpush.msra.mxu3 %v9205_v11 }
 0x662   : > { %3270 = vmatpush.msra.mxu0 %v9206_v4  ;;  %3290 = vmatpush.msra.mxu1 %v9207_v47 }
 0x663   : > { %3310 = vmatpush.msra.mxu2 %v9208_v37  ;;  %3330 = vmatpush.msra.mxu3 %v9209_v0 }
 0x664   : > { %3271 = vmatpush.msra.mxu0 %v9210_v46  ;;  %3291 = vmatpush.msra.mxu1 %v9211_v56 }
 0x665   : > { %3311 = vmatpush.msra.mxu2 %v9212_v17  ;;  %3331 = vmatpush.msra.mxu3 %v9213_v42 }
 0x666   : > { %3272 = vmatpush.msra.mxu0 %v9214_v6  ;;  %3292 = vmatpush.msra.mxu1 %v9215_v50 }
 0x667   : > { %3312 = vmatpush.msra.mxu2 %v9216_v44  ;;  %3332 = vmatpush.msra.mxu3 %v9217_v54 }
 0x668   : > { %3273 = vmatpush.msra.mxu0 %v9218_v53  ;;  %3293 = vmatpush.msra.mxu1 %v9219_v28  ;;  %v9369_v53 = vld [vmem:[#allocation217_spill] sm:$0xff] }
 0x669   : > { %3313 = vmatpush.msra.mxu2 %v9220_v8  ;;  %3333 = vmatpush.msra.mxu3 %v9221_v13 }
 0x66a   : > { %3274 = vmatpush.msra.mxu0 %v9222_v63  ;;  %3294 = vmatpush.msra.mxu1 %v9223_v27 }
 0x66b   : > { %3314 = vmatpush.msra.mxu2 %v9224_v22  ;;  %3334 = vmatpush.msra.mxu3 %v9225_v55  ;;  %v9235_v22 = vld [vmem:[#allocation18_spill] sm:$0xff]  ;;  %v9236_v55 = vld [vmem:[#allocation19_spill] sm:$0xff] }
 0x66c   : > { %3275 = vmatpush.msra.mxu0 %v9226_v60  ;;  %3295 = vmatpush.msra.mxu1 %v9227_v18  ;;  %v9237_v60 = vld [vmem:[#allocation20_spill] sm:$0xff] }
 0x66d   : > { %3315 = vmatpush.msra.mxu2 %v9228_v33  ;;  %3335 = vmatpush.msra.mxu3 %v9229_v40  ;;  %v4747_v40 = vmov 6   ;;  %v9246_v33 = vld [vmem:[#allocation205_spill] sm:$0xff] }
 0x66e   : > { %3276 = vmatpush.msra.mxu0 %v9230_v52  ;;  %3296 = vmatpush.msra.mxu1 %v9231_v62  ;;  %v9238_v52 = vld [vmem:[#allocation206_spill] sm:$0xff]  ;;  %v9239_v62 = vld [vmem:[#allocation211_spill] sm:$0xff] }
 0x66f   : > { %3316 = vmatpush.msra.mxu2 %v9232_v58  ;;  %3336 = vmatpush.msra.mxu3 %v9233_v41  ;;  %v9240_v58 = vld [vmem:[#allocation207_spill] sm:$0xff]  ;;  %v9241_v41 = vld [vmem:[#allocation208_spill] sm:$0xff] }
 0x670   : > { %3277 = vmatpush.msra.mxu0 %v9234_v48  ;;  %3297 = vmatpush.msra.mxu1 %v9235_v22  ;;  %v9242_v48 = vld [vmem:[#allocation209_spill] sm:$0xff]  ;;  %v9243_v22 = vld [vmem:[#allocation202_spill] sm:$0xff] }
 0x671   : > { %3317 = vmatpush.msra.mxu2 %v9236_v55  ;;  %3337 = vmatpush.msra.mxu3 %v9237_v60  ;;  %v9244_v55 = vld [vmem:[#allocation203_spill] sm:$0xff]  ;;  %v9245_v60 = vld [vmem:[#allocation204_spill] sm:$0xff] }
 0x672   : > { %3278 = vmatmul.f32.vlgmr.msra.gmra.mxu0 %v3019_v1  ;;  %3298 = vmatmul.f32.vlgmr.msra.gmra.mxu1 %v3019_v1 }
 0x673   : > { %3318 = vmatmul.f32.vlgmr.msra.gmra.mxu2 %v3019_v1  ;;  %3338 = vmatmul.f32.vlgmr.msra.gmra.mxu3 %v3019_v1  ;;  %v9247_v1 = vld [vmem:[#allocation198_spill] sm:$0xff] }
 0x674   : > { %4337 = vset.pattern.permute.xlu1 %v4747_v40  ;;  %3409 = vmatpush.msrb.mxu0 %v9238_v52  ;;  %v9248_v40 = vld [vmem:[#allocation199_spill] sm:$0xff]  ;;  %v9249_v52 = vld [vmem:[#allocation200_spill] sm:$0xff] }
 0x675   : > { %3251 = vperm.xlu1 %4337, %v9239_v62   ;;  %3429 = vmatpush.msrb.mxu1 %v9240_v58  ;;  %v9250_v62 = vld [vmem:[#allocation201_spill] sm:$0xff]  ;;  %v9251_v58 = vld [vmem:[#allocation194_spill] sm:$0xff] }
 0x676   : > { %3449 = vmatpush.msrb.mxu2 %v9241_v41  ;;  %3469 = vmatpush.msrb.mxu3 %v9242_v48  ;;  %v9252_v41 = vld [vmem:[#allocation195_spill] sm:$0xff]  ;;  %v9253_v48 = vld [vmem:[#allocation196_spill] sm:$0xff] }
 0x677   : > { %3410 = vmatpush.msrb.mxu0 %v9243_v22  ;;  %3430 = vmatpush.msrb.mxu1 %v9244_v55  ;;  %v9254_v22 = vld [vmem:[#allocation197_spill] sm:$0xff]  ;;  %v9255_v55 = vld [vmem:[#allocation190_spill] sm:$0xff] }
 0x678   : > { %3450 = vmatpush.msrb.mxu2 %v9245_v60  ;;  %3470 = vmatpush.msrb.mxu3 %v9246_v33  ;;  %v9256_v60 = vld [vmem:[#allocation191_spill] sm:$0xff]  ;;  %v9257_v33 = vld [vmem:[#allocation192_spill] sm:$0xff] }
 0x679   : > { %3411 = vmatpush.msrb.mxu0 %v9247_v1  ;;  %3431 = vmatpush.msrb.mxu1 %v9248_v40  ;;  %v9258_v1 = vld [vmem:[#allocation193_spill] sm:$0xff]  ;;  %v9259_v40 = vld [vmem:[#allocation186_spill] sm:$0xff] }
 0x67a   : > { %3451 = vmatpush.msrb.mxu2 %v9249_v52  ;;  %3471 = vmatpush.msrb.mxu3 %v9250_v62  ;;  %v9260_v52 = vld [vmem:[#allocation187_spill] sm:$0xff]  ;;  %v9261_v62 = vld [vmem:[#allocation188_spill] sm:$0xff] }
 0x67b   : > { %3412 = vmatpush.msrb.mxu0 %v9251_v58  ;;  %3432 = vmatpush.msrb.mxu1 %v9252_v41  ;;  %v9262_v58 = vld [vmem:[#allocation189_spill] sm:$0xff]  ;;  %v9263_v41 = vld [vmem:[#allocation182_spill] sm:$0xff] }
 0x67c   : > { %3452 = vmatpush.msrb.mxu2 %v9253_v48  ;;  %3472 = vmatpush.msrb.mxu3 %v9254_v22  ;;  %v9264_v48 = vld [vmem:[#allocation183_spill] sm:$0xff]  ;;  %v9265_v22 = vld [vmem:[#allocation184_spill] sm:$0xff] }
 0x67d   : > { %3413 = vmatpush.msrb.mxu0 %v9255_v55  ;;  %3433 = vmatpush.msrb.mxu1 %v9256_v60  ;;  %v9266_v55 = vld [vmem:[#allocation185_spill] sm:$0xff]  ;;  %v9267_v60 = vld [vmem:[#allocation178_spill] sm:$0xff] }
 0x67e   : > { %3453 = vmatpush.msrb.mxu2 %v9257_v33  ;;  %3473 = vmatpush.msrb.mxu3 %v9258_v1  ;;  %v9268_v33 = vld [vmem:[#allocation179_spill] sm:$0xff]  ;;  %v9269_v1 = vld [vmem:[#allocation180_spill] sm:$0xff] }
 0x67f   : > { %3414 = vmatpush.msrb.mxu0 %v9259_v40  ;;  %3434 = vmatpush.msrb.mxu1 %v9260_v52  ;;  %v9270_v40 = vld [vmem:[#allocation181_spill] sm:$0xff]  ;;  %v9271_v52 = vld [vmem:[#allocation174_spill] sm:$0xff] }
 0x680   : > { %3454 = vmatpush.msrb.mxu2 %v9261_v62  ;;  %3474 = vmatpush.msrb.mxu3 %v9262_v58  ;;  %v9272_v62 = vld [vmem:[#allocation175_spill] sm:$0xff]  ;;  %v9273_v58 = vld [vmem:[#allocation176_spill] sm:$0xff] }
 0x681   : > { %3415 = vmatpush.msrb.mxu0 %v9263_v41  ;;  %3435 = vmatpush.msrb.mxu1 %v9264_v48  ;;  %v9274_v41 = vld [vmem:[#allocation177_spill] sm:$0xff]  ;;  %v9275_v48 = vld [vmem:[#allocation170_spill] sm:$0xff] }
 0x682   : > { %3455 = vmatpush.msrb.mxu2 %v9265_v22  ;;  %3475 = vmatpush.msrb.mxu3 %v9266_v55  ;;  %v9276_v22 = vld [vmem:[#allocation171_spill] sm:$0xff]  ;;  %v9277_v55 = vld [vmem:[#allocation172_spill] sm:$0xff] }
 0x683   : > { %3416 = vmatpush.msrb.mxu0 %v9267_v60  ;;  %3436 = vmatpush.msrb.mxu1 %v9268_v33  ;;  %v9278_v60 = vld [vmem:[#allocation173_spill] sm:$0xff]  ;;  %v9279_v33 = vld [vmem:[#allocation166_spill] sm:$0xff] }
 0x684   : > { %3456 = vmatpush.msrb.mxu2 %v9269_v1  ;;  %3476 = vmatpush.msrb.mxu3 %v9270_v40  ;;  %v9280_v1 = vld [vmem:[#allocation167_spill] sm:$0xff]  ;;  %v9281_v40 = vld [vmem:[#allocation168_spill] sm:$0xff] }
 0x685   : > { %3417 = vmatpush.msrb.mxu0 %v9271_v52  ;;  %3437 = vmatpush.msrb.mxu1 %v9272_v62  ;;  %v9282_v52 = vld [vmem:[#allocation169_spill] sm:$0xff]  ;;  %v9283_v62 = vld [vmem:[#allocation162_spill] sm:$0xff] }
 0x686   : > { %3457 = vmatpush.msrb.mxu2 %v9273_v58  ;;  %3477 = vmatpush.msrb.mxu3 %v9274_v41  ;;  %v9284_v58 = vld [vmem:[#allocation163_spill] sm:$0xff]  ;;  %v9285_v41 = vld [vmem:[#allocation164_spill] sm:$0xff] }
 0x687   : > { %3418 = vmatpush.msrb.mxu0 %v9275_v48  ;;  %3438 = vmatpush.msrb.mxu1 %v9276_v22  ;;  %v9286_v48 = vld [vmem:[#allocation165_spill] sm:$0xff]  ;;  %v9287_v22 = vld [vmem:[#allocation158_spill] sm:$0xff] }
 0x688   : > { %3458 = vmatpush.msrb.mxu2 %v9277_v55  ;;  %3478 = vmatpush.msrb.mxu3 %v9278_v60  ;;  %v9288_v55 = vld [vmem:[#allocation159_spill] sm:$0xff]  ;;  %v9289_v60 = vld [vmem:[#allocation160_spill] sm:$0xff] }
 0x689   : > { %3419 = vmatpush.msrb.mxu0 %v9279_v33  ;;  %3439 = vmatpush.msrb.mxu1 %v9280_v1  ;;  %v9290_v33 = vld [vmem:[#allocation161_spill] sm:$0xff]  ;;  %v9291_v1 = vld [vmem:[#allocation154_spill] sm:$0xff] }
 0x68a   : > { %3459 = vmatpush.msrb.mxu2 %v9281_v40  ;;  %3479 = vmatpush.msrb.mxu3 %v9282_v52  ;;  %v9292_v40 = vld [vmem:[#allocation155_spill] sm:$0xff]  ;;  %v9293_v52 = vld [vmem:[#allocation156_spill] sm:$0xff] }
 0x68b   : > { %3420 = vmatpush.msrb.mxu0 %v9283_v62  ;;  %3440 = vmatpush.msrb.mxu1 %v9284_v58  ;;  %v9294_v62 = vld [vmem:[#allocation157_spill] sm:$0xff]  ;;  %v9295_v58 = vld [vmem:[#allocation150_spill] sm:$0xff] }
 0x68c   : > { %3460 = vmatpush.msrb.mxu2 %v9285_v41  ;;  %3480 = vmatpush.msrb.mxu3 %v9286_v48  ;;  %v9296_v41 = vld [vmem:[#allocation151_spill] sm:$0xff]  ;;  %v9297_v48 = vld [vmem:[#allocation152_spill] sm:$0xff] }
 0x68d   : > { %3421 = vmatpush.msrb.mxu0 %v9287_v22  ;;  %3441 = vmatpush.msrb.mxu1 %v9288_v55  ;;  %v9298_v22 = vld [vmem:[#allocation153_spill] sm:$0xff]  ;;  %v9299_v55 = vld [vmem:[#allocation146_spill] sm:$0xff] }
 0x68e   : > { %3461 = vmatpush.msrb.mxu2 %v9289_v60  ;;  %3481 = vmatpush.msrb.mxu3 %v9290_v33  ;;  %v9300_v60 = vld [vmem:[#allocation147_spill] sm:$0xff]  ;;  %v9301_v33 = vld [vmem:[#allocation148_spill] sm:$0xff] }
 0x68f   : > { %3422 = vmatpush.msrb.mxu0 %v9291_v1  ;;  %3442 = vmatpush.msrb.mxu1 %v9292_v40  ;;  %v9302_v1 = vld [vmem:[#allocation149_spill] sm:$0xff]  ;;  %v9303_v40 = vld [vmem:[#allocation142_spill] sm:$0xff] }
 0x690   : > { %3462 = vmatpush.msrb.mxu2 %v9293_v52  ;;  %3482 = vmatpush.msrb.mxu3 %v9294_v62  ;;  %v9304_v52 = vld [vmem:[#allocation143_spill] sm:$0xff]  ;;  %v9305_v62 = vld [vmem:[#allocation144_spill] sm:$0xff] }
 0x691   : > { %3423 = vmatpush.msrb.mxu0 %v9295_v58  ;;  %3443 = vmatpush.msrb.mxu1 %v9296_v41  ;;  %v9306_v58 = vld [vmem:[#allocation145_spill] sm:$0xff]  ;;  %v9307_v41 = vld [vmem:[#allocation138_spill] sm:$0xff] }
 0x692   : > { %3463 = vmatpush.msrb.mxu2 %v9297_v48  ;;  %3483 = vmatpush.msrb.mxu3 %v9298_v22  ;;  %v9308_v48 = vld [vmem:[#allocation139_spill] sm:$0xff]  ;;  %v9309_v22 = vld [vmem:[#allocation140_spill] sm:$0xff] }
 0x693   : > { %3424 = vmatpush.msrb.mxu0 %v9299_v55  ;;  %3444 = vmatpush.msrb.mxu1 %v9300_v60  ;;  %v9310_v55 = vld [vmem:[#allocation141_spill] sm:$0xff]  ;;  %v9311_v60 = vld [vmem:[#allocation134_spill] sm:$0xff] }
 0x694   : > { %3464 = vmatpush.msrb.mxu2 %v9301_v33  ;;  %3484 = vmatpush.msrb.mxu3 %v9302_v1  ;;  %v9312_v33 = vld [vmem:[#allocation135_spill] sm:$0xff]  ;;  %v9313_v1 = vld [vmem:[#allocation136_spill] sm:$0xff] }
 0x695   : > { %3489 = vmatpush.msra.mxu0 %v9303_v40  ;;  %3509 = vmatpush.msra.mxu1 %v9304_v52  ;;  %v9314_v40 = vld [vmem:[#allocation137_spill] sm:$0xff]  ;;  %v9315_v52 = vld [vmem:[#allocation130_spill] sm:$0xff] }
 0x696   : > { %3529 = vmatpush.msra.mxu2 %v9305_v62  ;;  %3549 = vmatpush.msra.mxu3 %v9306_v58  ;;  %v9316_v62 = vld [vmem:[#allocation131_spill] sm:$0xff]  ;;  %v9317_v58 = vld [vmem:[#allocation132_spill] sm:$0xff] }
 0x697   : > { %3490 = vmatpush.msra.mxu0 %v9307_v41  ;;  %3510 = vmatpush.msra.mxu1 %v9308_v48  ;;  %v9318_v41 = vld [vmem:[#allocation133_spill] sm:$0xff]  ;;  %v9319_v48 = vld [vmem:[#allocation126_spill] sm:$0xff] }
 0x698   : > { %3530 = vmatpush.msra.mxu2 %v9309_v22  ;;  %3550 = vmatpush.msra.mxu3 %v9310_v55  ;;  %v9320_v22 = vld [vmem:[#allocation127_spill] sm:$0xff]  ;;  %v9321_v55 = vld [vmem:[#allocation128_spill] sm:$0xff] }
 0x699   : > { %3491 = vmatpush.msra.mxu0 %v9311_v60  ;;  %3511 = vmatpush.msra.mxu1 %v9312_v33  ;;  %v9322_v60 = vld [vmem:[#allocation129_spill] sm:$0xff]  ;;  %v9323_v33 = vld [vmem:[#allocation122_spill] sm:$0xff] }
 0x69a   : > { %3531 = vmatpush.msra.mxu2 %v9313_v1  ;;  %3551 = vmatpush.msra.mxu3 %v9314_v40  ;;  %v9324_v1 = vld [vmem:[#allocation123_spill] sm:$0xff]  ;;  %v9325_v40 = vld [vmem:[#allocation124_spill] sm:$0xff] }
 0x69b   : > { %3492 = vmatpush.msra.mxu0 %v9315_v52  ;;  %3512 = vmatpush.msra.mxu1 %v9316_v62  ;;  %v9326_v52 = vld [vmem:[#allocation125_spill] sm:$0xff]  ;;  %v9327_v62 = vld [vmem:[#allocation118_spill] sm:$0xff] }
 0x69c   : > { %3532 = vmatpush.msra.mxu2 %v9317_v58  ;;  %3552 = vmatpush.msra.mxu3 %v9318_v41  ;;  %v9328_v58 = vld [vmem:[#allocation119_spill] sm:$0xff]  ;;  %v9329_v41 = vld [vmem:[#allocation120_spill] sm:$0xff] }
 0x69d   : > { %3493 = vmatpush.msra.mxu0 %v9319_v48  ;;  %3513 = vmatpush.msra.mxu1 %v9320_v22  ;;  %v9330_v48 = vld [vmem:[#allocation121_spill] sm:$0xff]  ;;  %v9331_v22 = vld [vmem:[#allocation114_spill] sm:$0xff] }
 0x69e   : > { %3533 = vmatpush.msra.mxu2 %v9321_v55  ;;  %3553 = vmatpush.msra.mxu3 %v9322_v60  ;;  %v9332_v55 = vld [vmem:[#allocation115_spill] sm:$0xff]  ;;  %v9333_v60 = vld [vmem:[#allocation116_spill] sm:$0xff] }
 0x69f   : > { %3494 = vmatpush.msra.mxu0 %v9323_v33  ;;  %3514 = vmatpush.msra.mxu1 %v9324_v1  ;;  %v9334_v33 = vld [vmem:[#allocation117_spill] sm:$0xff]  ;;  %v9335_v1 = vld [vmem:[#allocation110_spill] sm:$0xff] }
 0x6a0   : > { %3534 = vmatpush.msra.mxu2 %v9325_v40  ;;  %3554 = vmatpush.msra.mxu3 %v9326_v52  ;;  %v9336_v40 = vld [vmem:[#allocation111_spill] sm:$0xff]  ;;  %v9337_v52 = vld [vmem:[#allocation112_spill] sm:$0xff] }
 0x6a1   : > { %3495 = vmatpush.msra.mxu0 %v9327_v62  ;;  %3515 = vmatpush.msra.mxu1 %v9328_v58  ;;  %v9338_v62 = vld [vmem:[#allocation113_spill] sm:$0xff]  ;;  %v9339_v58 = vld [vmem:[#allocation106_spill] sm:$0xff] }
 0x6a2   : > { %3535 = vmatpush.msra.mxu2 %v9329_v41  ;;  %3555 = vmatpush.msra.mxu3 %v9330_v48  ;;  %v9340_v41 = vld [vmem:[#allocation107_spill] sm:$0xff]  ;;  %v9341_v48 = vld [vmem:[#allocation108_spill] sm:$0xff] }
 0x6a3   : > { %3496 = vmatpush.msra.mxu0 %v9331_v22  ;;  %3516 = vmatpush.msra.mxu1 %v9332_v55  ;;  %v9342_v22 = vld [vmem:[#allocation109_spill] sm:$0xff]  ;;  %v9343_v55 = vld [vmem:[#allocation102_spill] sm:$0xff] }
 0x6a4   : > { %3536 = vmatpush.msra.mxu2 %v9333_v60  ;;  %3556 = vmatpush.msra.mxu3 %v9334_v33  ;;  %v9344_v60 = vld [vmem:[#allocation103_spill] sm:$0xff]  ;;  %v9345_v33 = vld [vmem:[#allocation104_spill] sm:$0xff] }
 0x6a5   : > { %3497 = vmatpush.msra.mxu0 %v9335_v1  ;;  %3517 = vmatpush.msra.mxu1 %v9336_v40  ;;  %v9346_v1 = vld [vmem:[#allocation105_spill] sm:$0xff]  ;;  %v9347_v40 = vld [vmem:[#allocation98_spill] sm:$0xff] }
 0x6a6   : > { %3537 = vmatpush.msra.mxu2 %v9337_v52  ;;  %3557 = vmatpush.msra.mxu3 %v9338_v62  ;;  %v9348_v52 = vld [vmem:[#allocation99_spill] sm:$0xff]  ;;  %v9349_v62 = vld [vmem:[#allocation100_spill] sm:$0xff] }
 0x6a7   : > { %3498 = vmatpush.msra.mxu0 %v9339_v58  ;;  %3518 = vmatpush.msra.mxu1 %v9340_v41  ;;  %v9350_v58 = vld [vmem:[#allocation101_spill] sm:$0xff]  ;;  %v9351_v41 = vld [vmem:[#allocation94_spill] sm:$0xff] }
 0x6a8   : > { %3538 = vmatpush.msra.mxu2 %v9341_v48  ;;  %3558 = vmatpush.msra.mxu3 %v9342_v22  ;;  %v9352_v48 = vld [vmem:[#allocation95_spill] sm:$0xff]  ;;  %v9353_v22 = vld [vmem:[#allocation96_spill] sm:$0xff] }
 0x6a9   : > { %3499 = vmatpush.msra.mxu0 %v9343_v55  ;;  %3519 = vmatpush.msra.mxu1 %v9344_v60  ;;  %v9354_v55 = vld [vmem:[#allocation97_spill] sm:$0xff]  ;;  %v9355_v60 = vld [vmem:[#allocation90_spill] sm:$0xff] }
 0x6aa   : > { %3539 = vmatpush.msra.mxu2 %v9345_v33  ;;  %3559 = vmatpush.msra.mxu3 %v9346_v1  ;;  %v9356_v33 = vld [vmem:[#allocation91_spill] sm:$0xff]  ;;  %v9357_v1 = vld [vmem:[#allocation92_spill] sm:$0xff] }
 0x6ab   : > { %3500 = vmatpush.msra.mxu0 %v9347_v40  ;;  %3520 = vmatpush.msra.mxu1 %v9348_v52  ;;  %v9358_v40 = vld [vmem:[#allocation93_spill] sm:$0xff]  ;;  %v9359_v52 = vld [vmem:[#allocation86_spill] sm:$0xff] }
 0x6ac   : > { %3540 = vmatpush.msra.mxu2 %v9349_v62  ;;  %3560 = vmatpush.msra.mxu3 %v9350_v58  ;;  %v9360_v62 = vld [vmem:[#allocation87_spill] sm:$0xff]  ;;  %v9361_v58 = vld [vmem:[#allocation88_spill] sm:$0xff] }
 0x6ad   : > { %3501 = vmatpush.msra.mxu0 %v9351_v41  ;;  %3521 = vmatpush.msra.mxu1 %v9352_v48  ;;  %v9362_v41 = vld [vmem:[#allocation89_spill] sm:$0xff]  ;;  %v9363_v48 = vld [vmem:[#allocation82_spill] sm:$0xff] }
 0x6ae   : > { %3541 = vmatpush.msra.mxu2 %v9353_v22  ;;  %3561 = vmatpush.msra.mxu3 %v9354_v55  ;;  %v9364_v22 = vld [vmem:[#allocation83_spill] sm:$0xff]  ;;  %v9365_v55 = vld [vmem:[#allocation84_spill] sm:$0xff] }
 0x6af   : > { %3502 = vmatpush.msra.mxu0 %v9355_v60  ;;  %3522 = vmatpush.msra.mxu1 %v9356_v33  ;;  %v9366_v60 = vld [vmem:[#allocation85_spill] sm:$0xff] }
 0x6b0   : > { %3542 = vmatpush.msra.mxu2 %v9357_v1  ;;  %3562 = vmatpush.msra.mxu3 %v9358_v40 }
 0x6b1   : > { %3503 = vmatpush.msra.mxu0 %v9359_v52  ;;  %3523 = vmatpush.msra.mxu1 %v9360_v62  ;;  %v9367_v62 = vld [vmem:[#allocation210_spill] sm:$0xff] }
 0x6b2   : > { %3543 = vmatpush.msra.mxu2 %v9361_v58  ;;  %3563 = vmatpush.msra.mxu3 %v9362_v41  ;;  %v9368_v58 = vld [vmem:[#allocation216_spill] sm:$0xff] }
 0x6b3   : > { %3504 = vmatpush.msra.mxu0 %v9363_v48  ;;  %3524 = vmatpush.msra.mxu1 %v9364_v22 }
 0x6b4   : > { %3544 = vmatpush.msra.mxu2 %v9365_v55  ;;  %3564 = vmatpush.msra.mxu3 %v9366_v60 }
 0x6cb   : > { %v3037_v33 = vpop.f32.mrf.mxu0  ;;  %v3057_v1 = vpop.f32.mrf.mxu1 }
 0x6d2   : > { %v3097_v18 = vpop.f32.mrf.mxu3  ;;  %v3077_v41 = vpop.f32.mrf.mxu2 }
 0x6d6   : > { %v3117_v40 = vpop.f32.mrf.mxu0  ;;  %v3137_v27 = vpop.f32.mrf.mxu1 }
 0x6d7   : > { %v3118_v52 = vadd.f32 %v3117_v40, %v3037_v33  ;;  %v3138_v63 = vadd.f32 %v3137_v27, %v3057_v1  ;;  %v9372_v40 = vld [vmem:[#allocation218_spill] sm:$0xff] }
 0x6d9   : > { %v3180_v13 = vadd.f32 %v3118_v52, %v9367_v62  ;;  %v3181_v8 = vadd.f32 %v3138_v63, %v9368_v58 }
 0x6db   : > { %v4214_v28 = vmul.f32 -1.442695, %v3180_v13  ;;  %v4215_v48 = vmul.f32 -1.442695, %v3181_v8  ;;  %v9370_v13 = vld [vmem:[#allocation78_spill] sm:$0xff]  ;;  %v9371_v8 = vld [vmem:[#allocation79_spill] sm:$0xff] }
 0x6dd   : > { %4516 = vpow2.f32 %v4214_v28  ;;  %v3177_v22 = vpop.f32.mrf.mxu3  ;;  %v3157_v42 = vpop.f32.mrf.mxu2 }
 0x6de   : > { %4518 = vpow2.f32 %v4215_v48  ;;  %v3178_v55 = vadd.f32 %v3177_v22, %v3097_v18  ;;  %v3158_v33 = vadd.f32 %v3157_v42, %v3077_v41  ;;  %v9373_v22 = vld [vmem:[#allocation80_spill] sm:$0xff] }
 0x6e0   : > { %v3183_v60 = vadd.f32 %v3178_v55, %v9369_v53  ;;  %v3182_v52 = vadd.f32 %v3158_v33, %v9372_v40 }
 0x6e2   : > { %v4216_v54 = vmul.f32 -1.442695, %v3183_v60 }
 0x6e3   : > { %v4517_v44 = vpop.eup %4516 }
 0x6e4   : > { %v4519_v50 = vpop.eup %4518  ;;  %v3187_v6 = vadd.f32 1.0, %v4517_v44  ;;  %4520 = vpow2.f32 %v4216_v54 }
 0x6e5   : > { %v3206_v27 = vadd.f32 1.0, %v4519_v50  ;;  %v9374_v50 = vld [vmem:[#allocation16_spill] sm:$0xff] }
 0x6e6   : > { %4522 = vrcp.f32 %v3187_v6  ;;  %v3199_v58 = vand.u32 2147483648, %v3187_v6  ;;  %vm3193_vm3 = vweird.f32 %v3187_v6 }
 0x6e7   : > { %4524 = vrcp.f32 %v3206_v27  ;;  %v7220_v63 = vpop.permute.xlu1 %3251  ;;  %v3218_v33 = vand.u32 2147483648, %v3206_v27  ;;  %vm3212_vm2 = vweird.f32 %v3206_v27 }
 0x6e8   : > { %v3254_v28 = vmul.f32 %v7220_v63, %v9370_v13  ;;  %v3255_v18 = vmul.f32 %v7220_v63, %v9371_v8  ;;  %v3197_v13 = vand.u32 2147483647, %v3187_v6 }
 0x6ea   : > { %v4521_v1 = vpop.eup %4520  ;;  %v3258_v54 = vadd.f32 %v3254_v28, %v9373_v22  ;;  %v3259_v55 = vadd.f32 %v3255_v18, %v9374_v50  ;;  %v3216_v28 = vand.u32 2147483647, %v3206_v27  ;;  %v9375_v22 = vld [vmem:[#allocation81_spill] sm:$0xff]  ;;  %vm3198_vm4 = vcmp.eq.f32.partialorder %v3197_v13, 8.507059e+37 }
 0x6eb   : > { %v7227_v48 = vadd.f32 1.0, %v4521_v1  ;;  %v3257_v18 = vmul.f32 %v7220_v63, %v9375_v22 }
 0x6ec   : > { %v4523_v44 = vpop.eup %4522  ;;  %vm3217_vm7 = vcmp.eq.f32.partialorder %v3216_v28, 8.507059e+37  ;;  %v9378_v28 = vld [vmem:[#allocation214_spill] sm:$0xff] }
 0x6ed   : > { %v4525_v60 = vpop.eup %4524  ;;  %v3189_v42 = vmul.f32 %v4523_v44, %v3187_v6  ;;  %4526 = vrcp.f32 %v7227_v48  ;;  %vm3194_vm0 = vweird.f32 %v4523_v44  ;;  %vm3232_vm9 = vweird.f32 %v7227_v48 }
 0x6ee   : > { %v3208_v41 = vmul.f32 %v4525_v60, %v3206_v27  ;;  %4528 = vtanh.f32 %v3182_v52  ;;  %vm3213_vm1 = vweird.f32 %v4525_v60  ;;  %vm3195_vm5 = vmor %vm3193_vm3, %vm3194_vm0  ;;  %v3200_v52 = vor.u32 1.1754944e-38, %v3199_v58  ;;  %v9377_v58 = vld [vmem:[#allocation73_spill] sm:$0xff] }
 0x6ef   : > { %v3190_v53 = vsub.f32 1.0, %v3189_v42  ;;  %v3279_v8 = vpop.f32.mrf.mxu0  ;;  %v3299_v62 = vpop.f32.mrf.mxu1  ;;  %vm3214_vm6 = vmor %vm3212_vm2, %vm3213_vm1 }
 0x6f0   : > { %v3209_v17 = vsub.f32 1.0, %v3208_v41  ;;  %v3342_v1 = vadd.f32 %v3279_v8, %v3258_v54  ;;  %v3343_v40 = vadd.f32 %v3299_v62, %v3259_v55  ;;  %v3219_v8 = vor.u32 1.1754944e-38, %v3218_v33 }
 0x6f1   : > { %v3191_v56 = vmul.f32 %v4523_v44, %v3190_v53 }
 0x6f2   : > { %v3210_v50 = vmul.f32 %v4525_v60, %v3209_v17  ;;  %v4217_v46 = vmul.f32 -1.442695, %v3342_v1  ;;  %v4218_v0 = vmul.f32 -1.442695, %v3343_v40  ;;  %v9376_v17 = vld [vmem:[#allocation213_spill] sm:$0xff] }
 0x6f3   : > { %v4527_v42 = vpop.eup %4526  ;;  %v3192_v37 = vadd.f32 %v4523_v44, %v3191_v56  ;;  %v3261_v55 = vadd.f32 %v3257_v18, %v9376_v17  ;;  %v3236_v18 = vand.u32 2147483647, %v7227_v48 }
 0x6f4   : > { %v3211_v41 = vadd.f32 %v4525_v60, %v3210_v50  ;;  %v3228_v62 = vmul.f32 %v4527_v42, %v7227_v48  ;;  %4530 = vpow2.f32 %v4217_v46  ;;  %v4529_v53 = vpop.eup %4528  ;;  %vm3233_vm8 = vweird.f32 %v4527_v42 }
 0x6f5   : > { %v3196_v54 = vsel %vm3195_vm5, %v4523_v44, %v3192_v37  ;;  %4532 = vpow2.f32 %v4218_v0  ;;  %v3238_v44 = vand.u32 2147483648, %v7227_v48  ;;  %vm3234_vm10 = vmor %vm3232_vm9, %vm3233_vm8  ;;  %vm3237_vm11 = vcmp.eq.f32.partialorder %v3236_v18, 8.507059e+37 }
 0x6f6   : > { %v3201_v1 = vsel %vm3198_vm4, %v3200_v52, %v3196_v54  ;;  %v3215_v40 = vsel %vm3214_vm6, %v4525_v60, %v3211_v41  ;;  %v3229_v27 = vsub.f32 1.0, %v3228_v62  ;;  %v3339_v56 = vpop.f32.mrf.mxu3  ;;  %v9379_v62 = vld [vmem:[#allocation215_spill] sm:$0xff] }
 0x6f7   : > { %v3220_v6 = vsel %vm3217_vm7, %v3219_v8, %v3215_v40  ;;  %v3243_v13 = vmul.f32 %v4529_v53, %v3201_v1  ;;  %v3345_v22 = vadd.f32 %v3339_v56, %v3261_v55  ;;  %v3239_v52 = vor.u32 1.1754944e-38, %v3238_v44  ;;  %v9380_v1 = vld [vmem:[#allocation212_spill] sm:$0xff] }
 0x6f8   : > { %v3242_v50 = vmul.f32 %v3220_v6, %v9377_v58  ;;  %v3230_v47 = vmul.f32 %v4527_v42, %v3229_v27 }
 0x6f9   : > { %v4219_v4 = vmul.f32 -1.442695, %v3345_v22  ;;  %v3256_v22 = vmul.f32 %v7220_v63, %v9378_v28  ;;  %v3247_v63 = vperm.slane %v9380_v1, 5 }
 0x6fa   : > { %v4531_v46 = vpop.eup %4530  ;;  %v7237_v11 = vadd.f32 %v3243_v13, %v3242_v50  ;;  %v3231_v0 = vadd.f32 %v4527_v42, %v3230_v47  ;;  %v3319_v47 = vpop.f32.mrf.mxu2 }
 0x6fb   : > { %v4533_v33 = vpop.eup %4532  ;;  %v7239_v37 = vadd.f32 1.0, %v4531_v46  ;;  %4534 = vpow2.f32 %v4219_v4  ;;  %v3260_v53 = vadd.f32 %v3256_v22, %v9379_v62 }
 0x6fc   : > { %4536 = vtanh.f32 %v7237_v11  ;;  %v7243_v60 = vadd.f32 1.0, %v4533_v33  ;;  %v3235_v4 = vsel %vm3234_vm10, %v4527_v42, %v3231_v0 }
 0x6fd   : > { %4538 = vrcp.f32 %v7239_v37  ;;  %v3240_v55 = vsel %vm3237_vm11, %v3239_v52, %v3235_v4  ;;  %v3344_v27 = vadd.f32 %v3319_v47, %v3260_v53  ;;  %v3359_v46 = vand.u32 2147483647, %v7239_v37  ;;  %v9393_v52 = vld [vmem:[#allocation40_spill] sm:$0xff]  ;;  %v9395_v53 = vld [vmem:[#allocation34_spill] sm:$0xff] }
 0x6fe   : > { %4540 = vrcp.f32 %v7243_v60  ;;  %v3361_v33 = vand.u32 2147483648, %v7239_v37  ;;  %v3380_v0 = vand.u32 2147483648, %v7243_v60  ;;  %v3378_v4 = vand.u32 2147483647, %v7243_v60 }
 0x6ff   : > { %vm3355_vm14 = vweird.f32 %v7239_v37  ;;  %vm3374_vm15 = vweird.f32 %v7243_v60  ;;  %vm3360_vm2 = vcmp.eq.f32.partialorder %v3359_v46, 8.507059e+37  ;;  %v9409_v46 = vld [vmem:[#allocation24_spill] sm:$0xff] }
 0x700   : > { %vm3379_vm3 = vcmp.eq.f32.partialorder %v3378_v4, 8.507059e+37  ;;  %v4748_v4 = vmov 7  }
 0x701   : > { %v4535_v41 = vpop.eup %4534  ;;  %4338 = vset.pattern.permute.xlu2 %v4748_v4  ;;  %4339 = vset.pattern.permute.xlu0 %v4748_v4 }
 0x702   : > { %v4537_v8 = vpop.eup %4536  ;;  %v7252_v54 = vadd.f32 1.0, %v4535_v41  ;;  %v9394_v41 = vld [vmem:[#allocation33_spill] sm:$0xff] }
 0x703   : > { %v4539_v40 = vpop.eup %4538  ;;  %v3246_v56 = vmul.f32 %v4537_v8, %v3240_v55  ;;  %v9396_v8 = vld [vmem:[#allocation35_spill] sm:$0xff]  ;;  %v9398_v55 = vld [vmem:[#allocation29_spill] sm:$0xff] }
 0x704   : > { %v4541_v48 = vpop.eup %4540  ;;  %v3351_v6 = vmul.f32 %v4539_v40, %v7239_v37  ;;  %4542 = vrcp.f32 %v7252_v54  ;;  %vm3356_vm12 = vweird.f32 %v4539_v40  ;;  %vm3394_vm5 = vweird.f32 %v7252_v54 }
 0x705   : > { %v3370_v42 = vmul.f32 %v4541_v48, %v7243_v60  ;;  %3425 = vmatmul.f32.vlgmr.msrb.gmra.mxu0 %v3246_v56  ;;  %3445 = vmatmul.f32.vlgmr.msrb.gmra.mxu1 %v3246_v56  ;;  %v3248_v58 = vmul.f32 %v3247_v63, %v3246_v56  ;;  %4544 = vtanh.f32 %v3344_v27  ;;  %vm3375_vm13 = vweird.f32 %v4541_v48  ;;  %vm3357_vm0 = vmor %vm3355_vm14, %vm3356_vm12  ;;  %v9399_v63 = vld [vmem:[#allocation30_spill] sm:$0xff]  ;;  %v9401_v27 = vld [vmem:[#allocation32_spill] sm:$0xff] }
 0x706   : > { %v3352_v13 = vsub.f32 1.0, %v3351_v6  ;;  %3465 = vmatmul.f32.vlgmr.msrb.gmra.mxu2 %v3246_v56  ;;  %3485 = vmatmul.f32.vlgmr.msrb.gmra.mxu3 %v3246_v56  ;;  %vm3376_vm1 = vmor %vm3374_vm15, %vm3375_vm13  ;;  %v9402_v56 = vld [vmem:[#allocation25_spill] sm:$0xff]  ;;  %v9404_v6 = vld [vmem:[#allocation27_spill] sm:$0xff] }
 0x707   : > { %v3371_v50 = vsub.f32 1.0, %v3370_v42  ;;  %3651 = vmatpush.msrb.mxu0 %v8503_v3  ;;  %3671 = vmatpush.msrb.mxu1 %v8188_v25  ;;  %v7264_v22 = vadd.f32 %v3248_v58, %v7019_v16  ;;  %v9405_v42 = vld [vmem:[#allocation28_spill] sm:$0xff]  ;;  %v9407_v58 = vld [vmem:[#allocation22_spill] sm:$0xff] }
 0x708   : > { %v3353_v44 = vmul.f32 %v4539_v40, %v3352_v13  ;;  %3691 = vmatpush.msrb.mxu2 %v8189_v7  ;;  %3711 = vmatpush.msrb.mxu3 %v8190_v32  ;;  %v3362_v7 = vor.u32 1.1754944e-38, %v3361_v33  ;;  %v9406_v13 = vld [vmem:[#allocation21_spill] sm:$0xff] }
 0x709   : > { %v3372_v18 = vmul.f32 %v4541_v48, %v3371_v50  ;;  %3652 = vmatpush.msrb.mxu0 %v8504_v14  ;;  %3672 = vmatpush.msrb.mxu1 %v8505_v35  ;;  %v3381_v35 = vor.u32 1.1754944e-38, %v3380_v0  ;;  %v9408_v50 = vld [vmem:[#allocation23_spill] sm:$0xff]  ;;  %v9410_v33 = vld [vmem:[#allocation17_spill] sm:$0xff]  ;;  %v9411_v0 = vld [vmem:[#allocation18_spill] sm:$0xff] }
 0x70a   : > { %v7271_v25 = vpop.eup %4542  ;;  %v3354_v3 = vadd.f32 %v4539_v40, %v3353_v44  ;;  %3692 = vmatpush.msrb.mxu2 %v8506_v38  ;;  %3712 = vmatpush.msrb.mxu3 %v8507_v26  ;;  %v9412_v44 = vld [vmem:[#allocation19_spill] sm:$0xff] }
 0x70b   : > { %v3373_v32 = vadd.f32 %v4541_v48, %v3372_v18  ;;  %v3390_v14 = vmul.f32 %v7271_v25, %v7252_v54  ;;  %3653 = vmatpush.msrb.mxu0 %v8508_v15  ;;  %3673 = vmatpush.msrb.mxu1 %v8509_v24  ;;  %v4545_v38 = vpop.eup %4544  ;;  %vm3395_vm4 = vweird.f32 %v7271_v25  ;;  %v9413_v18 = vld [vmem:[#allocation20_spill] sm:$0xff] }
 0x70c   : > { %v3358_v16 = vsel %vm3357_vm0, %v4539_v40, %v3354_v3  ;;  %3693 = vmatpush.msrb.mxu2 %v8510_v23  ;;  %3713 = vmatpush.msrb.mxu3 %v8511_v10  ;;  %vm3396_vm6 = vmor %vm3394_vm5, %vm3395_vm4  ;;  %v9400_v40 = vld [vmem:[#allocation31_spill] sm:$0xff] }
 0x70d   : > { %v3363_v26 = vsel %vm3360_vm2, %v3362_v7, %v3358_v16  ;;  %v3377_v37 = vsel %vm3376_vm1, %v4541_v48, %v3373_v32  ;;  %v3391_v60 = vsub.f32 1.0, %v3390_v14  ;;  %3654 = vmatpush.msrb.mxu0 %v8512_v19  ;;  %3674 = vmatpush.msrb.mxu1 %v8513_v20  ;;  %v3400_v20 = vand.u32 2147483648, %v7252_v54  ;;  %v9403_v48 = vld [vmem:[#allocation26_spill] sm:$0xff] }
 0x70e   : > { %v3382_v15 = vsel %vm3379_vm3, %v3381_v35, %v3377_v37  ;;  %v3405_v24 = vmul.f32 %v4545_v38, %v3363_v26  ;;  %3694 = vmatpush.msrb.mxu2 %v8514_v9  ;;  %3714 = vmatpush.msrb.mxu3 %v8515_v21  ;;  %v3398_v9 = vand.u32 2147483647, %v7252_v54  ;;  %v9397_v54 = vld [vmem:[#allocation36_spill] sm:$0xff]  ;;  %v9415_v37 = vld [vmem:[#allocation210_spill] sm:$0xff] }
 0x70f   : > { %v3404_v47 = vmul.f32 %v3382_v15, %v7012_v5  ;;  %v3392_v23 = vmul.f32 %v7271_v25, %v3391_v60  ;;  %3655 = vmatpush.msrb.mxu0 %v8516_v30  ;;  %3675 = vmatpush.msrb.mxu1 %v8517_v31  ;;  %v9381_v30 = vld [vmem:[#allocation52_spill] sm:$0xff]  ;;  %v3401_v31 = vor.u32 1.1754944e-38, %v3400_v20  ;;  %v9392_v5 = vld [vmem:[#allocation39_spill] sm:$0xff]  ;;  %v9417_v20 = vld [vmem:[#allocation78_spill] sm:$0xff] }
 0x710   : > { %3695 = vmatpush.msrb.mxu2 %v8518_v43  ;;  %3715 = vmatpush.msrb.mxu3 %v8519_v39  ;;  %v9382_v43 = vld [vmem:[#allocation45_spill] sm:$0xff]  ;;  %v9383_v39 = vld [vmem:[#allocation46_spill] sm:$0xff]  ;;  %vm3399_vm7 = vcmp.eq.f32.partialorder %v3398_v9, 8.507059e+37  ;;  %v9416_v15 = vld [vmem:[#allocation216_spill] sm:$0xff] }
 0x711   : > { %v7295_v10 = vadd.f32 %v3405_v24, %v3404_v47  ;;  %3656 = vmatpush.msrb.mxu0 %v8520_v34  ;;  %3676 = vmatpush.msrb.mxu1 %v8521_v12  ;;  %v3393_v19 = vadd.f32 %v7271_v25, %v3392_v23  ;;  %v9384_v34 = vld [vmem:[#allocation47_spill] sm:$0xff]  ;;  %v9385_v12 = vld [vmem:[#allocation48_spill] sm:$0xff] }
 0x712   : > { %3696 = vmatpush.msrb.mxu2 %v8522_v2  ;;  %3716 = vmatpush.msrb.mxu3 %v8680_v49 }
 0x713   : > { %4546 = vtanh.f32 %v7295_v10  ;;  %3657 = vmatpush.msrb.mxu0 %v8681_v61  ;;  %3677 = vmatpush.msrb.mxu1 %v8682_v29  ;;  %v3397_v21 = vsel %vm3396_vm6, %v7271_v25, %v3393_v19  ;;  %v9386_v61 = vld [vmem:[#allocation41_spill] sm:$0xff]  ;;  %v9387_v29 = vld [vmem:[#allocation42_spill] sm:$0xff]  ;;  %v9414_v25 = vld [vmem:[#allocation211_spill] sm:$0xff] }
 0x714   : > { %3697 = vmatpush.msrb.mxu2 %v8683_v51  ;;  %3717 = vmatpush.msrb.mxu3 %v8684_v57  ;;  %v3402_v49 = vsel %vm3399_vm7, %v3401_v31, %v3397_v21  ;;  %v9388_v57 = vld [vmem:[#allocation43_spill] sm:$0xff] }
 0x715   : > { %3658 = vmatpush.msrb.mxu0 %v8685_v45  ;;  %3678 = vmatpush.msrb.mxu1 %v8686_v36  ;;  %v9389_v45 = vld [vmem:[#allocation44_spill] sm:$0xff]  ;;  %v9390_v36 = vld [vmem:[#allocation37_spill] sm:$0xff]  ;;  %v9418_v21 = vld [vmem:[#allocation79_spill] sm:$0xff] }
 0x716   : > { %3698 = vmatpush.msrb.mxu2 %v8687_v59  ;;  %3718 = vmatpush.msrb.mxu3 %v9381_v30  ;;  %v9391_v59 = vld [vmem:[#allocation38_spill] sm:$0xff] }
 0x717   : > { %3659 = vmatpush.msrb.mxu0 %v9382_v43  ;;  %3679 = vmatpush.msrb.mxu1 %v9383_v39  ;;  %v9419_v39 = vld [vmem:[#allocation80_spill] sm:$0xff] }
 0x718   : > { %3699 = vmatpush.msrb.mxu2 %v9384_v34  ;;  %3719 = vmatpush.msrb.mxu3 %v9385_v12  ;;  %v9420_v12 = vld [vmem:[#allocation16_spill] sm:$0xff] }
 0x719   : > { %v4547_v2 = vpop.eup %4546  ;;  %3660 = vmatpush.msrb.mxu0 %v9386_v61  ;;  %3680 = vmatpush.msrb.mxu1 %v9387_v29 }
 0x71a   : > { %v3408_v51 = vmul.f32 %v4547_v2, %v3402_v49  ;;  %3700 = vmatpush.msrb.mxu2 %v9388_v57  ;;  %3720 = vmatpush.msrb.mxu3 %v9389_v45  ;;  %v9421_v49 = vld [vmem:[#allocation217_spill] sm:$0xff] }
 0x71b   : > { %3661 = vmatpush.msrb.mxu0 %v9390_v36  ;;  %3681 = vmatpush.msrb.mxu1 %v9391_v59 }
 0x71c   : > { %3701 = vmatpush.msrb.mxu2 %v9392_v5  ;;  %3721 = vmatpush.msrb.mxu3 %v9393_v52 }
 0x71d   : > { %3505 = vmatmul.f32.vlgmr.msra.gmra.mxu0 %v3408_v51  ;;  %3525 = vmatmul.f32.vlgmr.msra.gmra.mxu1 %v3408_v51 }
 0x71e   : > { %3545 = vmatmul.f32.vlgmr.msra.gmra.mxu2 %v3408_v51  ;;  %3565 = vmatmul.f32.vlgmr.msra.gmra.mxu3 %v3408_v51 }
 0x71f   : > { %3662 = vmatpush.msrb.mxu0 %v9394_v41  ;;  %3682 = vmatpush.msrb.mxu1 %v9395_v53  ;;  %v9422_v53 = vld [vmem:[#allocation81_spill] sm:$0xff] }
 0x720   : > { %3702 = vmatpush.msrb.mxu2 %v9396_v8  ;;  %3722 = vmatpush.msrb.mxu3 %v9397_v54 }
 0x721   : > { %3663 = vmatpush.msrb.mxu0 %v9398_v55  ;;  %3683 = vmatpush.msrb.mxu1 %v9399_v63 }
 0x722   : > { %3703 = vmatpush.msrb.mxu2 %v9400_v40  ;;  %3723 = vmatpush.msrb.mxu3 %v9401_v27 }
 0x723   : > { %3664 = vmatpush.msrb.mxu0 %v9402_v56  ;;  %3684 = vmatpush.msrb.mxu1 %v9403_v48 }
 0x724   : > { %3704 = vmatpush.msrb.mxu2 %v9404_v6  ;;  %3724 = vmatpush.msrb.mxu3 %v9405_v42  ;;  %v9423_v6 = vld [vmem:[#allocation218_spill] sm:$0xff] }
 0x725   : > { %3665 = vmatpush.msrb.mxu0 %v9406_v13  ;;  %3685 = vmatpush.msrb.mxu1 %v9407_v58 }
 0x726   : > { %3705 = vmatpush.msrb.mxu2 %v9408_v50  ;;  %3725 = vmatpush.msrb.mxu3 %v9409_v46 }
 0x727   : > { %3666 = vmatpush.msrb.mxu0 %v9410_v33  ;;  %3686 = vmatpush.msrb.mxu1 %v9411_v0 }
 0x728   : > { %3706 = vmatpush.msrb.mxu2 %v9412_v44  ;;  %3726 = vmatpush.msrb.mxu3 %v9413_v18 }
 0x729   : > { %3667 = vmatmul.f32.vlgmr.msrb.gmra.mxu0 %v3408_v51  ;;  %3687 = vmatmul.f32.vlgmr.msrb.gmra.mxu1 %v3408_v51 }
 0x72a   : > { %3707 = vmatmul.f32.vlgmr.msrb.gmra.mxu2 %v3408_v51  ;;  %3727 = vmatmul.f32.vlgmr.msrb.gmra.mxu3 %v3408_v51 }
 0x72b   : > { %3640 = vperm.xlu2 %4338, %v9414_v25  }
 0x782   : > { %v3426_v3 = vpop.f32.mrf.mxu0  ;;  %v3446_v7 = vpop.f32.mrf.mxu1 }
 0x785   : > { %v3641_v26 = vpop.permute.xlu2 %3640 }
 0x786   : > { %v3643_v9 = vmul.f32 %v3641_v26, %v9417_v20  ;;  %v3644_v30 = vmul.f32 %v3641_v26, %v9418_v21  ;;  %v3646_v8 = vmul.f32 %v3641_v26, %v9422_v53  ;;  %v3645_v4 = vmul.f32 %v3641_v26, %v9378_v28 }
 0x788   : > { %v3647_v34 = vadd.f32 %v3643_v9, %v9419_v39  ;;  %v3648_v2 = vadd.f32 %v3644_v30, %v9420_v12  ;;  %v3650_v27 = vadd.f32 %v3646_v8, %v9376_v17  ;;  %v3649_v28 = vadd.f32 %v3645_v4, %v9379_v62 }
 0x789   : > { %v3486_v32 = vpop.f32.mrf.mxu3  ;;  %v3466_v47 = vpop.f32.mrf.mxu2 }
 0x79a   : > { %v3506_v14 = vpop.f32.mrf.mxu0  ;;  %v3526_v35 = vpop.f32.mrf.mxu1 }
 0x79b   : > { %v3507_v16 = vadd.f32 %v3506_v14, %v3426_v3  ;;  %v3527_v38 = vadd.f32 %v3526_v35, %v3446_v7 }
 0x79d   : > { %v3569_v60 = vadd.f32 %v3507_v16, %v9415_v37  ;;  %v3570_v24 = vadd.f32 %v3527_v38, %v9416_v15 }
 0x79f   : > { %v4220_v23 = vmul.f32 -1.442695, %v3569_v60  ;;  %v4221_v19 = vmul.f32 -1.442695, %v3570_v24 }
 0x7a1   : > { %4548 = vpow2.f32 %v4220_v23  ;;  %v3566_v31 = vpop.f32.mrf.mxu3  ;;  %v3546_v36 = vpop.f32.mrf.mxu2 }
 0x7a2   : > { %4550 = vpow2.f32 %v4221_v19  ;;  %v3567_v43 = vadd.f32 %v3566_v31, %v3486_v32  ;;  %v3547_v40 = vadd.f32 %v3546_v36, %v3466_v47 }
 0x7a4   : > { %v3572_v61 = vadd.f32 %v3567_v43, %v9421_v49  ;;  %v3571_v42 = vadd.f32 %v3547_v40, %v9423_v6  ;;  %v3636_v6 = vperm.slane %v9380_v1, 6 }
 0x7a6   : > { %v4222_v29 = vmul.f32 -1.442695, %v3572_v61  ;;  %v3668_v51 = vpop.f32.mrf.mxu0  ;;  %v3688_v57 = vpop.f32.mrf.mxu1 }
 0x7a7   : > { %v4549_v45 = vpop.eup %4548  ;;  %v3731_v59 = vadd.f32 %v3668_v51, %v3647_v34  ;;  %v3732_v5 = vadd.f32 %v3688_v57, %v3648_v2 }
 0x7a8   : > { %v4551_v52 = vpop.eup %4550  ;;  %v3576_v41 = vadd.f32 1.0, %v4549_v45  ;;  %4552 = vpow2.f32 %v4222_v29 }
 0x7a9   : > { %v3595_v54 = vadd.f32 1.0, %v4551_v52  ;;  %v4223_v55 = vmul.f32 -1.442695, %v3731_v59  ;;  %v4224_v63 = vmul.f32 -1.442695, %v3732_v5 }
 0x7aa   : > { %4554 = vrcp.f32 %v3576_v41  ;;  %v3586_v3 = vand.u32 2147483647, %v3576_v41  ;;  %v3588_v35 = vand.u32 2147483648, %v3576_v41  ;;  %vm3582_vm11 = vweird.f32 %v3576_v41 }
 0x7ab   : > { %4556 = vrcp.f32 %v3595_v54  ;;  %v3607_v14 = vand.u32 2147483648, %v3595_v54  ;;  %v3605_v37 = vand.u32 2147483647, %v3595_v54  ;;  %vm3601_vm10 = vweird.f32 %v3595_v54 }
 0x7ac   : > { %4558 = vpow2.f32 %v4223_v55  ;;  %v3589_v23 = vor.u32 1.1754944e-38, %v3588_v35  ;;  %vm3587_vm14 = vcmp.eq.f32.partialorder %v3586_v3, 8.507059e+37 }
 0x7ad   : > { %4560 = vpow2.f32 %v4224_v63  ;;  %v3728_v56 = vpop.f32.mrf.mxu3  ;;  %v3708_v60 = vpop.f32.mrf.mxu2  ;;  %v3608_v30 = vor.u32 1.1754944e-38, %v3607_v14  ;;  %vm3606_vm15 = vcmp.eq.f32.partialorder %v3605_v37, 8.507059e+37 }
 0x7ae   : > { %v4553_v48 = vpop.eup %4552  ;;  %v3734_v13 = vadd.f32 %v3728_v56, %v3650_v27  ;;  %v3733_v9 = vadd.f32 %v3708_v60, %v3649_v28 }
 0x7af   : > { %v7359_v58 = vadd.f32 1.0, %v4553_v48 }
 0x7b0   : > { %v4555_v50 = vpop.eup %4554  ;;  %v4225_v46 = vmul.f32 -1.442695, %v3734_v13 }
 0x7b1   : > { %v4557_v33 = vpop.eup %4556  ;;  %v3578_v0 = vmul.f32 %v4555_v50, %v3576_v41  ;;  %4562 = vrcp.f32 %v7359_v58  ;;  %vm3583_vm8 = vweird.f32 %v4555_v50  ;;  %vm3621_vm0 = vweird.f32 %v7359_v58 }
 0x7b2   : > { %v4559_v44 = vpop.eup %4558  ;;  %v3597_v18 = vmul.f32 %v4557_v33, %v3595_v54  ;;  %4564 = vtanh.f32 %v3571_v42  ;;  %vm3602_vm9 = vweird.f32 %v4557_v33  ;;  %vm3584_vm12 = vmor %vm3582_vm11, %vm3583_vm8  ;;  %v3627_v59 = vand.u32 2147483648, %v7359_v58 }
 0x7b3   : > { %v4561_v17 = vpop.eup %4560  ;;  %v3579_v25 = vsub.f32 1.0, %v3578_v0  ;;  %v7363_v7 = vadd.f32 1.0, %v4559_v44  ;;  %4566 = vpow2.f32 %v4225_v46  ;;  %vm3603_vm13 = vmor %vm3601_vm10, %vm3602_vm9  ;;  %v3625_v55 = vand.u32 2147483647, %v7359_v58 }
 0x7b4   : > { %v3598_v32 = vsub.f32 1.0, %v3597_v18  ;;  %v7365_v16 = vadd.f32 1.0, %v4561_v17  ;;  %v3628_v48 = vor.u32 1.1754944e-38, %v3627_v59 }
 0x7b5   : > { %v3580_v38 = vmul.f32 %v4555_v50, %v3579_v25  ;;  %4568 = vrcp.f32 %v7363_v7  ;;  %v3748_v52 = vand.u32 2147483647, %v7363_v7  ;;  %v3750_v53 = vand.u32 2147483648, %v7363_v7 }
 0x7b6   : > { %v3599_v15 = vmul.f32 %v4557_v33, %v3598_v32  ;;  %4570 = vrcp.f32 %v7365_v16  ;;  %v3769_v8 = vand.u32 2147483648, %v7365_v16  ;;  %v3767_v40 = vand.u32 2147483647, %v7365_v16 }
 0x7b7   : > { %v7370_v26 = vpop.eup %4562  ;;  %v3581_v24 = vadd.f32 %v4555_v50, %v3580_v38  ;;  %4572 = vtanh.f32 %v3733_v9  ;;  %vm3744_vm5 = vweird.f32 %v7363_v7  ;;  %vm3763_vm6 = vweird.f32 %v7365_v16 }
 0x7b8   : > { %v4565_v47 = vpop.eup %4564  ;;  %v3600_v19 = vadd.f32 %v4557_v33, %v3599_v15  ;;  %v3617_v20 = vmul.f32 %v7370_v26, %v7359_v58  ;;  %vm3622_vm1 = vweird.f32 %v7370_v26  ;;  %v3751_v46 = vor.u32 1.1754944e-38, %v3750_v53 }
 0x7b9   : > { %v4567_v21 = vpop.eup %4566  ;;  %v3585_v31 = vsel %vm3584_vm12, %v4555_v50, %v3581_v24  ;;  %vm7396_vm4 = vmor %vm3621_vm0, %vm3622_vm1  ;;  %vm3749_vm9 = vcmp.eq.f32.partialorder %v3748_v52, 8.507059e+37  ;;  %vm3626_vm10 = vcmp.eq.f32.partialorder %v3625_v55, 8.507059e+37  ;;  %vm3768_vm11 = vcmp.eq.f32.partialorder %v3767_v40, 8.507059e+37 }
 0x7ba   : > { %v3590_v62 = vsel %vm3587_vm14, %v3589_v23, %v3585_v31  ;;  %v3604_v43 = vsel %vm3603_vm13, %v4557_v33, %v3600_v19  ;;  %v3618_v39 = vsub.f32 1.0, %v3617_v20  ;;  %v7374_v34 = vadd.f32 1.0, %v4567_v21 }
 0x7bb   : > { %v4569_v12 = vpop.eup %4568  ;;  %v3609_v2 = vsel %vm3606_vm15, %v3608_v30, %v3604_v43  ;;  %v3632_v49 = vmul.f32 %v4565_v47, %v3590_v62  ;;  %v3770_v33 = vor.u32 1.1754944e-38, %v3769_v8 }
 0x7bc   : > { %v4571_v61 = vpop.eup %4570  ;;  %v3631_v29 = vmul.f32 %v3609_v2, %v7237_v11  ;;  %v3619_v51 = vmul.f32 %v7370_v26, %v3618_v39  ;;  %v3740_v57 = vmul.f32 %v4569_v12, %v7363_v7  ;;  %4574 = vrcp.f32 %v7374_v34 }
 0x7bd   : > { %v3759_v45 = vmul.f32 %v4571_v61, %v7365_v16  ;;  %vm3745_vm2 = vweird.f32 %v4569_v12  ;;  %vm3764_vm3 = vweird.f32 %v4571_v61  ;;  %v4573_v27 = vpop.eup %4572  ;;  %v3789_v15 = vand.u32 2147483648, %v7374_v34 }
 0x7be   : > { %v7382_v36 = vadd.f32 %v3632_v49, %v3631_v29  ;;  %v3741_v5 = vsub.f32 1.0, %v3740_v57  ;;  %v3620_v11 = vadd.f32 %v7370_v26, %v3619_v51  ;;  %vm3746_vm7 = vmor %vm3744_vm5, %vm3745_vm2  ;;  %vm3783_vm13 = vweird.f32 %v7374_v34 }
 0x7bf   : > { %v3760_v41 = vsub.f32 1.0, %v3759_v45  ;;  %vm3765_vm8 = vmor %vm3763_vm6, %vm3764_vm3  ;;  %v3787_v28 = vand.u32 2147483647, %v7374_v34 }
 0x7c0   : > { %4576 = vtanh.f32 %v7382_v36  ;;  %3801 = vst [vmem:[#allocation5] sm:$0xff] %v7382_v36  ;;  %v3742_v54 = vmul.f32 %v4569_v12, %v3741_v5  ;;  %v3624_v50 = vsel %vm7396_vm4, %v7370_v26, %v3620_v11  ;;  %v3790_v26 = vor.u32 1.1754944e-38, %v3789_v15 }
 0x7c1   : > { %v3761_v63 = vmul.f32 %v4571_v61, %v3760_v41  ;;  %v3629_v17 = vsel %vm3626_vm10, %v3628_v48, %v3624_v50  ;;  %vm3788_vm15 = vcmp.eq.f32.partialorder %v3787_v28, 8.507059e+37 }
 0x7c2   : > { %v3743_v42 = vadd.f32 %v4569_v12, %v3742_v54  ;;  %v4575_v13 = vpop.eup %4574 }
 0x7c3   : > { %v3762_v58 = vadd.f32 %v4571_v61, %v3761_v63  ;;  %v3779_v44 = vmul.f32 %v4575_v13, %v7374_v34  ;;  %vm3784_vm12 = vweird.f32 %v4575_v13 }
 0x7c4   : > { %v3747_v0 = vsel %vm3746_vm7, %v4569_v12, %v3743_v42  ;;  %vm3785_vm14 = vmor %vm3783_vm13, %vm3784_vm12 }
 0x7c5   : > { %v3752_v1 = vsel %vm3749_vm9, %v3751_v46, %v3747_v0  ;;  %v3766_v18 = vsel %vm3765_vm8, %v4571_v61, %v3762_v58  ;;  %v3780_v7 = vsub.f32 1.0, %v3779_v44 }
 0x7c6   : > { %v4577_v4 = vpop.eup %4576  ;;  %v3771_v25 = vsel %vm3768_vm11, %v3770_v33, %v3766_v18  ;;  %v3794_v3 = vmul.f32 %v4573_v27, %v3752_v1 }
 0x7c7   : > { %v7407_v32 = vmul.f32 %v4577_v4, %v3629_v17  ;;  %v3793_v14 = vmul.f32 %v3771_v25, %v7295_v10  ;;  %v3781_v35 = vmul.f32 %v4575_v13, %v3780_v7 }
 0x7c9   : > { %v3637_v16 = vmul.f32 %v3636_v6, %v7407_v32  ;;  %3800 = vst [vmem:[#allocation4] sm:$0xff] %v7407_v32  ;;  %v3795_v38 = vadd.f32 %v3794_v3, %v3793_v14  ;;  %v3782_v37 = vadd.f32 %v4575_v13, %v3781_v35 }
 0x7cb   : > { %v7413_v60 = vadd.f32 %v3637_v16, %v7264_v22  ;;  %4578 = vtanh.f32 %v3795_v38  ;;  %3799 = vst [vmem:[#allocation3] sm:$0xff] %v3795_v38  ;;  %v3786_v10 = vsel %vm3785_vm14, %v4575_v13, %v3782_v37 }
 0x7cc   : > { %v3791_v47 = vsel %vm3788_vm15, %v3790_v26, %v3786_v10 }
 0x7cd   : > { %3802 = vst [vmem:[#allocation6] sm:$0xff] %v7413_v60 }
 0x7d0   : > { %3807 = sbr.rel (%p4226_p12) target bundleno = 2365 (0x93d), region = 80 }
 0x7d1   : > { %v4579_v24 = vpop.eup %4578 }
 0x7d2   : > { %v7419_v23 = vmul.f32 %v4579_v24, %v3791_v47 }
 0x7d4   : > { %3798 = vst [vmem:[#allocation2] sm:$0xff] %v7419_v23 }
 0x7d5   : > { %v9426_v22 = vld [vmem:[#allocation206_spill] sm:$0xff]  ;;  %v9427_v19 = vld [vmem:[#allocation207_spill] sm:$0xff]  ;;  %v9428_v20 = vld [vmem:[#allocation209_spill] sm:$0xff]  ;;  %vm4045_vm12 = vcmask 7168  }
 0x7d6   : > { %3808 = vmatpush.msra.mxu0 %v9426_v22  ;;  %3828 = vmatpush.msra.mxu1 %v9427_v19  ;;  %v9429_v9 = vld [vmem:[#allocation208_spill] sm:$0xff]  ;;  %v9430_v21 = vld [vmem:[#allocation202_spill] sm:$0xff]  ;;  %v9431_v30 = vld [vmem:[#allocation203_spill] sm:$0xff] }
 0x7d7   : > { %3868 = vmatpush.msra.mxu3 %v9428_v20  ;;  %3848 = vmatpush.msra.mxu2 %v9429_v9  ;;  %v9432_v31 = vld [vmem:[#allocation205_spill] sm:$0xff]  ;;  %v9433_v62 = vld [vmem:[#allocation204_spill] sm:$0xff]  ;;  %v9434_v43 = vld [vmem:[#allocation198_spill] sm:$0xff] }
 0x7d8   : > { %3809 = vmatpush.msra.mxu0 %v9430_v21  ;;  %3829 = vmatpush.msra.mxu1 %v9431_v30  ;;  %v9435_v39 = vld [vmem:[#allocation199_spill] sm:$0xff]  ;;  %v9436_v34 = vld [vmem:[#allocation201_spill] sm:$0xff]  ;;  %v9437_v12 = vld [vmem:[#allocation200_spill] sm:$0xff] }
 0x7d9   : > { %3869 = vmatpush.msra.mxu3 %v9432_v31  ;;  %3849 = vmatpush.msra.mxu2 %v9433_v62  ;;  %v9438_v2 = vld [vmem:[#allocation194_spill] sm:$0xff]  ;;  %v9439_v49 = vld [vmem:[#allocation195_spill] sm:$0xff]  ;;  %v9440_v61 = vld [vmem:[#allocation197_spill] sm:$0xff] }
 0x7da   : > { %3810 = vmatpush.msra.mxu0 %v9434_v43  ;;  %3830 = vmatpush.msra.mxu1 %v9435_v39  ;;  %v9441_v29 = vld [vmem:[#allocation196_spill] sm:$0xff]  ;;  %v9442_v51 = vld [vmem:[#allocation190_spill] sm:$0xff]  ;;  %v9443_v57 = vld [vmem:[#allocation191_spill] sm:$0xff] }
 0x7db   : > { %3870 = vmatpush.msra.mxu3 %v9436_v34  ;;  %3850 = vmatpush.msra.mxu2 %v9437_v12  ;;  %v9444_v45 = vld [vmem:[#allocation193_spill] sm:$0xff]  ;;  %v9445_v59 = vld [vmem:[#allocation192_spill] sm:$0xff]  ;;  %v9446_v5 = vld [vmem:[#allocation186_spill] sm:$0xff] }
 0x7dc   : > { %3811 = vmatpush.msra.mxu0 %v9438_v2  ;;  %3831 = vmatpush.msra.mxu1 %v9439_v49  ;;  %v9447_v52 = vld [vmem:[#allocation187_spill] sm:$0xff]  ;;  %v9448_v11 = vld [vmem:[#allocation189_spill] sm:$0xff]  ;;  %v9449_v41 = vld [vmem:[#allocation188_spill] sm:$0xff] }
 0x7dd   : > { %3871 = vmatpush.msra.mxu3 %v9440_v61  ;;  %3851 = vmatpush.msra.mxu2 %v9441_v29  ;;  %v9450_v53 = vld [vmem:[#allocation182_spill] sm:$0xff]  ;;  %v9451_v8 = vld [vmem:[#allocation183_spill] sm:$0xff]  ;;  %v9452_v54 = vld [vmem:[#allocation185_spill] sm:$0xff] }
 0x7de   : > { %3812 = vmatpush.msra.mxu0 %v9442_v51  ;;  %3832 = vmatpush.msra.mxu1 %v9443_v57  ;;  %v9453_v55 = vld [vmem:[#allocation184_spill] sm:$0xff]  ;;  %v9454_v63 = vld [vmem:[#allocation178_spill] sm:$0xff]  ;;  %v9455_v40 = vld [vmem:[#allocation179_spill] sm:$0xff] }
 0x7df   : > { %3872 = vmatpush.msra.mxu3 %v9444_v45  ;;  %3852 = vmatpush.msra.mxu2 %v9445_v59  ;;  %v9456_v27 = vld [vmem:[#allocation181_spill] sm:$0xff]  ;;  %v9457_v56 = vld [vmem:[#allocation180_spill] sm:$0xff]  ;;  %v9458_v48 = vld [vmem:[#allocation174_spill] sm:$0xff] }
 0x7e0   : > { %3813 = vmatpush.msra.mxu0 %v9446_v5  ;;  %3833 = vmatpush.msra.mxu1 %v9447_v52  ;;  %v9459_v6 = vld [vmem:[#allocation175_spill] sm:$0xff]  ;;  %v9460_v42 = vld [vmem:[#allocation177_spill] sm:$0xff]  ;;  %v9461_v13 = vld [vmem:[#allocation176_spill] sm:$0xff] }
 0x7e1   : > { %3873 = vmatpush.msra.mxu3 %v9448_v11  ;;  %3853 = vmatpush.msra.mxu2 %v9449_v41  ;;  %v9462_v50 = vld [vmem:[#allocation170_spill] sm:$0xff]  ;;  %v9463_v46 = vld [vmem:[#allocation171_spill] sm:$0xff]  ;;  %v9464_v58 = vld [vmem:[#allocation173_spill] sm:$0xff] }
 0x7e2   : > { %3814 = vmatpush.msra.mxu0 %v9450_v53  ;;  %3834 = vmatpush.msra.mxu1 %v9451_v8  ;;  %v9465_v33 = vld [vmem:[#allocation172_spill] sm:$0xff]  ;;  %v9466_v0 = vld [vmem:[#allocation166_spill] sm:$0xff]  ;;  %v9467_v44 = vld [vmem:[#allocation167_spill] sm:$0xff] }
 0x7e3   : > { %3874 = vmatpush.msra.mxu3 %v9452_v54  ;;  %3854 = vmatpush.msra.mxu2 %v9453_v55  ;;  %v9468_v1 = vld [vmem:[#allocation169_spill] sm:$0xff]  ;;  %v9469_v18 = vld [vmem:[#allocation168_spill] sm:$0xff]  ;;  %v9470_v4 = vld [vmem:[#allocation162_spill] sm:$0xff] }
 0x7e4   : > { %3815 = vmatpush.msra.mxu0 %v9454_v63  ;;  %3835 = vmatpush.msra.mxu1 %v9455_v40  ;;  %v9471_v17 = vld [vmem:[#allocation163_spill] sm:$0xff]  ;;  %v9472_v25 = vld [vmem:[#allocation165_spill] sm:$0xff]  ;;  %v9473_v3 = vld [vmem:[#allocation164_spill] sm:$0xff] }
 0x7e5   : > { %3875 = vmatpush.msra.mxu3 %v9456_v27  ;;  %3855 = vmatpush.msra.mxu2 %v9457_v56  ;;  %v9474_v7 = vld [vmem:[#allocation158_spill] sm:$0xff]  ;;  %v9475_v14 = vld [vmem:[#allocation159_spill] sm:$0xff]  ;;  %v9476_v35 = vld [vmem:[#allocation161_spill] sm:$0xff] }
 0x7e6   : > { %3816 = vmatpush.msra.mxu0 %v9458_v48  ;;  %3836 = vmatpush.msra.mxu1 %v9459_v6  ;;  %v9477_v16 = vld [vmem:[#allocation160_spill] sm:$0xff]  ;;  %v9478_v38 = vld [vmem:[#allocation154_spill] sm:$0xff]  ;;  %v9479_v37 = vld [vmem:[#allocation155_spill] sm:$0xff] }
 0x7e7   : > { %3876 = vmatpush.msra.mxu3 %v9460_v42  ;;  %3856 = vmatpush.msra.mxu2 %v9461_v13  ;;  %v9480_v15 = vld [vmem:[#allocation157_spill] sm:$0xff]  ;;  %v9481_v28 = vld [vmem:[#allocation156_spill] sm:$0xff]  ;;  %v9482_v10 = vld [vmem:[#allocation150_spill] sm:$0xff] }
 0x7e8   : > { %3817 = vmatpush.msra.mxu0 %v9462_v50  ;;  %3837 = vmatpush.msra.mxu1 %v9463_v46  ;;  %v9483_v26 = vld [vmem:[#allocation151_spill] sm:$0xff]  ;;  %v9484_v24 = vld [vmem:[#allocation153_spill] sm:$0xff]  ;;  %v9485_v47 = vld [vmem:[#allocation152_spill] sm:$0xff] }
 0x7e9   : > { %3877 = vmatpush.msra.mxu3 %v9464_v58  ;;  %3857 = vmatpush.msra.mxu2 %v9465_v33  ;;  %v9486_v22 = vld [vmem:[#allocation146_spill] sm:$0xff]  ;;  %v9487_v19 = vld [vmem:[#allocation147_spill] sm:$0xff]  ;;  %v9488_v20 = vld [vmem:[#allocation149_spill] sm:$0xff] }
 0x7ea   : > { %3818 = vmatpush.msra.mxu0 %v9466_v0  ;;  %3838 = vmatpush.msra.mxu1 %v9467_v44  ;;  %v9489_v9 = vld [vmem:[#allocation142_spill] sm:$0xff]  ;;  %v9490_v21 = vld [vmem:[#allocation143_spill] sm:$0xff]  ;;  %v9491_v30 = vld [vmem:[#allocation145_spill] sm:$0xff] }
 0x7eb   : > { %3878 = vmatpush.msra.mxu3 %v9468_v1  ;;  %3858 = vmatpush.msra.mxu2 %v9469_v18  ;;  %v9492_v31 = vld [vmem:[#allocation138_spill] sm:$0xff]  ;;  %v9493_v62 = vld [vmem:[#allocation148_spill] sm:$0xff]  ;;  %v9494_v43 = vld [vmem:[#allocation139_spill] sm:$0xff] }
 0x7ec   : > { %3819 = vmatpush.msra.mxu0 %v9470_v4  ;;  %3839 = vmatpush.msra.mxu1 %v9471_v17  ;;  %v9495_v39 = vld [vmem:[#allocation141_spill] sm:$0xff]  ;;  %v9496_v34 = vld [vmem:[#allocation134_spill] sm:$0xff]  ;;  %v9497_v12 = vld [vmem:[#allocation144_spill] sm:$0xff] }
 0x7ed   : > { %3879 = vmatpush.msra.mxu3 %v9472_v25  ;;  %3859 = vmatpush.msra.mxu2 %v9473_v3  ;;  %v9498_v2 = vld [vmem:[#allocation135_spill] sm:$0xff]  ;;  %v9499_v49 = vld [vmem:[#allocation137_spill] sm:$0xff]  ;;  %v9500_v61 = vld [vmem:[#allocation130_spill] sm:$0xff] }
 0x7ee   : > { %3820 = vmatpush.msra.mxu0 %v9474_v7  ;;  %3840 = vmatpush.msra.mxu1 %v9475_v14  ;;  %v9501_v29 = vld [vmem:[#allocation140_spill] sm:$0xff]  ;;  %v9502_v51 = vld [vmem:[#allocation131_spill] sm:$0xff]  ;;  %v9503_v57 = vld [vmem:[#allocation133_spill] sm:$0xff] }
 0x7ef   : > { %3880 = vmatpush.msra.mxu3 %v9476_v35  ;;  %3860 = vmatpush.msra.mxu2 %v9477_v16  ;;  %v9504_v45 = vld [vmem:[#allocation126_spill] sm:$0xff]  ;;  %v9505_v59 = vld [vmem:[#allocation136_spill] sm:$0xff]  ;;  %v9506_v5 = vld [vmem:[#allocation127_spill] sm:$0xff] }
 0x7f0   : > { %3821 = vmatpush.msra.mxu0 %v9478_v38  ;;  %3841 = vmatpush.msra.mxu1 %v9479_v37  ;;  %v9507_v52 = vld [vmem:[#allocation129_spill] sm:$0xff]  ;;  %v9508_v11 = vld [vmem:[#allocation122_spill] sm:$0xff]  ;;  %v9509_v41 = vld [vmem:[#allocation132_spill] sm:$0xff] }
 0x7f1   : > { %3881 = vmatpush.msra.mxu3 %v9480_v15  ;;  %3861 = vmatpush.msra.mxu2 %v9481_v28  ;;  %v9510_v53 = vld [vmem:[#allocation123_spill] sm:$0xff]  ;;  %v9511_v8 = vld [vmem:[#allocation125_spill] sm:$0xff]  ;;  %v9512_v54 = vld [vmem:[#allocation118_spill] sm:$0xff] }
 0x7f2   : > { %3822 = vmatpush.msra.mxu0 %v9482_v10  ;;  %3842 = vmatpush.msra.mxu1 %v9483_v26  ;;  %v9513_v55 = vld [vmem:[#allocation128_spill] sm:$0xff]  ;;  %v9514_v63 = vld [vmem:[#allocation119_spill] sm:$0xff]  ;;  %v9515_v40 = vld [vmem:[#allocation121_spill] sm:$0xff] }
 0x7f3   : > { %3882 = vmatpush.msra.mxu3 %v9484_v24  ;;  %3862 = vmatpush.msra.mxu2 %v9485_v47  ;;  %v9516_v27 = vld [vmem:[#allocation114_spill] sm:$0xff]  ;;  %v9517_v56 = vld [vmem:[#allocation124_spill] sm:$0xff]  ;;  %v9518_v48 = vld [vmem:[#allocation115_spill] sm:$0xff] }
 0x7f4   : > { %3823 = vmatpush.msra.mxu0 %v9486_v22  ;;  %3843 = vmatpush.msra.mxu1 %v9487_v19  ;;  %v9519_v6 = vld [vmem:[#allocation117_spill] sm:$0xff]  ;;  %v9520_v42 = vld [vmem:[#allocation110_spill] sm:$0xff]  ;;  %v9521_v13 = vld [vmem:[#allocation120_spill] sm:$0xff] }
 0x7f5   : > { %3883 = vmatpush.msra.mxu3 %v9488_v20  ;;  %3863 = vmatpush.msra.mxu2 %v9493_v62  ;;  %v9522_v50 = vld [vmem:[#allocation111_spill] sm:$0xff]  ;;  %v9523_v46 = vld [vmem:[#allocation113_spill] sm:$0xff]  ;;  %v9524_v58 = vld [vmem:[#allocation106_spill] sm:$0xff] }
 0x7f6   : > { %3888 = vmatpush.msrb.mxu0 %v9489_v9  ;;  %3908 = vmatpush.msrb.mxu1 %v9490_v21  ;;  %v9525_v33 = vld [vmem:[#allocation116_spill] sm:$0xff]  ;;  %v9526_v0 = vld [vmem:[#allocation107_spill] sm:$0xff]  ;;  %v9527_v44 = vld [vmem:[#allocation109_spill] sm:$0xff] }
 0x7f7   : > { %3948 = vmatpush.msrb.mxu3 %v9491_v30  ;;  %3928 = vmatpush.msrb.mxu2 %v9497_v12  ;;  %v9528_v1 = vld [vmem:[#allocation102_spill] sm:$0xff]  ;;  %v9529_v18 = vld [vmem:[#allocation103_spill] sm:$0xff]  ;;  %v9530_v4 = vld [vmem:[#allocation105_spill] sm:$0xff] }
 0x7f8   : > { %3889 = vmatpush.msrb.mxu0 %v9492_v31  ;;  %3909 = vmatpush.msrb.mxu1 %v9494_v43  ;;  %v9531_v17 = vld [vmem:[#allocation98_spill] sm:$0xff]  ;;  %v9532_v25 = vld [vmem:[#allocation99_spill] sm:$0xff]  ;;  %v9533_v3 = vld [vmem:[#allocation101_spill] sm:$0xff] }
 0x7f9   : > { %3949 = vmatpush.msrb.mxu3 %v9495_v39  ;;  %3929 = vmatpush.msrb.mxu2 %v9501_v29  ;;  %v9534_v7 = vld [vmem:[#allocation112_spill] sm:$0xff]  ;;  %v9535_v14 = vld [vmem:[#allocation94_spill] sm:$0xff]  ;;  %v9536_v35 = vld [vmem:[#allocation95_spill] sm:$0xff] }
 0x7fa   : > { %3890 = vmatpush.msrb.mxu0 %v9496_v34  ;;  %3910 = vmatpush.msrb.mxu1 %v9498_v2  ;;  %v9537_v16 = vld [vmem:[#allocation97_spill] sm:$0xff]  ;;  %v9538_v38 = vld [vmem:[#allocation108_spill] sm:$0xff]  ;;  %v9539_v37 = vld [vmem:[#allocation90_spill] sm:$0xff] }
 0x7fb   : > { %3950 = vmatpush.msrb.mxu3 %v9499_v49  ;;  %3930 = vmatpush.msrb.mxu2 %v9505_v59  ;;  %v9540_v15 = vld [vmem:[#allocation91_spill] sm:$0xff]  ;;  %v9541_v28 = vld [vmem:[#allocation93_spill] sm:$0xff]  ;;  %v9542_v10 = vld [vmem:[#allocation104_spill] sm:$0xff] }
 0x7fc   : > { %3891 = vmatpush.msrb.mxu0 %v9500_v61  ;;  %3911 = vmatpush.msrb.mxu1 %v9502_v51  ;;  %v9543_v26 = vld [vmem:[#allocation86_spill] sm:$0xff]  ;;  %v9544_v24 = vld [vmem:[#allocation87_spill] sm:$0xff]  ;;  %v9545_v47 = vld [vmem:[#allocation89_spill] sm:$0xff] }
 0x7fd   : > { %3951 = vmatpush.msrb.mxu3 %v9503_v57  ;;  %3931 = vmatpush.msrb.mxu2 %v9509_v41  ;;  %v9546_v22 = vld [vmem:[#allocation100_spill] sm:$0xff]  ;;  %v9547_v19 = vld [vmem:[#allocation82_spill] sm:$0xff]  ;;  %v9548_v20 = vld [vmem:[#allocation83_spill] sm:$0xff] }
 0x7fe   : > { %3892 = vmatpush.msrb.mxu0 %v9504_v45  ;;  %3912 = vmatpush.msrb.mxu1 %v9506_v5  ;;  %v9549_v9 = vld [vmem:[#allocation85_spill] sm:$0xff]  ;;  %v9550_v21 = vld [vmem:[#allocation96_spill] sm:$0xff]  ;;  %v9554_v61 = vld [vmem:[#allocation210_spill] sm:$0xff] }
 0x7ff   : > { %3952 = vmatpush.msrb.mxu3 %v9507_v52  ;;  %3932 = vmatpush.msrb.mxu2 %v9513_v55  ;;  %v9551_v30 = vld [vmem:[#allocation92_spill] sm:$0xff]  ;;  %v9556_v41 = vld [vmem:[#allocation217_spill] sm:$0xff] }
 0x800   : > { %3893 = vmatpush.msrb.mxu0 %v9508_v11  ;;  %3913 = vmatpush.msrb.mxu1 %v9510_v53  ;;  %v9552_v31 = vld [vmem:[#allocation88_spill] sm:$0xff] }
 0x801   : > { %3953 = vmatpush.msrb.mxu3 %v9511_v8  ;;  %3933 = vmatpush.msrb.mxu2 %v9517_v56  ;;  %v9553_v62 = vld [vmem:[#allocation84_spill] sm:$0xff] }
 0x802   : > { %3894 = vmatpush.msrb.mxu0 %v9512_v54  ;;  %3914 = vmatpush.msrb.mxu1 %v9514_v63  ;;  %v9555_v51 = vld [vmem:[#allocation216_spill] sm:$0xff] }
 0x803   : > { %3954 = vmatpush.msrb.mxu3 %v9515_v40  ;;  %3934 = vmatpush.msrb.mxu2 %v9521_v13 }
 0x804   : > { %3895 = vmatpush.msrb.mxu0 %v9516_v27  ;;  %3915 = vmatpush.msrb.mxu1 %v9518_v48 }
 0x805   : > { %3955 = vmatpush.msrb.mxu3 %v9519_v6  ;;  %3935 = vmatpush.msrb.mxu2 %v9525_v33 }
 0x806   : > { %3896 = vmatpush.msrb.mxu0 %v9520_v42  ;;  %3916 = vmatpush.msrb.mxu1 %v9522_v50  ;;  %v9557_v42 = vld [vmem:[#allocation218_spill] sm:$0xff] }
 0x807   : > { %3956 = vmatpush.msrb.mxu3 %v9523_v46  ;;  %3844 = vmatmul.f32.vlgmr.msra.gmra.mxu1 %v7407_v32 }
 0x808   : > { %3897 = vmatpush.msrb.mxu0 %v9524_v58  ;;  %3917 = vmatpush.msrb.mxu1 %v9526_v0 }
 0x809   : > { %3957 = vmatpush.msrb.mxu3 %v9527_v44  ;;  %3824 = vmatmul.f32.vlgmr.msra.gmra.mxu0 %v7407_v32 }
 0x80a   : > { %3898 = vmatpush.msrb.mxu0 %v9528_v1  ;;  %3918 = vmatpush.msrb.mxu1 %v9529_v18 }
 0x80b   : > { %3958 = vmatpush.msrb.mxu3 %v9530_v4  ;;  %3936 = vmatpush.msrb.mxu2 %v9534_v7 }
 0x80c   : > { %3899 = vmatpush.msrb.mxu0 %v9531_v17  ;;  %3884 = vmatmul.f32.vlgmr.msra.gmra.mxu3 %v7407_v32 }
 0x80d   : > { %3919 = vmatpush.msrb.mxu1 %v9532_v25  ;;  %3959 = vmatpush.msrb.mxu3 %v9533_v3 }
 0x80e   : > { %3900 = vmatpush.msrb.mxu0 %v9535_v14  ;;  %3937 = vmatpush.msrb.mxu2 %v9538_v38 }
 0x80f   : > { %3920 = vmatpush.msrb.mxu1 %v9536_v35  ;;  %3960 = vmatpush.msrb.mxu3 %v9537_v16 }
 0x810   : > { %3901 = vmatpush.msrb.mxu0 %v9539_v37  ;;  %3938 = vmatpush.msrb.mxu2 %v9542_v10 }
 0x811   : > { %3921 = vmatpush.msrb.mxu1 %v9540_v15  ;;  %3961 = vmatpush.msrb.mxu3 %v9541_v28 }
 0x812   : > { %3902 = vmatpush.msrb.mxu0 %v9543_v26  ;;  %3939 = vmatpush.msrb.mxu2 %v9546_v22 }
 0x813   : > { %3922 = vmatpush.msrb.mxu1 %v9544_v24  ;;  %3962 = vmatpush.msrb.mxu3 %v9545_v47 }
 0x814   : > { %3864 = vmatmul.f32.vlgmr.msra.gmra.mxu2 %v7407_v32  ;;  %3903 = vmatpush.msrb.mxu0 %v9547_v19 }
 0x815   : > { %3923 = vmatpush.msrb.mxu1 %v9548_v20  ;;  %3963 = vmatpush.msrb.mxu3 %v9549_v9 }
 0x816   : > { %3904 = vmatmul.f32.vlgmr.msrb.gmra.mxu0 %v7419_v23  ;;  %3924 = vmatmul.f32.vlgmr.msrb.gmra.mxu1 %v7419_v23 }
 0x817   : > { %3940 = vmatpush.msrb.mxu2 %v9550_v21  ;;  %3964 = vmatmul.f32.vlgmr.msrb.gmra.mxu3 %v7419_v23 }
 0x819   : > { %3941 = vmatpush.msrb.mxu2 %v9551_v30 }
 0x81b   : > { %3942 = vmatpush.msrb.mxu2 %v9552_v31 }
 0x81d   : > { %3943 = vmatpush.msrb.mxu2 %v9553_v62 }
 0x81e   : > { %3944 = vmatmul.f32.vlgmr.msrb.gmra.mxu2 %v7419_v23 }
 0x884   : > { %v3845_v32 = vpop.f32.mrf.mxu1 }
 0x886   : > { %v3825_v43 = vpop.f32.mrf.mxu0 }
 0x88f   : > { %v3885_v39 = vpop.f32.mrf.mxu3 }
 0x893   : > { %v3905_v34 = vpop.f32.mrf.mxu0  ;;  %v3925_v12 = vpop.f32.mrf.mxu1 }
 0x894   : > { %v3906_v2 = vadd.f32 %v3905_v34, %v3825_v43  ;;  %v3926_v49 = vadd.f32 %v3925_v12, %v3845_v32  ;;  %v9558_v32 = vld [vmem:[#allocation212_spill] sm:$0xff] }
 0x895   : > { %v4035_v43 = vperm.slane %v9558_v32, 7 }
 0x896   : > { %v3968_v29 = vadd.f32 %v3906_v2, %v9554_v61  ;;  %v3969_v57 = vadd.f32 %v3926_v49, %v9555_v51  ;;  %v4580_v49 = vld [vmem:[#allocation8] ss:$0 sm:$0xff] }
 0x897   : > { %v3865_v5 = vpop.f32.mrf.mxu2 }
 0x898   : > { %v4227_v45 = vmul.f32 -1.442695, %v3968_v29  ;;  %v4228_v59 = vmul.f32 -1.442695, %v3969_v57 }
 0x89a   : > { %4581 = vpow2.f32 %v4227_v45  ;;  %v3965_v52 = vpop.f32.mrf.mxu3 }
 0x89b   : > { %4583 = vpow2.f32 %v4228_v59  ;;  %v3966_v11 = vadd.f32 %v3965_v52, %v3885_v39 }
 0x89d   : > { %v3971_v23 = vadd.f32 %v3966_v11, %v9556_v41 }
 0x89f   : > { %v4229_v53 = vmul.f32 -1.442695, %v3971_v23 }
 0x8a0   : > { %v4582_v8 = vpop.eup %4581 }
 0x8a1   : > { %v4584_v54 = vpop.eup %4583  ;;  %v3975_v55 = vadd.f32 1.0, %v4582_v8  ;;  %4585 = vpow2.f32 %v4229_v53  ;;  %v3945_v40 = vpop.f32.mrf.mxu2 }
 0x8a2   : > { %v3994_v63 = vadd.f32 1.0, %v4584_v54  ;;  %v3946_v27 = vadd.f32 %v3945_v40, %v3865_v5 }
 0x8a3   : > { %4587 = vrcp.f32 %v3975_v55  ;;  %v3987_v44 = vand.u32 2147483648, %v3975_v55  ;;  %v3985_v4 = vand.u32 2147483647, %v3975_v55  ;;  %vm3981_vm2 = vweird.f32 %v3975_v55 }
 0x8a4   : > { %4589 = vrcp.f32 %v3994_v63  ;;  %v3970_v13 = vadd.f32 %v3946_v27, %v9557_v42  ;;  %v4006_v1 = vand.u32 2147483648, %v3994_v63  ;;  %v4004_v25 = vand.u32 2147483647, %v3994_v63 }
 0x8a5   : > { %vm4000_vm3 = vweird.f32 %v3994_v63  ;;  %v3988_v14 = vor.u32 1.1754944e-38, %v3987_v44  ;;  %vm3986_vm5 = vcmp.eq.f32.partialorder %v3985_v4, 8.507059e+37 }
 0x8a6   : > { %v4007_v37 = vor.u32 1.1754944e-38, %v4006_v1  ;;  %vm4005_vm7 = vcmp.eq.f32.partialorder %v4004_v25, 8.507059e+37 }
 0x8a7   : > { %v4586_v56 = vpop.eup %4585 }
 0x8a8   : > { %v4014_v48 = vadd.f32 1.0, %v4586_v56 }
 0x8a9   : > { %v4588_v6 = vpop.eup %4587 }
 0x8aa   : > { %v4590_v50 = vpop.eup %4589  ;;  %v3977_v46 = vmul.f32 %v4588_v6, %v3975_v55  ;;  %4591 = vrcp.f32 %v4014_v48  ;;  %vm3982_vm0 = vweird.f32 %v4588_v6  ;;  %v4026_v21 = vand.u32 2147483648, %v4014_v48 }
 0x8ab   : > { %v3996_v58 = vmul.f32 %v4590_v50, %v3994_v63  ;;  %4593 = vtanh.f32 %v3970_v13  ;;  %vm4001_vm1 = vweird.f32 %v4590_v50  ;;  %vm3983_vm4 = vmor %vm3981_vm2, %vm3982_vm0  ;;  %vm4020_vm9 = vweird.f32 %v4014_v48 }
 0x8ac   : > { %v3978_v33 = vsub.f32 1.0, %v3977_v46  ;;  %vm4002_vm6 = vmor %vm4000_vm3, %vm4001_vm1  ;;  %v4024_v30 = vand.u32 2147483647, %v4014_v48  ;;  %v4027_v62 = vor.u32 1.1754944e-38, %v4026_v21 }
 0x8ad   : > { %v3997_v0 = vsub.f32 1.0, %v3996_v58 }
 0x8ae   : > { %v3979_v18 = vmul.f32 %v4588_v6, %v3978_v33  ;;  %vm4025_vm11 = vcmp.eq.f32.partialorder %v4024_v30, 8.507059e+37 }
 0x8af   : > { %v3998_v17 = vmul.f32 %v4590_v50, %v3997_v0 }
 0x8b0   : > { %v4592_v3 = vpop.eup %4591  ;;  %v3980_v7 = vadd.f32 %v4588_v6, %v3979_v18 }
 0x8b1   : > { %v3999_v35 = vadd.f32 %v4590_v50, %v3998_v17  ;;  %v4016_v16 = vmul.f32 %v4592_v3, %v4014_v48  ;;  %v4594_v15 = vpop.eup %4593  ;;  %vm4021_vm8 = vweird.f32 %v4592_v3 }
 0x8b2   : > { %v3984_v38 = vsel %vm3983_vm4, %v4588_v6, %v3980_v7  ;;  %vm4022_vm10 = vmor %vm4020_vm9, %vm4021_vm8 }
 0x8b3   : > { %v3989_v28 = vsel %vm3986_vm5, %v3988_v14, %v3984_v38  ;;  %v4003_v10 = vsel %vm4002_vm6, %v4590_v50, %v3999_v35  ;;  %v4017_v26 = vsub.f32 1.0, %v4016_v16 }
 0x8b4   : > { %v4031_v24 = vmul.f32 %v4594_v15, %v3989_v28  ;;  %v4008_v47 = vsel %vm4005_vm7, %v4007_v37, %v4003_v10 }
 0x8b5   : > { %v4018_v22 = vmul.f32 %v4592_v3, %v4017_v26  ;;  %v4030_v19 = vmul.f32 %v4008_v47, %v7382_v36 }
 0x8b7   : > { %v4032_v20 = vadd.f32 %v4031_v24, %v4030_v19  ;;  %v4019_v9 = vadd.f32 %v4592_v3, %v4018_v22 }
 0x8b9   : > { %4595 = vtanh.f32 %v4032_v20  ;;  %v4023_v31 = vsel %vm4022_vm10, %v4592_v3, %v4019_v9 }
 0x8ba   : > { %v4028_v34 = vsel %vm4025_vm11, %v4027_v62, %v4023_v31 }
 0x8bf   : > { %v4596_v39 = vpop.eup %4595 }
 0x8c0   : > { %v4034_v12 = vmul.f32 %v4596_v39, %v4028_v34 }
 0x8c2   : > { %v4036_v2 = vmul.f32 %v4035_v43, %v4034_v12 }
 0x8c4   : > { %v4037_v36 = vadd.f32 %v4036_v2, %v7413_v60 }
 0x8c6   : > { %4038 = vadd.xlane.f32.xlu0 %v4037_v36 }
 0x939   : > { %v4039_v61 = vpop.xlane.xlu0 %4038 }
 0x93a   : > { %v4044_v29 = vadd.f32 %v4580_v49, %v4039_v61 }
 0x93c   : > { %4046 = vst.msk [vmem:[%s4886_s25] sm:$0xff] %vm4045_vm12, %v4044_v29 }
 0x93d PF: > { %s23_s15 = sadd.s32 1, %s4733_s15   ;;  %s9559_s11 = smov %s4725_s13 }
 0x93e   : > { %p20_p13 = scmp.ge.s32.totalorder %s23_s15, 6   ;;  %s9560_s12 = smov %s4729_s14 }
 0x93f   : > { %s9561_s13 = smov %s9564_s26  ;;  %s9562_s14 = smov %s9568_s27 }
 0x940   :  { %22 = sbr.rel (!%p20_p13) target bundleno = 7 (0x7), region = 114 }
 0x945   :  { %4066 = vsyncpa [#allocation10], 1 }
 0x946   :  { %4068 = vsyncpa [#allocation10 + $0x1], 1 }
 0x947   :  { %4069 = vsyncpa [#allocation12], 1 }

</bundles_post_ra>
